<compile_context>
chip_gen: v5e
topology: v5e:2x2
jax: 0.10.0
libtpu: 0.0.40
codegen_flags: <defaults>
</compile_context>

<pallas_src>
import numpy as np
import jax
import jax.numpy as jnp
from jax import lax
from jax.experimental import pallas as pl
from jax.experimental.pallas import tpu as pltpu


def _round_up(x, m):
    return (x + m - 1) // m * m


# ------------------------------- static sizes -------------------------------
H1 = W1 = 28
H2 = W2 = 14
H3 = W3 = 7
KS = 5
C1, C2, NCLS = 16, 32, 10
F1 = _round_up(H1 * W1, 128)        # 896   padded per-image 28*28
F2 = _round_up(H2 * W2, 128)        # 256   padded per-image 14*14
F3 = _round_up(H3 * W3, 128)        # 128   padded per-image 7*7
OUT_PAD = 128                       # lane-dense output, sliced to 10 outside
FC_COLS = C2 * NCLS                 # 320


# ----------------------------------------------------------------------------
# Fused per-image kernel: conv1+ReLU+pool1 + conv2+ReLU+pool2 + Linear.
# ----------------------------------------------------------------------------
def _cnn_fused_kernel(x_ref, mask1_ref, s1_ref, mask2_ref, s2_ref,
                      w1s_ref, b1_ref, w2s_ref, b2_ref,
                      wbig_ref, fcmask_ref, fold_ref, bfc_ref,
                      o_ref, taps1_ref, taps2_ref):
    f1 = x_ref.shape[1]            # 896
    f2 = s1_ref.shape[1]           # 256
    half = KS // 2

    def shifted(v, s, n):
        # result[:, p] = v[:, (p + s) % n]   (s is a static Python int)
        if s % n == 0:
            return v
        return pltpu.roll(v, (-s) % n, axis=1)

    # ---- layer1: Conv2d(1->16, k=5, p=2): stage 25 masked taps, 1 MXU dot --
    x = x_ref[...]                                        # (1, F1) f32
    for t in range(KS * KS):
        dh, dw = t // KS - half, t % KS - half
        taps1_ref[pl.ds(t, 1), :] = (
            shifted(x, dh * W1 + dw, f1) * mask1_ref[pl.ds(t, 1), :])
    y1 = jnp.maximum(
        jnp.dot(w1s_ref[...], taps1_ref[...],
                preferred_element_type=jnp.float32) + b1_ref[...], 0.0)

    # ---- maxpool1 2x2: neighbour maxes + host-precomputed one-hot select ---
    # NOTE: roll-based pooling is valid because selected (even-h, even-w)
    # corners only read the 3 neighbours inside the same image; padded-tail
    # columns (which hold relu(bias)) are never selected by s1/s2.  Any change
    # to the image size / padding scheme must re-check this invariant.
    p1 = jnp.maximum(y1, shifted(y1, 1, f1))
    p1 = jnp.maximum(p1, shifted(p1, W1, f1))
    a1 = jnp.dot(p1.astype(jnp.bfloat16), s1_ref[...],
                 preferred_element_type=jnp.float32)      # (16, F2)

    # ---- layer2: Conv2d(16->32, k=5, p=2): stage (400, F2) taps, 1 MXU dot -
    for t in range(KS * KS):
        dh, dw = t // KS - half, t % KS - half
        src = shifted(a1, dh * W2 + dw, f2) * mask2_ref[pl.ds(t, 1), :]
        taps2_ref[pl.ds(t * C1, C1), :] = src.astype(jnp.bfloat16)
    y2 = jnp.maximum(
        jnp.dot(w2s_ref[...], taps2_ref[...],
                preferred_element_type=jnp.float32) + b2_ref[...], 0.0)

    # ---- maxpool2 2x2 ------------------------------------------------------
    p2 = jnp.maximum(y2, shifted(y2, 1, f2))
    p2 = jnp.maximum(p2, shifted(p2, W2, f2))
    a2 = jnp.dot(p2.astype(jnp.bfloat16), s2_ref[...],
                 preferred_element_type=jnp.float32)      # (32, F3=128)

    # ---- output Linear (32*7*7 -> 10): two 2D MXU dots + sublane reduce ----
    #   pblk[c, c'*10+o] = sum_f a2[c, f] * W3[o, c'*49 + f]
    #   keep c == c' (fcmask), fold the 32 column blocks onto the 10 outputs.
    pblk = jnp.dot(a2.astype(jnp.bfloat16), wbig_ref[...],
                   preferred_element_type=jnp.float32)    # (32, 320)
    pblk = pblk * fcmask_ref[...]
    q = jnp.dot(pblk, fold_ref[...],
                preferred_element_type=jnp.float32)       # (32, 128)
    o_ref[...] = jnp.sum(q, axis=0, keepdims=True) + bfc_ref[...]


# ----------------------------------------------------------------------------
# Host-side constant tables (batch independent) and parameter repacking.
# ----------------------------------------------------------------------------
def _conv_tap_masks(h, w, f):
    half = KS // 2
    p = np.arange(f)
    valid = p < h * w
    hh = np.where(valid, p // w, -10_000)
    ww = np.where(valid, p % w, -10_000)
    m = np.zeros((KS * KS, f), np.float32)
    for t in range(KS * KS):
        dh, dw = t // KS - half, t % KS - half
        m[t] = (valid & (hh + dh >= 0) & (hh + dh < h) &
                (ww + dw >= 0) & (ww + dw < w)).astype(np.float32)
    return m


def _pool_onehot(hin, win, fin, fout):
    ho, wo = hin // 2, win // 2
    s = np.zeros((fin, fout), np.float32)
    for col in range(ho * wo):
        i, j = col // wo, col % wo
        s[2 * i * win + 2 * j, col] = 1.0
    return s


def prepare_params(params):
    """One-time repack of PyTorch-layout params + constant tables."""
    assert H1 % 2 == 0 and W1 % 2 == 0 and H2 % 2 == 0 and W2 % 2 == 0

    w1s = jnp.asarray(params["w1"]).reshape(C1, KS * KS).astype(jnp.float32)
    w2s = (jnp.asarray(params["w2"]).transpose(0, 2, 3, 1)
           .reshape(C2, KS * KS * C1).astype(jnp.bfloat16))

    # W3[o, c*49+ij]  ->  wbig[ij (padded to 128), c*10 + o]
    w3r = jnp.asarray(params["w3"]).reshape(NCLS, C2, H3 * W3)
    wbig = jnp.zeros((F3, C2, NCLS), jnp.float32)
    wbig = wbig.at[:H3 * W3].set(jnp.transpose(w3r, (2, 1, 0)))
    wbig = wbig.reshape(F3, FC_COLS).astype(jnp.bfloat16)

    fcmask = (np.arange(FC_COLS)[None, :] // NCLS ==
              np.arange(C2)[:, None]).astype(np.float32)          # (32, 320)
    fold = np.zeros((FC_COLS, OUT_PAD), np.float32)                # (320, 128)
    fold[np.arange(FC_COLS), np.arange(FC_COLS) % NCLS] = 1.0
    bfc = np.zeros((1, OUT_PAD), np.float32)
    bfc[0, :NCLS] = np.asarray(params["b3"])

    return {
        "w1s": w1s,
        "b1": jnp.asarray(params["b1"]).reshape(C1, 1).astype(jnp.float32),
        "w2s": w2s,
        "b2": jnp.asarray(params["b2"]).reshape(C2, 1).astype(jnp.float32),
        "wbig": wbig,
        "fcmask": jnp.asarray(fcmask),
        "fold": jnp.asarray(fold),
        "bfc": jnp.asarray(bfc),
        "mask1": jnp.asarray(_conv_tap_masks(H1, W1, F1)),
        "mask2": jnp.asarray(_conv_tap_masks(H2, W2, F2)),
        "s1": jnp.asarray(_pool_onehot(H1, W1, F1, F2)).astype(jnp.bfloat16),
        "s2": jnp.asarray(_pool_onehot(H2, W2, F2, F3)).astype(jnp.bfloat16),
    }


# ----------------------------------------------------------------------------
# Forward pass: one pallas_call, grid over images ("parallel" for v7x 2 TCs).
# ----------------------------------------------------------------------------
def cnn_forward(kp, x):
    batch = x.shape[0]
    xf = x.reshape(batch, 1, H1 * W1).astype(jnp.float32)
    xf = jnp.pad(xf, ((0, 0), (0, 0), (0, F1 - H1 * W1)))

    inputs = [xf, kp["mask1"], kp["s1"], kp["mask2"], kp["s2"],
              kp["w1s"], kp["b1"], kp["w2s"], kp["b2"],
              kp["wbig"], kp["fcmask"], kp["fold"], kp["bfc"]]

    def const_spec(a):
        nd = a.ndim
        return pl.BlockSpec(a.shape, lambda b, nd=nd: (0,) * nd)

    in_specs = ([pl.BlockSpec((None, 1, F1), lambda b: (b, 0, 0))] +
                [const_spec(a) for a in inputs[1:]])

    out = pl.pallas_call(
        _cnn_fused_kernel,
        out_shape=jax.ShapeDtypeStruct((batch, 1, OUT_PAD), jnp.float32),
        grid=(batch,),
        in_specs=in_specs,
        out_specs=pl.BlockSpec((None, 1, OUT_PAD), lambda b: (b, 0, 0)),
        scratch_shapes=[pltpu.VMEM((KS * KS, F1), jnp.float32),
                        pltpu.VMEM((KS * KS * C1, F2), jnp.bfloat16)],
        compiler_params=pltpu.CompilerParams(
            dimension_semantics=("parallel",)),
    )(*inputs)
    return out.reshape(batch, OUT_PAD)[:, :NCLS]


# ----------------------------------------------------------------------------
# Parameter init (PyTorch-like) and pure-JAX reference for a sanity check.
# ----------------------------------------------------------------------------
def init_params(key):
    ks = jax.random.split(key, 6)

    def uni(k, shape, fan_in):
        bound = 1.0 / jnp.sqrt(jnp.float32(fan_in))
        return jax.random.uniform(k, shape, jnp.float32, -bound, bound)

    return {
        "w1": uni(ks[0], (16, 1, 5, 5), 1 * 5 * 5),
        "b1": uni(ks[1], (16,), 1 * 5 * 5),
        "w2": uni(ks[2], (32, 16, 5, 5), 16 * 5 * 5),
        "b2": uni(ks[3], (32,), 16 * 5 * 5),
        "w3": uni(ks[4], (10, 32 * 7 * 7), 32 * 7 * 7),
        "b3": uni(ks[5], (10,), 32 * 7 * 7),
    }


def cnn_reference(params, x):
    def conv(x, w, b):
        y = lax.conv_general_dilated(
            x, w, window_strides=(1, 1), padding=((2, 2), (2, 2)),
            dimension_numbers=("NCHW", "OIHW", "NCHW"))
        return jnp.maximum(y + b[None, :, None, None], 0.0)

    def pool(x):
        b, c, h, w = x.shape
        return x.reshape(b, c, h // 2, 2, w // 2, 2).max(axis=(3, 5))

    x = pool(conv(x, params["w1"], params["b1"]))
    x = pool(conv(x, params["w2"], params["b2"]))
    x = x.reshape(x.shape[0], -1)
    return x @ params["w3"].T + params["b3"]


# ----------------------------------------------------------------------------
if __name__ == "__main__":
    key = jax.random.PRNGKey(0)
    k_param, k_x = jax.random.split(key)
    params = init_params(k_param)
    # Input implied by the module: MNIST-like NCHW, 1 channel, 28x28.
    x = jax.random.normal(k_x, (2, 1, 28, 28), jnp.float32)

    kparams = prepare_params(params)          # one-time repack (batch-free)
    fwd = jax.jit(cnn_forward)
    out = jax.block_until_ready(fwd(kparams, x))
    assert out.shape == (2, 10)

    ref = jax.block_until_ready(cnn_reference(params, x))
    # bf16 MXU operands => ~1e-3 abs error vs the f32 reference.
    assert jnp.allclose(out, ref, rtol=2e-2, atol=2e-2), "mismatch vs reference"

    print("KERNEL_OK")
</pallas_src>

<mosaic_0001>
module attributes {stable_mosaic.version = 11 : i64} {
  func.func @_cnn_fused_kernel(%arg0: i32, %arg1: memref<1x1x896xf32, #tpu.memory_space<vmem>>, %arg2: memref<25x896xf32, #tpu.memory_space<vmem>>, %arg3: memref<896x256xbf16, #tpu.memory_space<vmem>>, %arg4: memref<25x256xf32, #tpu.memory_space<vmem>>, %arg5: memref<256x128xbf16, #tpu.memory_space<vmem>>, %arg6: memref<16x25xf32, #tpu.memory_space<vmem>>, %arg7: memref<16x1xf32, #tpu.memory_space<vmem>>, %arg8: memref<32x400xbf16, #tpu.memory_space<vmem>>, %arg9: memref<32x1xf32, #tpu.memory_space<vmem>>, %arg10: memref<128x320xbf16, #tpu.memory_space<vmem>>, %arg11: memref<32x320xf32, #tpu.memory_space<vmem>>, %arg12: memref<320x128xf32, #tpu.memory_space<vmem>>, %arg13: memref<1x128xf32, #tpu.memory_space<vmem>>, %arg14: memref<1x1x128xf32, #tpu.memory_space<vmem>>, %arg15: memref<25x896xf32, #tpu.memory_space<vmem>>, %arg16: memref<400x256xbf16, #tpu.memory_space<vmem>>) attributes {dimension_semantics = [#tpu.dimension_semantics<parallel>], iteration_bounds = array<i64: 2>, scalar_prefetch = 0 : i64, scratch_operands = 2 : i64, tpu.core_type = #tpu.core_type<tc>, window_params = [{transform_indices = @transform_0, window_bounds = array<i64: 1, 1, 896>}, {pipeline_mode = #tpu.pipeline_mode<synchronous>, transform_indices = @transform_1, window_bounds = array<i64: 25, 896>}, {pipeline_mode = #tpu.pipeline_mode<synchronous>, transform_indices = @transform_2, window_bounds = array<i64: 896, 256>}, {pipeline_mode = #tpu.pipeline_mode<synchronous>, transform_indices = @transform_3, window_bounds = array<i64: 25, 256>}, {pipeline_mode = #tpu.pipeline_mode<synchronous>, transform_indices = @transform_4, window_bounds = array<i64: 256, 128>}, {pipeline_mode = #tpu.pipeline_mode<synchronous>, transform_indices = @transform_5, window_bounds = array<i64: 16, 25>}, {pipeline_mode = #tpu.pipeline_mode<synchronous>, transform_indices = @transform_6, window_bounds = array<i64: 16, 1>}, {pipeline_mode = #tpu.pipeline_mode<synchronous>, transform_indices = @transform_7, window_bounds = array<i64: 32, 400>}, {pipeline_mode = #tpu.pipeline_mode<synchronous>, transform_indices = @transform_8, window_bounds = array<i64: 32, 1>}, {pipeline_mode = #tpu.pipeline_mode<synchronous>, transform_indices = @transform_9, window_bounds = array<i64: 128, 320>}, {pipeline_mode = #tpu.pipeline_mode<synchronous>, transform_indices = @transform_10, window_bounds = array<i64: 32, 320>}, {pipeline_mode = #tpu.pipeline_mode<synchronous>, transform_indices = @transform_11, window_bounds = array<i64: 320, 128>}, {pipeline_mode = #tpu.pipeline_mode<synchronous>, transform_indices = @transform_12, window_bounds = array<i64: 1, 128>}, {transform_indices = @transform_13, window_bounds = array<i64: 1, 1, 128>}]} {
    %c0 = arith.constant 0 : index
    %c0_0 = arith.constant 0 : index
    %c0_1 = arith.constant 0 : index
    %0 = vector.load %arg1[%c0, %c0_0, %c0_1] : memref<1x1x896xf32, #tpu.memory_space<vmem>>, vector<1x1x896xf32>
    %1 = vector.shape_cast %0 : vector<1x1x896xf32> to vector<1x896xf32>
    %c58_i32 = arith.constant 58 : i32
    %2 = tpu.dynamic_rotate %1 by %c58_i32 dim 1 : vector<1x896xf32>, i32 -> vector<1x896xf32>
    %c0_2 = arith.constant 0 : index
    %c0_3 = arith.constant 0 : index
    %3 = vector.load %arg2[%c0_2, %c0_3] : memref<25x896xf32, #tpu.memory_space<vmem>>, vector<1x896xf32>
    %4 = arith.mulf %2, %3 : vector<1x896xf32>
    %c0_4 = arith.constant 0 : index
    %c0_5 = arith.constant 0 : index
    %5 = vector.load %arg15[%c0_4, %c0_5] : memref<25x896xf32, #tpu.memory_space<vmem>>, vector<1x896xf32>
    tpu.vector_store %arg15[%c0_4, %c0_5], %4 {strides = array<i32>} : memref<25x896xf32, #tpu.memory_space<vmem>>, vector<1x896xf32>,
    %c57_i32 = arith.constant 57 : i32
    %6 = tpu.dynamic_rotate %1 by %c57_i32 dim 1 : vector<1x896xf32>, i32 -> vector<1x896xf32>
    %c1 = arith.constant 1 : index
    %c0_6 = arith.constant 0 : index
    %7 = vector.load %arg2[%c1, %c0_6] : memref<25x896xf32, #tpu.memory_space<vmem>>, vector<1x896xf32>
    %8 = arith.mulf %6, %7 : vector<1x896xf32>
    %c1_7 = arith.constant 1 : index
    %c0_8 = arith.constant 0 : index
    %9 = vector.load %arg15[%c1_7, %c0_8] : memref<25x896xf32, #tpu.memory_space<vmem>>, vector<1x896xf32>
    tpu.vector_store %arg15[%c1_7, %c0_8], %8 {strides = array<i32>} : memref<25x896xf32, #tpu.memory_space<vmem>>, vector<1x896xf32>,
    %c56_i32 = arith.constant 56 : i32
    %10 = tpu.dynamic_rotate %1 by %c56_i32 dim 1 : vector<1x896xf32>, i32 -> vector<1x896xf32>
    %c2 = arith.constant 2 : index
    %c0_9 = arith.constant 0 : index
    %11 = vector.load %arg2[%c2, %c0_9] : memref<25x896xf32, #tpu.memory_space<vmem>>, vector<1x896xf32>
    %12 = arith.mulf %10, %11 : vector<1x896xf32>
    %c2_10 = arith.constant 2 : index
    %c0_11 = arith.constant 0 : index
    %13 = vector.load %arg15[%c2_10, %c0_11] : memref<25x896xf32, #tpu.memory_space<vmem>>, vector<1x896xf32>
    tpu.vector_store %arg15[%c2_10, %c0_11], %12 {strides = array<i32>} : memref<25x896xf32, #tpu.memory_space<vmem>>, vector<1x896xf32>,
    %c55_i32 = arith.constant 55 : i32
    %14 = tpu.dynamic_rotate %1 by %c55_i32 dim 1 : vector<1x896xf32>, i32 -> vector<1x896xf32>
    %c3 = arith.constant 3 : index
    %c0_12 = arith.constant 0 : index
    %15 = vector.load %arg2[%c3, %c0_12] : memref<25x896xf32, #tpu.memory_space<vmem>>, vector<1x896xf32>
    %16 = arith.mulf %14, %15 : vector<1x896xf32>
    %c3_13 = arith.constant 3 : index
    %c0_14 = arith.constant 0 : index
    %17 = vector.load %arg15[%c3_13, %c0_14] : memref<25x896xf32, #tpu.memory_space<vmem>>, vector<1x896xf32>
    tpu.vector_store %arg15[%c3_13, %c0_14], %16 {strides = array<i32>} : memref<25x896xf32, #tpu.memory_space<vmem>>, vector<1x896xf32>,
    %c54_i32 = arith.constant 54 : i32
    %18 = tpu.dynamic_rotate %1 by %c54_i32 dim 1 : vector<1x896xf32>, i32 -> vector<1x896xf32>
    %c4 = arith.constant 4 : index
    %c0_15 = arith.constant 0 : index
    %19 = vector.load %arg2[%c4, %c0_15] : memref<25x896xf32, #tpu.memory_space<vmem>>, vector<1x896xf32>
    %20 = arith.mulf %18, %19 : vector<1x896xf32>
    %c4_16 = arith.constant 4 : index
    %c0_17 = arith.constant 0 : index
    %21 = vector.load %arg15[%c4_16, %c0_17] : memref<25x896xf32, #tpu.memory_space<vmem>>, vector<1x896xf32>
    tpu.vector_store %arg15[%c4_16, %c0_17], %20 {strides = array<i32>} : memref<25x896xf32, #tpu.memory_space<vmem>>, vector<1x896xf32>,
    %c30_i32 = arith.constant 30 : i32
    %22 = tpu.dynamic_rotate %1 by %c30_i32 dim 1 : vector<1x896xf32>, i32 -> vector<1x896xf32>
    %c5 = arith.constant 5 : index
    %c0_18 = arith.constant 0 : index
    %23 = vector.load %arg2[%c5, %c0_18] : memref<25x896xf32, #tpu.memory_space<vmem>>, vector<1x896xf32>
    %24 = arith.mulf %22, %23 : vector<1x896xf32>
    %c5_19 = arith.constant 5 : index
    %c0_20 = arith.constant 0 : index
    %25 = vector.load %arg15[%c5_19, %c0_20] : memref<25x896xf32, #tpu.memory_space<vmem>>, vector<1x896xf32>
    tpu.vector_store %arg15[%c5_19, %c0_20], %24 {strides = array<i32>} : memref<25x896xf32, #tpu.memory_space<vmem>>, vector<1x896xf32>,
    %c29_i32 = arith.constant 29 : i32
    %26 = tpu.dynamic_rotate %1 by %c29_i32 dim 1 : vector<1x896xf32>, i32 -> vector<1x896xf32>
    %c6 = arith.constant 6 : index
    %c0_21 = arith.constant 0 : index
    %27 = vector.load %arg2[%c6, %c0_21] : memref<25x896xf32, #tpu.memory_space<vmem>>, vector<1x896xf32>
    %28 = arith.mulf %26, %27 : vector<1x896xf32>
    %c6_22 = arith.constant 6 : index
    %c0_23 = arith.constant 0 : index
    %29 = vector.load %arg15[%c6_22, %c0_23] : memref<25x896xf32, #tpu.memory_space<vmem>>, vector<1x896xf32>
    tpu.vector_store %arg15[%c6_22, %c0_23], %28 {strides = array<i32>} : memref<25x896xf32, #tpu.memory_space<vmem>>, vector<1x896xf32>,
    %c28_i32 = arith.constant 28 : i32
    %30 = tpu.dynamic_rotate %1 by %c28_i32 dim 1 : vector<1x896xf32>, i32 -> vector<1x896xf32>
    %c7 = arith.constant 7 : index
    %c0_24 = arith.constant 0 : index
    %31 = vector.load %arg2[%c7, %c0_24] : memref<25x896xf32, #tpu.memory_space<vmem>>, vector<1x896xf32>
    %32 = arith.mulf %30, %31 : vector<1x896xf32>
    %c7_25 = arith.constant 7 : index
    %c0_26 = arith.constant 0 : index
    %33 = vector.load %arg15[%c7_25, %c0_26] : memref<25x896xf32, #tpu.memory_space<vmem>>, vector<1x896xf32>
    tpu.vector_store %arg15[%c7_25, %c0_26], %32 {strides = array<i32>} : memref<25x896xf32, #tpu.memory_space<vmem>>, vector<1x896xf32>,
    %c27_i32 = arith.constant 27 : i32
    %34 = tpu.dynamic_rotate %1 by %c27_i32 dim 1 : vector<1x896xf32>, i32 -> vector<1x896xf32>
    %c8 = arith.constant 8 : index
    %c0_27 = arith.constant 0 : index
    %35 = vector.load %arg2[%c8, %c0_27] : memref<25x896xf32, #tpu.memory_space<vmem>>, vector<1x896xf32>
    %36 = arith.mulf %34, %35 : vector<1x896xf32>
    %c8_28 = arith.constant 8 : index
    %c0_29 = arith.constant 0 : index
    %37 = vector.load %arg15[%c8_28, %c0_29] : memref<25x896xf32, #tpu.memory_space<vmem>>, vector<1x896xf32>
    tpu.vector_store %arg15[%c8_28, %c0_29], %36 {strides = array<i32>} : memref<25x896xf32, #tpu.memory_space<vmem>>, vector<1x896xf32>,
    %c26_i32 = arith.constant 26 : i32
    %38 = tpu.dynamic_rotate %1 by %c26_i32 dim 1 : vector<1x896xf32>, i32 -> vector<1x896xf32>
    %c9 = arith.constant 9 : index
    %c0_30 = arith.constant 0 : index
    %39 = vector.load %arg2[%c9, %c0_30] : memref<25x896xf32, #tpu.memory_space<vmem>>, vector<1x896xf32>
    %40 = arith.mulf %38, %39 : vector<1x896xf32>
    %c9_31 = arith.constant 9 : index
    %c0_32 = arith.constant 0 : index
    %41 = vector.load %arg15[%c9_31, %c0_32] : memref<25x896xf32, #tpu.memory_space<vmem>>, vector<1x896xf32>
    tpu.vector_store %arg15[%c9_31, %c0_32], %40 {strides = array<i32>} : memref<25x896xf32, #tpu.memory_space<vmem>>, vector<1x896xf32>,
    %c2_i32 = arith.constant 2 : i32
    %42 = tpu.dynamic_rotate %1 by %c2_i32 dim 1 : vector<1x896xf32>, i32 -> vector<1x896xf32>
    %c10 = arith.constant 10 : index
    %c0_33 = arith.constant 0 : index
    %43 = vector.load %arg2[%c10, %c0_33] : memref<25x896xf32, #tpu.memory_space<vmem>>, vector<1x896xf32>
    %44 = arith.mulf %42, %43 : vector<1x896xf32>
    %c10_34 = arith.constant 10 : index
    %c0_35 = arith.constant 0 : index
    %45 = vector.load %arg15[%c10_34, %c0_35] : memref<25x896xf32, #tpu.memory_space<vmem>>, vector<1x896xf32>
    tpu.vector_store %arg15[%c10_34, %c0_35], %44 {strides = array<i32>} : memref<25x896xf32, #tpu.memory_space<vmem>>, vector<1x896xf32>,
    %c1_i32 = arith.constant 1 : i32
    %46 = tpu.dynamic_rotate %1 by %c1_i32 dim 1 : vector<1x896xf32>, i32 -> vector<1x896xf32>
    %c11 = arith.constant 11 : index
    %c0_36 = arith.constant 0 : index
    %47 = vector.load %arg2[%c11, %c0_36] : memref<25x896xf32, #tpu.memory_space<vmem>>, vector<1x896xf32>
    %48 = arith.mulf %46, %47 : vector<1x896xf32>
    %c11_37 = arith.constant 11 : index
    %c0_38 = arith.constant 0 : index
    %49 = vector.load %arg15[%c11_37, %c0_38] : memref<25x896xf32, #tpu.memory_space<vmem>>, vector<1x896xf32>
    tpu.vector_store %arg15[%c11_37, %c0_38], %48 {strides = array<i32>} : memref<25x896xf32, #tpu.memory_space<vmem>>, vector<1x896xf32>,
    %c12 = arith.constant 12 : index
    %c0_39 = arith.constant 0 : index
    %50 = vector.load %arg2[%c12, %c0_39] : memref<25x896xf32, #tpu.memory_space<vmem>>, vector<1x896xf32>
    %51 = arith.mulf %1, %50 : vector<1x896xf32>
    %c12_40 = arith.constant 12 : index
    %c0_41 = arith.constant 0 : index
    %52 = vector.load %arg15[%c12_40, %c0_41] : memref<25x896xf32, #tpu.memory_space<vmem>>, vector<1x896xf32>
    tpu.vector_store %arg15[%c12_40, %c0_41], %51 {strides = array<i32>} : memref<25x896xf32, #tpu.memory_space<vmem>>, vector<1x896xf32>,
    %c895_i32 = arith.constant 895 : i32
    %53 = tpu.dynamic_rotate %1 by %c895_i32 dim 1 : vector<1x896xf32>, i32 -> vector<1x896xf32>
    %c13 = arith.constant 13 : index
    %c0_42 = arith.constant 0 : index
    %54 = vector.load %arg2[%c13, %c0_42] : memref<25x896xf32, #tpu.memory_space<vmem>>, vector<1x896xf32>
    %55 = arith.mulf %53, %54 : vector<1x896xf32>
    %c13_43 = arith.constant 13 : index
    %c0_44 = arith.constant 0 : index
    %56 = vector.load %arg15[%c13_43, %c0_44] : memref<25x896xf32, #tpu.memory_space<vmem>>, vector<1x896xf32>
    tpu.vector_store %arg15[%c13_43, %c0_44], %55 {strides = array<i32>} : memref<25x896xf32, #tpu.memory_space<vmem>>, vector<1x896xf32>,
    %c894_i32 = arith.constant 894 : i32
    %57 = tpu.dynamic_rotate %1 by %c894_i32 dim 1 : vector<1x896xf32>, i32 -> vector<1x896xf32>
    %c14 = arith.constant 14 : index
    %c0_45 = arith.constant 0 : index
    %58 = vector.load %arg2[%c14, %c0_45] : memref<25x896xf32, #tpu.memory_space<vmem>>, vector<1x896xf32>
    %59 = arith.mulf %57, %58 : vector<1x896xf32>
    %c14_46 = arith.constant 14 : index
    %c0_47 = arith.constant 0 : index
    %60 = vector.load %arg15[%c14_46, %c0_47] : memref<25x896xf32, #tpu.memory_space<vmem>>, vector<1x896xf32>
    tpu.vector_store %arg15[%c14_46, %c0_47], %59 {strides = array<i32>} : memref<25x896xf32, #tpu.memory_space<vmem>>, vector<1x896xf32>,
    %c870_i32 = arith.constant 870 : i32
    %61 = tpu.dynamic_rotate %1 by %c870_i32 dim 1 : vector<1x896xf32>, i32 -> vector<1x896xf32>
    %c15 = arith.constant 15 : index
    %c0_48 = arith.constant 0 : index
    %62 = vector.load %arg2[%c15, %c0_48] : memref<25x896xf32, #tpu.memory_space<vmem>>, vector<1x896xf32>
    %63 = arith.mulf %61, %62 : vector<1x896xf32>
    %c15_49 = arith.constant 15 : index
    %c0_50 = arith.constant 0 : index
    %64 = vector.load %arg15[%c15_49, %c0_50] : memref<25x896xf32, #tpu.memory_space<vmem>>, vector<1x896xf32>
    tpu.vector_store %arg15[%c15_49, %c0_50], %63 {strides = array<i32>} : memref<25x896xf32, #tpu.memory_space<vmem>>, vector<1x896xf32>,
    %c869_i32 = arith.constant 869 : i32
    %65 = tpu.dynamic_rotate %1 by %c869_i32 dim 1 : vector<1x896xf32>, i32 -> vector<1x896xf32>
    %c16 = arith.constant 16 : index
    %c0_51 = arith.constant 0 : index
    %66 = vector.load %arg2[%c16, %c0_51] : memref<25x896xf32, #tpu.memory_space<vmem>>, vector<1x896xf32>
    %67 = arith.mulf %65, %66 : vector<1x896xf32>
    %c16_52 = arith.constant 16 : index
    %c0_53 = arith.constant 0 : index
    %68 = vector.load %arg15[%c16_52, %c0_53] : memref<25x896xf32, #tpu.memory_space<vmem>>, vector<1x896xf32>
    tpu.vector_store %arg15[%c16_52, %c0_53], %67 {strides = array<i32>} : memref<25x896xf32, #tpu.memory_space<vmem>>, vector<1x896xf32>,
    %c868_i32 = arith.constant 868 : i32
    %69 = tpu.dynamic_rotate %1 by %c868_i32 dim 1 : vector<1x896xf32>, i32 -> vector<1x896xf32>
    %c17 = arith.constant 17 : index
    %c0_54 = arith.constant 0 : index
    %70 = vector.load %arg2[%c17, %c0_54] : memref<25x896xf32, #tpu.memory_space<vmem>>, vector<1x896xf32>
    %71 = arith.mulf %69, %70 : vector<1x896xf32>
    %c17_55 = arith.constant 17 : index
    %c0_56 = arith.constant 0 : index
    %72 = vector.load %arg15[%c17_55, %c0_56] : memref<25x896xf32, #tpu.memory_space<vmem>>, vector<1x896xf32>
    tpu.vector_store %arg15[%c17_55, %c0_56], %71 {strides = array<i32>} : memref<25x896xf32, #tpu.memory_space<vmem>>, vector<1x896xf32>,
    %c867_i32 = arith.constant 867 : i32
    %73 = tpu.dynamic_rotate %1 by %c867_i32 dim 1 : vector<1x896xf32>, i32 -> vector<1x896xf32>
    %c18 = arith.constant 18 : index
    %c0_57 = arith.constant 0 : index
    %74 = vector.load %arg2[%c18, %c0_57] : memref<25x896xf32, #tpu.memory_space<vmem>>, vector<1x896xf32>
    %75 = arith.mulf %73, %74 : vector<1x896xf32>
    %c18_58 = arith.constant 18 : index
    %c0_59 = arith.constant 0 : index
    %76 = vector.load %arg15[%c18_58, %c0_59] : memref<25x896xf32, #tpu.memory_space<vmem>>, vector<1x896xf32>
    tpu.vector_store %arg15[%c18_58, %c0_59], %75 {strides = array<i32>} : memref<25x896xf32, #tpu.memory_space<vmem>>, vector<1x896xf32>,
    %c866_i32 = arith.constant 866 : i32
    %77 = tpu.dynamic_rotate %1 by %c866_i32 dim 1 : vector<1x896xf32>, i32 -> vector<1x896xf32>
    %c19 = arith.constant 19 : index
    %c0_60 = arith.constant 0 : index
    %78 = vector.load %arg2[%c19, %c0_60] : memref<25x896xf32, #tpu.memory_space<vmem>>, vector<1x896xf32>
    %79 = arith.mulf %77, %78 : vector<1x896xf32>
    %c19_61 = arith.constant 19 : index
    %c0_62 = arith.constant 0 : index
    %80 = vector.load %arg15[%c19_61, %c0_62] : memref<25x896xf32, #tpu.memory_space<vmem>>, vector<1x896xf32>
    tpu.vector_store %arg15[%c19_61, %c0_62], %79 {strides = array<i32>} : memref<25x896xf32, #tpu.memory_space<vmem>>, vector<1x896xf32>,
    %c842_i32 = arith.constant 842 : i32
    %81 = tpu.dynamic_rotate %1 by %c842_i32 dim 1 : vector<1x896xf32>, i32 -> vector<1x896xf32>
    %c20 = arith.constant 20 : index
    %c0_63 = arith.constant 0 : index
    %82 = vector.load %arg2[%c20, %c0_63] : memref<25x896xf32, #tpu.memory_space<vmem>>, vector<1x896xf32>
    %83 = arith.mulf %81, %82 : vector<1x896xf32>
    %c20_64 = arith.constant 20 : index
    %c0_65 = arith.constant 0 : index
    %84 = vector.load %arg15[%c20_64, %c0_65] : memref<25x896xf32, #tpu.memory_space<vmem>>, vector<1x896xf32>
    tpu.vector_store %arg15[%c20_64, %c0_65], %83 {strides = array<i32>} : memref<25x896xf32, #tpu.memory_space<vmem>>, vector<1x896xf32>,
    %c841_i32 = arith.constant 841 : i32
    %85 = tpu.dynamic_rotate %1 by %c841_i32 dim 1 : vector<1x896xf32>, i32 -> vector<1x896xf32>
    %c21 = arith.constant 21 : index
    %c0_66 = arith.constant 0 : index
    %86 = vector.load %arg2[%c21, %c0_66] : memref<25x896xf32, #tpu.memory_space<vmem>>, vector<1x896xf32>
    %87 = arith.mulf %85, %86 : vector<1x896xf32>
    %c21_67 = arith.constant 21 : index
    %c0_68 = arith.constant 0 : index
    %88 = vector.load %arg15[%c21_67, %c0_68] : memref<25x896xf32, #tpu.memory_space<vmem>>, vector<1x896xf32>
    tpu.vector_store %arg15[%c21_67, %c0_68], %87 {strides = array<i32>} : memref<25x896xf32, #tpu.memory_space<vmem>>, vector<1x896xf32>,
    %c840_i32 = arith.constant 840 : i32
    %89 = tpu.dynamic_rotate %1 by %c840_i32 dim 1 : vector<1x896xf32>, i32 -> vector<1x896xf32>
    %c22 = arith.constant 22 : index
    %c0_69 = arith.constant 0 : index
    %90 = vector.load %arg2[%c22, %c0_69] : memref<25x896xf32, #tpu.memory_space<vmem>>, vector<1x896xf32>
    %91 = arith.mulf %89, %90 : vector<1x896xf32>
    %c22_70 = arith.constant 22 : index
    %c0_71 = arith.constant 0 : index
    %92 = vector.load %arg15[%c22_70, %c0_71] : memref<25x896xf32, #tpu.memory_space<vmem>>, vector<1x896xf32>
    tpu.vector_store %arg15[%c22_70, %c0_71], %91 {strides = array<i32>} : memref<25x896xf32, #tpu.memory_space<vmem>>, vector<1x896xf32>,
    %c839_i32 = arith.constant 839 : i32
    %93 = tpu.dynamic_rotate %1 by %c839_i32 dim 1 : vector<1x896xf32>, i32 -> vector<1x896xf32>
    %c23 = arith.constant 23 : index
    %c0_72 = arith.constant 0 : index
    %94 = vector.load %arg2[%c23, %c0_72] : memref<25x896xf32, #tpu.memory_space<vmem>>, vector<1x896xf32>
    %95 = arith.mulf %93, %94 : vector<1x896xf32>
    %c23_73 = arith.constant 23 : index
    %c0_74 = arith.constant 0 : index
    %96 = vector.load %arg15[%c23_73, %c0_74] : memref<25x896xf32, #tpu.memory_space<vmem>>, vector<1x896xf32>
    tpu.vector_store %arg15[%c23_73, %c0_74], %95 {strides = array<i32>} : memref<25x896xf32, #tpu.memory_space<vmem>>, vector<1x896xf32>,
    %c838_i32 = arith.constant 838 : i32
    %97 = tpu.dynamic_rotate %1 by %c838_i32 dim 1 : vector<1x896xf32>, i32 -> vector<1x896xf32>
    %c24 = arith.constant 24 : index
    %c0_75 = arith.constant 0 : index
    %98 = vector.load %arg2[%c24, %c0_75] : memref<25x896xf32, #tpu.memory_space<vmem>>, vector<1x896xf32>
    %99 = arith.mulf %97, %98 : vector<1x896xf32>
    %c24_76 = arith.constant 24 : index
    %c0_77 = arith.constant 0 : index
    %100 = vector.load %arg15[%c24_76, %c0_77] : memref<25x896xf32, #tpu.memory_space<vmem>>, vector<1x896xf32>
    tpu.vector_store %arg15[%c24_76, %c0_77], %99 {strides = array<i32>} : memref<25x896xf32, #tpu.memory_space<vmem>>, vector<1x896xf32>,
    %c0_78 = arith.constant 0 : index
    %c0_79 = arith.constant 0 : index
    %101 = vector.load %arg6[%c0_78, %c0_79] : memref<16x25xf32, #tpu.memory_space<vmem>>, vector<16x25xf32>
    %c0_80 = arith.constant 0 : index
    %c0_81 = arith.constant 0 : index
    %102 = vector.load %arg15[%c0_80, %c0_81] : memref<25x896xf32, #tpu.memory_space<vmem>>, vector<25x896xf32>
    %cst = arith.constant dense<0.000000e+00> : vector<16x896xf32>
    %103 = tpu.matmul %101, %102, %cst {dimension_numbers = #tpu.dot_dimension_numbers<[1], [0], [0], [1], [0, 0, 1, 1], [], []>} : vector<16x25xf32>, vector<25x896xf32>, vector<16x896xf32> -> vector<16x896xf32>
    %c0_82 = arith.constant 0 : index
    %c0_83 = arith.constant 0 : index
    %104 = vector.load %arg7[%c0_82, %c0_83] : memref<16x1xf32, #tpu.memory_space<vmem>>, vector<16x1xf32>
    %105 = vector.broadcast %104 : vector<16x1xf32> to vector<16x896xf32>
    %106 = arith.addf %103, %105 : vector<16x896xf32>
    %cst_84 = arith.constant 0.000000e+00 : f32
    %107 = vector.broadcast %cst_84 : f32 to vector<16x896xf32>
    %108 = arith.maximumf %106, %107 : vector<16x896xf32>
    %c895_i32_85 = arith.constant 895 : i32
    %109 = tpu.dynamic_rotate %108 by %c895_i32_85 dim 1 : vector<16x896xf32>, i32 -> vector<16x896xf32>
    %110 = arith.maximumf %108, %109 : vector<16x896xf32>
    %c868_i32_86 = arith.constant 868 : i32
    %111 = tpu.dynamic_rotate %110 by %c868_i32_86 dim 1 : vector<16x896xf32>, i32 -> vector<16x896xf32>
    %112 = arith.maximumf %110, %111 : vector<16x896xf32>
    %113 = arith.truncf %112 : vector<16x896xf32> to vector<16x896xbf16>
    %c0_87 = arith.constant 0 : index
    %c0_88 = arith.constant 0 : index
    %114 = vector.load %arg3[%c0_87, %c0_88] : memref<896x256xbf16, #tpu.memory_space<vmem>>, vector<896x256xbf16>
    %cst_89 = arith.constant dense<0.000000e+00> : vector<16x256xf32>
    %115 = tpu.matmul %113, %114, %cst_89 {dimension_numbers = #tpu.dot_dimension_numbers<[1], [0], [0], [1], [0, 0, 1, 1], [], []>} : vector<16x896xbf16>, vector<896x256xbf16>, vector<16x256xf32> -> vector<16x256xf32>
    %c30_i32_90 = arith.constant 30 : i32
    %116 = tpu.dynamic_rotate %115 by %c30_i32_90 dim 1 : vector<16x256xf32>, i32 -> vector<16x256xf32>
    %c0_91 = arith.constant 0 : index
    %c0_92 = arith.constant 0 : index
    %117 = vector.load %arg4[%c0_91, %c0_92] : memref<25x256xf32, #tpu.memory_space<vmem>>, vector<1x256xf32>
    %118 = vector.broadcast %117 : vector<1x256xf32> to vector<16x256xf32>
    %119 = arith.mulf %116, %118 : vector<16x256xf32>
    %120 = arith.truncf %119 : vector<16x256xf32> to vector<16x256xbf16>
    %c0_93 = arith.constant 0 : index
    %c0_94 = arith.constant 0 : index
    %121 = vector.load %arg16[%c0_93, %c0_94] : memref<400x256xbf16, #tpu.memory_space<vmem>>, vector<16x256xbf16>
    tpu.vector_store %arg16[%c0_93, %c0_94], %120 {strides = array<i32>} : memref<400x256xbf16, #tpu.memory_space<vmem>>, vector<16x256xbf16>,
    %c29_i32_95 = arith.constant 29 : i32
    %122 = tpu.dynamic_rotate %115 by %c29_i32_95 dim 1 : vector<16x256xf32>, i32 -> vector<16x256xf32>
    %c1_96 = arith.constant 1 : index
    %c0_97 = arith.constant 0 : index
    %123 = vector.load %arg4[%c1_96, %c0_97] : memref<25x256xf32, #tpu.memory_space<vmem>>, vector<1x256xf32>
    %124 = vector.broadcast %123 : vector<1x256xf32> to vector<16x256xf32>
    %125 = arith.mulf %122, %124 : vector<16x256xf32>
    %126 = arith.truncf %125 : vector<16x256xf32> to vector<16x256xbf16>
    %c16_98 = arith.constant 16 : index
    %c0_99 = arith.constant 0 : index
    %127 = vector.load %arg16[%c16_98, %c0_99] : memref<400x256xbf16, #tpu.memory_space<vmem>>, vector<16x256xbf16>
    tpu.vector_store %arg16[%c16_98, %c0_99], %126 {strides = array<i32>} : memref<400x256xbf16, #tpu.memory_space<vmem>>, vector<16x256xbf16>,
    %c28_i32_100 = arith.constant 28 : i32
    %128 = tpu.dynamic_rotate %115 by %c28_i32_100 dim 1 : vector<16x256xf32>, i32 -> vector<16x256xf32>
    %c2_101 = arith.constant 2 : index
    %c0_102 = arith.constant 0 : index
    %129 = vector.load %arg4[%c2_101, %c0_102] : memref<25x256xf32, #tpu.memory_space<vmem>>, vector<1x256xf32>
    %130 = vector.broadcast %129 : vector<1x256xf32> to vector<16x256xf32>
    %131 = arith.mulf %128, %130 : vector<16x256xf32>
    %132 = arith.truncf %131 : vector<16x256xf32> to vector<16x256xbf16>
    %c32 = arith.constant 32 : index
    %c0_103 = arith.constant 0 : index
    %133 = vector.load %arg16[%c32, %c0_103] : memref<400x256xbf16, #tpu.memory_space<vmem>>, vector<16x256xbf16>
    tpu.vector_store %arg16[%c32, %c0_103], %132 {strides = array<i32>} : memref<400x256xbf16, #tpu.memory_space<vmem>>, vector<16x256xbf16>,
    %c27_i32_104 = arith.constant 27 : i32
    %134 = tpu.dynamic_rotate %115 by %c27_i32_104 dim 1 : vector<16x256xf32>, i32 -> vector<16x256xf32>
    %c3_105 = arith.constant 3 : index
    %c0_106 = arith.constant 0 : index
    %135 = vector.load %arg4[%c3_105, %c0_106] : memref<25x256xf32, #tpu.memory_space<vmem>>, vector<1x256xf32>
    %136 = vector.broadcast %135 : vector<1x256xf32> to vector<16x256xf32>
    %137 = arith.mulf %134, %136 : vector<16x256xf32>
    %138 = arith.truncf %137 : vector<16x256xf32> to vector<16x256xbf16>
    %c48 = arith.constant 48 : index
    %c0_107 = arith.constant 0 : index
    %139 = vector.load %arg16[%c48, %c0_107] : memref<400x256xbf16, #tpu.memory_space<vmem>>, vector<16x256xbf16>
    tpu.vector_store %arg16[%c48, %c0_107], %138 {strides = array<i32>} : memref<400x256xbf16, #tpu.memory_space<vmem>>, vector<16x256xbf16>,
    %c26_i32_108 = arith.constant 26 : i32
    %140 = tpu.dynamic_rotate %115 by %c26_i32_108 dim 1 : vector<16x256xf32>, i32 -> vector<16x256xf32>
    %c4_109 = arith.constant 4 : index
    %c0_110 = arith.constant 0 : index
    %141 = vector.load %arg4[%c4_109, %c0_110] : memref<25x256xf32, #tpu.memory_space<vmem>>, vector<1x256xf32>
    %142 = vector.broadcast %141 : vector<1x256xf32> to vector<16x256xf32>
    %143 = arith.mulf %140, %142 : vector<16x256xf32>
    %144 = arith.truncf %143 : vector<16x256xf32> to vector<16x256xbf16>
    %c64 = arith.constant 64 : index
    %c0_111 = arith.constant 0 : index
    %145 = vector.load %arg16[%c64, %c0_111] : memref<400x256xbf16, #tpu.memory_space<vmem>>, vector<16x256xbf16>
    tpu.vector_store %arg16[%c64, %c0_111], %144 {strides = array<i32>} : memref<400x256xbf16, #tpu.memory_space<vmem>>, vector<16x256xbf16>,
    %c16_i32 = arith.constant 16 : i32
    %146 = tpu.dynamic_rotate %115 by %c16_i32 dim 1 : vector<16x256xf32>, i32 -> vector<16x256xf32>
    %c5_112 = arith.constant 5 : index
    %c0_113 = arith.constant 0 : index
    %147 = vector.load %arg4[%c5_112, %c0_113] : memref<25x256xf32, #tpu.memory_space<vmem>>, vector<1x256xf32>
    %148 = vector.broadcast %147 : vector<1x256xf32> to vector<16x256xf32>
    %149 = arith.mulf %146, %148 : vector<16x256xf32>
    %150 = arith.truncf %149 : vector<16x256xf32> to vector<16x256xbf16>
    %c80 = arith.constant 80 : index
    %c0_114 = arith.constant 0 : index
    %151 = vector.load %arg16[%c80, %c0_114] : memref<400x256xbf16, #tpu.memory_space<vmem>>, vector<16x256xbf16>
    tpu.vector_store %arg16[%c80, %c0_114], %150 {strides = array<i32>} : memref<400x256xbf16, #tpu.memory_space<vmem>>, vector<16x256xbf16>,
    %c15_i32 = arith.constant 15 : i32
    %152 = tpu.dynamic_rotate %115 by %c15_i32 dim 1 : vector<16x256xf32>, i32 -> vector<16x256xf32>
    %c6_115 = arith.constant 6 : index
    %c0_116 = arith.constant 0 : index
    %153 = vector.load %arg4[%c6_115, %c0_116] : memref<25x256xf32, #tpu.memory_space<vmem>>, vector<1x256xf32>
    %154 = vector.broadcast %153 : vector<1x256xf32> to vector<16x256xf32>
    %155 = arith.mulf %152, %154 : vector<16x256xf32>
    %156 = arith.truncf %155 : vector<16x256xf32> to vector<16x256xbf16>
    %c96 = arith.constant 96 : index
    %c0_117 = arith.constant 0 : index
    %157 = vector.load %arg16[%c96, %c0_117] : memref<400x256xbf16, #tpu.memory_space<vmem>>, vector<16x256xbf16>
    tpu.vector_store %arg16[%c96, %c0_117], %156 {strides = array<i32>} : memref<400x256xbf16, #tpu.memory_space<vmem>>, vector<16x256xbf16>,
    %c14_i32 = arith.constant 14 : i32
    %158 = tpu.dynamic_rotate %115 by %c14_i32 dim 1 : vector<16x256xf32>, i32 -> vector<16x256xf32>
    %c7_118 = arith.constant 7 : index
    %c0_119 = arith.constant 0 : index
    %159 = vector.load %arg4[%c7_118, %c0_119] : memref<25x256xf32, #tpu.memory_space<vmem>>, vector<1x256xf32>
    %160 = vector.broadcast %159 : vector<1x256xf32> to vector<16x256xf32>
    %161 = arith.mulf %158, %160 : vector<16x256xf32>
    %162 = arith.truncf %161 : vector<16x256xf32> to vector<16x256xbf16>
    %c112 = arith.constant 112 : index
    %c0_120 = arith.constant 0 : index
    %163 = vector.load %arg16[%c112, %c0_120] : memref<400x256xbf16, #tpu.memory_space<vmem>>, vector<16x256xbf16>
    tpu.vector_store %arg16[%c112, %c0_120], %162 {strides = array<i32>} : memref<400x256xbf16, #tpu.memory_space<vmem>>, vector<16x256xbf16>,
    %c13_i32 = arith.constant 13 : i32
    %164 = tpu.dynamic_rotate %115 by %c13_i32 dim 1 : vector<16x256xf32>, i32 -> vector<16x256xf32>
    %c8_121 = arith.constant 8 : index
    %c0_122 = arith.constant 0 : index
    %165 = vector.load %arg4[%c8_121, %c0_122] : memref<25x256xf32, #tpu.memory_space<vmem>>, vector<1x256xf32>
    %166 = vector.broadcast %165 : vector<1x256xf32> to vector<16x256xf32>
    %167 = arith.mulf %164, %166 : vector<16x256xf32>
    %168 = arith.truncf %167 : vector<16x256xf32> to vector<16x256xbf16>
    %c128 = arith.constant 128 : index
    %c0_123 = arith.constant 0 : index
    %169 = vector.load %arg16[%c128, %c0_123] : memref<400x256xbf16, #tpu.memory_space<vmem>>, vector<16x256xbf16>
    tpu.vector_store %arg16[%c128, %c0_123], %168 {strides = array<i32>} : memref<400x256xbf16, #tpu.memory_space<vmem>>, vector<16x256xbf16>,
    %c12_i32 = arith.constant 12 : i32
    %170 = tpu.dynamic_rotate %115 by %c12_i32 dim 1 : vector<16x256xf32>, i32 -> vector<16x256xf32>
    %c9_124 = arith.constant 9 : index
    %c0_125 = arith.constant 0 : index
    %171 = vector.load %arg4[%c9_124, %c0_125] : memref<25x256xf32, #tpu.memory_space<vmem>>, vector<1x256xf32>
    %172 = vector.broadcast %171 : vector<1x256xf32> to vector<16x256xf32>
    %173 = arith.mulf %170, %172 : vector<16x256xf32>
    %174 = arith.truncf %173 : vector<16x256xf32> to vector<16x256xbf16>
    %c144 = arith.constant 144 : index
    %c0_126 = arith.constant 0 : index
    %175 = vector.load %arg16[%c144, %c0_126] : memref<400x256xbf16, #tpu.memory_space<vmem>>, vector<16x256xbf16>
    tpu.vector_store %arg16[%c144, %c0_126], %174 {strides = array<i32>} : memref<400x256xbf16, #tpu.memory_space<vmem>>, vector<16x256xbf16>,
    %c2_i32_127 = arith.constant 2 : i32
    %176 = tpu.dynamic_rotate %115 by %c2_i32_127 dim 1 : vector<16x256xf32>, i32 -> vector<16x256xf32>
    %c10_128 = arith.constant 10 : index
    %c0_129 = arith.constant 0 : index
    %177 = vector.load %arg4[%c10_128, %c0_129] : memref<25x256xf32, #tpu.memory_space<vmem>>, vector<1x256xf32>
    %178 = vector.broadcast %177 : vector<1x256xf32> to vector<16x256xf32>
    %179 = arith.mulf %176, %178 : vector<16x256xf32>
    %180 = arith.truncf %179 : vector<16x256xf32> to vector<16x256xbf16>
    %c160 = arith.constant 160 : index
    %c0_130 = arith.constant 0 : index
    %181 = vector.load %arg16[%c160, %c0_130] : memref<400x256xbf16, #tpu.memory_space<vmem>>, vector<16x256xbf16>
    tpu.vector_store %arg16[%c160, %c0_130], %180 {strides = array<i32>} : memref<400x256xbf16, #tpu.memory_space<vmem>>, vector<16x256xbf16>,
    %c1_i32_131 = arith.constant 1 : i32
    %182 = tpu.dynamic_rotate %115 by %c1_i32_131 dim 1 : vector<16x256xf32>, i32 -> vector<16x256xf32>
    %c11_132 = arith.constant 11 : index
    %c0_133 = arith.constant 0 : index
    %183 = vector.load %arg4[%c11_132, %c0_133] : memref<25x256xf32, #tpu.memory_space<vmem>>, vector<1x256xf32>
    %184 = vector.broadcast %183 : vector<1x256xf32> to vector<16x256xf32>
    %185 = arith.mulf %182, %184 : vector<16x256xf32>
    %186 = arith.truncf %185 : vector<16x256xf32> to vector<16x256xbf16>
    %c176 = arith.constant 176 : index
    %c0_134 = arith.constant 0 : index
    %187 = vector.load %arg16[%c176, %c0_134] : memref<400x256xbf16, #tpu.memory_space<vmem>>, vector<16x256xbf16>
    tpu.vector_store %arg16[%c176, %c0_134], %186 {strides = array<i32>} : memref<400x256xbf16, #tpu.memory_space<vmem>>, vector<16x256xbf16>,
    %c12_135 = arith.constant 12 : index
    %c0_136 = arith.constant 0 : index
    %188 = vector.load %arg4[%c12_135, %c0_136] : memref<25x256xf32, #tpu.memory_space<vmem>>, vector<1x256xf32>
    %189 = vector.broadcast %188 : vector<1x256xf32> to vector<16x256xf32>
    %190 = arith.mulf %115, %189 : vector<16x256xf32>
    %191 = arith.truncf %190 : vector<16x256xf32> to vector<16x256xbf16>
    %c192 = arith.constant 192 : index
    %c0_137 = arith.constant 0 : index
    %192 = vector.load %arg16[%c192, %c0_137] : memref<400x256xbf16, #tpu.memory_space<vmem>>, vector<16x256xbf16>
    tpu.vector_store %arg16[%c192, %c0_137], %191 {strides = array<i32>} : memref<400x256xbf16, #tpu.memory_space<vmem>>, vector<16x256xbf16>,
    %c255_i32 = arith.constant 255 : i32
    %193 = tpu.dynamic_rotate %115 by %c255_i32 dim 1 : vector<16x256xf32>, i32 -> vector<16x256xf32>
    %c13_138 = arith.constant 13 : index
    %c0_139 = arith.constant 0 : index
    %194 = vector.load %arg4[%c13_138, %c0_139] : memref<25x256xf32, #tpu.memory_space<vmem>>, vector<1x256xf32>
    %195 = vector.broadcast %194 : vector<1x256xf32> to vector<16x256xf32>
    %196 = arith.mulf %193, %195 : vector<16x256xf32>
    %197 = arith.truncf %196 : vector<16x256xf32> to vector<16x256xbf16>
    %c208 = arith.constant 208 : index
    %c0_140 = arith.constant 0 : index
    %198 = vector.load %arg16[%c208, %c0_140] : memref<400x256xbf16, #tpu.memory_space<vmem>>, vector<16x256xbf16>
    tpu.vector_store %arg16[%c208, %c0_140], %197 {strides = array<i32>} : memref<400x256xbf16, #tpu.memory_space<vmem>>, vector<16x256xbf16>,
    %c254_i32 = arith.constant 254 : i32
    %199 = tpu.dynamic_rotate %115 by %c254_i32 dim 1 : vector<16x256xf32>, i32 -> vector<16x256xf32>
    %c14_141 = arith.constant 14 : index
    %c0_142 = arith.constant 0 : index
    %200 = vector.load %arg4[%c14_141, %c0_142] : memref<25x256xf32, #tpu.memory_space<vmem>>, vector<1x256xf32>
    %201 = vector.broadcast %200 : vector<1x256xf32> to vector<16x256xf32>
    %202 = arith.mulf %199, %201 : vector<16x256xf32>
    %203 = arith.truncf %202 : vector<16x256xf32> to vector<16x256xbf16>
    %c224 = arith.constant 224 : index
    %c0_143 = arith.constant 0 : index
    %204 = vector.load %arg16[%c224, %c0_143] : memref<400x256xbf16, #tpu.memory_space<vmem>>, vector<16x256xbf16>
    tpu.vector_store %arg16[%c224, %c0_143], %203 {strides = array<i32>} : memref<400x256xbf16, #tpu.memory_space<vmem>>, vector<16x256xbf16>,
    %c244_i32 = arith.constant 244 : i32
    %205 = tpu.dynamic_rotate %115 by %c244_i32 dim 1 : vector<16x256xf32>, i32 -> vector<16x256xf32>
    %c15_144 = arith.constant 15 : index
    %c0_145 = arith.constant 0 : index
    %206 = vector.load %arg4[%c15_144, %c0_145] : memref<25x256xf32, #tpu.memory_space<vmem>>, vector<1x256xf32>
    %207 = vector.broadcast %206 : vector<1x256xf32> to vector<16x256xf32>
    %208 = arith.mulf %205, %207 : vector<16x256xf32>
    %209 = arith.truncf %208 : vector<16x256xf32> to vector<16x256xbf16>
    %c240 = arith.constant 240 : index
    %c0_146 = arith.constant 0 : index
    %210 = vector.load %arg16[%c240, %c0_146] : memref<400x256xbf16, #tpu.memory_space<vmem>>, vector<16x256xbf16>
    tpu.vector_store %arg16[%c240, %c0_146], %209 {strides = array<i32>} : memref<400x256xbf16, #tpu.memory_space<vmem>>, vector<16x256xbf16>,
    %c243_i32 = arith.constant 243 : i32
    %211 = tpu.dynamic_rotate %115 by %c243_i32 dim 1 : vector<16x256xf32>, i32 -> vector<16x256xf32>
    %c16_147 = arith.constant 16 : index
    %c0_148 = arith.constant 0 : index
    %212 = vector.load %arg4[%c16_147, %c0_148] : memref<25x256xf32, #tpu.memory_space<vmem>>, vector<1x256xf32>
    %213 = vector.broadcast %212 : vector<1x256xf32> to vector<16x256xf32>
    %214 = arith.mulf %211, %213 : vector<16x256xf32>
    %215 = arith.truncf %214 : vector<16x256xf32> to vector<16x256xbf16>
    %c256 = arith.constant 256 : index
    %c0_149 = arith.constant 0 : index
    %216 = vector.load %arg16[%c256, %c0_149] : memref<400x256xbf16, #tpu.memory_space<vmem>>, vector<16x256xbf16>
    tpu.vector_store %arg16[%c256, %c0_149], %215 {strides = array<i32>} : memref<400x256xbf16, #tpu.memory_space<vmem>>, vector<16x256xbf16>,
    %c242_i32 = arith.constant 242 : i32
    %217 = tpu.dynamic_rotate %115 by %c242_i32 dim 1 : vector<16x256xf32>, i32 -> vector<16x256xf32>
    %c17_150 = arith.constant 17 : index
    %c0_151 = arith.constant 0 : index
    %218 = vector.load %arg4[%c17_150, %c0_151] : memref<25x256xf32, #tpu.memory_space<vmem>>, vector<1x256xf32>
    %219 = vector.broadcast %218 : vector<1x256xf32> to vector<16x256xf32>
    %220 = arith.mulf %217, %219 : vector<16x256xf32>
    %221 = arith.truncf %220 : vector<16x256xf32> to vector<16x256xbf16>
    %c272 = arith.constant 272 : index
    %c0_152 = arith.constant 0 : index
    %222 = vector.load %arg16[%c272, %c0_152] : memref<400x256xbf16, #tpu.memory_space<vmem>>, vector<16x256xbf16>
    tpu.vector_store %arg16[%c272, %c0_152], %221 {strides = array<i32>} : memref<400x256xbf16, #tpu.memory_space<vmem>>, vector<16x256xbf16>,
    %c241_i32 = arith.constant 241 : i32
    %223 = tpu.dynamic_rotate %115 by %c241_i32 dim 1 : vector<16x256xf32>, i32 -> vector<16x256xf32>
    %c18_153 = arith.constant 18 : index
    %c0_154 = arith.constant 0 : index
    %224 = vector.load %arg4[%c18_153, %c0_154] : memref<25x256xf32, #tpu.memory_space<vmem>>, vector<1x256xf32>
    %225 = vector.broadcast %224 : vector<1x256xf32> to vector<16x256xf32>
    %226 = arith.mulf %223, %225 : vector<16x256xf32>
    %227 = arith.truncf %226 : vector<16x256xf32> to vector<16x256xbf16>
    %c288 = arith.constant 288 : index
    %c0_155 = arith.constant 0 : index
    %228 = vector.load %arg16[%c288, %c0_155] : memref<400x256xbf16, #tpu.memory_space<vmem>>, vector<16x256xbf16>
    tpu.vector_store %arg16[%c288, %c0_155], %227 {strides = array<i32>} : memref<400x256xbf16, #tpu.memory_space<vmem>>, vector<16x256xbf16>,
    %c240_i32 = arith.constant 240 : i32
    %229 = tpu.dynamic_rotate %115 by %c240_i32 dim 1 : vector<16x256xf32>, i32 -> vector<16x256xf32>
    %c19_156 = arith.constant 19 : index
    %c0_157 = arith.constant 0 : index
    %230 = vector.load %arg4[%c19_156, %c0_157] : memref<25x256xf32, #tpu.memory_space<vmem>>, vector<1x256xf32>
    %231 = vector.broadcast %230 : vector<1x256xf32> to vector<16x256xf32>
    %232 = arith.mulf %229, %231 : vector<16x256xf32>
    %233 = arith.truncf %232 : vector<16x256xf32> to vector<16x256xbf16>
    %c304 = arith.constant 304 : index
    %c0_158 = arith.constant 0 : index
    %234 = vector.load %arg16[%c304, %c0_158] : memref<400x256xbf16, #tpu.memory_space<vmem>>, vector<16x256xbf16>
    tpu.vector_store %arg16[%c304, %c0_158], %233 {strides = array<i32>} : memref<400x256xbf16, #tpu.memory_space<vmem>>, vector<16x256xbf16>,
    %c230_i32 = arith.constant 230 : i32
    %235 = tpu.dynamic_rotate %115 by %c230_i32 dim 1 : vector<16x256xf32>, i32 -> vector<16x256xf32>
    %c20_159 = arith.constant 20 : index
    %c0_160 = arith.constant 0 : index
    %236 = vector.load %arg4[%c20_159, %c0_160] : memref<25x256xf32, #tpu.memory_space<vmem>>, vector<1x256xf32>
    %237 = vector.broadcast %236 : vector<1x256xf32> to vector<16x256xf32>
    %238 = arith.mulf %235, %237 : vector<16x256xf32>
    %239 = arith.truncf %238 : vector<16x256xf32> to vector<16x256xbf16>
    %c320 = arith.constant 320 : index
    %c0_161 = arith.constant 0 : index
    %240 = vector.load %arg16[%c320, %c0_161] : memref<400x256xbf16, #tpu.memory_space<vmem>>, vector<16x256xbf16>
    tpu.vector_store %arg16[%c320, %c0_161], %239 {strides = array<i32>} : memref<400x256xbf16, #tpu.memory_space<vmem>>, vector<16x256xbf16>,
    %c229_i32 = arith.constant 229 : i32
    %241 = tpu.dynamic_rotate %115 by %c229_i32 dim 1 : vector<16x256xf32>, i32 -> vector<16x256xf32>
    %c21_162 = arith.constant 21 : index
    %c0_163 = arith.constant 0 : index
    %242 = vector.load %arg4[%c21_162, %c0_163] : memref<25x256xf32, #tpu.memory_space<vmem>>, vector<1x256xf32>
    %243 = vector.broadcast %242 : vector<1x256xf32> to vector<16x256xf32>
    %244 = arith.mulf %241, %243 : vector<16x256xf32>
    %245 = arith.truncf %244 : vector<16x256xf32> to vector<16x256xbf16>
    %c336 = arith.constant 336 : index
    %c0_164 = arith.constant 0 : index
    %246 = vector.load %arg16[%c336, %c0_164] : memref<400x256xbf16, #tpu.memory_space<vmem>>, vector<16x256xbf16>
    tpu.vector_store %arg16[%c336, %c0_164], %245 {strides = array<i32>} : memref<400x256xbf16, #tpu.memory_space<vmem>>, vector<16x256xbf16>,
    %c228_i32 = arith.constant 228 : i32
    %247 = tpu.dynamic_rotate %115 by %c228_i32 dim 1 : vector<16x256xf32>, i32 -> vector<16x256xf32>
    %c22_165 = arith.constant 22 : index
    %c0_166 = arith.constant 0 : index
    %248 = vector.load %arg4[%c22_165, %c0_166] : memref<25x256xf32, #tpu.memory_space<vmem>>, vector<1x256xf32>
    %249 = vector.broadcast %248 : vector<1x256xf32> to vector<16x256xf32>
    %250 = arith.mulf %247, %249 : vector<16x256xf32>
    %251 = arith.truncf %250 : vector<16x256xf32> to vector<16x256xbf16>
    %c352 = arith.constant 352 : index
    %c0_167 = arith.constant 0 : index
    %252 = vector.load %arg16[%c352, %c0_167] : memref<400x256xbf16, #tpu.memory_space<vmem>>, vector<16x256xbf16>
    tpu.vector_store %arg16[%c352, %c0_167], %251 {strides = array<i32>} : memref<400x256xbf16, #tpu.memory_space<vmem>>, vector<16x256xbf16>,
    %c227_i32 = arith.constant 227 : i32
    %253 = tpu.dynamic_rotate %115 by %c227_i32 dim 1 : vector<16x256xf32>, i32 -> vector<16x256xf32>
    %c23_168 = arith.constant 23 : index
    %c0_169 = arith.constant 0 : index
    %254 = vector.load %arg4[%c23_168, %c0_169] : memref<25x256xf32, #tpu.memory_space<vmem>>, vector<1x256xf32>
    %255 = vector.broadcast %254 : vector<1x256xf32> to vector<16x256xf32>
    %256 = arith.mulf %253, %255 : vector<16x256xf32>
    %257 = arith.truncf %256 : vector<16x256xf32> to vector<16x256xbf16>
    %c368 = arith.constant 368 : index
    %c0_170 = arith.constant 0 : index
    %258 = vector.load %arg16[%c368, %c0_170] : memref<400x256xbf16, #tpu.memory_space<vmem>>, vector<16x256xbf16>
    tpu.vector_store %arg16[%c368, %c0_170], %257 {strides = array<i32>} : memref<400x256xbf16, #tpu.memory_space<vmem>>, vector<16x256xbf16>,
    %c226_i32 = arith.constant 226 : i32
    %259 = tpu.dynamic_rotate %115 by %c226_i32 dim 1 : vector<16x256xf32>, i32 -> vector<16x256xf32>
    %c24_171 = arith.constant 24 : index
    %c0_172 = arith.constant 0 : index
    %260 = vector.load %arg4[%c24_171, %c0_172] : memref<25x256xf32, #tpu.memory_space<vmem>>, vector<1x256xf32>
    %261 = vector.broadcast %260 : vector<1x256xf32> to vector<16x256xf32>
    %262 = arith.mulf %259, %261 : vector<16x256xf32>
    %263 = arith.truncf %262 : vector<16x256xf32> to vector<16x256xbf16>
    %c384 = arith.constant 384 : index
    %c0_173 = arith.constant 0 : index
    %264 = vector.load %arg16[%c384, %c0_173] : memref<400x256xbf16, #tpu.memory_space<vmem>>, vector<16x256xbf16>
    tpu.vector_store %arg16[%c384, %c0_173], %263 {strides = array<i32>} : memref<400x256xbf16, #tpu.memory_space<vmem>>, vector<16x256xbf16>,
    %c0_174 = arith.constant 0 : index
    %c0_175 = arith.constant 0 : index
    %265 = vector.load %arg8[%c0_174, %c0_175] : memref<32x400xbf16, #tpu.memory_space<vmem>>, vector<32x400xbf16>
    %c0_176 = arith.constant 0 : index
    %c0_177 = arith.constant 0 : index
    %266 = vector.load %arg16[%c0_176, %c0_177] : memref<400x256xbf16, #tpu.memory_space<vmem>>, vector<400x256xbf16>
    %cst_178 = arith.constant dense<0.000000e+00> : vector<32x256xf32>
    %267 = tpu.matmul %265, %266, %cst_178 {dimension_numbers = #tpu.dot_dimension_numbers<[1], [0], [0], [1], [0, 0, 1, 1], [], []>} : vector<32x400xbf16>, vector<400x256xbf16>, vector<32x256xf32> -> vector<32x256xf32>
    %c0_179 = arith.constant 0 : index
    %c0_180 = arith.constant 0 : index
    %268 = vector.load %arg9[%c0_179, %c0_180] : memref<32x1xf32, #tpu.memory_space<vmem>>, vector<32x1xf32>
    %269 = vector.broadcast %268 : vector<32x1xf32> to vector<32x256xf32>
    %270 = arith.addf %267, %269 : vector<32x256xf32>
    %cst_181 = arith.constant 0.000000e+00 : f32
    %271 = vector.broadcast %cst_181 : f32 to vector<32x256xf32>
    %272 = arith.maximumf %270, %271 : vector<32x256xf32>
    %c255_i32_182 = arith.constant 255 : i32
    %273 = tpu.dynamic_rotate %272 by %c255_i32_182 dim 1 : vector<32x256xf32>, i32 -> vector<32x256xf32>
    %274 = arith.maximumf %272, %273 : vector<32x256xf32>
    %c242_i32_183 = arith.constant 242 : i32
    %275 = tpu.dynamic_rotate %274 by %c242_i32_183 dim 1 : vector<32x256xf32>, i32 -> vector<32x256xf32>
    %276 = arith.maximumf %274, %275 : vector<32x256xf32>
    %277 = arith.truncf %276 : vector<32x256xf32> to vector<32x256xbf16>
    %c0_184 = arith.constant 0 : index
    %c0_185 = arith.constant 0 : index
    %278 = vector.load %arg5[%c0_184, %c0_185] : memref<256x128xbf16, #tpu.memory_space<vmem>>, vector<256x128xbf16>
    %cst_186 = arith.constant dense<0.000000e+00> : vector<32x128xf32>
    %279 = tpu.matmul %277, %278, %cst_186 {dimension_numbers = #tpu.dot_dimension_numbers<[1], [0], [0], [1], [0, 0, 1, 1], [], []>} : vector<32x256xbf16>, vector<256x128xbf16>, vector<32x128xf32> -> vector<32x128xf32>
    %280 = arith.truncf %279 : vector<32x128xf32> to vector<32x128xbf16>
    %c0_187 = arith.constant 0 : index
    %c0_188 = arith.constant 0 : index
    %281 = vector.load %arg10[%c0_187, %c0_188] : memref<128x320xbf16, #tpu.memory_space<vmem>>, vector<128x320xbf16>
    %cst_189 = arith.constant dense<0.000000e+00> : vector<32x320xf32>
    %282 = tpu.matmul %280, %281, %cst_189 {dimension_numbers = #tpu.dot_dimension_numbers<[1], [0], [0], [1], [0, 0, 1, 1], [], []>} : vector<32x128xbf16>, vector<128x320xbf16>, vector<32x320xf32> -> vector<32x320xf32>
    %c0_190 = arith.constant 0 : index
    %c0_191 = arith.constant 0 : index
    %283 = vector.load %arg11[%c0_190, %c0_191] : memref<32x320xf32, #tpu.memory_space<vmem>>, vector<32x320xf32>
    %284 = arith.mulf %282, %283 : vector<32x320xf32>
    %c0_192 = arith.constant 0 : index
    %c0_193 = arith.constant 0 : index
    %285 = vector.load %arg12[%c0_192, %c0_193] : memref<320x128xf32, #tpu.memory_space<vmem>>, vector<320x128xf32>
    %cst_194 = arith.constant dense<0.000000e+00> : vector<32x128xf32>
    %286 = tpu.matmul %284, %285, %cst_194 {dimension_numbers = #tpu.dot_dimension_numbers<[1], [0], [0], [1], [0, 0, 1, 1], [], []>} : vector<32x320xf32>, vector<320x128xf32>, vector<32x128xf32> -> vector<32x128xf32>
    %cst_195 = arith.constant dense<0.000000e+00> : vector<128xf32>
    %287 = vector.multi_reduction <add>, %286, %cst_195 [0] : vector<32x128xf32> to vector<128xf32>
    %288 = vector.shape_cast %287 : vector<128xf32> to vector<1x128xf32>
    %c0_196 = arith.constant 0 : index
    %c0_197 = arith.constant 0 : index
    %289 = vector.load %arg13[%c0_196, %c0_197] : memref<1x128xf32, #tpu.memory_space<vmem>>, vector<1x128xf32>
    %290 = arith.addf %288, %289 : vector<1x128xf32>
    %c0_198 = arith.constant 0 : index
    %c0_199 = arith.constant 0 : index
    %c0_200 = arith.constant 0 : index
    %291 = vector.load %arg14[%c0_198, %c0_199, %c0_200] : memref<1x1x128xf32, #tpu.memory_space<vmem>>, vector<1x1x128xf32>
    %292 = vector.shape_cast %291 : vector<1x1x128xf32> to vector<1x128xf32>
    %293 = vector.shape_cast %290 : vector<1x128xf32> to vector<1x1x128xf32>
    tpu.vector_store %arg14[%c0_198, %c0_199, %c0_200], %293 {strides = array<i32>} : memref<1x1x128xf32, #tpu.memory_space<vmem>>, vector<1x1x128xf32>,
    return
  }
  func.func @transform_0(%arg0: i32) -> (i32, i32, i32) {
    %c0_i32 = arith.constant 0 : i32
    %c0_i32_0 = arith.constant 0 : i32
    %c0_i32_1 = arith.constant 0 : i32
    return %arg0, %c0_i32, %c0_i32_0 : i32, i32, i32
  }
  func.func @transform_1(%arg0: i32) -> (i32, i32) {
    %c0_i32 = arith.constant 0 : i32
    %c0_i32_0 = arith.constant 0 : i32
    %c0_i32_1 = arith.constant 0 : i32
    return %c0_i32, %c0_i32_0 : i32, i32
  }
  func.func @transform_2(%arg0: i32) -> (i32, i32) {
    %c0_i32 = arith.constant 0 : i32
    %c0_i32_0 = arith.constant 0 : i32
    %c0_i32_1 = arith.constant 0 : i32
    return %c0_i32, %c0_i32_0 : i32, i32
  }
  func.func @transform_3(%arg0: i32) -> (i32, i32) {
    %c0_i32 = arith.constant 0 : i32
    %c0_i32_0 = arith.constant 0 : i32
    %c0_i32_1 = arith.constant 0 : i32
    return %c0_i32, %c0_i32_0 : i32, i32
  }
  func.func @transform_4(%arg0: i32) -> (i32, i32) {
    %c0_i32 = arith.constant 0 : i32
    %c0_i32_0 = arith.constant 0 : i32
    %c0_i32_1 = arith.constant 0 : i32
    return %c0_i32, %c0_i32_0 : i32, i32
  }
  func.func @transform_5(%arg0: i32) -> (i32, i32) {
    %c0_i32 = arith.constant 0 : i32
    %c0_i32_0 = arith.constant 0 : i32
    %c0_i32_1 = arith.constant 0 : i32
    return %c0_i32, %c0_i32_0 : i32, i32
  }
  func.func @transform_6(%arg0: i32) -> (i32, i32) {
    %c0_i32 = arith.constant 0 : i32
    %c0_i32_0 = arith.constant 0 : i32
    %c0_i32_1 = arith.constant 0 : i32
    return %c0_i32, %c0_i32_0 : i32, i32
  }
  func.func @transform_7(%arg0: i32) -> (i32, i32) {
    %c0_i32 = arith.constant 0 : i32
    %c0_i32_0 = arith.constant 0 : i32
    %c0_i32_1 = arith.constant 0 : i32
    return %c0_i32, %c0_i32_0 : i32, i32
  }
  func.func @transform_8(%arg0: i32) -> (i32, i32) {
    %c0_i32 = arith.constant 0 : i32
    %c0_i32_0 = arith.constant 0 : i32
    %c0_i32_1 = arith.constant 0 : i32
    return %c0_i32, %c0_i32_0 : i32, i32
  }
  func.func @transform_9(%arg0: i32) -> (i32, i32) {
    %c0_i32 = arith.constant 0 : i32
    %c0_i32_0 = arith.constant 0 : i32
    %c0_i32_1 = arith.constant 0 : i32
    return %c0_i32, %c0_i32_0 : i32, i32
  }
  func.func @transform_10(%arg0: i32) -> (i32, i32) {
    %c0_i32 = arith.constant 0 : i32
    %c0_i32_0 = arith.constant 0 : i32
    %c0_i32_1 = arith.constant 0 : i32
    return %c0_i32, %c0_i32_0 : i32, i32
  }
  func.func @transform_11(%arg0: i32) -> (i32, i32) {
    %c0_i32 = arith.constant 0 : i32
    %c0_i32_0 = arith.constant 0 : i32
    %c0_i32_1 = arith.constant 0 : i32
    return %c0_i32, %c0_i32_0 : i32, i32
  }
  func.func @transform_12(%arg0: i32) -> (i32, i32) {
    %c0_i32 = arith.constant 0 : i32
    %c0_i32_0 = arith.constant 0 : i32
    %c0_i32_1 = arith.constant 0 : i32
    return %c0_i32, %c0_i32_0 : i32, i32
  }
  func.func @transform_13(%arg0: i32) -> (i32, i32, i32) {
    %c0_i32 = arith.constant 0 : i32
    %c0_i32_0 = arith.constant 0 : i32
    %c0_i32_1 = arith.constant 0 : i32
    return %arg0, %c0_i32, %c0_i32_0 : i32, i32, i32
  }
}

</mosaic_0001>

<bundles_post_ra>
// kernel: cnn_forward.1
= control target key start
LH: loop header
LB: loop body
LE: loop exit
PB: predicated region body
PF: predicated region fallthrough
CT: control target
= control target key end

     0   :  { %s10954_s0 = inlined_call_operand.vmem [shape: f32[2,1,896], index: 0, kind: input, shape index: {}]   ;;  %s10955_s1 = inlined_call_operand.hbm [shape: f32[25,896], index: 1, kind: input, shape index: {}]   ;;  %s10956_s2 = inlined_call_operand.hbm [shape: bf16[896,256], index: 2, kind: input, shape index: {}]   ;;  %s10957_s3 = inlined_call_operand.hbm [shape: f32[25,256], index: 3, kind: input, shape index: {}]   ;;  %s10958_s4 = inlined_call_operand.hbm [shape: bf16[256,128], index: 4, kind: input, shape index: {}]   ;;  %s10959_s5 = inlined_call_operand.hbm [shape: f32[16,25], index: 5, kind: input, shape index: {}]   ;;  %s10960_s6 = inlined_call_operand.vmem [shape: f32[16,1], index: 6, kind: input, shape index: {}]   ;;  %s10961_s7 = inlined_call_operand.hbm [shape: bf16[32,400], index: 7, kind: input, shape index: {}]   ;;  %s10962_s8 = inlined_call_operand.vmem [shape: f32[32,1], index: 8, kind: input, shape index: {}]   ;;  %s10963_s9 = inlined_call_operand.vmem [shape: bf16[128,320], index: 9, kind: input, shape index: {}]   ;;  %s10964_s10 = inlined_call_operand.vmem [shape: f32[32,320], index: 10, kind: input, shape index: {}]   ;;  %s10965_s11 = inlined_call_operand.vmem [shape: f32[320,128], index: 11, kind: input, shape index: {}]   ;;  %s10966_s12 = inlined_call_operand.vmem [shape: f32[1,128], index: 12, kind: input, shape index: {}]   ;;  %s10967_s13 = inlined_call_operand.hbm [shape: f32[2,1,128], index: 13, kind: output, shape index: {}]  }
   0x1   :  { %11086 = sst [smem:[#allocation43_spill]] %s10956_s2 }
   0x2   :  { %11087 = sst [smem:[#allocation44_spill]] %s10958_s4 }
   0x3   :  { %11088 = sst [smem:[#allocation45_spill]] %s10966_s12 }
   0x4   :  { %18 = vsyncpa [#allocation5], 0 }
   0x5   :  { %19 = vsyncpa [#allocation8], 0 }
   0x6   :  { %20 = vsyncpa [#allocation11], 0 }
   0x7   :  { %21 = vsyncpa [#allocation14], 0 }
   0x8   :  { %22 = vsyncpa [#allocation6], 0 }
   0x9   :  { %24 = vsyncpa [#allocation6 + $0x1], 0  ;;  %s7218_s25 = smov 0   ;;  %s7220_s26 = smov 0  }
   0xa   :  { %s7222_s27 = smov 0   ;;  %s7224_s28 = smov 0  }
   0xb LB: > { %11089 = sst [smem:[#allocation21_spill]] %s7085_s25  ;;  %s7239_s29 = sadd.s32 4294967295, %s7097_s28   ;;  %s7097_s28 = sphi %s7224_s28, %s11306_s28   ;;  %s7093_s27 = sphi %s7222_s27, %s11308_s27   ;;  %s7089_s26 = sphi %s7220_s26, %s11310_s26   ;;  %s7085_s25 = sphi %s7218_s25, %s11309_s25  }
   0xc   : > { %11090 = sst [smem:[#allocation22_spill]] %s7093_s27  ;;  %s5472_s30 = sadd.s32 4294967294, %s7097_s28  }
   0xd   : > { %11091 = sst [smem:[#allocation23_spill]] %s7097_s28  ;;  %s7243_s14 = sadd.s32 1, %s7097_s28  }
   0xe   : > { %11092 = sst [smem:[#allocation24_spill]] %s7243_s14  ;;  %s315_s15 = sadd.s32 1, %s7093_s27 }
   0xf   : > { %s312_s16 = ssub.s32 %s7097_s28, %s7243_s14  ;;  %p325_p0 = scmp.ne.s32.totalorder %s7093_s27, %s7089_s26 }
  0x10   : > { %p313_p1 = scmp.eq.s32.totalorder %s312_s16, 0  ;;  %p326_p2 = scmp.eq.s32.totalorder %s7239_s29, 1 }
  0x11   : > { %p331_p3 = scmp.ne.s32.totalorder %s7089_s26, %s7085_s25  ;;  %p332_p4 = scmp.eq.s32.totalorder %s5472_s30, 1 }
  0x12   : > { %s7254_s17 = scalar_select %p313_p1, %s7093_s27, %s315_s15  }
  0x13   : > { %p7256_p5 = por %p326_p2, %p325_p0  ;;  %p7260_p6 = por %p332_p4, %p331_p3 }
  0x14   : > { %11093 = sst [smem:[#allocation25_spill]] %s7254_s17  ;;  %p5473_p7 = scmp.ge.s32.totalorder %s7097_s28, 1 }
  0x15   : > { %s11094_s18 = scalar_select %p7256_p5, 1, 0 }
  0x16   : > { %s11096_s19 = scalar_select %p7260_p6, 1, 0 }
  0x17   : > { %11095 = sst [smem:[#allocation26_spill]] %s11094_s18  ;;  %p339_p8 = scmp.lt.s32.totalorder %s7097_s28, 3 }
  0x18   : > { %11097 = sst [smem:[#allocation27_spill]] %s11096_s19  ;;  %p6631_p9 = scmp.eq.s32.totalorder %s7239_s29, 0 }
  0x19   : > { %p7267_p10 = pnand %p5473_p7, %p339_p8  ;;  %s11099_s2 = sld [smem:[#allocation43_spill]] }
  0x1a   : > { %s7099_s24 = smov [#allocation7]   ;;  %s11101_s4 = sld [smem:[#allocation44_spill]] }
  0x1b   : > { %p6608_p11 = pneg %p7267_p10  ;;  %s366_s30 = sshll.u32 %s7099_s24, 4  ;;  %s367_s30 = int_to_ptr.vmem [resolvable:$true] %s366_s30 }
  0x1c   : > { %s10976_s21 = smov 128   ;;  %s10977_s22 = smov 8  }
  0x1d   : > { %p7278_p12 = pnand %p6631_p9, %p6608_p11  ;;  %s7102_s24 = smov [#allocation10]  }
  0x1e   : > { %s7103_s14 = smov 64   ;;  %s7104_s19 = smov 4  }
  0x1f   : > { %s364_s23 = sshll.u32 %s11099_s2, 4  ;;  %s394_s2 = sshll.u32 %s7102_s24, 4  ;;  %s365_s23 = int_to_ptr.hbm [resolvable:$true] %s364_s23  ;;  %s395_s2 = int_to_ptr.vmem [resolvable:$true] %s394_s2 }
  0x20   : > { %s392_s27 = sshll.u32 %s11101_s4, 4  ;;  %s350_s4 = sshll.u32 %s10955_s1, 4  ;;  %s393_s27 = int_to_ptr.hbm [resolvable:$true] %s392_s27  ;;  %s351_s4 = int_to_ptr.hbm [resolvable:$true] %s350_s4 }
  0x21   : > { %6614 = dma.hbm_to_vmem [thread:$0]  (!%p7278_p12), %s365_s23, 14336, %s367_s30, [#allocation8], %s10976_s21, %s10976_s21, %s10977_s22  }
  0x22   : > { %6620 = dma.hbm_to_vmem [thread:$0]  (!%p7278_p12), %s393_s27, 2048, %s395_s2, [#allocation11], %s7103_s14, %s7103_s14, %s7104_s19  }
  0x23   : > { %s7105_s25 = smov [#allocation4]   ;;  %s378_s23 = sshll.u32 %s10957_s3, 4  ;;  %s379_s23 = int_to_ptr.hbm [resolvable:$true] %s378_s23 }
  0x24   : > { %s352_s28 = sshll.u32 %s7105_s25, 4  ;;  %s7106_s30 = smov 896   ;;  %s353_s28 = int_to_ptr.vmem [resolvable:$true] %s352_s28 }
  0x25   : > { %s7107_s24 = smov 56   ;;  %s7108_s2 = smov [#allocation9]  }
  0x26   : > { %6611 = dma.hbm_to_vmem [thread:$0]  (!%p7278_p12), %s351_s4, 3584, %s353_s28, [#allocation5], %s7106_s30, %s7106_s30, %s7107_s24  }
  0x27   : > { %s380_s27 = sshll.u32 %s7108_s2, 4  ;;  %s7109_s14 = smov 256   ;;  %s381_s27 = int_to_ptr.vmem [resolvable:$true] %s380_s27 }
  0x28   : > { %s7110_s19 = smov 16   ;;  %s406_s16 = sshll.u32 %s10959_s5, 4  ;;  %s407_s16 = int_to_ptr.hbm [resolvable:$true] %s406_s16 }
  0x29   : > { %6617 = dma.hbm_to_vmem [thread:$0]  (!%p7278_p12), %s379_s23, 1024, %s381_s27, [#allocation8], %s7109_s14, %s7109_s14, %s7110_s19  }
  0x2a   : > { %s7111_s12 = smov [#allocation12]   ;;  %s423_s4 = sshll.u32 %s10961_s7, 4  ;;  %s424_s4 = int_to_ptr.hbm [resolvable:$true] %s423_s4 }
  0x2b   : > { %s408_s18 = sshll.u32 %s7111_s12, 4  ;;  %s11102_s28 = smov 8   ;;  %s409_s18 = int_to_ptr.vmem [resolvable:$true] %s408_s18 }
  0x2c   : > { %s11103_s30 = smov 128   ;;  %s7112_s24 = smov [#allocation13]  }
  0x2d   : > { %6623 = dma.hbm_to_vmem [thread:$0]  (!%p7278_p12), %s407_s16, 256, %s409_s18, [#allocation11], %s11103_s30, %s11103_s30, %s11102_s28  }
  0x2e   : > { %s425_s23 = sshll.u32 %s7112_s24, 4  ;;  %463 = sbr.rel (%p7267_p10) target bundleno = 2452 (0x994), region = 72  ;;  %s426_s23 = int_to_ptr.vmem [resolvable:$true] %s425_s23 }
  0x2f   : > { %6626 = dma.hbm_to_vmem [thread:$0]  (!%p7278_p12), %s424_s4, 1024, %s426_s23, [#allocation14], %s7109_s14, %s7109_s14, %s7110_s19  }
  0x33   : > { %7064 = dma.done.wait (%p6631_p9), [#allocation5], 3584  }
  0x34   : > { %7066 = vsyncadd (%p6631_p9), [#allocation5], 4294963712 }
  0x35   : > { %7068 = dma.done.wait (%p6631_p9), [#allocation8], 15360  }
  0x36   : > { %7070 = vsyncadd (%p6631_p9), [#allocation8], 4294951936 }
  0x37   : > { %7072 = dma.done.wait (%p6631_p9), [#allocation11], 2304  }
  0x38   : > { %7074 = vsyncadd (%p6631_p9), [#allocation11], 4294964992 }
  0x39   : > { %7076 = dma.done.wait (%p6631_p9), [#allocation14], 1024  }
  0x3a   : > { %7078 = vsyncadd (%p6631_p9), [#allocation14], 4294966272  ;;  %p531_p13 = scmp.lt.s32.totalorder %s7239_s29, 1  ;;  %s7113_s27 = smov 70   ;;  %v566_v13 = vlaneseq  ;;  %vm620_vm1 = vcmask 1044484   ;;  %vm616_vm2 = vcmask 1042434  }
  0x3b   : > { %s11047_s14 = smov 101   ;;  %s11046_s19 = smov 100   ;;  %v2226_v15 = vld [vmem:[#allocation4 + $0xa8] ss:$8 sm:$0xf]  ;;  %vm614_vm3 = vcmask 1040384  }
  0x3c   : > { %s532_s20 = scalar_select %p531_p13, %s7239_s29, 1  ;;  %v2227_v16 = vld [vmem:[#allocation4 + $0xa8] ss:$8 sm:$0xf0]  ;;  %v7442_v17 = vand.u32 127, %v566_v13  ;;  %vm618_vm4 = vcmask 1041408  }
  0x3d   : > { %s11044_s25 = smov 99   ;;  %s11011_s17 = smov 98   ;;  %v2228_v18 = vor.u32 %v2227_v16, %v2226_v15  ;;  %vm622_vm5 = vcmask 1045508   ;;  %vm624_vm6 = vcmask 1043456   ;;  %vm7480_vm7 = vcmp.lt.s32.totalorder %v566_v13, 896 }
  0x3e   : > { %s6581_s15 = smul.u32 7, %s532_s20  ;;  %s7118_s16 = smov 74   ;;  %vm2217_vm0 = vcmp.lt.s32.totalorder %v7442_v17, 70  ;;  %vm11010_vm8 = vcmp.lt.s32.totalorder %v7442_v17, 101  ;;  %vm1720_vm9 = vcmp.lt.s32.totalorder %v7442_v17, 100  ;;  %vm1791_vm10 = vcmp.lt.s32.totalorder %v7442_v17, 99 }
  0x3f   : > { %s7119_s12 = smov 73   ;;  %s7120_s18 = smov 72   ;;  %v2233_v21 = vperm.slane %v2228_v18, 3  ;;  %v2232_v22 = vperm.slane %v2228_v18, 2  ;;  %v2234_v24 = vperm.slane %v2228_v18, 4  ;;  %v2231_v28 = vperm.slane %v2228_v18, 1 }
  0x40   : > { %s7338_s2 = scalar_lea.vmem %s10954_s0, %s6581_s15  ;;  %v2235_v29 = vperm.slane %v2228_v18, 5  ;;  %s7121_s4 = smov 71   ;;  %v2230_v36 = vperm.slane %v2228_v18, 0  ;;  %v2236_v37 = vperm.slane %v2228_v18, 6  ;;  %vm11009_vm11 = vcmp.lt.s32.totalorder %v7442_v17, 98 }
  0x41   : > { %v536_v0 = vld [vmem:[%s7338_s2] sm:$0xff]  ;;  %s7122_s28 = smov 27   ;;  %s11040_s30 = smov 26   ;;  %vm1933_vm12 = vcmp.lt.s32.totalorder %v7442_v17, 74  ;;  %vm2004_vm13 = vcmp.lt.s32.totalorder %v7442_v17, 73  ;;  %vm2075_vm14 = vcmp.lt.s32.totalorder %v7442_v17, 72 }
  0x42   : > { %v7341_v1 = vperm.slane %v536_v0, 5  ;;  %v7343_v2 = vperm.slane %v536_v0, 3  ;;  %v7345_v3 = vperm.slane %v536_v0, 1  ;;  %v7350_v4 = vperm.slane %v536_v0, 6  ;;  %s11042_s24 = smov 2   ;;  %s11038_s23 = smov 1  }
  0x43   : > { %v7352_v5 = vperm.slane %v536_v0, 4  ;;  %v7354_v6 = vperm.slane %v536_v0, 2  ;;  %v7359_v7 = vperm.slane %v536_v0, 0  ;;  %s7126_s20 = smov 127   ;;  %s7127_s15 = smov 126   ;;  %vm2146_vm15 = vcmp.lt.s32.totalorder %v7442_v17, 71 }
  0x44   : > { %2213 = vrot.lane.b32.xlu2 %v7341_v1, %s7113_s27  ;;  %2209 = vrot.lane.b32.xlu1 %v7343_v2, %s7113_s27  ;;  %11104 = vst [vmem:[#allocation28_spill] sm:$0xff] %v7350_v4  ;;  %s11030_s21 = smov 102   ;;  %s7129_s22 = smov 58  }
  0x45   : > { %2205 = vrot.lane.b32.xlu0 %v7345_v3, %s7113_s27  ;;  %11105 = vst [vmem:[#allocation29_spill] sm:$0xff] %v7359_v7 }
  0x4c   : > { %2215 = vrot.lane.b32.xlu2 %v7350_v4, %s7113_s27  ;;  %2211 = vrot.lane.b32.xlu1 %v7352_v5, %s7113_s27 }
  0x4d   : > { %2207 = vrot.lane.b32.xlu0 %v7354_v6, %s7113_s27 }
  0x54   : > { %1639 = vrot.lane.b32.xlu2 %v7354_v6, %s11047_s14  ;;  %1637 = vrot.lane.b32.xlu1 %v7345_v3, %s11047_s14 }
  0x55   : > { %2203 = vrot.lane.b32.xlu0 %v7359_v7, %s7113_s27  ;;  %s7130_s27 = smov 57  }
  0x5c   : > { %1645 = vrot.lane.b32.xlu2 %v7341_v1, %s11047_s14  ;;  %1643 = vrot.lane.b32.xlu1 %v7352_v5, %s11047_s14 }
  0x5d   : > { %1641 = vrot.lane.b32.xlu0 %v7343_v2, %s11047_s14 }
  0x64   : > { %1710 = vrot.lane.b32.xlu2 %v7354_v6, %s11046_s19  ;;  %1708 = vrot.lane.b32.xlu1 %v7345_v3, %s11046_s19 }
  0x65   : > { %1647 = vrot.lane.b32.xlu0 %v7350_v4, %s11047_s14 }
  0x6c   : > { %1716 = vrot.lane.b32.xlu2 %v7341_v1, %s11046_s19  ;;  %1714 = vrot.lane.b32.xlu1 %v7352_v5, %s11046_s19 }
  0x6d   : > { %1712 = vrot.lane.b32.xlu0 %v7343_v2, %s11046_s19 }
  0x74   : > { %1781 = vrot.lane.b32.xlu2 %v7354_v6, %s11044_s25  ;;  %1779 = vrot.lane.b32.xlu1 %v7345_v3, %s11044_s25 }
  0x75   : > { %1718 = vrot.lane.b32.xlu0 %v7350_v4, %s11046_s19 }
  0x7c   : > { %1787 = vrot.lane.b32.xlu2 %v7341_v1, %s11044_s25  ;;  %1785 = vrot.lane.b32.xlu1 %v7352_v5, %s11044_s25 }
  0x7d   : > { %1783 = vrot.lane.b32.xlu0 %v7343_v2, %s11044_s25 }
  0x84   : > { %1852 = vrot.lane.b32.xlu2 %v7354_v6, %s11011_s17  ;;  %1850 = vrot.lane.b32.xlu1 %v7345_v3, %s11011_s17 }
  0x85   : > { %1789 = vrot.lane.b32.xlu0 %v7350_v4, %s11044_s25 }
  0x8c   : > { %1858 = vrot.lane.b32.xlu2 %v7341_v1, %s11011_s17  ;;  %1856 = vrot.lane.b32.xlu1 %v7352_v5, %s11011_s17 }
  0x8d   : > { %1854 = vrot.lane.b32.xlu0 %v7343_v2, %s11011_s17 }
  0x94   : > { %1923 = vrot.lane.b32.xlu2 %v7354_v6, %s7118_s16  ;;  %1921 = vrot.lane.b32.xlu1 %v7345_v3, %s7118_s16 }
  0x95   : > { %1860 = vrot.lane.b32.xlu0 %v7350_v4, %s11011_s17 }
  0x9c   : > { %1929 = vrot.lane.b32.xlu2 %v7341_v1, %s7118_s16  ;;  %1927 = vrot.lane.b32.xlu1 %v7352_v5, %s7118_s16 }
  0x9d   : > { %1925 = vrot.lane.b32.xlu0 %v7343_v2, %s7118_s16 }
  0x9e   : > { %v2214_v8 = vpop.permute.xlu2 %2213 }
  0xa4   : > { %1994 = vrot.lane.b32.xlu2 %v7354_v6, %s7119_s12  ;;  %1992 = vrot.lane.b32.xlu1 %v7345_v3, %s7119_s12 }
  0xa5   : > { %1931 = vrot.lane.b32.xlu0 %v7350_v4, %s7118_s16 }
  0xa6   : > { %v2216_v9 = vpop.permute.xlu2 %2215 }
  0xa7   : > { %v2218_v31 = vsel %vm2217_vm0, %v2214_v8, %v2216_v9 }
  0xa8   : > { %v2249_v38 = vmul.f32 %v2235_v29, %v2218_v31 }
  0xaa   : > { %v2262_v50 = vrot.slane %v2249_v38, 3 }
  0xac   : > { %2000 = vrot.lane.b32.xlu2 %v7341_v1, %s7119_s12  ;;  %1998 = vrot.lane.b32.xlu1 %v7352_v5, %s7119_s12 }
  0xad   : > { %1996 = vrot.lane.b32.xlu0 %v7343_v2, %s7119_s12 }
  0xae   : > { %v7432_v10 = vpop.permute.xlu2 %1639 }
  0xb4   : > { %2065 = vrot.lane.b32.xlu2 %v7354_v6, %s7120_s18  ;;  %2063 = vrot.lane.b32.xlu1 %v7345_v3, %s7120_s18 }
  0xb5   : > { %2002 = vrot.lane.b32.xlu0 %v7350_v4, %s7119_s12 }
  0xb6   : > { %v2210_v11 = vpop.permute.xlu1 %2209  ;;  %v7440_v12 = vpop.permute.xlu2 %1645 }
  0xb7   : > { %v2206_v14 = vpop.permute.xlu0 %2205 }
  0xbc   : > { %2071 = vrot.lane.b32.xlu2 %v7341_v1, %s7120_s18  ;;  %2069 = vrot.lane.b32.xlu1 %v7352_v5, %s7120_s18 }
  0xbd   : > { %2067 = vrot.lane.b32.xlu0 %v7343_v2, %s7120_s18 }
  0xbe   : > { %v2212_v19 = vpop.permute.xlu1 %2211  ;;  %v7450_v20 = vpop.permute.xlu2 %1710 }
  0xbf   : > { %v2208_v23 = vpop.permute.xlu0 %2207  ;;  %v2220_v25 = vsel %vm2217_vm0, %v2210_v11, %v2212_v19  ;;  %v2219_v27 = vsel %vm2217_vm0, %v2212_v19, %v2214_v8 }
  0xc0   : > { %v2221_v26 = vsel %vm2217_vm0, %v2208_v23, %v2210_v11  ;;  %v2222_v30 = vsel %vm2217_vm0, %v2206_v14, %v2208_v23  ;;  %v2247_v32 = vmul.f32 %v2233_v21, %v2220_v25  ;;  %v2248_v34 = vmul.f32 %v2234_v24, %v2219_v27 }
  0xc1   : > { %v2246_v33 = vmul.f32 %v2232_v22, %v2221_v26  ;;  %v2245_v35 = vmul.f32 %v2231_v28, %v2222_v30 }
  0xc2   : > { %v2260_v41 = vrot.slane %v2247_v32, 5  ;;  %v2261_v44 = vrot.slane %v2248_v34, 4 }
  0xc3   : > { %v2259_v42 = vrot.slane %v2246_v33, 6  ;;  %v2258_v47 = vrot.slane %v2245_v35, 7 }
  0xc4   : > { %2136 = vrot.lane.b32.xlu2 %v7354_v6, %s7121_s4  ;;  %2134 = vrot.lane.b32.xlu1 %v7345_v3, %s7121_s4  ;;  %v2267_v54 = vsel %vm620_vm1, %v2261_v44, %v2262_v50  ;;  %v1800_v44 = vld [vmem:[#allocation4 + $0x72] ss:$8 sm:$0xf] }
  0xc5   : > { %2073 = vrot.lane.b32.xlu0 %v7350_v4, %s7120_s18  ;;  %v2265_v51 = vsel %vm616_vm2, %v2259_v42, %v2260_v41  ;;  %v1729_v41 = vld [vmem:[#allocation4 + $0x71] ss:$8 sm:$0xf] }
  0xc6   : > { %v7469_v39 = vpop.permute.xlu2 %1716  ;;  %v7471_v40 = vpop.permute.xlu1 %1637  ;;  %v1730_v42 = vld [vmem:[#allocation4 + $0x71] ss:$8 sm:$0xf0] }
  0xc7   : > { %11106 = vst [vmem:[#allocation30_spill] sm:$0xff] %v7471_v40  ;;  %v2204_v43 = vpop.permute.xlu0 %2203 }
  0xc8   : > { %v2223_v45 = vsel %vm2217_vm0, %v2204_v43, %v2206_v14  ;;  %v2224_v46 = vsel %vm2217_vm0, %v2216_v9, %v2204_v43  ;;  %v7612_v43 = vor.u32 %v1730_v42, %v1729_v41  ;;  %v1872_v41 = vld [vmem:[#allocation4 + $0x73] ss:$8 sm:$0xf0]  ;;  %vm11014_vm0 = vcmp.lt.s32.totalorder %v7442_v17, 27 }
  0xc9   : > { %v2244_v48 = vmul.f32 %v2230_v36, %v2223_v45  ;;  %v2250_v49 = vmul.f32 %v2236_v37, %v2224_v46  ;;  %v1658_v36 = vld [vmem:[#allocation4 + $0x70] ss:$8 sm:$0xf]  ;;  %v1801_v45 = vld [vmem:[#allocation4 + $0x72] ss:$8 sm:$0xf0] }
  0xca   : > { %v1659_v37 = vld [vmem:[#allocation4 + $0x70] ss:$8 sm:$0xf0]  ;;  %v1737_v42 = vperm.slane %v7612_v43, 4 }
  0xcb   : > { %v2263_v52 = vrot.slane %v2250_v49, 2  ;;  %v2264_v53 = vsel %vm614_vm3, %v2244_v48, %v2258_v47  ;;  %v7603_v38 = vor.u32 %v1659_v37, %v1658_v36 }
  0xcc   : > { %v2266_v56 = vsel %vm618_vm4, %v2264_v53, %v2265_v51  ;;  %2142 = vrot.lane.b32.xlu2 %v7341_v1, %s7121_s4  ;;  %2140 = vrot.lane.b32.xlu1 %v7352_v5, %s7121_s4 }
  0xcd   : > { %v2268_v57 = vsel %vm622_vm5, %v2267_v54, %v2263_v52  ;;  %2138 = vrot.lane.b32.xlu0 %v7343_v2, %s7121_s4  ;;  %11114 = vst [vmem:[#allocation36_spill] sm:$0xff] %v7603_v38  ;;  %v1663_v48 = vperm.slane %v7603_v38, 1  ;;  %v1664_v49 = vperm.slane %v7603_v38, 2  ;;  %v1665_v50 = vperm.slane %v7603_v38, 3 }
  0xce   : > { %v2269_v58 = vsel %vm624_vm6, %v2266_v56, %v2268_v57  ;;  %v7493_v59 = vpop.permute.xlu2 %1781  ;;  %v7495_v60 = vpop.permute.xlu1 %1643  ;;  %v1654_v52 = vsel %vm11010_vm8, %v7471_v40, %v7432_v10  ;;  %v1666_v56 = vperm.slane %v7603_v38, 4  ;;  %v7636_v57 = vor.u32 %v1801_v45, %v1800_v44 }
  0xcf   : > { %2272 = vst.msk [vmem:[#allocation2 + $0xa8] ss:$8 sm:$0xf] %vm7480_vm7, %v2269_v58  ;;  %v7499_v61 = vpop.permute.xlu0 %1641  ;;  %v1736_v44 = vperm.slane %v7612_v43, 3 }
  0xd0   : > { %2273 = vst.msk [vmem:[#allocation2 + $0xa8] ss:$8 sm:$0x70] %vm7480_vm7, %v2269_v58  ;;  %v1652_v53 = vsel %vm11010_vm8, %v7499_v61, %v7495_v60  ;;  %v1653_v54 = vsel %vm11010_vm8, %v7432_v10, %v7499_v61  ;;  %v1651_v58 = vsel %vm11010_vm8, %v7495_v60, %v7440_v12  ;;  %v1871_v61 = vld [vmem:[#allocation4 + $0x73] ss:$8 sm:$0xf] }
  0xd1   : > { %11116 = vst [vmem:[#allocation38_spill] sm:$0xff] %v7636_v57  ;;  %v1678_v36 = vmul.f32 %v1664_v49, %v1653_v54  ;;  %v1679_v37 = vmul.f32 %v1665_v50, %v1652_v53  ;;  %v1735_v60 = vperm.slane %v7612_v43, 2  ;;  %v1680_v45 = vmul.f32 %v1666_v56, %v1651_v58 }
  0xd2   : > { %v1805_v49 = vperm.slane %v7636_v57, 1  ;;  %v1738_v53 = vperm.slane %v7612_v43, 5  ;;  %v7675_v54 = vor.u32 %v1872_v41, %v1871_v61 }
  0xd4   : > { %1706 = vrot.lane.b32.xlu2 %v7359_v7, %s11046_s19  ;;  %1635 = vrot.lane.b32.xlu1 %v7359_v7, %s11047_s14 }
  0xd5   : > { %2144 = vrot.lane.b32.xlu0 %v7350_v4, %s7121_s4 }
  0xd6   : > { %v7509_v62 = vpop.permute.xlu2 %1787  ;;  %v7511_v63 = vpop.permute.xlu1 %1708  ;;  %v2297_v0 = vld [vmem:[#allocation2 + $0xa8] sm:$0x1]  ;;  %v2299_v8 = vld [vmem:[#allocation2 + $0xb8] sm:$0x1]  ;;  %v2300_v9 = vld [vmem:[#allocation2 + $0xc0] sm:$0x1] }
  0xd7   : > { %5488 = vmatpush.msk.msra.mxu0 %vm614_vm3, %v2297_v0  ;;  %6569 = vmatpush.msk.msra.mxu1 %vm614_vm3, %v2297_v0  ;;  %v7515_v11 = vpop.permute.xlu0 %1647  ;;  %v1734_v0 = vperm.slane %v7612_v43, 1  ;;  %v1725_v50 = vsel %vm1720_vm9, %v7511_v63, %v7450_v20  ;;  %v2301_v55 = vld [vmem:[#allocation2 + $0xc8] sm:$0x1] }
  0xd8   : > { %11109 = vst [vmem:[#allocation31_spill] sm:$0xff] %v7515_v11  ;;  %5494 = vmatpush.msk.msra.mxu2 %vm614_vm3, %v2299_v8  ;;  %5497 = vmatpush.msk.msra.mxu3 %vm614_vm3, %v2300_v9  ;;  %v1667_v8 = vperm.slane %v7603_v38, 5  ;;  %v7645_v9 = vmul.f32 %v1663_v48, %v1654_v52  ;;  %v1650_v10 = vsel %vm11010_vm8, %v7440_v12, %v7515_v11  ;;  %v1692_v11 = vrot.slane %v1679_v37, 5 }
  0xd9   : > { %v7690_v61 = vmul.f32 %v1734_v0, %v1725_v50  ;;  %v1807_v37 = vperm.slane %v7636_v57, 3  ;;  %v1942_v0 = vld [vmem:[#allocation4 + $0x74] ss:$8 sm:$0xf] }
  0xda   : > { %11117 = vst [vmem:[#allocation39_spill] sm:$0xff] %v7645_v9  ;;  %v1681_v52 = vmul.f32 %v1667_v8, %v1650_v10  ;;  %v1806_v8 = vperm.slane %v7636_v57, 2  ;;  %v1693_v10 = vrot.slane %v1680_v45, 4 }
  0xdc   : > { %1919 = vrot.lane.b32.xlu2 %v7359_v7, %s7118_s16  ;;  %1848 = vrot.lane.b32.xlu1 %v7359_v7, %s11011_s17  ;;  %v1694_v41 = vrot.slane %v1681_v52, 3  ;;  %s7131_s16 = smov 56   ;;  %s11034_s17 = smov 28  }
  0xdd   : > { %1777 = vrot.lane.b32.xlu0 %v7359_v7, %s11044_s25 }
  0xde   : > { %v7525_v13 = vpop.permute.xlu2 %1852  ;;  %v7527_v14 = vpop.permute.xlu1 %1714 }
  0xdf   : > { %v7529_v15 = vpop.permute.xlu0 %1712 }
  0xe0   : > { %v1723_v12 = vsel %vm1720_vm9, %v7529_v15, %v7527_v14  ;;  %v1724_v48 = vsel %vm1720_vm9, %v7450_v20, %v7529_v15 }
  0xe1   : > { %v1749_v38 = vmul.f32 %v1735_v60, %v1724_v48  ;;  %v1876_v60 = vperm.slane %v7675_v54, 1  ;;  %v1943_v48 = vld [vmem:[#allocation4 + $0x74] ss:$8 sm:$0xf0] }
  0xe3   : > { %v1762_v15 = vrot.slane %v1749_v38, 6  ;;  %v1877_v38 = vperm.slane %v7675_v54, 2 }
  0xe4   : > { %2132 = vrot.lane.b32.xlu2 %v7359_v7, %s7121_s4  ;;  %2061 = vrot.lane.b32.xlu1 %v7359_v7, %s7120_s18  ;;  %s7133_s18 = smov 54   ;;  %s11049_s4 = smov 30  }
  0xe5   : > { %1990 = vrot.lane.b32.xlu0 %v7359_v7, %s7119_s12  ;;  %s7132_s12 = smov 55  }
  0xe6   : > { %v7537_v16 = vpop.permute.xlu2 %1858  ;;  %v7539_v18 = vpop.permute.xlu1 %1779 }
  0xe7   : > { %11110 = vst [vmem:[#allocation32_spill] sm:$0xff] %v7539_v18  ;;  %v7541_v19 = vpop.permute.xlu0 %1718 }
  0xe8   : > { %v1721_v20 = vsel %vm1720_vm9, %v7469_v39, %v7541_v19 }
  0xe9   : > { %v1752_v45 = vmul.f32 %v1738_v53, %v1721_v20  ;;  %v7731_v53 = vor.u32 %v1943_v48, %v1942_v0  ;;  %v2013_v20 = vld [vmem:[#allocation4 + $0x75] ss:$8 sm:$0xf] }
  0xec   : > { %1134 = vrot.lane.b32.xlu2 %v7354_v6, %s7122_s28  ;;  %1132 = vrot.lane.b32.xlu1 %v7345_v3, %s7122_s28 }
  0xed   : > { %1130 = vrot.lane.b32.xlu0 %v7359_v7, %s7122_s28 }
  0xee   : > { %v7549_v21 = vpop.permute.xlu2 %1923  ;;  %v7551_v22 = vpop.permute.xlu1 %1785 }
  0xef   : > { %v7553_v23 = vpop.permute.xlu0 %1783 }
  0xf0   : > { %v1795_v52 = vsel %vm1791_vm10, %v7493_v59, %v7553_v23 }
  0xf4   : > { %1140 = vrot.lane.b32.xlu2 %v7341_v1, %s7122_s28  ;;  %1138 = vrot.lane.b32.xlu1 %v7352_v5, %s7122_s28 }
  0xf5   : > { %1136 = vrot.lane.b32.xlu0 %v7343_v2, %s7122_s28 }
  0xf6   : > { %v7561_v24 = vpop.permute.xlu2 %1929  ;;  %v7563_v25 = vpop.permute.xlu1 %1850 }
  0xf7   : > { %11111 = vst [vmem:[#allocation33_spill] sm:$0xff] %v7563_v25  ;;  %v7565_v26 = vpop.permute.xlu0 %1789 }
  0xf8   : > { %11112 = vst [vmem:[#allocation34_spill] sm:$0xff] %v7565_v26 }
  0xfc   : > { %1205 = vrot.lane.b32.xlu2 %v7354_v6, %s11040_s30  ;;  %1203 = vrot.lane.b32.xlu1 %v7345_v3, %s11040_s30 }
  0xfd   : > { %1201 = vrot.lane.b32.xlu0 %v7359_v7, %s11040_s30 }
  0xfe   : > { %v7573_v27 = vpop.permute.xlu2 %1994  ;;  %v7575_v28 = vpop.permute.xlu1 %1856 }
  0xff   : > { %v7577_v29 = vpop.permute.xlu0 %1854 }
 0x104   : > { %1211 = vrot.lane.b32.xlu2 %v7341_v1, %s11040_s30  ;;  %1209 = vrot.lane.b32.xlu1 %v7352_v5, %s11040_s30 }
 0x105   : > { %1207 = vrot.lane.b32.xlu0 %v7343_v2, %s11040_s30 }
 0x106   : > { %v7585_v30 = vpop.permute.xlu2 %2000  ;;  %v7587_v31 = vpop.permute.xlu1 %1921 }
 0x107   : > { %v7589_v32 = vpop.permute.xlu0 %1860 }
 0x10c   : > { %1276 = vrot.lane.b32.xlu2 %v7354_v6, %s11042_s24  ;;  %1274 = vrot.lane.b32.xlu1 %v7345_v3, %s11042_s24 }
 0x10d   : > { %1272 = vrot.lane.b32.xlu0 %v7359_v7, %s11042_s24 }
 0x10e   : > { %v7597_v33 = vpop.permute.xlu2 %2065  ;;  %v7599_v34 = vpop.permute.xlu1 %1927 }
 0x10f   : > { %11113 = vst [vmem:[#allocation35_spill] sm:$0xff] %v7597_v33  ;;  %v7601_v35 = vpop.permute.xlu0 %1925  ;;  %v1750_v33 = vmul.f32 %v1736_v44, %v1723_v12  ;;  %v1809_v44 = vperm.slane %v7636_v57, 5 }
 0x111   : > { %v1763_v9 = vrot.slane %v1750_v33, 5 }
 0x113   : > { %v1768_v48 = vsel %vm616_vm2, %v1762_v15, %v1763_v9  ;;  %v1950_v15 = vperm.slane %v7731_v53, 4 }
 0x114   : > { %1282 = vrot.lane.b32.xlu2 %v7341_v1, %s11042_s24  ;;  %1280 = vrot.lane.b32.xlu1 %v7352_v5, %s11042_s24 }
 0x115   : > { %1278 = vrot.lane.b32.xlu0 %v7343_v2, %s11042_s24 }
 0x116   : > { %v7614_v46 = vpop.permute.xlu2 %2071  ;;  %v7616_v47 = vpop.permute.xlu1 %1992 }
 0x117   : > { %11115 = vst [vmem:[#allocation37_spill] sm:$0xff] %v7614_v46  ;;  %v7621_v51 = vpop.permute.xlu0 %1931  ;;  %v1691_v46 = vrot.slane %v1678_v36, 6  ;;  %v1722_v36 = vsel %vm1720_vm9, %v7527_v14, %v7469_v39  ;;  %v1796_v39 = vsel %vm1791_vm10, %v7539_v18, %v7493_v59  ;;  %v1793_v14 = vsel %vm1791_vm10, %v7551_v22, %v7509_v62 }
 0x118   : > { %v1751_v50 = vmul.f32 %v1737_v42, %v1722_v36  ;;  %v1794_v42 = vsel %vm1791_vm10, %v7553_v23, %v7551_v22  ;;  %v2014_v36 = vld [vmem:[#allocation4 + $0x75] ss:$8 sm:$0xf0]  ;;  %v1867_v22 = vsel %vm11009_vm11, %v7563_v25, %v7525_v13  ;;  %v1792_v59 = vsel %vm1791_vm10, %v7509_v62, %v7565_v26 }
 0x119   : > { %v7701_v12 = vsel %vm616_vm2, %v1691_v46, %v1692_v11  ;;  %v7721_v46 = vsel %vm620_vm1, %v1693_v10, %v1694_v41  ;;  %v7737_v10 = vmul.f32 %v1805_v49, %v1796_v39  ;;  %v1765_v41 = vrot.slane %v1752_v45, 3 }
 0x11a   : > { %11118 = vst [vmem:[#allocation40_spill] sm:$0xff] %v7721_v46  ;;  %v1764_v0 = vrot.slane %v1751_v50, 4  ;;  %v1878_v49 = vperm.slane %v7675_v54, 3  ;;  %v1820_v45 = vmul.f32 %v1806_v8, %v1795_v52  ;;  %v1821_v39 = vmul.f32 %v1807_v37, %v1794_v42 }
 0x11b   : > { %11119 = vst [vmem:[#allocation41_spill] sm:$0xff] %v7737_v10  ;;  %v7756_v25 = vmul.f32 %v1876_v60, %v1867_v22  ;;  %v7758_v46 = vmul.f32 %v1809_v44, %v1792_v59  ;;  %v1947_v62 = vperm.slane %v7731_v53, 1  ;;  %v1880_v50 = vperm.slane %v7675_v54, 5 }
 0x11c   : > { %1347 = vrot.lane.b32.xlu2 %v7354_v6, %s11038_s23  ;;  %1345 = vrot.lane.b32.xlu1 %v7345_v3, %s11038_s23  ;;  %v1948_v8 = vperm.slane %v7731_v53, 2  ;;  %v1733_v60 = vperm.slane %v7612_v43, 0  ;;  %v1739_v44 = vperm.slane %v7612_v43, 6  ;;  %v1833_v42 = vrot.slane %v1820_v45, 6 }
 0x11d   : > { %1343 = vrot.lane.b32.xlu0 %v7359_v7, %s11038_s23  ;;  %v1808_v7 = vperm.slane %v7636_v57, 4  ;;  %v7754_v57 = vor.u32 %v2014_v36, %v2013_v20  ;;  %11120 = vst [vmem:[#allocation42_spill] sm:$0xff] %v7756_v25  ;;  %v1834_v52 = vrot.slane %v1821_v39, 5  ;;  %v1951_v36 = vperm.slane %v7731_v53, 5 }
 0x11e   : > { %v7677_v56 = vpop.permute.xlu2 %2136  ;;  %v7679_v58 = vpop.permute.xlu1 %1998  ;;  %v1836_v22 = vrot.slane %v7758_v46, 3  ;;  %v1866_v59 = vsel %vm11009_vm11, %v7525_v13, %v7577_v29  ;;  %v1936_v39 = vsel %vm1933_vm12, %v7601_v35, %v7599_v34  ;;  %v1937_v46 = vsel %vm1933_vm12, %v7549_v21, %v7601_v35 }
 0x11f   : > { %v7683_v40 = vpop.permute.xlu0 %1996  ;;  %v7750_v18 = vmul.f32 %v1808_v7, %v1793_v14  ;;  %v1770_v7 = vsel %vm620_vm1, %v1764_v0, %v1765_v41  ;;  %v1949_v14 = vperm.slane %v7731_v53, 3  ;;  %v1865_v43 = vsel %vm11009_vm11, %v7577_v29, %v7575_v28 }
 0x120   : > { %v1934_v35 = vsel %vm1933_vm12, %v7561_v24, %v7621_v51  ;;  %v1938_v29 = vsel %vm1933_vm12, %v7587_v31, %v7549_v21  ;;  %v1935_v37 = vsel %vm1933_vm12, %v7599_v34, %v7561_v24  ;;  %v1962_v10 = vmul.f32 %v1948_v8, %v1937_v46  ;;  %v2085_v8 = vld [vmem:[#allocation4 + $0x76] ss:$8 sm:$0xf0] }
 0x121   : > { %v1963_v25 = vmul.f32 %v1949_v14, %v1936_v39  ;;  %v1946_v24 = vperm.slane %v7731_v53, 0  ;;  %v1952_v34 = vperm.slane %v7731_v53, 6 }
 0x124   : > { %1353 = vrot.lane.b32.xlu2 %v7341_v1, %s11038_s23  ;;  %1351 = vrot.lane.b32.xlu1 %v7352_v5, %s11038_s23 }
 0x125   : > { %1349 = vrot.lane.b32.xlu0 %v7343_v2, %s11038_s23 }
 0x126   : > { %v7733_v33 = vpop.permute.xlu2 %2142  ;;  %v7735_v11 = vpop.permute.xlu1 %2063 }
 0x127   : > { %v7747_v23 = vpop.permute.xlu0 %2002 }
 0x12c   : > { %1428 = vrot.lane.b32.xlu2 %v7343_v2, %s7126_s20  ;;  %1426 = vrot.lane.b32.xlu1 %v7354_v6, %s7126_s20 }
 0x12d   : > { %1424 = vrot.lane.b32.xlu0 %v7345_v3, %s7126_s20 }
 0x12e   : > { %v7785_v0 = vpop.permute.xlu1 %2069  ;;  %v1707_v45 = vpop.permute.xlu2 %1706 }
 0x12f   : > { %v1726_v9 = vsel %vm1720_vm9, %v1707_v45, %v7511_v63  ;;  %v1727_v13 = vsel %vm1720_vm9, %v7541_v19, %v1707_v45  ;;  %v7801_v41 = vpop.permute.xlu0 %2067  ;;  %v1864_v19 = vsel %vm11009_vm11, %v7575_v28, %v7537_v16  ;;  %v1891_v45 = vmul.f32 %v1877_v38, %v1866_v59 }
 0x130   : > { %v1747_v20 = vmul.f32 %v1733_v60, %v1726_v9  ;;  %v1753_v63 = vmul.f32 %v1739_v44, %v1727_v13  ;;  %v11121_v60 = vrot.slane %v7690_v61, 7  ;;  %v1892_v13 = vmul.f32 %v1878_v49, %v1865_v43 }
 0x131   : > { %v1863_v28 = vsel %vm11009_vm11, %v7537_v16, %v7589_v32  ;;  %v1965_v38 = vmul.f32 %v1951_v36, %v1934_v35  ;;  %v1961_v59 = vmul.f32 %v1947_v62, %v1938_v29  ;;  %v7840_v61 = vsel %vm616_vm2, %v1833_v42, %v1834_v52  ;;  %v2084_v62 = vld [vmem:[#allocation4 + $0x76] ss:$8 sm:$0xf]  ;;  %v2155_v29 = vld [vmem:[#allocation4 + $0x77] ss:$8 sm:$0xf] }
 0x132   : > { %v1766_v9 = vrot.slane %v1753_v63, 2  ;;  %v1767_v44 = vsel %vm614_vm3, %v1747_v20, %v11121_v60  ;;  %v11122_v16 = vperm.slane %v7675_v54, 4  ;;  %v1904_v14 = vrot.slane %v1891_v45, 6  ;;  %v2156_v60 = vld [vmem:[#allocation4 + $0x77] ss:$8 sm:$0xf0] }
 0x133   : > { %v1769_v21 = vsel %vm618_vm4, %v1767_v44, %v1768_v48  ;;  %v1964_v48 = vmul.f32 %v1950_v15, %v1935_v37  ;;  %v1894_v20 = vmul.f32 %v1880_v50, %v1863_v28  ;;  %v1975_v36 = vrot.slane %v1962_v10, 6 }
 0x134   : > { %v1771_v26 = vsel %vm622_vm5, %v1770_v7, %v1766_v9  ;;  %1434 = vrot.lane.b32.xlu2 %v7350_v4, %s7126_s20  ;;  %1432 = vrot.lane.b32.xlu1 %v7341_v1, %s7126_s20  ;;  %v1893_v49 = vmul.f32 %v11122_v16, %v1864_v19  ;;  %v1976_v43 = vrot.slane %v1963_v25, 5  ;;  %v1905_v52 = vrot.slane %v1892_v13, 5 }
 0x135   : > { %v1772_v7 = vsel %vm624_vm6, %v1769_v21, %v1771_v26  ;;  %1430 = vrot.lane.b32.xlu0 %v7352_v5, %s7126_s20  ;;  %v1978_v39 = vrot.slane %v1965_v38, 3  ;;  %v1974_v50 = vrot.slane %v1961_v59, 7  ;;  %v7861_v15 = vor.u32 %v2085_v8, %v2084_v62 }
 0x136   : > { %1775 = vst.msk [vmem:[#allocation2 + $0x71] ss:$8 sm:$0xf] %vm7480_vm7, %v1772_v7  ;;  %v7849_v53 = vpop.permute.xlu1 %2134  ;;  %v1920_v42 = vpop.permute.xlu2 %1919  ;;  %v11123_v35 = vrot.slane %v7750_v18, 4  ;;  %v1977_v19 = vrot.slane %v1964_v48, 4  ;;  %v2019_v45 = vperm.slane %v7754_v57, 2  ;;  %v2009_v18 = vsel %vm2004_vm13, %v7616_v47, %v7573_v27 }
 0x137   : > { %1776 = vst.msk [vmem:[#allocation2 + $0x71] ss:$8 sm:$0x70] %vm7480_vm7, %v1772_v7  ;;  %v1939_v26 = vsel %vm1933_vm12, %v1920_v42, %v7587_v31  ;;  %v1940_v10 = vsel %vm1933_vm12, %v7621_v51, %v1920_v42  ;;  %v7859_v25 = vpop.permute.xlu0 %2073  ;;  %v2020_v31 = vperm.slane %v7754_v57, 3  ;;  %v1907_v9 = vrot.slane %v1894_v20, 3 }
 0x138   : > { %v1960_v37 = vmul.f32 %v1946_v24, %v1939_v26  ;;  %v1966_v46 = vmul.f32 %v1952_v34, %v1940_v10  ;;  %v7866_v63 = vsel %vm620_vm1, %v11123_v35, %v1836_v22  ;;  %v1981_v51 = vsel %vm616_vm2, %v1975_v36, %v1976_v43 }
 0x139   : > { %v1906_v28 = vrot.slane %v1893_v49, 4  ;;  %v1983_v22 = vsel %vm620_vm1, %v1977_v19, %v1978_v39  ;;  %v7879_v21 = vsel %vm616_vm2, %v1904_v14, %v1905_v52  ;;  %v2089_v59 = vperm.slane %v7861_v15, 1 }
 0x13a   : > { %v1979_v44 = vrot.slane %v1966_v46, 2  ;;  %v1980_v13 = vsel %vm614_vm3, %v1960_v37, %v1974_v50  ;;  %v2008_v34 = vsel %vm2004_vm13, %v7573_v27, %v7683_v40  ;;  %v2022_v16 = vperm.slane %v7754_v57, 5 }
 0x13b   : > { %v1982_v38 = vsel %vm618_vm4, %v1980_v13, %v1981_v51  ;;  %v2157_v49 = vor.u32 %v2156_v60, %v2155_v29  ;;  %v7897_v62 = vsel %vm620_vm1, %v1906_v28, %v1907_v9  ;;  %v11124_v8 = vperm.slane %v7754_v57, 1  ;;  %v11126_v9 = vld [vmem:[#allocation35_spill] sm:$0xff] }
 0x13c   : > { %v1984_v24 = vsel %vm622_vm5, %v1983_v22, %v1979_v44  ;;  %1499 = vrot.lane.b32.xlu2 %v7343_v2, %s7127_s15  ;;  %1497 = vrot.lane.b32.xlu1 %v7354_v6, %s7127_s15  ;;  %v2007_v27 = vsel %vm2004_vm13, %v7683_v40, %v7679_v58  ;;  %v2092_v14 = vperm.slane %v7861_v15, 4  ;;  %v2006_v43 = vsel %vm2004_vm13, %v7679_v58, %v7585_v30 }
 0x13d   : > { %v1985_v48 = vsel %vm624_vm6, %v1982_v38, %v1984_v24  ;;  %1495 = vrot.lane.b32.xlu0 %v7345_v3, %s7127_s15  ;;  %v7901_v7 = vmul.f32 %v11124_v8, %v2009_v18  ;;  %v2161_v42 = vperm.slane %v2157_v49, 2  ;;  %v2162_v52 = vperm.slane %v2157_v49, 3  ;;  %v11127_v38 = vld [vmem:[#allocation36_spill] sm:$0xff] }
 0x13e   : > { %1988 = vst.msk [vmem:[#allocation2 + $0x74] ss:$8 sm:$0xf] %vm7480_vm7, %v1985_v48  ;;  %v2141_v20 = vpop.permute.xlu1 %2140  ;;  %v2133_v36 = vpop.permute.xlu2 %2132  ;;  %v7917_v39 = vmul.f32 %v2019_v45, %v2008_v34  ;;  %v2090_v26 = vperm.slane %v7861_v15, 2  ;;  %v7925_v58 = vmul.f32 %v2020_v31, %v2007_v27  ;;  %v2091_v37 = vperm.slane %v7861_v15, 3 }
 0x13f   : > { %1989 = vst.msk [vmem:[#allocation2 + $0x74] ss:$8 sm:$0x70] %vm7480_vm7, %v1985_v48  ;;  %v2139_v40 = vpop.permute.xlu0 %2138  ;;  %v2160_v46 = vperm.slane %v2157_v49, 1  ;;  %v11125_v45 = vperm.slane %v7754_v57, 4  ;;  %v2080_v51 = vsel %vm2075_vm14, %v7735_v11, %v11126_v9  ;;  %v2163_v60 = vperm.slane %v2157_v49, 4 }
 0x140   : > { %v2149_v10 = vsel %vm2146_vm15, %v2139_v40, %v2141_v20  ;;  %v2150_v50 = vsel %vm2146_vm15, %v7677_v56, %v2139_v40  ;;  %v2151_v31 = vsel %vm2146_vm15, %v7849_v53, %v7677_v56  ;;  %v2148_v44 = vsel %vm2146_vm15, %v2141_v20, %v7733_v33  ;;  %v11133_v56 = vld [vmem:[#allocation40_spill] sm:$0xff] }
 0x141   : > { %v7932_v29 = vmul.f32 %v11125_v45, %v2006_v43  ;;  %v2175_v13 = vmul.f32 %v2161_v42, %v2150_v50  ;;  %v2176_v28 = vmul.f32 %v2162_v52, %v2149_v10  ;;  %v2159_v22 = vperm.slane %v2157_v49, 0  ;;  %v11128_v45 = vld [vmem:[#allocation30_spill] sm:$0xff] }
 0x142   : > { %v1662_v24 = vperm.slane %v11127_v38, 0  ;;  %v1668_v34 = vperm.slane %v11127_v38, 6  ;;  %v7953_v48 = vmul.f32 %v2089_v59, %v2080_v51  ;;  %v2164_v8 = vperm.slane %v2157_v49, 5  ;;  %v11129_v51 = vld [vmem:[#allocation31_spill] sm:$0xff] }
 0x143   : > { %v2165_v27 = vperm.slane %v2157_v49, 6  ;;  %v2005_v20 = vsel %vm2004_vm13, %v7585_v30, %v7747_v23  ;;  %v2174_v43 = vmul.f32 %v2160_v46, %v2151_v31  ;;  %v2177_v42 = vmul.f32 %v2163_v60, %v2148_v44  ;;  %v11130_v44 = vld [vmem:[#allocation37_spill] sm:$0xff] }
 0x144   : > { %1505 = vrot.lane.b32.xlu2 %v7350_v4, %s7127_s15  ;;  %1503 = vrot.lane.b32.xlu1 %v7341_v1, %s7127_s15  ;;  %v2152_v52 = vsel %vm2146_vm15, %v2133_v36, %v7849_v53  ;;  %v2188_v10 = vrot.slane %v2175_v13, 6  ;;  %v2189_v50 = vrot.slane %v2176_v28, 5  ;;  %v2077_v13 = vsel %vm2075_vm14, %v7785_v0, %v11130_v44 }
 0x145   : > { %1501 = vrot.lane.b32.xlu0 %v7352_v5, %s7127_s15  ;;  %v2173_v28 = vmul.f32 %v2159_v22, %v2152_v52  ;;  %v2187_v18 = vrot.slane %v2174_v43, 7  ;;  %v1875_v22 = vperm.slane %v7675_v54, 0  ;;  %v2078_v52 = vsel %vm2075_vm14, %v7801_v41, %v7785_v0 }
 0x146   : > { %v7964_v40 = vpop.permute.xlu2 %1134  ;;  %v1636_v59 = vpop.permute.xlu1 %1635  ;;  %v2076_v0 = vsel %vm2075_vm14, %v11130_v44, %v7859_v25  ;;  %v11137_v44 = vld [vmem:[#allocation32_spill] sm:$0xff]  ;;  %vm11015_vm12 = vcmp.lt.s32.totalorder %v7442_v17, 26 }
 0x147   : > { %v1655_v49 = vsel %vm11010_vm8, %v1636_v59, %v11128_v45  ;;  %v1656_v38 = vsel %vm11010_vm8, %v11129_v51, %v1636_v59  ;;  %v2145_v30 = vpop.permute.xlu0 %2144  ;;  %v2190_v59 = vrot.slane %v2177_v42, 4  ;;  %vm11013_vm8 = vcmp.lt.s32.totalorder %v7442_v17, 102 }
 0x148   : > { %v1676_v46 = vmul.f32 %v1662_v24, %v1655_v49  ;;  %v1682_v60 = vmul.f32 %v1668_v34, %v1656_v38  ;;  %v2147_v53 = vsel %vm2146_vm15, %v7733_v33, %v2145_v30  ;;  %v2153_v31 = vsel %vm2146_vm15, %v2145_v30, %v2133_v36  ;;  %v11131_v24 = vld [vmem:[#allocation39_spill] sm:$0xff] }
 0x149   : > { %v2178_v45 = vmul.f32 %v2164_v8, %v2147_v53  ;;  %v2179_v19 = vmul.f32 %v2165_v27, %v2153_v31  ;;  %v11132_v34 = vrot.slane %v11131_v24, 7  ;;  %v2194_v33 = vsel %vm616_vm2, %v2188_v10, %v2189_v50  ;;  %v11134_v27 = vld [vmem:[#allocation38_spill] sm:$0xff] }
 0x14a   : > { %v1695_v51 = vrot.slane %v1682_v60, 2  ;;  %v1881_v8 = vperm.slane %v7675_v54, 6  ;;  %v1804_v43 = vperm.slane %v11134_v27, 0  ;;  %v2079_v54 = vsel %vm2075_vm14, %v11126_v9, %v7801_v41  ;;  %v11136_v9 = vld [vmem:[#allocation33_spill] sm:$0xff] }
 0x14b   : > { %v1696_v49 = vsel %vm614_vm3, %v1676_v46, %v11132_v34  ;;  %v2191_v38 = vrot.slane %v2178_v45, 3  ;;  %v2192_v30 = vrot.slane %v2179_v19, 2  ;;  %v2036_v24 = vmul.f32 %v2022_v16, %v2005_v20 }
 0x14c   : > { %v1698_v36 = vsel %vm618_vm4, %v1696_v49, %v7701_v12  ;;  %v1700_v35 = vsel %vm622_vm5, %v11133_v56, %v1695_v51  ;;  %1570 = vrot.lane.b32.xlu2 %v7343_v2, %s11030_s21  ;;  %1568 = vrot.lane.b32.xlu1 %v7354_v6, %s11030_s21  ;;  %v2193_v12 = vsel %vm614_vm3, %v2173_v28, %v2187_v18  ;;  %v1810_v56 = vperm.slane %v11134_v27, 6  ;;  %v11142_v27 = vld [vmem:[#allocation41_spill] sm:$0xff] }
 0x14d   : > { %v1701_v19 = vsel %vm624_vm6, %v1698_v36, %v1700_v35  ;;  %v2196_v42 = vsel %vm620_vm1, %v2190_v59, %v2191_v38  ;;  %1566 = vrot.lane.b32.xlu0 %v7345_v3, %s11030_s21  ;;  %v2195_v18 = vsel %vm618_vm4, %v2193_v12, %v2194_v33  ;;  %v11138_v59 = vld [vmem:[#allocation34_spill] sm:$0xff]  ;;  %v2104_v33 = vmul.f32 %v2090_v26, %v2079_v54 }
 0x14e   : > { %1704 = vst.msk [vmem:[#allocation2 + $0x70] ss:$8 sm:$0xf] %vm7480_vm7, %v1701_v19  ;;  %v2197_v35 = vsel %vm622_vm5, %v2196_v42, %v2192_v30  ;;  %v8014_v10 = vpop.permute.xlu2 %1140  ;;  %v1849_v50 = vpop.permute.xlu1 %1848  ;;  %v2105_v36 = vmul.f32 %v2091_v37, %v2078_v52  ;;  %v11139_v30 = vld [vmem:[#allocation42_spill] sm:$0xff]  ;;  %v11141_v16 = vperm.slane %v7861_v15, 5  ;;  %v2116_v52 = vrot.slane %v7953_v48, 7 }
 0x14f   : > { %11135 = vst [vmem:[#allocation35_spill] sm:$0xff] %v8014_v10  ;;  %v2198_v41 = vsel %vm624_vm6, %v2195_v18, %v2197_v35  ;;  %v1868_v46 = vsel %vm11009_vm11, %v1849_v50, %v11136_v9  ;;  %v1869_v60 = vsel %vm11009_vm11, %v7589_v32, %v1849_v50  ;;  %v1778_v53 = vpop.permute.xlu0 %1777  ;;  %v2106_v32 = vmul.f32 %v2092_v14, %v2077_v13 }
 0x150   : > { %1705 = vst.msk [vmem:[#allocation2 + $0x70] ss:$8 sm:$0x70] %vm7480_vm7, %v1701_v19  ;;  %v1889_v31 = vmul.f32 %v1875_v22, %v1868_v46  ;;  %v1895_v28 = vmul.f32 %v1881_v8, %v1869_v60  ;;  %v1797_v45 = vsel %vm1791_vm10, %v1778_v53, %v11137_v44  ;;  %v1798_v51 = vsel %vm1791_vm10, %v11138_v59, %v1778_v53 }
 0x151   : > { %2201 = vst.msk [vmem:[#allocation2 + $0x77] ss:$8 sm:$0xf] %vm7480_vm7, %v2198_v41  ;;  %v1818_v34 = vmul.f32 %v1804_v43, %v1797_v45  ;;  %v1824_v49 = vmul.f32 %v1810_v56, %v1798_v51  ;;  %v11140_v22 = vrot.slane %v11139_v30, 7  ;;  %v2107_v20 = vmul.f32 %v11141_v16, %v2076_v0  ;;  %v11149_v16 = vld [vmem:[#allocation29_spill] sm:$0xff] }
 0x152   : > { %2202 = vst.msk [vmem:[#allocation2 + $0x77] ss:$8 sm:$0x70] %vm7480_vm7, %v2198_v41  ;;  %v1908_v38 = vrot.slane %v1895_v28, 2  ;;  %v11143_v43 = vrot.slane %v11142_v27, 7  ;;  %v2088_v19 = vperm.slane %v7861_v15, 0 }
 0x153   : > { %v1909_v8 = vsel %vm614_vm3, %v1889_v31, %v11140_v22  ;;  %v1837_v13 = vrot.slane %v1824_v49, 2  ;;  %v2117_v54 = vrot.slane %v2104_v33, 6  ;;  %v2118_v18 = vrot.slane %v2105_v36, 5 }
 0x154   : > { %v1911_v14 = vsel %vm618_vm4, %v1909_v8, %v7879_v21  ;;  %v1838_v12 = vsel %vm614_vm3, %v1818_v34, %v11143_v43  ;;  %v1913_v26 = vsel %vm622_vm5, %v7897_v62, %v1908_v38  ;;  %1576 = vrot.lane.b32.xlu2 %v7350_v4, %s11030_s21  ;;  %1574 = vrot.lane.b32.xlu1 %v7341_v1, %s11030_s21  ;;  %v2094_v21 = vperm.slane %v7861_v15, 6 }
 0x155   : > { %v1840_v37 = vsel %vm618_vm4, %v1838_v12, %v7840_v61  ;;  %v1914_v42 = vsel %vm624_vm6, %v1911_v14, %v1913_v26  ;;  %v1842_v56 = vsel %vm622_vm5, %v7866_v63, %v1837_v13  ;;  %1572 = vrot.lane.b32.xlu0 %v7352_v5, %s11030_s21  ;;  %v2017_v61 = vperm.slane %v7754_v57, 0 }
 0x156   : > { %v2023_v62 = vperm.slane %v7754_v57, 6  ;;  %1917 = vst.msk [vmem:[#allocation2 + $0x73] ss:$8 sm:$0xf] %vm7480_vm7, %v1914_v42  ;;  %v1843_v15 = vsel %vm624_vm6, %v1840_v37, %v1842_v56  ;;  %v8078_v35 = vpop.permute.xlu2 %1205  ;;  %v2062_v50 = vpop.permute.xlu1 %2061  ;;  %v2049_v63 = vrot.slane %v2036_v24, 3  ;;  %v2120_v0 = vrot.slane %v2107_v20, 3 }
 0x157   : > { %1918 = vst.msk [vmem:[#allocation2 + $0x73] ss:$8 sm:$0x70] %vm7480_vm7, %v1914_v42  ;;  %v2081_v57 = vsel %vm2075_vm14, %v2062_v50, %v7735_v11  ;;  %v2082_v48 = vsel %vm2075_vm14, %v7859_v25, %v2062_v50  ;;  %v1991_v41 = vpop.permute.xlu0 %1990  ;;  %v2048_v11 = vrot.slane %v7932_v29, 4  ;;  %v2119_v31 = vrot.slane %v2106_v32, 4 }
 0x158   : > { %1846 = vst.msk [vmem:[#allocation2 + $0x72] ss:$8 sm:$0xf] %vm7480_vm7, %v1843_v15  ;;  %v2102_v9 = vmul.f32 %v2088_v19, %v2081_v57  ;;  %v2108_v46 = vmul.f32 %v2094_v21, %v2082_v48  ;;  %v2010_v60 = vsel %vm2004_vm13, %v1991_v41, %v7616_v47  ;;  %v2011_v53 = vsel %vm2004_vm13, %v7747_v23, %v1991_v41 }
 0x159   : > { %1847 = vst.msk [vmem:[#allocation2 + $0x72] ss:$8 sm:$0x70] %vm7480_vm7, %v1843_v15  ;;  %v2031_v25 = vmul.f32 %v2017_v61, %v2010_v60  ;;  %v2037_v28 = vmul.f32 %v2023_v62, %v2011_v53  ;;  %v11144_v44 = vrot.slane %v7925_v58, 5  ;;  %v11145_v45 = vrot.slane %v7917_v39, 6 }
 0x15a   : > { %v2123_v47 = vsel %vm616_vm2, %v2117_v54, %v2118_v18  ;;  %v2121_v51 = vrot.slane %v2108_v46, 2  ;;  %v2122_v24 = vsel %vm614_vm3, %v2102_v9, %v2116_v52  ;;  %v2125_v23 = vsel %vm620_vm1, %v2119_v31, %v2120_v0  ;;  %v1153_v9 = vld [vmem:[#allocation4 + $0x38] ss:$8 sm:$0xf] }
 0x15b   : > { %v2052_v59 = vsel %vm616_vm2, %v11145_v45, %v11144_v44  ;;  %v2124_v29 = vsel %vm618_vm4, %v2122_v24, %v2123_v47  ;;  %v2050_v32 = vrot.slane %v2037_v28, 2  ;;  %v11146_v34 = vrot.slane %v7901_v7, 7  ;;  %v1154_v46 = vld [vmem:[#allocation4 + $0x38] ss:$8 sm:$0xf0] }
 0x15c   : > { %v2054_v58 = vsel %vm620_vm1, %v2048_v11, %v2049_v63  ;;  %v2126_v39 = vsel %vm622_vm5, %v2125_v23, %v2121_v51  ;;  %1284 = vrot.lane.b32.xlu2 %v7350_v4, %s11042_s24  ;;  %1213 = vrot.lane.b32.xlu1 %v7350_v4, %s11040_s30  ;;  %v8227_v60 = vor.u32 %v1154_v46, %v1153_v9  ;;  %v1224_v53 = vld [vmem:[#allocation4 + $0x39] ss:$8 sm:$0xf]  ;;  %vm11016_vm13 = vcmp.lt.s32.totalorder %v7442_v17, 2 }
 0x15d   : > { %v2051_v49 = vsel %vm614_vm3, %v2031_v25, %v11146_v34  ;;  %v2127_v36 = vsel %vm624_vm6, %v2124_v29, %v2126_v39  ;;  %v2055_v38 = vsel %vm622_vm5, %v2054_v58, %v2050_v32  ;;  %1142 = vrot.lane.b32.xlu0 %v7350_v4, %s7122_s28  ;;  %v1225_v11 = vld [vmem:[#allocation4 + $0x39] ss:$8 sm:$0xf0]  ;;  %v1295_v32 = vld [vmem:[#allocation4 + $0x3a] ss:$8 sm:$0xf] }
 0x15e   : > { %v2053_v33 = vsel %vm618_vm4, %v2051_v49, %v2052_v59  ;;  %2130 = vst.msk [vmem:[#allocation2 + $0x76] ss:$8 sm:$0xf] %vm7480_vm7, %v2127_v36  ;;  %v8125_v30 = vpop.permute.xlu2 %1211  ;;  %v8127_v22 = vpop.permute.xlu1 %1132  ;;  %v8236_v44 = vor.u32 %v1225_v11, %v1224_v53  ;;  %v1159_v45 = vperm.slane %v8227_v60, 2  ;;  %v1158_v59 = vperm.slane %v8227_v60, 1 }
 0x15f   : > { %v2056_v7 = vsel %vm624_vm6, %v2053_v33, %v2055_v38  ;;  %11147 = vst [vmem:[#allocation36_spill] sm:$0xff] %v8125_v30  ;;  %v8131_v8 = vpop.permute.xlu0 %1130  ;;  %v1162_v47 = vperm.slane %v8227_v60, 5  ;;  %v1160_v51 = vperm.slane %v8227_v60, 3  ;;  %v1149_v24 = vsel %vm11014_vm0, %v8127_v22, %v7964_v40  ;;  %v1296_v34 = vld [vmem:[#allocation4 + $0x3a] ss:$8 sm:$0xf0] }
 0x160   : > { %2131 = vst.msk [vmem:[#allocation2 + $0x76] ss:$8 sm:$0x70] %vm7480_vm7, %v2127_v36  ;;  %v1150_v23 = vsel %vm11014_vm0, %v8131_v8, %v8127_v22  ;;  %v1161_v29 = vperm.slane %v8227_v60, 4  ;;  %v1230_v33 = vperm.slane %v8236_v44, 2  ;;  %v8271_v36 = vmul.f32 %v1159_v45, %v1149_v24 }
 0x161   : > { %11148 = vst [vmem:[#allocation30_spill] sm:$0xff] %v8131_v8  ;;  %v8273_v38 = vmul.f32 %v1158_v59, %v1150_v23  ;;  %v1366_v22 = vld [vmem:[#allocation4 + $0x3b] ss:$8 sm:$0xf]  ;;  %v1233_v11 = vperm.slane %v8236_v44, 5  ;;  %v1231_v59 = vperm.slane %v8236_v44, 3 }
 0x162   : > { %2059 = vst.msk [vmem:[#allocation2 + $0x75] ss:$8 sm:$0xf] %vm7480_vm7, %v2056_v7  ;;  %v1232_v24 = vperm.slane %v8236_v44, 4  ;;  %vm11020_vm14 = vcmp.lt.s32.totalorder %v7442_v17, 1  ;;  %vm11026_vm15 = vcmp.lt.s32.totalorder %v7442_v17, 126 }
 0x163   : > { %2060 = vst.msk [vmem:[#allocation2 + $0x75] ss:$8 sm:$0x70] %vm7480_vm7, %v2056_v7  ;;  %vm1436_vm11 = vcmp.lt.s32.totalorder %v7442_v17, 127 }
 0x164   : > { %1493 = vrot.lane.b32.xlu2 %v11149_v16, %s7127_s15  ;;  %1422 = vrot.lane.b32.xlu1 %v11149_v16, %s7126_s20  ;;  %11152 = vst [vmem:[#allocation39_spill] sm:$0xff] %v8227_v60 }
 0x165   : > { %1355 = vrot.lane.b32.xlu0 %v7350_v4, %s11038_s23  ;;  %11153 = vst [vmem:[#allocation40_spill] sm:$0xff] %v8236_v44 }
 0x166   : > { %v8143_v20 = vpop.permute.xlu2 %1276  ;;  %v8145_v14 = vpop.permute.xlu1 %1138  ;;  %11154 = vst [vmem:[#allocation38_spill] sm:$0xff] %v8273_v38 }
 0x167   : > { %v8147_v12 = vpop.permute.xlu0 %1136  ;;  %v1146_v49 = vsel %vm11014_vm0, %v8145_v14, %v8014_v10 }
 0x168   : > { %v1147_v58 = vsel %vm11014_vm0, %v8147_v12, %v8145_v14  ;;  %v1148_v39 = vsel %vm11014_vm0, %v7964_v40, %v8147_v12  ;;  %v1367_v14 = vld [vmem:[#allocation4 + $0x3b] ss:$8 sm:$0xf0]  ;;  %v1229_v40 = vperm.slane %v8236_v44, 1  ;;  %v8288_v9 = vmul.f32 %v1162_v47, %v1146_v49 }
 0x169   : > { %v2290_v13 = vld [vmem:[#allocation2 + $0x70] sm:$0xff]  ;;  %v2292_v27 = vld [vmem:[#allocation2 + $0x80] sm:$0xff]  ;;  %v2293_v43 = vld [vmem:[#allocation2 + $0x88] sm:$0xff]  ;;  %v8290_v46 = vmul.f32 %v1160_v51, %v1148_v39  ;;  %v8292_v53 = vmul.f32 %v1161_v29, %v1147_v58  ;;  %v8299_v23 = vor.u32 %v1367_v14, %v1366_v22 }
 0x16a   : > { %2357 = vmatpush.msra.mxu0 %v2290_v13  ;;  %6570 = vmatpush.msra.mxu1 %v2290_v13 }
 0x16b   : > { %2403 = vmatpush.msra.mxu2 %v2292_v27  ;;  %2426 = vmatpush.msra.mxu3 %v2293_v43  ;;  %v8284_v43 = vor.u32 %v1296_v34, %v1295_v32 }
 0x16c   : > { %554 = vrot.lane.b32.xlu2 %v7345_v3, %s7129_s22  ;;  %552 = vrot.lane.b32.xlu1 %v11149_v16, %s7129_s22 }
 0x16d   : > { %1564 = vrot.lane.b32.xlu0 %v11149_v16, %s11030_s21  ;;  %v1301_v51 = vperm.slane %v8284_v43, 2  ;;  %v1300_v29 = vperm.slane %v8284_v43, 1  ;;  %v1304_v49 = vperm.slane %v8284_v43, 5  ;;  %v1302_v58 = vperm.slane %v8284_v43, 3 }
 0x16e   : > { %v8155_v26 = vpop.permute.xlu2 %1282  ;;  %v8157_v37 = vpop.permute.xlu1 %1203  ;;  %v1303_v22 = vperm.slane %v8284_v43, 4 }
 0x16f   : > { %v8159_v19 = vpop.permute.xlu0 %1201  ;;  %v1220_v7 = vsel %vm11015_vm12, %v8157_v37, %v8078_v35 }
 0x170   : > { %11150 = vst [vmem:[#allocation31_spill] sm:$0xff] %v8159_v19  ;;  %v8295_v45 = vmul.f32 %v1230_v33, %v1220_v7  ;;  %v1221_v47 = vsel %vm11015_vm12, %v8159_v19, %v8157_v37  ;;  %v1516_v7 = vld [vmem:[#allocation4 + $0x3e] ss:$8 sm:$0xf] }
 0x171   : > { %v8321_v14 = vmul.f32 %v1229_v40, %v1221_v47 }
 0x174   : > { %560 = vrot.lane.b32.xlu2 %v7352_v5, %s7129_s22  ;;  %558 = vrot.lane.b32.xlu1 %v7343_v2, %s7129_s22 }
 0x175   : > { %556 = vrot.lane.b32.xlu0 %v7354_v6, %s7129_s22 }
 0x176   : > { %v8167_v21 = vpop.permute.xlu2 %1347  ;;  %v8169_v42 = vpop.permute.xlu1 %1209 }
 0x177   : > { %v8171_v56 = vpop.permute.xlu0 %1207 }
 0x17c   : > { %635 = vrot.lane.b32.xlu2 %v7345_v3, %s7130_s27  ;;  %633 = vrot.lane.b32.xlu1 %v11149_v16, %s7130_s27 }
 0x17d   : > { %562 = vrot.lane.b32.xlu0 %v7341_v1, %s7129_s22 }
 0x17e   : > { %v8179_v61 = vpop.permute.xlu2 %1353  ;;  %v8181_v62 = vpop.permute.xlu1 %1274 }
 0x17f   : > { %v8183_v52 = vpop.permute.xlu0 %1272  ;;  %v1291_v34 = vsel %vm11016_vm13, %v8181_v62, %v8143_v20 }
 0x180   : > { %v1292_v39 = vsel %vm11016_vm13, %v8183_v52, %v8181_v62  ;;  %v1517_v62 = vld [vmem:[#allocation4 + $0x3e] ss:$8 sm:$0xf0] }
 0x181   : > { %v8365_v44 = vor.u32 %v1517_v62, %v1516_v7 }
 0x183   : > { %v1520_v19 = vperm.slane %v8365_v44, 0 }
 0x184   : > { %641 = vrot.lane.b32.xlu2 %v7352_v5, %s7130_s27  ;;  %639 = vrot.lane.b32.xlu1 %v7343_v2, %s7130_s27 }
 0x185   : > { %637 = vrot.lane.b32.xlu0 %v7354_v6, %s7130_s27 }
 0x186   : > { %v8191_v54 = vpop.permute.xlu2 %1428  ;;  %v8193_v18 = vpop.permute.xlu1 %1280 }
 0x187   : > { %v8195_v15 = vpop.permute.xlu0 %1278  ;;  %v1288_v40 = vsel %vm11016_vm13, %v8193_v18, %v8155_v26 }
 0x188   : > { %v1289_v47 = vsel %vm11016_vm13, %v8195_v15, %v8193_v18  ;;  %v1290_v37 = vsel %vm11016_vm13, %v8143_v20, %v8195_v15  ;;  %v1218_v18 = vsel %vm11015_vm12, %v8171_v56, %v8169_v42  ;;  %v1219_v20 = vsel %vm11015_vm12, %v8078_v35, %v8171_v56 }
 0x189   : > { %v1315_v15 = vmul.f32 %v1301_v51, %v1291_v34  ;;  %v1318_v38 = vmul.f32 %v1304_v49, %v1288_v40  ;;  %v1316_v8 = vmul.f32 %v1302_v58, %v1290_v37  ;;  %v1317_v10 = vmul.f32 %v1303_v22, %v1289_v47 }
 0x18a   : > { %v1373_v35 = vperm.slane %v8299_v23, 3  ;;  %v1299_v51 = vperm.slane %v8284_v43, 0  ;;  %v1522_v49 = vperm.slane %v8365_v44, 2  ;;  %v1521_v58 = vperm.slane %v8365_v44, 1 }
 0x18b   : > { %v1328_v56 = vrot.slane %v1315_v15, 6  ;;  %v1523_v22 = vperm.slane %v8365_v44, 3 }
 0x18c   : > { %706 = vrot.lane.b32.xlu2 %v7345_v3, %s7131_s16  ;;  %704 = vrot.lane.b32.xlu1 %v11149_v16, %s7131_s16 }
 0x18d   : > { %643 = vrot.lane.b32.xlu0 %v7341_v1, %s7130_s27 }
 0x18e   : > { %v8203_v50 = vpop.permute.xlu2 %1434  ;;  %v8205_v63 = vpop.permute.xlu1 %1345 }
 0x18f   : > { %11151 = vst [vmem:[#allocation37_spill] sm:$0xff] %v8203_v50  ;;  %v8207_v0 = vpop.permute.xlu0 %1343  ;;  %v8371_v50 = vmul.f32 %v1232_v24, %v1218_v18  ;;  %v1330_v24 = vrot.slane %v1317_v10, 4  ;;  %v1445_v18 = vld [vmem:[#allocation4 + $0x3d] ss:$8 sm:$0xf] }
 0x194   : > { %712 = vrot.lane.b32.xlu2 %v7352_v5, %s7131_s16  ;;  %710 = vrot.lane.b32.xlu1 %v7343_v2, %s7131_s16 }
 0x195   : > { %708 = vrot.lane.b32.xlu0 %v7354_v6, %s7131_s16 }
 0x196   : > { %v8215_v57 = vpop.permute.xlu2 %1499  ;;  %v8217_v48 = vpop.permute.xlu1 %1351 }
 0x197   : > { %v8219_v41 = vpop.permute.xlu0 %1349 }
 0x19c   : > { %777 = vrot.lane.b32.xlu2 %v7345_v3, %s7132_s12  ;;  %775 = vrot.lane.b32.xlu1 %v11149_v16, %s7132_s12 }
 0x19d   : > { %714 = vrot.lane.b32.xlu0 %v7341_v1, %s7131_s16 }
 0x19e   : > { %v8229_v31 = vpop.permute.xlu2 %1505  ;;  %v8231_v25 = vpop.permute.xlu1 %1426 }
 0x19f   : > { %v8233_v28 = vpop.permute.xlu0 %1424 }
 0x1a4   : > { %783 = vrot.lane.b32.xlu2 %v7352_v5, %s7132_s12  ;;  %781 = vrot.lane.b32.xlu1 %v7343_v2, %s7132_s12 }
 0x1a5   : > { %779 = vrot.lane.b32.xlu0 %v7354_v6, %s7132_s12 }
 0x1a6   : > { %v8279_v13 = vpop.permute.xlu2 %1570  ;;  %v8281_v27 = vpop.permute.xlu1 %1432 }
 0x1a7   : > { %11155 = vst [vmem:[#allocation33_spill] sm:$0xff] %v8279_v13  ;;  %v8286_v12 = vpop.permute.xlu0 %1430  ;;  %v1217_v13 = vsel %vm11015_vm12, %v8169_v42, %v8125_v30  ;;  %v1375_v30 = vperm.slane %v8299_v23, 5  ;;  %v8369_v42 = vmul.f32 %v1231_v59, %v1219_v20  ;;  %v1331_v59 = vrot.slane %v1318_v38, 3 }
 0x1a8   : > { %11156 = vst [vmem:[#allocation32_spill] sm:$0xff] %v8281_v27  ;;  %v8367_v27 = vmul.f32 %v1233_v11, %v1217_v13  ;;  %v1305_v13 = vperm.slane %v8284_v43, 6  ;;  %v1525_v38 = vperm.slane %v8365_v44, 5  ;;  %v1524_v43 = vperm.slane %v8365_v44, 4 }
 0x1ac   : > { %848 = vrot.lane.b32.xlu2 %v7345_v3, %s7133_s18  ;;  %846 = vrot.lane.b32.xlu1 %v11149_v16, %s7133_s18 }
 0x1ad   : > { %785 = vrot.lane.b32.xlu0 %v7341_v1, %s7132_s12 }
 0x1ae   : > { %v8346_v32 = vpop.permute.xlu2 %1576  ;;  %v1498_v33 = vpop.permute.xlu1 %1497 }
 0x1af   : > { %11157 = vst [vmem:[#allocation34_spill] sm:$0xff] %v8346_v32  ;;  %v8348_v4 = vpop.permute.xlu0 %1495  ;;  %v1314_v32 = vmul.f32 %v1300_v29, %v1292_v39  ;;  %v1329_v29 = vrot.slane %v1316_v8, 5 }
 0x1b0   : > { %v1512_v20 = vsel %vm11026_vm15, %v8348_v4, %v1498_v33 }
 0x1b1   : > { %v1327_v11 = vrot.slane %v1314_v32, 7  ;;  %v1535_v34 = vmul.f32 %v1521_v58, %v1512_v20  ;;  %v1259_v58 = vrot.slane %v8371_v50, 4 }
 0x1b4   : > { %854 = vrot.lane.b32.xlu2 %v7352_v5, %s7133_s18  ;;  %852 = vrot.lane.b32.xlu1 %v7343_v2, %s7133_s18 }
 0x1b5   : > { %850 = vrot.lane.b32.xlu0 %v7354_v6, %s7133_s18 }
 0x1b6   : > { %v1285_v39 = vpop.permute.xlu2 %1284  ;;  %v1504_v7 = vpop.permute.xlu1 %1503 }
 0x1b7   : > { %v1287_v8 = vsel %vm11016_vm13, %v8155_v26, %v1285_v39  ;;  %v1293_v10 = vsel %vm11016_vm13, %v1285_v39, %v8183_v52  ;;  %v1502_v32 = vpop.permute.xlu0 %1501  ;;  %v1508_v47 = vsel %vm11026_vm15, %v1504_v7, %v8229_v31  ;;  %v1334_v26 = vsel %vm616_vm2, %v1328_v56, %v1329_v29 }
 0x1b8   : > { %v1313_v37 = vmul.f32 %v1299_v51, %v1293_v10  ;;  %v1319_v40 = vmul.f32 %v1305_v13, %v1287_v8  ;;  %v1509_v62 = vsel %vm11026_vm15, %v1502_v32, %v1504_v7  ;;  %v1511_v52 = vsel %vm11026_vm15, %v1498_v33, %v8215_v57  ;;  %v1446_v13 = vld [vmem:[#allocation4 + $0x3d] ss:$8 sm:$0xf0] }
 0x1b9   : > { %v1510_v15 = vsel %vm11026_vm15, %v8215_v57, %v1502_v32  ;;  %v1336_v51 = vsel %vm620_vm1, %v1330_v24, %v1331_v59  ;;  %v1539_v8 = vmul.f32 %v1525_v38, %v1508_v47  ;;  %v1538_v10 = vmul.f32 %v1524_v43, %v1509_v62 }
 0x1ba   : > { %v1332_v39 = vrot.slane %v1319_v40, 2  ;;  %v1333_v7 = vsel %vm614_vm3, %v1313_v37, %v1327_v11  ;;  %v1537_v56 = vmul.f32 %v1523_v22, %v1510_v15  ;;  %v1536_v60 = vmul.f32 %v1522_v49, %v1511_v52 }
 0x1bb   : > { %v1335_v29 = vsel %vm618_vm4, %v1333_v7, %v1334_v26  ;;  %v1526_v57 = vperm.slane %v8365_v44, 6  ;;  %v1260_v11 = vrot.slane %v8367_v27, 3  ;;  %v1258_v59 = vrot.slane %v8369_v42, 5  ;;  %v11166_v27 = vld [vmem:[#allocation37_spill] sm:$0xff] }
 0x1bc   : > { %v1337_v33 = vsel %vm622_vm5, %v1336_v51, %v1332_v39  ;;  %919 = vrot.lane.b32.xlu2 %v7345_v3, %s11049_s4  ;;  %917 = vrot.lane.b32.xlu1 %v11149_v16, %s11049_s4  ;;  %v8423_v24 = vor.u32 %v1446_v13, %v1445_v18  ;;  %v1361_v22 = vsel %vm11020_vm14, %v8167_v21, %v8219_v41  ;;  %v1550_v44 = vrot.slane %v1537_v56, 5 }
 0x1bd   : > { %v1338_v49 = vsel %vm624_vm6, %v1335_v29, %v1337_v33  ;;  %856 = vrot.lane.b32.xlu0 %v7341_v1, %s7133_s18  ;;  %v1552_v43 = vrot.slane %v1539_v8, 3  ;;  %v1551_v32 = vrot.slane %v1538_v10, 4  ;;  %v1549_v47 = vrot.slane %v1536_v60, 6  ;;  %v1587_v33 = vld [vmem:[#allocation4 + $0x3f] ss:$8 sm:$0xf] }
 0x1be   : > { %1341 = vst.msk [vmem:[#allocation2 + $0x3a] ss:$8 sm:$0xf] %vm7480_vm7, %v1338_v49  ;;  %v1494_v42 = vpop.permute.xlu2 %1493  ;;  %v8436_v38 = vpop.permute.xlu1 %1568  ;;  %v1548_v62 = vrot.slane %v1535_v34, 7  ;;  %v1359_v52 = vsel %vm11020_vm14, %v8217_v48, %v8179_v61  ;;  %v1451_v20 = vperm.slane %v8423_v24, 2  ;;  %v1363_v51 = vsel %vm11020_vm14, %v8207_v0, %v8205_v63 }
 0x1bf   : > { %1342 = vst.msk [vmem:[#allocation2 + $0x3a] ss:$8 sm:$0x70] %vm7480_vm7, %v1338_v49  ;;  %v1513_v50 = vsel %vm11026_vm15, %v1494_v42, %v8348_v4  ;;  %v1514_v37 = vsel %vm11026_vm15, %v8229_v31, %v1494_v42  ;;  %v8446_v40 = vpop.permute.xlu0 %1566  ;;  %v1360_v4 = vsel %vm11020_vm14, %v8219_v41, %v8217_v48  ;;  %v1450_v31 = vperm.slane %v8423_v24, 1 }
 0x1c0   : > { %v1534_v26 = vmul.f32 %v1520_v19, %v1513_v50  ;;  %v1540_v18 = vmul.f32 %v1526_v57, %v1514_v37  ;;  %v1362_v19 = vsel %vm11020_vm14, %v8205_v63, %v8167_v21  ;;  %v1555_v60 = vsel %vm616_vm2, %v1549_v47, %v1550_v44  ;;  %v1415_v63 = vld [vmem:[#allocation4 + $0x3c] ss:$8 sm:$0xf] }
 0x1c1   : > { %v1387_v48 = vmul.f32 %v1373_v35, %v1361_v22  ;;  %v1557_v41 = vsel %vm620_vm1, %v1551_v32, %v1552_v43  ;;  %v1389_v21 = vmul.f32 %v1375_v30, %v1359_v52  ;;  %v11158_v39 = vperm.slane %v8299_v23, 4  ;;  %v1416_v35 = vld [vmem:[#allocation4 + $0x3c] ss:$8 sm:$0xf0] }
 0x1c2   : > { %v1553_v34 = vrot.slane %v1540_v18, 2  ;;  %v1554_v15 = vsel %vm614_vm3, %v1534_v26, %v1548_v62  ;;  %v11159_v29 = vperm.slane %v8299_v23, 2  ;;  %v1452_v10 = vperm.slane %v8423_v24, 3  ;;  %v6838_v18 = vld [vmem:[%s7338_s2] sm:$0xff]  ;;  %s11048_s2 = smov 29  }
 0x1c3   : > { %v1556_v13 = vsel %vm618_vm4, %v1554_v15, %v1555_v60  ;;  %v1388_v7 = vmul.f32 %v11158_v39, %v1360_v4  ;;  %v1417_v57 = vor.u32 %v1416_v35, %v1415_v63  ;;  %v11160_v49 = vrot.slane %v8290_v46, 5  ;;  %v1588_v46 = vld [vmem:[#allocation4 + $0x3f] ss:$8 sm:$0xf0] }
 0x1c4   : > { %v1558_v56 = vsel %vm622_vm5, %v1557_v41, %v1553_v34  ;;  %925 = vrot.lane.b32.xlu2 %v7352_v5, %s11049_s4  ;;  %923 = vrot.lane.b32.xlu1 %v7343_v2, %s11049_s4  ;;  %v1386_v8 = vmul.f32 %v11159_v29, %v1362_v19  ;;  %v11161_v22 = vrot.slane %v8271_v36, 6  ;;  %v11162_v42 = vrot.slane %v8288_v9, 3  ;;  %v11169_v29 = vld [vmem:[#allocation39_spill] sm:$0xff] }
 0x1c5   : > { %v1559_v30 = vsel %vm624_vm6, %v1556_v13, %v1558_v56  ;;  %921 = vrot.lane.b32.xlu0 %v7354_v6, %s11049_s4  ;;  %v11163_v43 = vrot.slane %v8292_v53, 4  ;;  %v11164_v50 = vperm.slane %v8299_v23, 1  ;;  %v1400_v62 = vrot.slane %v1387_v48, 5 }
 0x1c6   : > { %v8492_v44 = vsel %vm616_vm2, %v11161_v22, %v11160_v49  ;;  %1562 = vst.msk [vmem:[#allocation2 + $0x3e] ss:$8 sm:$0xf] %vm7480_vm7, %v1559_v30  ;;  %v8507_v47 = vpop.permute.xlu2 %554  ;;  %v8509_v36 = vpop.permute.xlu1 %1574  ;;  %v1440_v9 = vsel %vm1436_vm11, %v8231_v25, %v8191_v54  ;;  %v1441_v53 = vsel %vm1436_vm11, %v8233_v28, %v8231_v25  ;;  %v1418_v52 = vmul.f32 %v6838_v18, %v1417_v57 }
 0x1c7   : > { %v8499_v32 = vsel %vm620_vm1, %v11163_v43, %v11162_v42  ;;  %v8503_v37 = vmul.f32 %v11164_v50, %v1363_v51  ;;  %1563 = vst.msk [vmem:[#allocation2 + $0x3e] ss:$8 sm:$0x70] %vm7480_vm7, %v1559_v30  ;;  %v8521_v26 = vpop.permute.xlu0 %1572  ;;  %v11165_v4 = vrot.slane %v8295_v45, 6  ;;  %v1402_v60 = vrot.slane %v1389_v21, 3 }
 0x1c8   : > { %v1401_v34 = vrot.slane %v1388_v7, 4  ;;  %v1439_v15 = vsel %vm1436_vm11, %v8191_v54, %v8286_v12  ;;  %v1265_v25 = vsel %vm620_vm1, %v1259_v58, %v1260_v11  ;;  %v1399_v51 = vrot.slane %v1386_v8, 6  ;;  %1420 = vst.msk [vmem:[#allocation2 + $0x3c] ss:$8 sm:$0xf] %vm7480_vm7, %v1418_v52  ;;  %v11167_v11 = vld [vmem:[#allocation32_spill] sm:$0xff] }
 0x1c9   : > { %v1263_v19 = vsel %vm616_vm2, %v11165_v4, %v1258_v59  ;;  %v1454_v48 = vperm.slane %v8423_v24, 5  ;;  %v8535_v41 = vor.u32 %v1588_v46, %v1587_v33  ;;  %v1398_v45 = vrot.slane %v8503_v37, 7  ;;  %1421 = vst.msk [vmem:[#allocation2 + $0x3c] ss:$8 sm:$0x70] %vm7480_vm7, %v1418_v52  ;;  %v11168_v7 = vld [vmem:[#allocation40_spill] sm:$0xff] }
 0x1ca   : > { %v1465_v59 = vmul.f32 %v1451_v20, %v1440_v9  ;;  %v8540_v13 = vmul.f32 %v1450_v31, %v1441_v53  ;;  %v1453_v21 = vperm.slane %v8423_v24, 4  ;;  %v8546_v54 = vsel %vm616_vm2, %v1399_v51, %v1400_v62  ;;  %v11170_v46 = vld [vmem:[#allocation36_spill] sm:$0xff]  ;;  %v11171_v9 = vld [vmem:[#allocation31_spill] sm:$0xff] }
 0x1cb   : > { %v1437_v58 = vsel %vm1436_vm11, %v11167_v11, %v11166_v27  ;;  %v1438_v20 = vsel %vm1436_vm11, %v8286_v12, %v11167_v11  ;;  %v1466_v31 = vmul.f32 %v1452_v10, %v1439_v15  ;;  %v8557_v39 = vsel %vm620_vm1, %v1401_v34, %v1402_v60  ;;  %v11172_v60 = vld [vmem:[#allocation35_spill] sm:$0xff]  ;;  %v11173_v15 = vld [vmem:[#allocation30_spill] sm:$0xff] }
 0x1cc   : > { %990 = vrot.lane.b32.xlu2 %v7345_v3, %s11048_s2  ;;  %988 = vrot.lane.b32.xlu1 %v11149_v16, %s11048_s2  ;;  %v1228_v56 = vperm.slane %v11168_v7, 0  ;;  %v1234_v63 = vperm.slane %v11168_v7, 6  ;;  %v1593_v35 = vperm.slane %v8535_v41, 2  ;;  %v1592_v12 = vperm.slane %v8535_v41, 1 }
 0x1cd   : > { %927 = vrot.lane.b32.xlu0 %v7341_v1, %s11049_s4  ;;  %v1157_v8 = vperm.slane %v11169_v29, 0  ;;  %v1163_v10 = vperm.slane %v11169_v29, 6  ;;  %v1478_v30 = vrot.slane %v1465_v59, 6  ;;  %v1477_v33 = vrot.slane %v8540_v13, 7 }
 0x1ce   : > { %v1468_v57 = vmul.f32 %v1454_v48, %v1437_v58  ;;  %v1467_v49 = vmul.f32 %v1453_v21, %v1438_v20  ;;  %v8573_v22 = vpop.permute.xlu2 %560  ;;  %v1214_v42 = vpop.permute.xlu1 %1213  ;;  %v1479_v43 = vrot.slane %v1466_v31, 5  ;;  %v1596_v50 = vperm.slane %v8535_v41, 5 }
 0x1cf   : > { %v1216_v62 = vsel %vm11015_vm12, %v11170_v46, %v1214_v42  ;;  %v1222_v53 = vsel %vm11015_vm12, %v1214_v42, %v11171_v9  ;;  %v1143_v18 = vpop.permute.xlu0 %1142  ;;  %v1594_v48 = vperm.slane %v8535_v41, 3  ;;  %v1595_v59 = vperm.slane %v8535_v41, 4  ;;  %v11175_v46 = vld [vmem:[#allocation38_spill] sm:$0xff] }
 0x1d0   : > { %v1242_v52 = vmul.f32 %v1228_v56, %v1222_v53  ;;  %v1248_v4 = vmul.f32 %v1234_v63, %v1216_v62  ;;  %v1145_v34 = vsel %vm11014_vm0, %v11172_v60, %v1143_v18  ;;  %v1151_v51 = vsel %vm11014_vm0, %v1143_v18, %v11173_v15 }
 0x1d1   : > { %v1171_v21 = vmul.f32 %v1157_v8, %v1151_v51  ;;  %v1177_v11 = vmul.f32 %v1163_v10, %v1145_v34  ;;  %v1481_v58 = vrot.slane %v1468_v57, 3  ;;  %v1480_v20 = vrot.slane %v1467_v49, 4  ;;  %v11177_v49 = vld [vmem:[#allocation33_spill] sm:$0xff] }
 0x1d2   : > { %v1261_v31 = vrot.slane %v1248_v4, 2  ;;  %v11174_v7 = vrot.slane %v8321_v14, 7  ;;  %v1484_v63 = vsel %vm616_vm2, %v1478_v30, %v1479_v43  ;;  %v11176_v62 = vrot.slane %v11175_v46, 7 }
 0x1d3   : > { %v1190_v42 = vrot.slane %v1177_v11, 2  ;;  %v1449_v14 = vperm.slane %v8423_v24, 0  ;;  %v1486_v57 = vsel %vm620_vm1, %v1480_v20, %v1481_v58  ;;  %v1582_v43 = vsel %vm11013_vm8, %v8436_v38, %v11177_v49 }
 0x1d4   : > { %v1262_v56 = vsel %vm614_vm3, %v1242_v52, %v11174_v7  ;;  %v1191_v9 = vsel %vm614_vm3, %v1171_v21, %v11176_v62  ;;  %v1266_v53 = vsel %vm622_vm5, %v1265_v25, %v1261_v31  ;;  %996 = vrot.lane.b32.xlu2 %v7352_v5, %s11048_s2  ;;  %994 = vrot.lane.b32.xlu1 %v7343_v2, %s11048_s2  ;;  %v1376_v25 = vperm.slane %v8299_v23, 6  ;;  %v11178_v52 = vld [vmem:[#allocation34_spill] sm:$0xff] }
 0x1d5   : > { %v1264_v29 = vsel %vm618_vm4, %v1262_v56, %v1263_v19  ;;  %v1193_v8 = vsel %vm618_vm4, %v1191_v9, %v8492_v44  ;;  %v1455_v19 = vperm.slane %v8423_v24, 6  ;;  %v1195_v30 = vsel %vm622_vm5, %v8499_v32, %v1190_v42  ;;  %992 = vrot.lane.b32.xlu0 %v7354_v6, %s11048_s2 }
 0x1d6   : > { %v1267_v10 = vsel %vm624_vm6, %v1264_v29, %v1266_v53  ;;  %v1370_v44 = vperm.slane %v8299_v23, 0  ;;  %v1583_v24 = vsel %vm11013_vm8, %v8446_v40, %v8436_v38  ;;  %v1196_v32 = vsel %vm624_vm6, %v1193_v8, %v1195_v30  ;;  %v8626_v18 = vpop.permute.xlu2 %635  ;;  %v1423_v23 = vpop.permute.xlu1 %1422 }
 0x1d7   : > { %1270 = vst.msk [vmem:[#allocation2 + $0x39] ss:$8 sm:$0xf] %vm7480_vm7, %v1267_v10  ;;  %v1579_v4 = vsel %vm11013_vm8, %v8509_v36, %v11178_v52  ;;  %v1581_v60 = vsel %vm11013_vm8, %v11177_v49, %v8521_v26  ;;  %v1442_v38 = vsel %vm1436_vm11, %v1423_v23, %v8233_v28  ;;  %v1443_v34 = vsel %vm1436_vm11, %v11166_v27, %v1423_v23  ;;  %v1356_v15 = vpop.permute.xlu0 %1355 }
 0x1d8   : > { %1271 = vst.msk [vmem:[#allocation2 + $0x39] ss:$8 sm:$0x70] %vm7480_vm7, %v1267_v10  ;;  %v1463_v51 = vmul.f32 %v1449_v14, %v1442_v38  ;;  %v1469_v21 = vmul.f32 %v1455_v19, %v1443_v34  ;;  %v1358_v11 = vsel %vm11020_vm14, %v8179_v61, %v1356_v15  ;;  %v1364_v58 = vsel %vm11020_vm14, %v1356_v15, %v8207_v0 }
 0x1d9   : > { %1199 = vst.msk [vmem:[#allocation2 + $0x38] ss:$8 sm:$0xf] %vm7480_vm7, %v1196_v32  ;;  %v1607_v20 = vmul.f32 %v1593_v35, %v1582_v43  ;;  %v1580_v28 = vsel %vm11013_vm8, %v8521_v26, %v8509_v36  ;;  %v1384_v27 = vmul.f32 %v1370_v44, %v1364_v58  ;;  %v1390_v31 = vmul.f32 %v1376_v25, %v1358_v11 }
 0x1da   : > { %1200 = vst.msk [vmem:[#allocation2 + $0x38] ss:$8 sm:$0x70] %vm7480_vm7, %v1196_v32  ;;  %v1606_v7 = vmul.f32 %v1592_v12, %v1583_v24  ;;  %v1610_v56 = vmul.f32 %v1596_v50, %v1579_v4  ;;  %v1482_v61 = vrot.slane %v1469_v21, 2  ;;  %v1483_v0 = vsel %vm614_vm3, %v1463_v51, %v1477_v33 }
 0x1db   : > { %v1608_v35 = vmul.f32 %v1594_v48, %v1581_v60  ;;  %v1485_v29 = vsel %vm618_vm4, %v1483_v0, %v1484_v63  ;;  %v1403_v42 = vrot.slane %v1390_v31, 2  ;;  %v1404_v36 = vsel %vm614_vm3, %v1384_v27, %v1398_v45 }
 0x1dc   : > { %v1609_v26 = vmul.f32 %v1595_v59, %v1580_v28  ;;  %v1487_v46 = vsel %vm622_vm5, %v1486_v57, %v1482_v61  ;;  %v1406_v12 = vsel %vm618_vm4, %v1404_v36, %v8546_v54  ;;  %1061 = vrot.lane.b32.xlu2 %v7345_v3, %s11034_s17  ;;  %1059 = vrot.lane.b32.xlu1 %v11149_v16, %s11034_s17  ;;  %v1591_v45 = vperm.slane %v8535_v41, 0 }
 0x1dd   : > { %v1488_v13 = vsel %vm624_vm6, %v1485_v29, %v1487_v46  ;;  %v1408_v37 = vsel %vm622_vm5, %v8557_v39, %v1403_v42  ;;  %998 = vrot.lane.b32.xlu0 %v7341_v1, %s11048_s2  ;;  %v1597_v33 = vperm.slane %v8535_v41, 6  ;;  %v1621_v50 = vrot.slane %v1608_v35, 5  ;;  %v576_v35 = vld [vmem:[#allocation4] ss:$8 sm:$0xf] }
 0x1de   : > { %1491 = vst.msk [vmem:[#allocation2 + $0x3d] ss:$8 sm:$0xf] %vm7480_vm7, %v1488_v13  ;;  %v1409_v3 = vsel %vm624_vm6, %v1406_v12, %v1408_v37  ;;  %v8684_v54 = vpop.permute.xlu2 %641  ;;  %v8686_v16 = vpop.permute.xlu1 %552  ;;  %v1623_v48 = vrot.slane %v1610_v56, 3  ;;  %v1622_v59 = vrot.slane %v1609_v26, 4  ;;  %v1620_v62 = vrot.slane %v1607_v20, 6 }
 0x1df   : > { %1492 = vst.msk [vmem:[#allocation2 + $0x3d] ss:$8 sm:$0x70] %vm7480_vm7, %v1488_v13  ;;  %v1565_v39 = vpop.permute.xlu0 %1564  ;;  %v1619_v9 = vrot.slane %v1606_v7, 7  ;;  %vm647_vm0 = vcmp.lt.s32.totalorder %v7442_v17, 57  ;;  %vm718_vm12 = vcmp.lt.s32.totalorder %v7442_v17, 56 }
 0x1e0   : > { %1412 = vst.msk [vmem:[#allocation2 + $0x3b] ss:$8 sm:$0xf] %vm7480_vm7, %v1409_v3  ;;  %v1584_v41 = vsel %vm11013_vm8, %v1565_v39, %v8446_v40  ;;  %v1585_v63 = vsel %vm11013_vm8, %v11178_v52, %v1565_v39  ;;  %v1626_v14 = vsel %vm616_vm2, %v1620_v62, %v1621_v50  ;;  %v1628_v30 = vsel %vm620_vm1, %v1622_v59, %v1623_v48  ;;  %v577_v29 = vld [vmem:[#allocation4] ss:$8 sm:$0xf0] }
 0x1e1   : > { %1413 = vst.msk [vmem:[#allocation2 + $0x3b] ss:$8 sm:$0x70] %vm7480_vm7, %v1409_v3  ;;  %v1605_v53 = vmul.f32 %v1591_v45, %v1584_v41  ;;  %v1611_v8 = vmul.f32 %v1597_v33, %v1585_v63  ;;  %v8786_v46 = vor.u32 %v577_v29, %v576_v35  ;;  %v656_v12 = vld [vmem:[#allocation4 + $0x1] ss:$8 sm:$0xf] }
 0x1e2   : > { %v657_v13 = vld [vmem:[#allocation4 + $0x1] ss:$8 sm:$0xf0]  ;;  %vm568_vm8 = vcmp.lt.s32.totalorder %v7442_v17, 58  ;;  %vm789_vm13 = vcmp.lt.s32.totalorder %v7442_v17, 55  ;;  %vm860_vm14 = vcmp.lt.s32.totalorder %v7442_v17, 54 }
 0x1e3   : > { %v1624_v19 = vrot.slane %v1611_v8, 2  ;;  %v1625_v10 = vsel %vm614_vm3, %v1605_v53, %v1619_v9  ;;  %v581_v37 = vperm.slane %v8786_v46, 1  ;;  %v8790_v45 = vor.u32 %v657_v13, %v656_v12  ;;  %v727_v3 = vld [vmem:[#allocation4 + $0x2] ss:$8 sm:$0xf] }
 0x1e4   : > { %v1627_v40 = vsel %vm618_vm4, %v1625_v10, %v1626_v14  ;;  %1067 = vrot.lane.b32.xlu2 %v7352_v5, %s11034_s17  ;;  %1065 = vrot.lane.b32.xlu1 %v7343_v2, %s11034_s17  ;;  %v11179_v2 = vld [vmem:[#allocation28_spill] sm:$0xff]  ;;  %v574_v33 = vsel %vm568_vm8, %v8686_v16, %v8507_v47  ;;  %v584_v59 = vperm.slane %v8786_v46, 4  ;;  %v582_v41 = vperm.slane %v8786_v46, 2 }
 0x1e5   : > { %v1629_v44 = vsel %vm622_vm5, %v1628_v30, %v1624_v19  ;;  %1063 = vrot.lane.b32.xlu0 %v7354_v6, %s11034_s17  ;;  %v728_v50 = vld [vmem:[#allocation4 + $0x2] ss:$8 sm:$0xf0]  ;;  %v8805_v62 = vmul.f32 %v581_v37, %v574_v33  ;;  %v583_v9 = vperm.slane %v8786_v46, 3  ;;  %v661_v53 = vperm.slane %v8790_v45, 1 }
 0x1e6   : > { %v1630_v25 = vsel %vm624_vm6, %v1627_v40, %v1629_v44  ;;  %v8712_v57 = vpop.permute.xlu2 %706  ;;  %v8714_v49 = vpop.permute.xlu1 %558  ;;  %v585_v8 = vperm.slane %v8786_v46, 5  ;;  %v8822_v30 = vor.u32 %v728_v50, %v727_v3  ;;  %v664_v44 = vperm.slane %v8790_v45, 4  ;;  %v798_v29 = vld [vmem:[#allocation4 + $0x3] ss:$8 sm:$0xf] }
 0x1e7   : > { %1633 = vst.msk [vmem:[#allocation2 + $0x3f] ss:$8 sm:$0xf] %vm7480_vm7, %v1630_v25  ;;  %v8718_v43 = vpop.permute.xlu0 %556  ;;  %v571_v14 = vsel %vm568_vm8, %v8714_v49, %v8573_v22  ;;  %v799_v12 = vld [vmem:[#allocation4 + $0x3] ss:$8 sm:$0xf0] }
 0x1e8   : > { %1634 = vst.msk [vmem:[#allocation2 + $0x3f] ss:$8 sm:$0x70] %vm7480_vm7, %v1630_v25  ;;  %v572_v19 = vsel %vm568_vm8, %v8718_v43, %v8714_v49  ;;  %v573_v10 = vsel %vm568_vm8, %v8507_v47, %v8718_v43  ;;  %v662_v25 = vperm.slane %v8790_v45, 2  ;;  %v665_v43 = vperm.slane %v8790_v45, 5 }
 0x1e9   : > { %11184 = vst [vmem:[#allocation32_spill] sm:$0xff] %v8805_v62  ;;  %v735_v37 = vperm.slane %v8822_v30, 4  ;;  %v736_v13 = vperm.slane %v8822_v30, 5  ;;  %vm931_vm15 = vcmp.lt.s32.totalorder %v7442_v17, 30 }
 0x1ea   : > { %11185 = vst [vmem:[#allocation40_spill] sm:$0xff] %v8822_v30 }
 0x1ec   : > { %645 = vrot.lane.b32.xlu2 %v11179_v2, %s7130_s27  ;;  %564 = vrot.lane.b32.xlu1 %v11179_v2, %s7129_s22  ;;  %s11045_s22 = smov 116   ;;  %s7140_s27 = smov 15  }
 0x1ed   : > { %1069 = vrot.lane.b32.xlu0 %v7341_v1, %s11034_s17 }
 0x1ee   : > { %v8728_v5 = vpop.permute.xlu2 %712  ;;  %v8730_v6 = vpop.permute.xlu1 %633  ;;  %v2283_v24 = vld [vmem:[#allocation2 + $0x38] sm:$0xff]  ;;  %v2285_v32 = vld [vmem:[#allocation2 + $0x48] sm:$0xff]  ;;  %v2286_v23 = vld [vmem:[#allocation2 + $0x50] sm:$0xff] }
 0x1ef   : > { %2358 = vmatpush.msra.mxu0 %v2283_v24  ;;  %6571 = vmatpush.msra.mxu1 %v2283_v24  ;;  %v8732_v52 = vpop.permute.xlu0 %562  ;;  %v653_v40 = vsel %vm647_vm0, %v8730_v6, %v8626_v18  ;;  %v8839_v24 = vmul.f32 %v584_v59, %v571_v14  ;;  %v734_v14 = vperm.slane %v8822_v30, 3 }
 0x1f0   : > { %2404 = vmatpush.msra.mxu2 %v2285_v32  ;;  %2427 = vmatpush.msra.mxu3 %v2286_v23  ;;  %v8841_v32 = vmul.f32 %v582_v41, %v573_v10  ;;  %v8843_v23 = vmul.f32 %v583_v9, %v572_v19  ;;  %v570_v35 = vsel %vm568_vm8, %v8573_v22, %v8732_v52 }
 0x1f1   : > { %v8866_v9 = vmul.f32 %v585_v8, %v570_v35  ;;  %v8870_v19 = vor.u32 %v799_v12, %v798_v29 }
 0x1f4   : > { %858 = vrot.lane.b32.xlu2 %v11179_v2, %s7133_s18  ;;  %787 = vrot.lane.b32.xlu1 %v11179_v2, %s7132_s12  ;;  %s7138_s18 = smov 14   ;;  %s11028_s12 = smov 112  }
 0x1f5   : > { %716 = vrot.lane.b32.xlu0 %v11179_v2, %s7131_s16  ;;  %s11036_s16 = smov 16  }
 0x1f6   : > { %v8740_v1 = vpop.permute.xlu2 %777  ;;  %v8742_v4 = vpop.permute.xlu1 %639 }
 0x1f7   : > { %v638_v60 = vpop.permute.xlu0 %637  ;;  %v650_v33 = vsel %vm647_vm0, %v8742_v4, %v8684_v54 }
 0x1f8   : > { %v651_v49 = vsel %vm647_vm0, %v638_v60, %v8742_v4  ;;  %v652_v47 = vsel %vm647_vm0, %v8626_v18, %v638_v60  ;;  %v8850_v18 = vmul.f32 %v661_v53, %v653_v40  ;;  %v732_v60 = vperm.slane %v8822_v30, 1 }
 0x1f9   : > { %v676_v3 = vmul.f32 %v662_v25, %v652_v47  ;;  %v733_v53 = vperm.slane %v8822_v30, 2  ;;  %v678_v25 = vmul.f32 %v664_v44, %v650_v33  ;;  %v870_v47 = vld [vmem:[#allocation4 + $0x4] ss:$8 sm:$0xf0]  ;;  %v803_v40 = vperm.slane %v8870_v19, 1 }
 0x1fa   : > { %v806_v44 = vperm.slane %v8870_v19, 4  ;;  %v804_v33 = vperm.slane %v8870_v19, 2 }
 0x1fb   : > { %v689_v29 = vrot.slane %v676_v3, 6 }
 0x1fc   : > { %1071 = vrot.lane.b32.xlu2 %v11179_v2, %s11034_s17  ;;  %1000 = vrot.lane.b32.xlu1 %v11179_v2, %s11048_s2 }
 0x1fd   : > { %929 = vrot.lane.b32.xlu0 %v11179_v2, %s11049_s4  ;;  %v663_v2 = vperm.slane %v8790_v45, 3 }
 0x1fe   : > { %v8750_v38 = vpop.permute.xlu2 %783  ;;  %v8752_v34 = vpop.permute.xlu1 %704 }
 0x1ff   : > { %11180 = vst [vmem:[#allocation42_spill] sm:$0xff] %v8752_v34  ;;  %v8754_v15 = vpop.permute.xlu0 %643  ;;  %v677_v50 = vmul.f32 %v663_v2, %v651_v49  ;;  %v724_v8 = vsel %vm718_vm12, %v8752_v34, %v8712_v57  ;;  %v869_v49 = vld [vmem:[#allocation4 + $0x4] ss:$8 sm:$0xf] }
 0x200   : > { %v649_v22 = vsel %vm647_vm0, %v8684_v54, %v8754_v15  ;;  %v8888_v54 = vmul.f32 %v732_v60, %v724_v8  ;;  %v805_v8 = vperm.slane %v8870_v19, 3 }
 0x201   : > { %v679_v2 = vmul.f32 %v665_v43, %v649_v22  ;;  %v690_v12 = vrot.slane %v677_v50, 5  ;;  %v8898_v50 = vor.u32 %v870_v47, %v869_v49  ;;  %v691_v22 = vrot.slane %v678_v25, 4  ;;  %v941_v49 = vld [vmem:[#allocation4 + $0x5] ss:$8 sm:$0xf0] }
 0x202   : > { %11186 = vst [vmem:[#allocation39_spill] sm:$0xff] %v8888_v54 }
 0x203   : > { %v692_v10 = vrot.slane %v679_v2, 3  ;;  %v8906_v35 = vsel %vm616_vm2, %v689_v29, %v690_v12 }
 0x206   : > { %v8756_v51 = vpop.permute.xlu2 %848  ;;  %v8758_v21 = vpop.permute.xlu1 %710 }
 0x207   : > { %v8760_v11 = vpop.permute.xlu0 %708  ;;  %v721_v43 = vsel %vm718_vm12, %v8758_v21, %v8728_v5 }
 0x208   : > { %v723_v3 = vsel %vm718_vm12, %v8712_v57, %v8760_v11  ;;  %v722_v60 = vsel %vm718_vm12, %v8760_v11, %v8758_v21  ;;  %v940_v57 = vld [vmem:[#allocation4 + $0x5] ss:$8 sm:$0xf]  ;;  %v8916_v2 = vmul.f32 %v735_v37, %v721_v43  ;;  %v11188_v37 = vrot.slane %v8850_v18, 7 }
 0x209   : > { %v8918_v30 = vmul.f32 %v733_v53, %v723_v3  ;;  %v8928_v12 = vmul.f32 %v734_v14, %v722_v60  ;;  %v697_v53 = vsel %vm620_vm1, %v691_v22, %v692_v10  ;;  %v877_v3 = vperm.slane %v8898_v50, 4  ;;  %v1011_v18 = vld [vmem:[#allocation4 + $0x6] ss:$8 sm:$0xf] }
 0x20a   : > { %v8936_v62 = vor.u32 %v941_v49, %v940_v57  ;;  %v875_v10 = vperm.slane %v8898_v50, 2  ;;  %v876_v22 = vperm.slane %v8898_v50, 3  ;;  %v878_v49 = vperm.slane %v8898_v50, 5 }
 0x20b   : > { %v761_v57 = vrot.slane %v8928_v12, 5 }
 0x20e   : > { %v8762_v58 = vpop.permute.xlu2 %854  ;;  %v8764_v20 = vpop.permute.xlu1 %775 }
 0x20f   : > { %11181 = vst [vmem:[#allocation41_spill] sm:$0xff] %v8764_v20  ;;  %v8766_v28 = vpop.permute.xlu0 %714  ;;  %v795_v34 = vsel %vm789_vm13, %v8764_v20, %v8740_v1  ;;  %v874_v20 = vperm.slane %v8898_v50, 1 }
 0x210   : > { %11182 = vst [vmem:[#allocation29_spill] sm:$0xff] %v8766_v28  ;;  %v720_v21 = vsel %vm718_vm12, %v8728_v5, %v8766_v28  ;;  %v8933_v43 = vmul.f32 %v803_v40, %v795_v34 }
 0x211   : > { %v8938_v5 = vmul.f32 %v736_v13, %v720_v21  ;;  %v660_v21 = vperm.slane %v8790_v45, 0 }
 0x212   : > { %11187 = vst [vmem:[#allocation36_spill] sm:$0xff] %v8933_v43 }
 0x216   : > { %v8768_v27 = vpop.permute.xlu2 %919  ;;  %v8770_v31 = vpop.permute.xlu1 %781 }
 0x217   : > { %v8772_v7 = vpop.permute.xlu0 %779  ;;  %v792_v14 = vsel %vm789_vm13, %v8770_v31, %v8750_v38 }
 0x218   : > { %v794_v60 = vsel %vm789_vm13, %v8740_v1, %v8772_v7  ;;  %v793_v13 = vsel %vm789_vm13, %v8772_v7, %v8770_v31  ;;  %v666_v1 = vperm.slane %v8790_v45, 6  ;;  %v8961_v34 = vmul.f32 %v806_v44, %v792_v14 }
 0x219   : > { %v8963_v40 = vmul.f32 %v804_v33, %v794_v60  ;;  %v763_v31 = vrot.slane %v8938_v5, 3  ;;  %v8967_v7 = vmul.f32 %v805_v8, %v793_v13 }
 0x21b   : > { %v831_v29 = vrot.slane %v8963_v40, 6 }
 0x21e   : > { %v8774_v56 = vpop.permute.xlu2 %925  ;;  %v8776_v61 = vpop.permute.xlu1 %846 }
 0x21f   : > { %v8778_v0 = vpop.permute.xlu0 %785  ;;  %v866_v14 = vsel %vm860_vm14, %v8776_v61, %v8756_v51 }
 0x220   : > { %v791_v40 = vsel %vm789_vm13, %v8750_v38, %v8778_v0 }
 0x226   : > { %v8780_v42 = vpop.permute.xlu2 %990  ;;  %v8782_v36 = vpop.permute.xlu1 %852 }
 0x227   : > { %v8784_v26 = vpop.permute.xlu0 %850 }
 0x228   : > { %v864_v45 = vsel %vm860_vm14, %v8784_v26, %v8782_v36  ;;  %v865_v44 = vsel %vm860_vm14, %v8756_v51, %v8784_v26 }
 0x229   : > { %v889_v12 = vmul.f32 %v875_v10, %v865_v44  ;;  %v890_v51 = vmul.f32 %v876_v22, %v864_v45  ;;  %v873_v10 = vperm.slane %v8898_v50, 0  ;;  %v879_v22 = vperm.slane %v8898_v50, 6  ;;  %v1012_v45 = vld [vmem:[#allocation4 + $0x6] ss:$8 sm:$0xf0] }
 0x22a   : > { %v11190_v44 = vrot.slane %v8841_v32, 6 }
 0x22e   : > { %v8796_v39 = vpop.permute.xlu2 %996  ;;  %v8798_v48 = vpop.permute.xlu1 %917 }
 0x22f   : > { %11183 = vst [vmem:[#allocation37_spill] sm:$0xff] %v8796_v39  ;;  %v8803_v63 = vpop.permute.xlu0 %856 }
 0x230   : > { %v862_v26 = vsel %vm860_vm14, %v8762_v58, %v8803_v63 }
 0x236   : > { %v8862_v59 = vpop.permute.xlu2 %1061  ;;  %v8864_v41 = vpop.permute.xlu1 %923 }
 0x237   : > { %v8872_v4 = vpop.permute.xlu0 %921 }
 0x23e   : > { %v8912_v47 = vpop.permute.xlu2 %1067  ;;  %v8914_v25 = vpop.permute.xlu1 %988 }
 0x23f   : > { %v8925_v11 = vpop.permute.xlu0 %927 }
 0x246   : > { %v646_v28 = vpop.permute.xlu2 %645  ;;  %v8971_v39 = vpop.permute.xlu1 %994 }
 0x247   : > { %v648_v33 = vsel %vm647_vm0, %v8754_v15, %v646_v28  ;;  %v654_v8 = vsel %vm647_vm0, %v646_v28, %v8730_v6  ;;  %v8988_v5 = vpop.permute.xlu0 %992  ;;  %v833_v15 = vrot.slane %v8961_v34, 4  ;;  %v863_v6 = vsel %vm860_vm14, %v8782_v36, %v8762_v58 }
 0x248   : > { %v674_v60 = vmul.f32 %v660_v21, %v654_v8  ;;  %v680_v13 = vmul.f32 %v666_v1, %v648_v33  ;;  %v947_v28 = vperm.slane %v8936_v62, 3  ;;  %v888_v21 = vmul.f32 %v874_v20, %v866_v14 }
 0x249   : > { %v892_v1 = vmul.f32 %v878_v49, %v862_v26  ;;  %v891_v58 = vmul.f32 %v877_v3, %v863_v6  ;;  %v903_v3 = vrot.slane %v890_v51, 5  ;;  %v11193_v6 = vrot.slane %v8839_v24, 4 }
 0x24a   : > { %v693_v54 = vrot.slane %v680_v13, 2  ;;  %v694_v43 = vsel %vm614_vm3, %v674_v60, %v11188_v37  ;;  %v11189_v37 = vrot.slane %v8843_v23, 5  ;;  %v11192_v13 = vrot.slane %v8866_v9, 3 }
 0x24b   : > { %v696_v33 = vsel %vm618_vm4, %v694_v43, %v8906_v35  ;;  %v832_v35 = vrot.slane %v8967_v7, 5  ;;  %v902_v43 = vrot.slane %v889_v12, 6  ;;  %v905_v8 = vrot.slane %v892_v1, 3 }
 0x24c   : > { %v698_v36 = vsel %vm622_vm5, %v697_v53, %v693_v54  ;;  %v9023_v38 = vsel %vm616_vm2, %v11190_v44, %v11189_v37  ;;  %v11191_v53 = vperm.slane %v8870_v19, 5  ;;  %v901_v12 = vrot.slane %v888_v21, 7 }
 0x24d   : > { %v699_v20 = vsel %vm624_vm6, %v696_v33, %v698_v36  ;;  %v904_v14 = vrot.slane %v891_v58, 4  ;;  %v9047_v51 = vsel %vm620_vm1, %v11193_v6, %v11192_v13  ;;  %v9059_v21 = vor.u32 %v1012_v45, %v1011_v18  ;;  %v1082_v33 = vld [vmem:[#allocation4 + $0x7] ss:$8 sm:$0xf] }
 0x24e   : > { %702 = vst.msk [vmem:[#allocation2 + $0x1] ss:$8 sm:$0xf] %vm7480_vm7, %v699_v20  ;;  %v859_v54 = vpop.permute.xlu2 %858  ;;  %v9028_v50 = vpop.permute.xlu1 %1059  ;;  %v821_v49 = vmul.f32 %v11191_v53, %v791_v40  ;;  %v11194_v40 = vrot.slane %v8918_v30, 6  ;;  %v908_v9 = vsel %vm616_vm2, %v902_v43, %v903_v3  ;;  %v937_v24 = vsel %vm931_vm15, %v8798_v48, %v8768_v27 }
 0x24f   : > { %703 = vst.msk [vmem:[#allocation2 + $0x1] ss:$8 sm:$0x70] %vm7480_vm7, %v699_v20  ;;  %v861_v32 = vsel %vm860_vm14, %v8803_v63, %v859_v54  ;;  %v867_v23 = vsel %vm860_vm14, %v859_v54, %v8776_v61  ;;  %v9040_v7 = vpop.permute.xlu0 %998  ;;  %v11195_v61 = vrot.slane %v8916_v2, 4  ;;  %v9068_v36 = vsel %vm616_vm2, %v831_v29, %v832_v35 }
 0x250   : > { %v887_v26 = vmul.f32 %v873_v10, %v867_v23  ;;  %v893_v60 = vmul.f32 %v879_v22, %v861_v32  ;;  %v9052_v63 = vsel %vm616_vm2, %v11194_v40, %v761_v57  ;;  %v1083_v58 = vld [vmem:[#allocation4 + $0x7] ss:$8 sm:$0xf0]  ;;  %v834_v2 = vrot.slane %v821_v49, 3 }
 0x251   : > { %v9057_v1 = vsel %vm620_vm1, %v11195_v61, %v763_v31  ;;  %v910_v31 = vsel %vm620_vm1, %v904_v14, %v905_v8  ;;  %vm1002_vm0 = vcmp.lt.s32.totalorder %v7442_v17, 29  ;;  %v949_v22 = vperm.slane %v8936_v62, 5 }
 0x252   : > { %v906_v30 = vrot.slane %v893_v60, 2  ;;  %v907_v57 = vsel %vm614_vm3, %v887_v26, %v901_v12  ;;  %v1084_v45 = vor.u32 %v1083_v58, %v1082_v33  ;;  %v11196_v20 = vperm.slane %v8936_v62, 1 }
 0x253   : > { %v909_v10 = vsel %vm618_vm4, %v907_v57, %v908_v9  ;;  %v936_v29 = vsel %vm931_vm15, %v8768_v27, %v8872_v4  ;;  %v1016_v44 = vperm.slane %v9059_v21, 1  ;;  %v935_v43 = vsel %vm931_vm15, %v8872_v4, %v8864_v41 }
 0x254   : > { %v911_v18 = vsel %vm622_vm5, %v910_v31, %v906_v30  ;;  %v9077_v37 = vmul.f32 %v11196_v20, %v937_v24  ;;  %v1019_v3 = vperm.slane %v9059_v21, 4  ;;  %v1017_v54 = vperm.slane %v9059_v21, 2 }
 0x255   : > { %v912_v35 = vsel %vm624_vm6, %v909_v10, %v911_v18  ;;  %v1018_v53 = vperm.slane %v9059_v21, 3  ;;  %v9097_v27 = vsel %vm620_vm1, %v833_v15, %v834_v2  ;;  %vm1073_vm14 = vcmp.lt.s32.totalorder %v7442_v17, 28 }
 0x256   : > { %915 = vst.msk [vmem:[#allocation2 + $0x4] ss:$8 sm:$0xf] %vm7480_vm7, %v912_v35  ;;  %v1066_v49 = vpop.permute.xlu1 %1065  ;;  %v1088_v4 = vperm.slane %v1084_v45, 2  ;;  %v1089_v8 = vperm.slane %v1084_v45, 3  ;;  %v11197_v23 = vperm.slane %v8936_v62, 2  ;;  %v934_v60 = vsel %vm931_vm15, %v8864_v41, %v8774_v56 }
 0x257   : > { %916 = vst.msk [vmem:[#allocation2 + $0x4] ss:$8 sm:$0x70] %vm7480_vm7, %v912_v35  ;;  %v1064_v32 = vpop.permute.xlu0 %1063  ;;  %v1087_v14 = vperm.slane %v1084_v45, 1  ;;  %v972_v15 = vrot.slane %v9077_v37, 7  ;;  %v9118_v13 = vmul.f32 %v947_v28, %v935_v43  ;;  %v1020_v6 = vperm.slane %v9059_v21, 5  ;;  %v1072_v28 = vpop.permute.xlu2 %1071 }
 0x258   : > { %v9104_v12 = vmul.f32 %v11197_v23, %v936_v29  ;;  %v1077_v26 = vsel %vm1073_vm14, %v1064_v32, %v1066_v49  ;;  %v1078_v34 = vsel %vm1073_vm14, %v8862_v59, %v1064_v32  ;;  %v1008_v40 = vsel %vm1002_vm0, %v8914_v25, %v8780_v42  ;;  %v2274_v37 = vld [vmem:[#allocation12] sm:$0xff] }
 0x259   : > { %v933_v61 = vsel %vm931_vm15, %v8774_v56, %v8925_v11  ;;  %v1086_v33 = vperm.slane %v1084_v45, 0  ;;  %v1090_v58 = vperm.slane %v1084_v45, 4  ;;  %v1079_v41 = vsel %vm1073_vm14, %v9028_v50, %v8862_v59 }
 0x25a   : > { %v1076_v9 = vsel %vm1073_vm14, %v1066_v49, %v8912_v47  ;;  %v1102_v24 = vmul.f32 %v1088_v4, %v1078_v34  ;;  %v1103_v30 = vmul.f32 %v1089_v8, %v1077_v26  ;;  %v11198_v57 = vperm.slane %v8936_v62, 4  ;;  %v11199_v34 = vld [vmem:[#allocation37_spill] sm:$0xff] }
 0x25b   : > { %v973_v56 = vrot.slane %v9104_v12, 6  ;;  %v580_v31 = vperm.slane %v8786_v46, 0  ;;  %v586_v10 = vperm.slane %v8786_v46, 6  ;;  %v974_v18 = vrot.slane %v9118_v13, 5 }
 0x25c   : > { %v9138_v2 = vmul.f32 %v11198_v57, %v934_v60  ;;  %v9144_v59 = vmul.f32 %v1016_v44, %v1008_v40  ;;  %v1091_v20 = vperm.slane %v1084_v45, 5  ;;  %v1092_v29 = vperm.slane %v1084_v45, 6 }
 0x25d   : > { %v9146_v35 = vmul.f32 %v949_v22, %v933_v61  ;;  %v1101_v43 = vmul.f32 %v1087_v14, %v1079_v41  ;;  %v1080_v49 = vsel %vm1073_vm14, %v1072_v28, %v9028_v50  ;;  %v1104_v4 = vmul.f32 %v1090_v58, %v1076_v9  ;;  %v11200_v9 = vld [vmem:[#allocation32_spill] sm:$0xff] }
 0x25e   : > { %v565_v8 = vpop.permute.xlu1 %564  ;;  %v1115_v32 = vrot.slane %v1102_v24, 6  ;;  %v1116_v23 = vrot.slane %v1103_v30, 5  ;;  %v1005_v60 = vsel %vm1002_vm0, %v8971_v39, %v11199_v34  ;;  %v11201_v24 = vrot.slane %v11200_v9, 7 }
 0x25f   : > { %v569_v46 = vsel %vm568_vm8, %v8732_v52, %v565_v8  ;;  %v575_v44 = vsel %vm568_vm8, %v565_v8, %v8686_v16  ;;  %v1070_v45 = vpop.permute.xlu0 %1069  ;;  %v1100_v52 = vmul.f32 %v1086_v33, %v1080_v49  ;;  %v1114_v58 = vrot.slane %v1101_v43, 7 }
 0x260   : > { %v594_v22 = vmul.f32 %v580_v31, %v575_v44  ;;  %v600_v26 = vmul.f32 %v586_v10, %v569_v46  ;;  %v1074_v14 = vsel %vm1073_vm14, %v1070_v45, %v1072_v28  ;;  %v1075_v50 = vsel %vm1073_vm14, %v8912_v47, %v1070_v45 }
 0x261   : > { %v1105_v40 = vmul.f32 %v1091_v20, %v1075_v50  ;;  %v1106_v61 = vmul.f32 %v1092_v29, %v1074_v14  ;;  %v1117_v16 = vrot.slane %v1104_v4, 4  ;;  %v1121_v28 = vsel %vm616_vm2, %v1115_v32, %v1116_v23  ;;  %v11202_v29 = vld [vmem:[#allocation40_spill] sm:$0xff]  ;;  %v11204_v50 = vld [vmem:[#allocation29_spill] sm:$0xff] }
 0x262   : > { %v613_v41 = vrot.slane %v600_v26, 2  ;;  %v615_v30 = vsel %vm614_vm3, %v594_v22, %v11201_v24  ;;  %v802_v33 = vperm.slane %v8870_v19, 0  ;;  %v808_v20 = vperm.slane %v8870_v19, 6 }
 0x263   : > { %v619_v47 = vsel %vm618_vm4, %v615_v30, %v9023_v38  ;;  %v1118_v57 = vrot.slane %v1105_v40, 3  ;;  %v1119_v31 = vrot.slane %v1106_v61, 2  ;;  %v731_v43 = vperm.slane %v11202_v29, 0  ;;  %v11206_v30 = vld [vmem:[#allocation36_spill] sm:$0xff] }
 0x264   : > { %v623_v10 = vsel %vm622_vm5, %v9047_v51, %v613_v41  ;;  %v1120_v49 = vsel %vm614_vm3, %v1100_v52, %v1114_v58  ;;  %v737_v32 = vperm.slane %v11202_v29, 6  ;;  %v1006_v38 = vsel %vm1002_vm0, %v8988_v5, %v8971_v39  ;;  %v11205_v52 = vld [vmem:[#allocation42_spill] sm:$0xff] }
 0x265   : > { %v625_v4 = vsel %vm624_vm6, %v619_v47, %v623_v10  ;;  %v1123_v8 = vsel %vm620_vm1, %v1117_v16, %v1118_v57  ;;  %v1007_v19 = vsel %vm1002_vm0, %v8780_v42, %v8988_v5  ;;  %v1122_v51 = vsel %vm618_vm4, %v1120_v49, %v1121_v28  ;;  %v11203_v5 = vld [vmem:[#allocation41_spill] sm:$0xff] }
 0x266   : > { %631 = vst.msk [vmem:[#allocation2] ss:$8 sm:$0xf] %vm7480_vm7, %v625_v4  ;;  %v1124_v23 = vsel %vm622_vm5, %v1123_v8, %v1119_v31  ;;  %v788_v46 = vpop.permute.xlu1 %787  ;;  %v1004_v44 = vsel %vm1002_vm0, %v11199_v34, %v9040_v7  ;;  %v1032_v61 = vmul.f32 %v1018_v53, %v1006_v38  ;;  %v1031_v41 = vmul.f32 %v1017_v54, %v1007_v19  ;;  %v2305_v49 = vld [vmem:[%s10960_s6 + $0x8] sm:$0xff] }
 0x267   : > { %632 = vst.msk [vmem:[#allocation2] ss:$8 sm:$0x70] %vm7480_vm7, %v625_v4  ;;  %v1125_v39 = vsel %vm624_vm6, %v1122_v51, %v1124_v23  ;;  %v790_v42 = vsel %vm789_vm13, %v8778_v0, %v788_v46  ;;  %v796_v45 = vsel %vm789_vm13, %v788_v46, %v11203_v5  ;;  %v717_v22 = vpop.permute.xlu0 %716  ;;  %v1033_v0 = vmul.f32 %v1019_v3, %v1005_v60  ;;  %v11208_v60 = vld [vmem:[#allocation39_spill] sm:$0xff] }
 0x268   : > { %1128 = vst.msk [vmem:[#allocation2 + $0x7] ss:$8 sm:$0xf] %vm7480_vm7, %v1125_v39  ;;  %v816_v26 = vmul.f32 %v802_v33, %v796_v45  ;;  %v822_v14 = vmul.f32 %v808_v20, %v790_v42  ;;  %v719_v34 = vsel %vm718_vm12, %v11204_v50, %v717_v22  ;;  %v725_v40 = vsel %vm718_vm12, %v717_v22, %v11205_v52 }
 0x269   : > { %1129 = vst.msk [vmem:[#allocation2 + $0x7] ss:$8 sm:$0x70] %vm7480_vm7, %v1125_v39  ;;  %v745_v58 = vmul.f32 %v731_v43, %v725_v40  ;;  %v751_v16 = vmul.f32 %v737_v32, %v719_v34  ;;  %v1034_v9 = vmul.f32 %v1020_v6, %v1004_v44  ;;  %v11207_v28 = vrot.slane %v11206_v30, 7  ;;  %v2287_v30 = vld [vmem:[#allocation2 + $0x58] sm:$0xff] }
 0x26a   : > { %v835_v24 = vrot.slane %v822_v14, 2  ;;  %v11209_v57 = vrot.slane %v11208_v60, 7  ;;  %v1015_v10 = vperm.slane %v9059_v21, 0  ;;  %v1021_v33 = vperm.slane %v9059_v21, 6 }
 0x26b   : > { %v836_v47 = vsel %vm614_vm3, %v816_v26, %v11207_v28  ;;  %v764_v53 = vrot.slane %v751_v16, 2  ;;  %v944_v20 = vperm.slane %v8936_v62, 0  ;;  %v950_v43 = vperm.slane %v8936_v62, 6  ;;  %v2291_v16 = vld [vmem:[#allocation2 + $0x78] sm:$0xff]  ;;  %v2289_v28 = vld [vmem:[#allocation2 + $0x68] sm:$0xff] }
 0x26c   : > { %v838_v3 = vsel %vm618_vm4, %v836_v47, %v9068_v36  ;;  %v765_v31 = vsel %vm614_vm3, %v745_v58, %v11209_v57  ;;  %v840_v54 = vsel %vm622_vm5, %v9097_v27, %v835_v24  ;;  %v2304_v27 = vld [vmem:[%s10960_s6] sm:$0xff]  ;;  %v1044_v21 = vrot.slane %v1031_v41, 6  ;;  %v2303_v58 = vld [vmem:[#allocation2 + $0xd8] sm:$0x1]  ;;  %v2294_v41 = vld [vmem:[#allocation2 + $0x90] sm:$0xff] }
 0x26d   : > { %v767_v6 = vsel %vm618_vm4, %v765_v31, %v9052_v63  ;;  %v841_v29 = vsel %vm624_vm6, %v838_v3, %v840_v54  ;;  %v769_v36 = vsel %vm622_vm5, %v9057_v1, %v764_v53  ;;  %v1043_v63 = vrot.slane %v9144_v59, 7  ;;  %v2284_v24 = vld [vmem:[#allocation2 + $0x40] sm:$0xff]  ;;  %v2302_v53 = vld [vmem:[#allocation2 + $0xd0] sm:$0x1]  ;;  %v2295_v57 = vld [vmem:[#allocation2 + $0x98] sm:$0xff] }
 0x26e   : > { %v1045_v4 = vrot.slane %v1032_v61, 5  ;;  %844 = vst.msk [vmem:[#allocation2 + $0x3] ss:$8 sm:$0xf] %vm7480_vm7, %v841_v29  ;;  %v770_v8 = vsel %vm624_vm6, %v767_v6, %v769_v36  ;;  %v1001_v1 = vpop.permute.xlu1 %1000  ;;  %v7137_v32 = vmov 0   ;;  %v976_v62 = vrot.slane %v9146_v35, 3 }
 0x26f   : > { %6726 = vset.pattern.permute.xlu1 %v7137_v32  ;;  %6725 = vset.pattern.permute.xlu0 %v7137_v32  ;;  %v1047_v38 = vrot.slane %v1034_v9, 3  ;;  %845 = vst.msk [vmem:[#allocation2 + $0x3] ss:$8 sm:$0x70] %vm7480_vm7, %v841_v29  ;;  %v1003_v59 = vsel %vm1002_vm0, %v9040_v7, %v1001_v1  ;;  %v1009_v19 = vsel %vm1002_vm0, %v1001_v1, %v8914_v25  ;;  %v930_v51 = vpop.permute.xlu0 %929  ;;  %v975_v44 = vrot.slane %v9138_v2, 4  ;;  %v2296_v9 = vld [vmem:[#allocation2 + $0xa0] sm:$0xff] }
 0x270   : > { %2313 = vperm.xlu1 %6726, %v2305_v49   ;;  %2308 = vperm.xlu0 %6725, %v2304_v27   ;;  %773 = vst.msk [vmem:[#allocation2 + $0x2] ss:$8 sm:$0xf] %vm7480_vm7, %v770_v8  ;;  %v1029_v23 = vmul.f32 %v1015_v10, %v1009_v19  ;;  %v1035_v35 = vmul.f32 %v1021_v33, %v1003_v59  ;;  %v1046_v39 = vrot.slane %v1033_v0, 4  ;;  %v2298_v61 = vld [vmem:[#allocation2 + $0xb0] sm:$0x1] }
 0x271   : > { %v932_v46 = vsel %vm931_vm15, %v8925_v11, %v930_v51  ;;  %v938_v7 = vsel %vm931_vm15, %v930_v51, %v8798_v48  ;;  %774 = vst.msk [vmem:[#allocation2 + $0x2] ss:$8 sm:$0x70] %vm7480_vm7, %v770_v8  ;;  %6797 = vset.pattern.permute.xlu2 %v7137_v32  ;;  %v979_v5 = vsel %vm616_vm2, %v973_v56, %v974_v18  ;;  %v2288_v31 = vld [vmem:[#allocation2 + $0x60] sm:$0xff]  ;;  %vm11232_vm8 = vcmp.lt.s32.totalorder %v7442_v17, 1 }
 0x272   : > { %v958_v25 = vmul.f32 %v944_v20, %v938_v7  ;;  %v964_v42 = vmul.f32 %v950_v43, %v932_v46  ;;  %v1050_v11 = vsel %vm616_vm2, %v1044_v21, %v1045_v4  ;;  %v1048_v45 = vrot.slane %v1035_v35, 2  ;;  %vm11233_vm12 = vmmov %vm11232_vm8 }
 0x273   : > { %v1049_v48 = vsel %vm614_vm3, %v1029_v23, %v1043_v63  ;;  %v1052_v2 = vsel %vm620_vm1, %v1046_v39, %v1047_v38  ;;  %v981_v13 = vsel %vm620_vm1, %v975_v44, %v976_v62  ;;  %vm2316_vm1 = vcmask 203776  }
 0x274   : > { %v1051_v22 = vsel %vm618_vm4, %v1049_v48, %v1050_v11  ;;  %v977_v26 = vrot.slane %v964_v42, 2  ;;  %v978_v14 = vsel %vm614_vm3, %v958_v25, %v972_v15  ;;  %v1053_v12 = vsel %vm622_vm5, %v1052_v2, %v1048_v45  ;;  %v2275_v15 = vld [vmem:[#allocation12 + $0x8] sm:$0xff] }
 0x275   : > { %v980_v56 = vsel %vm618_vm4, %v978_v14, %v979_v5  ;;  %v1054_v18 = vsel %vm624_vm6, %v1051_v22, %v1053_v12  ;;  %vm3704_vm2 = vcmp.lt.s32.totalorder %v7442_v17, 14  ;;  %vm3911_vm4 = vcmp.lt.s32.totalorder %v7442_v17, 116 }
 0x276   : > { %v982_v50 = vsel %vm622_vm5, %v981_v13, %v977_v26  ;;  %1057 = vst.msk [vmem:[#allocation2 + $0x6] ss:$8 sm:$0xf] %vm7480_vm7, %v1054_v18  ;;  %vm3648_vm5 = vcmp.lt.s32.totalorder %v7442_v17, 16  ;;  %vm11236_vm13 = vcmp.lt.s32.totalorder %v7442_v17, 2 }
 0x277   : > { %v983_v34 = vsel %vm624_vm6, %v980_v56, %v982_v50  ;;  %1058 = vst.msk [vmem:[#allocation2 + $0x6] ss:$8 sm:$0x70] %vm7480_vm7, %v1054_v18  ;;  %vm11230_vm6 = vcmp.lt.s32.totalorder %v7442_v17, 126 }
 0x278   : > { %986 = vst.msk [vmem:[#allocation2 + $0x5] ss:$8 sm:$0xf] %vm7480_vm7, %v983_v34 }
 0x279   : > { %987 = vst.msk [vmem:[#allocation2 + $0x5] ss:$8 sm:$0x70] %vm7480_vm7, %v983_v34  ;;  %vm11231_vm7 = vmmov %vm11230_vm6 }
 0x27f   : > { %v2276_v52 = vld [vmem:[#allocation2] sm:$0xff]  ;;  %v2278_v40 = vld [vmem:[#allocation2 + $0x10] sm:$0xff]  ;;  %v2279_v0 = vld [vmem:[#allocation2 + $0x18] sm:$0xff] }
 0x280   : > { %2359 = vmatpush.msra.mxu0 %v2276_v52  ;;  %6572 = vmatpush.msra.mxu1 %v2276_v52  ;;  %v2277_v47 = vld [vmem:[#allocation2 + $0x8] sm:$0xff]  ;;  %v2280_v3 = vld [vmem:[#allocation2 + $0x20] sm:$0xff]  ;;  %v2282_v60 = vld [vmem:[#allocation2 + $0x30] sm:$0xff] }
 0x281   : > { %2405 = vmatpush.msra.mxu2 %v2278_v40  ;;  %2428 = vmatpush.msra.mxu3 %v2279_v0  ;;  %v2281_v10 = vld [vmem:[#allocation2 + $0x28] sm:$0xff] }
 0x282   : > { %5489 = vmatmul.msk.f32.vlgmr.msra.gmra.mxu0 %vm2316_vm1, %v2274_v37  ;;  %5490 = vmatmul.msk.f32.vlgmr.msra.gmra.mxu1 %vm2316_vm1, %v2275_v15 }
 0x283   : > { %5491 = vmatpush.msk.msrb.mxu1 %vm614_vm3, %v2298_v61  ;;  %5495 = vmatmul.msk.f32.vlgmr.msra.gmra.mxu2 %vm2316_vm1, %v2274_v37 }
 0x284   : > { %5498 = vmatmul.msk.f32.vlgmr.msra.gmra.mxu3 %vm2316_vm1, %v2274_v37  ;;  %5500 = vmatpush.msk.msrb.mxu0 %vm614_vm3, %v2301_v55 }
 0x285   : > { %5506 = vmatpush.msk.msrb.mxu2 %vm614_vm3, %v2303_v58  ;;  %2380 = vmatpush.msrb.mxu1 %v2291_v16 }
 0x286   : > { %2449 = vmatpush.msrb.mxu0 %v2294_v41 }
 0x287   : > { %2495 = vmatpush.msrb.mxu2 %v2296_v9  ;;  %2381 = vmatpush.msrb.mxu1 %v2284_v24  ;;  %v5631_v9 = vld [vmem:[#allocation7 + $0xf0] sm:$0xf]  ;;  %v6390_v24 = vld [vmem:[#allocation7 + $0xf4] sm:$0xf0] }
 0x288   : > { %2450 = vmatpush.msrb.mxu0 %v2287_v30  ;;  %v5567_v30 = vld [vmem:[#allocation7 + $0x70] sm:$0xf] }
 0x289   : > { %2496 = vmatpush.msrb.mxu2 %v2289_v28  ;;  %2382 = vmatpush.msrb.mxu1 %v2277_v47  ;;  %v5632_v28 = vor.u32 %v6390_v24, %v5631_v9  ;;  %v6374_v47 = vld [vmem:[#allocation7 + $0x74] sm:$0xf0] }
 0x28a   : > { %2451 = vmatpush.msrb.mxu0 %v2280_v3  ;;  %5492 = vmatmul.msk.f32.vlgmr.msrb.gmra.mxu1 %vm2316_vm1, %v2274_v37  ;;  %v5623_v3 = vld [vmem:[#allocation7 + $0xe0] sm:$0xf] }
 0x28b   : > { %5503 = vmatpush.msk.msra.mxu1 %vm614_vm3, %v2302_v53  ;;  %2497 = vmatpush.msrb.mxu2 %v2282_v60  ;;  %v6388_v53 = vld [vmem:[#allocation7 + $0xe4] sm:$0xf0]  ;;  %v5568_v60 = vor.u32 %v6374_v47, %v5567_v30  ;;  %vm3676_vm3 = vcmp.lt.s32.totalorder %v7442_v17, 15 }
 0x28c   : > { %5496 = vmatmul.msk.f32.gmra.mxu2 %vm2316_vm1, %v2275_v15  ;;  %5499 = vmatmul.msk.f32.gmra.mxu3 %vm2316_vm1, %v2275_v15  ;;  %v6404_v47 = vld [vmem:[#allocation7 + $0x164] sm:$0xf0] }
 0x28d   : > { %5501 = vmatmul.msk.f32.vlgmr.msrb.gmra.mxu0 %vm2316_vm1, %v2274_v37  ;;  %2472 = vmatpush.msra.mxu1 %v2295_v57  ;;  %v5559_v57 = vld [vmem:[#allocation7 + $0x60] sm:$0xf] }
 0x28e   : > { %3324 = vmatpush.bf16.msra.mxu0 %v5632_v28  ;;  %3310 = vmatpush.bf16.msrb.mxu3 %v5568_v60 }
 0x28f   : > { %2473 = vmatpush.msra.mxu1 %v2288_v31  ;;  %v6372_v31 = vld [vmem:[#allocation7 + $0x64] sm:$0xf0] }
 0x291   : > { %2474 = vmatpush.msra.mxu1 %v2281_v10  ;;  %v5615_v10 = vld [vmem:[#allocation7 + $0xd0] sm:$0xf] }
 0x292   : > { %5493 = vmatmul.msk.f32.gmra.mxu1 %vm2316_vm1, %v2275_v15 }
 0x294   : > { %5507 = vmatmul.msk.f32.vlgmr.msrb.gmra.mxu2 %vm2316_vm1, %v2274_v37 }
 0x295   : > { %5502 = vmatmul.msk.f32.gmra.mxu0 %vm2316_vm1, %v2275_v15 }
 0x29a   : > { %5504 = vmatmul.msk.f32.vlgmr.msra.gmra.mxu1 %vm2316_vm1, %v2274_v37 }
 0x29c   : > { %5508 = vmatmul.msk.f32.gmra.mxu2 %vm2316_vm1, %v2275_v15 }
 0x2a2   : > { %5505 = vmatmul.msk.f32.gmra.mxu1 %vm2316_vm1, %v2275_v15  ;;  %vm11237_vm1 = vmmov %vm11236_vm13 }
 0x2e2   : > { %v2314_v54 = vpop.permute.xlu1 %2313  ;;  %v2309_v6 = vpop.permute.xlu0 %2308 }
 0x2ff   : > { %v2361_v33 = vpop.f32.mrf.mxu0  ;;  %v2364_v20 = vpop.f32.mrf.mxu1 }
 0x300   : > { %v9317_v29 = vadd.f32 %v2364_v20, %v2314_v54  ;;  %v9319_v36 = vadd.f32 %v2361_v33, %v2309_v6  ;;  %v6386_v33 = vld [vmem:[#allocation7 + $0xd4] sm:$0xf0]  ;;  %v5551_v20 = vld [vmem:[#allocation7 + $0x50] sm:$0xf] }
 0x301   : > { %v5616_v30 = vor.u32 %v6386_v33, %v5615_v10 }
 0x302   : > { %v2512_v43 = vmax.f32 %v9317_v29, 0.0  ;;  %v2505_v49 = vmax.f32 %v9319_v36, 0.0 }
 0x304   : > { %v6727_v27 = vpack.i.bf16 %v2512_v43, %v2505_v49 }
 0x306   : > { %v2407_v63 = vpop.f32.mrf.mxu2  ;;  %6728 = vrot.lane.b32.xlu2 %v6727_v27, %s7126_s20  ;;  %v6370_v27 = vld [vmem:[#allocation7 + $0x54] sm:$0xf0] }
 0x307   : > { %v2430_v21 = vpop.f32.mrf.mxu3  ;;  %v2384_v4 = vpop.f32.mrf.mxu1  ;;  %v9330_v32 = vadd.f32 %v2407_v63, %v2309_v6  ;;  %v5560_v63 = vor.u32 %v6372_v31, %v5559_v57  ;;  %v5552_v28 = vor.u32 %v6370_v27, %v5551_v20  ;;  %v5679_v20 = vld [vmem:[#allocation7 + $0x150] sm:$0xf] }
 0x308   : > { %v9328_v1 = vadd.f32 %v2430_v21, %v2309_v6  ;;  %v9332_v62 = vadd.f32 %v2384_v4, %v2309_v6  ;;  %v5695_v21 = vld [vmem:[#allocation7 + $0x170] sm:$0xf]  ;;  %v6406_v4 = vld [vmem:[#allocation7 + $0x174] sm:$0xf0] }
 0x309   : > { %v2507_v7 = vmax.f32 %v9330_v32, 0.0  ;;  %3311 = vmatpush.bf16.msrb.mxu3 %v5560_v63 }
 0x30a   : > { %v2453_v8 = vpop.f32.mrf.mxu0  ;;  %v2508_v19 = vmax.f32 %v9328_v1, 0.0  ;;  %v2506_v42 = vmax.f32 %v9332_v62, 0.0 }
 0x30b   : > { %v9354_v48 = vadd.f32 %v2453_v8, %v2309_v6  ;;  %v5759_v8 = vld [vmem:[#allocation7 + $0x1f0] sm:$0xf] }
 0x30d   : > { %v2509_v13 = vmax.f32 %v9354_v48, 0.0  ;;  %3312 = vmatpush.bf16.msrb.mxu3 %v5552_v28  ;;  %v6416_v28 = vld [vmem:[#allocation7 + $0x1c4] sm:$0xf0]  ;;  %v5519_v48 = vld [vmem:[#allocation7 + $0x10] sm:$0xf] }
 0x30f   : > { %v2410_v38 = vpop.f32.mrf.mxu2  ;;  %v2433_v59 = vpop.f32.mrf.mxu3 }
 0x310   : > { %v9335_v51 = vadd.f32 %v2410_v38, %v2314_v54  ;;  %v9337_v23 = vadd.f32 %v2433_v59, %v2314_v54  ;;  %v2387_v35 = vpop.f32.mrf.mxu1  ;;  %v5696_v59 = vor.u32 %v6406_v4, %v5695_v21 }
 0x311   : > { %v9339_v46 = vadd.f32 %v2387_v35, %v2314_v54  ;;  %v6422_v35 = vld [vmem:[#allocation7 + $0x1f4] sm:$0xf0] }
 0x312   : > { %v2514_v44 = vmax.f32 %v9335_v51, 0.0  ;;  %v2515_v39 = vmax.f32 %v9337_v23, 0.0  ;;  %v2456_v25 = vpop.f32.mrf.mxu0  ;;  %3338 = vmatpush.bf16.msrb.mxu1 %v5696_v59  ;;  %v6402_v59 = vld [vmem:[#allocation7 + $0x154] sm:$0xf0]  ;;  %v5583_v23 = vld [vmem:[#allocation7 + $0x90] sm:$0xf] }
 0x313   : > { %v2513_v5 = vmax.f32 %v9339_v46, 0.0  ;;  %v9360_v22 = vadd.f32 %v2456_v25, %v2314_v54  ;;  %v9397_v25 = vld [vmem:[#allocation7 + $0xc0] sm:$0xf]  ;;  %v6382_v46 = vld [vmem:[#allocation7 + $0xb4] sm:$0xf0] }
 0x314   : > { %v6737_v11 = vpack.i.bf16 %v2514_v44, %v2507_v7  ;;  %v6742_v45 = vpack.i.bf16 %v2515_v39, %v2508_v19 }
 0x315   : > { %v6732_v2 = vpack.i.bf16 %v2513_v5, %v2506_v42  ;;  %v2516_v12 = vmax.f32 %v9360_v22, 0.0 }
 0x316   : > { %6743 = vrot.lane.b32.xlu0 %v6742_v45, %s7126_s20  ;;  %6738 = vrot.lane.b32.xlu2 %v6737_v11, %s7126_s20  ;;  %v9399_v11 = vld [vmem:[#allocation7 + $0xc4] sm:$0xf0] }
 0x317   : > { %v2499_v26 = vpop.f32.mrf.mxu2  ;;  %6733 = vrot.lane.b32.xlu1 %v6732_v2, %s7126_s20  ;;  %v6747_v56 = vpack.i.bf16 %v2516_v12, %v2509_v13  ;;  %v5608_v31 = vor.u32 %v9399_v11, %v9397_v25  ;;  %v6418_v25 = vld [vmem:[#allocation7 + $0x1d4] sm:$0xf0]  ;;  %v5599_v11 = vld [vmem:[#allocation7 + $0xb0] sm:$0xf] }
 0x318   : > { %v2476_v14 = vpop.f32.mrf.mxu1  ;;  %v9371_v18 = vadd.f32 %v2499_v26, %v2309_v6 }
 0x319   : > { %v9373_v50 = vadd.f32 %v2476_v14, %v2309_v6  ;;  %v5624_v6 = vor.u32 %v6388_v53, %v5623_v3  ;;  %v5751_v3 = vld [vmem:[#allocation7 + $0x1e0] sm:$0xf]  ;;  %v6420_v53 = vld [vmem:[#allocation7 + $0x1e4] sm:$0xf0] }
 0x31a   : > { %v2511_v40 = vmax.f32 %v9371_v18, 0.0  ;;  %v5752_v33 = vor.u32 %v6420_v53, %v5751_v3  ;;  %v5600_v53 = vor.u32 %v6382_v46, %v5599_v11 }
 0x31b   : > { %v2510_v61 = vmax.f32 %v9373_v50, 0.0  ;;  %3325 = vmatpush.bf16.msra.mxu0 %v5624_v6 }
 0x31f   : > { %v2502_v34 = vpop.f32.mrf.mxu2  ;;  %6748 = vrot.lane.b32.xlu1 %v6747_v56, %s7126_s20  ;;  %v5760_v56 = vor.u32 %v6422_v35, %v5759_v8  ;;  %v5743_v35 = vld [vmem:[#allocation7 + $0x1d0] sm:$0xf]  ;;  %3326 = vmatpush.bf16.msra.mxu0 %v5616_v30  ;;  %v5735_v30 = vld [vmem:[#allocation7 + $0x1c0] sm:$0xf] }
 0x320   : > { %v9376_v37 = vadd.f32 %v2502_v34, %v2314_v54  ;;  %v2479_v15 = vpop.f32.mrf.mxu1  ;;  %v9404_v34 = vld [vmem:[#allocation7 + $0x40] sm:$0xf]  ;;  %v5744_v36 = vor.u32 %v6418_v25, %v5743_v35  ;;  %v5663_v25 = vld [vmem:[#allocation7 + $0x130] sm:$0xf] }
 0x321   : > { %v9378_v52 = vadd.f32 %v2479_v15, %v2314_v54  ;;  %v9406_v15 = vld [vmem:[#allocation7 + $0x44] sm:$0xf0]  ;;  %3352 = vmatpush.bf16.msra.mxu2 %v5760_v56 }
 0x322   : > { %v2518_v0 = vmax.f32 %v9376_v37, 0.0  ;;  %v5544_v6 = vor.u32 %v9406_v15, %v9404_v34  ;;  %v5680_v15 = vor.u32 %v6402_v59, %v5679_v20  ;;  %v6364_v20 = vld [vmem:[#allocation7 + $0x24] sm:$0xf0] }
 0x323   : > { %v2517_v55 = vmax.f32 %v9378_v52, 0.0  ;;  %3327 = vmatpush.bf16.msra.mxu0 %v5608_v31  ;;  %v5887_v52 = vld [vmem:[#allocation7 + $0x2f0] sm:$0xf] }
 0x324   : > { %v6757_v58 = vpack.i.bf16 %v2518_v0, %v2511_v40  ;;  %3313 = vmatpush.bf16.msrb.mxu3 %v5544_v6 }
 0x325   : > { %v6752_v16 = vpack.i.bf16 %v2517_v55, %v2510_v61  ;;  %3353 = vmatpush.bf16.msra.mxu2 %v5752_v33  ;;  %v5527_v33 = vld [vmem:[#allocation7 + $0x20] sm:$0xf] }
 0x326   : > { %6758 = vrot.lane.b32.xlu0 %v6757_v58, %s7126_s20  ;;  %v5687_v58 = vld [vmem:[#allocation7 + $0x160] sm:$0xf] }
 0x327   : > { %6753 = vrot.lane.b32.xlu2 %v6752_v16, %s7126_s20  ;;  %3328 = vmatpush.bf16.msra.mxu0 %v5600_v53  ;;  %v5719_v53 = vld [vmem:[#allocation7 + $0x1a0] sm:$0xf] }
 0x329   : > { %3354 = vmatpush.bf16.msra.mxu2 %v5744_v36  ;;  %v5575_v36 = vld [vmem:[#allocation7 + $0x80] sm:$0xf] }
 0x360   : > { %v9394_v41 = vpop.permute.xlu2 %6728 }
 0x361   : > { %v6731_v38 = vunpack.i.h.bf16 %v9394_v41  ;;  %v6730_v45 = vunpack.i.l.bf16 %v9394_v41 }
 0x370   : > { %v6739_v54 = vpop.permute.xlu2 %6738 }
 0x371   : > { %v6741_v2 = vunpack.i.h.bf16 %v6739_v54  ;;  %v6740_v26 = vunpack.i.l.bf16 %v6739_v54  ;;  %v5688_v54 = vor.u32 %v6404_v47, %v5687_v58  ;;  %v6380_v58 = vld [vmem:[#allocation7 + $0xa4] sm:$0xf0] }
 0x373   : > { %3339 = vmatpush.bf16.msrb.mxu1 %v5688_v54 }
 0x377   : > { %3340 = vmatpush.bf16.msrb.mxu1 %v5680_v15 }
 0x388   : > { %v9402_v14 = vpop.permute.xlu0 %6743 }
 0x389   : > { %v6746_v16 = vunpack.i.h.bf16 %v9402_v14  ;;  %v6745_v9 = vunpack.i.l.bf16 %v9402_v14  ;;  %v6734_v24 = vpop.permute.xlu1 %6733 }
 0x38a   : > { %v6736_v60 = vunpack.i.h.bf16 %v6734_v24  ;;  %v6735_v57 = vunpack.i.l.bf16 %v6734_v24  ;;  %v5671_v24 = vld [vmem:[#allocation7 + $0x140] sm:$0xf] }
 0x38b   : > { %v2553_v21 = vsel %vm1436_vm11, %v6740_v26, %v6745_v9  ;;  %v2554_v10 = vsel %vm1436_vm11, %v6741_v2, %v6746_v16 }
 0x38c   : > { %v9424_v27 = vmax.f32 %v2507_v7, %v2553_v21  ;;  %v9428_v63 = vmax.f32 %v2514_v44, %v2554_v10  ;;  %v2555_v4 = vsel %vm1436_vm11, %v6735_v57, %v6740_v26  ;;  %v2556_v8 = vsel %vm1436_vm11, %v6736_v60, %v6741_v2  ;;  %v9450_v2 = vpop.permute.xlu2 %6753 }
 0x38d   : > { %v2557_v32 = vsel %vm1436_vm11, %v6730_v45, %v6735_v57  ;;  %v2558_v51 = vsel %vm1436_vm11, %v6731_v38, %v6736_v60  ;;  %v9444_v7 = vmax.f32 %v2506_v42, %v2555_v4  ;;  %v9448_v44 = vmax.f32 %v2513_v5, %v2556_v8  ;;  %v5535_v42 = vld [vmem:[#allocation7 + $0x30] sm:$0xf]  ;;  %v6366_v5 = vld [vmem:[#allocation7 + $0x34] sm:$0xf0] }
 0x38e   : > { %v9454_v26 = vmax.f32 %v2505_v49, %v2557_v32  ;;  %v9458_v56 = vmax.f32 %v2512_v43, %v2558_v51  ;;  %v6772_v62 = vpack.i.bf16 %v9428_v63, %v9424_v27  ;;  %v5591_v49 = vld [vmem:[#allocation7 + $0xa0] sm:$0xf]  ;;  %v6400_v43 = vld [vmem:[#allocation7 + $0x144] sm:$0xf0]  ;;  %v6756_v47 = vunpack.i.h.bf16 %v9450_v2  ;;  %v6398_v32 = vld [vmem:[#allocation7 + $0x134] sm:$0xf0] }
 0x38f   : > { %v6767_v34 = vpack.i.bf16 %v9448_v44, %v9444_v7  ;;  %v6755_v60 = vunpack.i.l.bf16 %v9450_v2  ;;  %v5536_v21 = vor.u32 %v6366_v5, %v5535_v42  ;;  %v5592_v10 = vor.u32 %v6380_v58, %v5591_v49  ;;  %v6414_v2 = vld [vmem:[#allocation7 + $0x1b4] sm:$0xf0]  ;;  %v6376_v49 = vld [vmem:[#allocation7 + $0x84] sm:$0xf0] }
 0x390   : > { %6773 = vrot.lane.b32.xlu0 %v6772_v62, %s11046_s19  ;;  %v6762_v29 = vpack.i.bf16 %v9458_v56, %v9454_v26  ;;  %v5672_v4 = vor.u32 %v6400_v43, %v5671_v24  ;;  %v5736_v8 = vor.u32 %v6416_v28, %v5735_v30  ;;  %v5528_v62 = vor.u32 %v6364_v20, %v5527_v33  ;;  %v5879_v33 = vld [vmem:[#allocation7 + $0x2e0] sm:$0xf] }
 0x391   : > { %v6749_v3 = vpop.permute.xlu1 %6748  ;;  %6768 = vrot.lane.b32.xlu2 %v6767_v34, %s11046_s19  ;;  %3314 = vmatpush.bf16.msrb.mxu3 %v5536_v21  ;;  %v5664_v22 = vor.u32 %v6398_v32, %v5663_v25  ;;  %v5576_v41 = vor.u32 %v6376_v49, %v5575_v36  ;;  %v5823_v21 = vld [vmem:[#allocation7 + $0x270] sm:$0xf]  ;;  %v6410_v25 = vld [vmem:[#allocation7 + $0x194] sm:$0xf0]  ;;  %v5815_v32 = vld [vmem:[#allocation7 + $0x260] sm:$0xf] }
 0x392   : > { %v6751_v57 = vunpack.i.h.bf16 %v6749_v3  ;;  %v6750_v54 = vunpack.i.l.bf16 %v6749_v3  ;;  %6763 = vrot.lane.b32.xlu1 %v6762_v29, %s11046_s19  ;;  %3341 = vmatpush.bf16.msrb.mxu1 %v5672_v4  ;;  %v6396_v3 = vld [vmem:[#allocation7 + $0x124] sm:$0xf0]  ;;  %v6470_v36 = vld [vmem:[#allocation7 + $0x374] sm:$0xf0]  ;;  %v6373_v49 = vld [vmem:[#allocation7 + $0x74] sm:$0xf] }
 0x393   : > { %3355 = vmatpush.bf16.msra.mxu2 %v5736_v8  ;;  %3329 = vmatpush.bf16.msra.mxu0 %v5592_v10  ;;  %v6438_v10 = vld [vmem:[#allocation7 + $0x274] sm:$0xf0]  ;;  %v6452_v4 = vld [vmem:[#allocation7 + $0x2e4] sm:$0xf0]  ;;  %v5647_v8 = vld [vmem:[#allocation7 + $0x110] sm:$0xf] }
 0x394   : > { %v2552_v31 = vsel %vm1436_vm11, %v6746_v16, %v6751_v57  ;;  %v2549_v59 = vsel %vm1436_vm11, %v6750_v54, %v6755_v60  ;;  %v2550_v35 = vsel %vm1436_vm11, %v6751_v57, %v6756_v47  ;;  %v2551_v6 = vsel %vm1436_vm11, %v6745_v9, %v6750_v54  ;;  %v5727_v9 = vld [vmem:[#allocation7 + $0x1b0] sm:$0xf] }
 0x395   : > { %v9485_v51 = vmax.f32 %v2515_v39, %v2552_v31  ;;  %v9489_v16 = vmax.f32 %v2508_v19, %v2551_v6  ;;  %v9493_v11 = vmax.f32 %v2509_v13, %v2549_v59  ;;  %v9497_v14 = vmax.f32 %v2516_v12, %v2550_v35  ;;  %v6378_v39 = vld [vmem:[#allocation7 + $0x94] sm:$0xf0]  ;;  %3315 = vmatpush.bf16.msrb.mxu3 %v5528_v62  ;;  %v5711_v6 = vld [vmem:[#allocation7 + $0x190] sm:$0xf] }
 0x396   : > { %v6362_v13 = vld [vmem:[#allocation7 + $0x14] sm:$0xf0]  ;;  %v5728_v46 = vor.u32 %v6414_v2, %v5727_v9  ;;  %v5584_v34 = vor.u32 %v6378_v39, %v5583_v23  ;;  %3342 = vmatpush.bf16.msrb.mxu1 %v5664_v22  ;;  %v5824_v20 = vor.u32 %v6438_v10, %v5823_v21  ;;  %v5880_v59 = vor.u32 %v6452_v4, %v5879_v33  ;;  %v6436_v2 = vld [vmem:[#allocation7 + $0x264] sm:$0xf0]  ;;  %v5871_v23 = vld [vmem:[#allocation7 + $0x2d0] sm:$0xf] }
 0x397   : > { %v6782_v1 = vpack.i.bf16 %v9497_v14, %v9493_v11  ;;  %v6777_v19 = vpack.i.bf16 %v9485_v51, %v9489_v16  ;;  %v5520_v15 = vor.u32 %v6362_v13, %v5519_v48  ;;  %v6394_v31 = vld [vmem:[#allocation7 + $0x114] sm:$0xf0]  ;;  %v5712_v9 = vor.u32 %v6410_v25, %v5711_v6  ;;  %v6392_v48 = vld [vmem:[#allocation7 + $0x104] sm:$0xf0]  ;;  %v5703_v13 = vld [vmem:[#allocation7 + $0x180] sm:$0xf] }
 0x398   : > { %v6759_v12 = vpop.permute.xlu0 %6758  ;;  %3356 = vmatpush.bf16.msra.mxu2 %v5728_v46  ;;  %3330 = vmatpush.bf16.msra.mxu0 %v5584_v34  ;;  %v5648_v35 = vor.u32 %v6394_v31, %v5647_v8  ;;  %v5816_v62 = vor.u32 %v6436_v2, %v5815_v32  ;;  %v6450_v39 = vld [vmem:[#allocation7 + $0x2d4] sm:$0xf0]  ;;  %v5807_v46 = vld [vmem:[#allocation7 + $0x250] sm:$0xf]  ;;  %v5553_v4 = vld [vmem:[#allocation7 + $0x58] sm:$0xf0] }
 0x399   : > { %v6761_v42 = vunpack.i.h.bf16 %v6759_v12  ;;  %v6760_v5 = vunpack.i.l.bf16 %v6759_v12  ;;  %6783 = vrot.lane.b32.xlu2 %v6782_v1, %s11046_s19  ;;  %3316 = vmatpush.bf16.msrb.mxu3 %v5520_v15  ;;  %v5872_v1 = vor.u32 %v6450_v39, %v5871_v23  ;;  %v6408_v12 = vld [vmem:[#allocation7 + $0x184] sm:$0xf0]  ;;  %v5951_v15 = vld [vmem:[#allocation7 + $0x370] sm:$0xf]  ;;  %v6430_v21 = vld [vmem:[#allocation7 + $0x234] sm:$0xf0] }
 0x39a   : > { %6778 = vrot.lane.b32.xlu1 %v6777_v19, %s11046_s19  ;;  %v5639_v19 = vld [vmem:[#allocation7 + $0x100] sm:$0xf]  ;;  %v5935_v10 = vld [vmem:[#allocation7 + $0x350] sm:$0xf]  ;;  %v6466_v33 = vld [vmem:[#allocation7 + $0x354] sm:$0xf0] }
 0x39b   : > { %v2547_v58 = vsel %vm1436_vm11, %v6755_v60, %v6760_v5  ;;  %v2548_v24 = vsel %vm1436_vm11, %v6756_v47, %v6761_v42  ;;  %v2559_v29 = vsel %vm1436_vm11, %v6760_v5, %v6730_v45  ;;  %v2560_v43 = vsel %vm1436_vm11, %v6761_v42, %v6731_v38  ;;  %v6412_v60 = vld [vmem:[#allocation7 + $0x1a4] sm:$0xf0]  ;;  %v6434_v42 = vld [vmem:[#allocation7 + $0x254] sm:$0xf0]  ;;  %v5847_v8 = vld [vmem:[#allocation7 + $0x2a0] sm:$0xf] }
 0x39c   : > { %v9519_v30 = vmax.f32 %v2510_v61, %v2547_v58  ;;  %v9523_v28 = vmax.f32 %v2511_v40, %v2559_v29  ;;  %v9527_v47 = vmax.f32 %v2517_v55, %v2548_v24  ;;  %v9531_v45 = vmax.f32 %v2518_v0, %v2560_v43  ;;  %3331 = vmatpush.bf16.msra.mxu0 %v5576_v41  ;;  %v6454_v40 = vld [vmem:[#allocation7 + $0x2f4] sm:$0xf0]  ;;  %v5511_v0 = vld [vmem:[#allocation7] sm:$0xf]  ;;  %v6360_v61 = vld [vmem:[#allocation7 + $0x4] sm:$0xf0] }
 0x39d   : > { %v5888_v37 = vor.u32 %v6454_v40, %v5887_v52  ;;  %v5655_v55 = vld [vmem:[#allocation7 + $0x120] sm:$0xf]  ;;  %v5512_v38 = vor.u32 %v6360_v61, %v5511_v0  ;;  %v5720_v54 = vor.u32 %v6412_v60, %v5719_v53  ;;  %v5640_v22 = vor.u32 %v6392_v48, %v5639_v19  ;;  %v5569_v24 = vld [vmem:[#allocation7 + $0x78] sm:$0xf0]  ;;  %v6448_v43 = vld [vmem:[#allocation7 + $0x2c4] sm:$0xf0] }
 0x39e   : > { %v6787_v50 = vpack.i.bf16 %v9527_v47, %v9519_v30  ;;  %v6792_v18 = vpack.i.bf16 %v9531_v45, %v9523_v28  ;;  %v5656_v57 = vor.u32 %v6396_v3, %v5655_v55  ;;  %v5704_v5 = vor.u32 %v6408_v12, %v5703_v13  ;;  %v5863_v29 = vld [vmem:[#allocation7 + $0x2c0] sm:$0xf]  ;;  %v6432_v52 = vld [vmem:[#allocation7 + $0x244] sm:$0xf0]  ;;  %v6371_v61 = vld [vmem:[#allocation7 + $0x64] sm:$0xf] }
 0x39f   : > { %3317 = vmatpush.bf16.msrb.mxu3 %v5512_v38  ;;  %3357 = vmatpush.bf16.msra.mxu2 %v5720_v54  ;;  %v5808_v34 = vor.u32 %v6434_v42, %v5807_v46  ;;  %v5952_v58 = vor.u32 %v6470_v36, %v5951_v15  ;;  %v5572_v41 = vor.u32 %v6373_v49, %v5569_v24  ;;  %v5943_v40 = vld [vmem:[#allocation7 + $0x360] sm:$0xf]  ;;  %v6468_v0 = vld [vmem:[#allocation7 + $0x364] sm:$0xf0]  ;;  %v5561_v55 = vld [vmem:[#allocation7 + $0x68] sm:$0xf0] }
 0x3a0   : > { %6788 = vrot.lane.b32.xlu0 %v6787_v50, %s11046_s19  ;;  %3380 = vmatpush.bf16.msrb.mxu0 %v5888_v37  ;;  %v5864_v50 = vor.u32 %v6448_v43, %v5863_v29  ;;  %v5944_v38 = vor.u32 %v6468_v0, %v5943_v40  ;;  %v5564_v3 = vor.u32 %v6371_v61, %v5561_v55  ;;  %v5855_v53 = vld [vmem:[#allocation7 + $0x2b0] sm:$0xf]  ;;  %v6446_v60 = vld [vmem:[#allocation7 + $0x2b4] sm:$0xf0]  ;;  %v5783_v32 = vld [vmem:[#allocation7 + $0x220] sm:$0xf] }
 0x3a1   : > { %3343 = vmatpush.bf16.msrb.mxu1 %v5656_v57  ;;  %v5791_v57 = vld [vmem:[#allocation7 + $0x230] sm:$0xf]  ;;  %v5856_v54 = vor.u32 %v6446_v60, %v5855_v53  ;;  %v6464_v23 = vld [vmem:[#allocation7 + $0x344] sm:$0xf0]  ;;  %v6367_v39 = vld [vmem:[#allocation7 + $0x44] sm:$0xf] }
 0x3a2   : > { %6793 = vrot.lane.b32.xlu1 %v6792_v18, %s11046_s19  ;;  %v5799_v18 = vld [vmem:[#allocation7 + $0x240] sm:$0xf]  ;;  %v5792_v31 = vor.u32 %v6430_v21, %v5791_v57  ;;  %v5545_v19 = vld [vmem:[#allocation7 + $0x48] sm:$0xf0]  ;;  %v5839_v48 = vld [vmem:[#allocation7 + $0x290] sm:$0xf] }
 0x3a3   : > { %3366 = vmatpush.bf16.msra.mxu3 %v5824_v20  ;;  %3358 = vmatpush.bf16.msra.mxu2 %v5712_v9  ;;  %v5800_v37 = vor.u32 %v6432_v52, %v5799_v18  ;;  %v6369_v20 = vld [vmem:[#allocation7 + $0x54] sm:$0xf]  ;;  %v6428_v9 = vld [vmem:[#allocation7 + $0x224] sm:$0xf0]  ;;  %v6442_v13 = vld [vmem:[#allocation7 + $0x294] sm:$0xf0] }
 0x3a4   : > { %3381 = vmatpush.bf16.msrb.mxu0 %v5880_v59  ;;  %v5936_v59 = vor.u32 %v6466_v33, %v5935_v10  ;;  %v5556_v6 = vor.u32 %v6369_v20, %v5553_v4  ;;  %v5784_v2 = vor.u32 %v6428_v9, %v5783_v32  ;;  %v5840_v12 = vor.u32 %v6442_v13, %v5839_v48  ;;  %v5775_v46 = vld [vmem:[#allocation7 + $0x210] sm:$0xf]  ;;  %v6426_v42 = vld [vmem:[#allocation7 + $0x214] sm:$0xf0]  ;;  %v6365_v36 = vld [vmem:[#allocation7 + $0x34] sm:$0xf] }
 0x3a5   : > { %3344 = vmatpush.bf16.msrb.mxu1 %v5648_v35  ;;  %v6444_v35 = vld [vmem:[#allocation7 + $0x2a4] sm:$0xf0]  ;;  %v6462_v15 = vld [vmem:[#allocation7 + $0x334] sm:$0xf0]  ;;  %v5831_v24 = vld [vmem:[#allocation7 + $0x280] sm:$0xf] }
 0x3a6   : > { %v5848_v25 = vor.u32 %v6444_v35, %v5847_v8  ;;  %v6440_v29 = vld [vmem:[#allocation7 + $0x284] sm:$0xf0]  ;;  %v5911_v40 = vld [vmem:[#allocation7 + $0x320] sm:$0xf]  ;;  %v6363_v0 = vld [vmem:[#allocation7 + $0x24] sm:$0xf] }
 0x3a7   : > { %3367 = vmatpush.bf16.msra.mxu3 %v5816_v62  ;;  %3359 = vmatpush.bf16.msra.mxu2 %v5704_v5  ;;  %v5927_v62 = vld [vmem:[#allocation7 + $0x340] sm:$0xf]  ;;  %v5776_v5 = vor.u32 %v6426_v42, %v5775_v46  ;;  %v6424_v18 = vld [vmem:[#allocation7 + $0x204] sm:$0xf0]  ;;  %v5529_v55 = vld [vmem:[#allocation7 + $0x28] sm:$0xf0] }
 0x3a8   : > { %3382 = vmatpush.bf16.msrb.mxu0 %v5872_v1  ;;  %v5928_v1 = vor.u32 %v6464_v23, %v5927_v62  ;;  %v6458_v53 = vld [vmem:[#allocation7 + $0x314] sm:$0xf0]  ;;  %v6361_v60 = vld [vmem:[#allocation7 + $0x14] sm:$0xf]  ;;  %v5895_v10 = vld [vmem:[#allocation7 + $0x300] sm:$0xf] }
 0x3a9   : > { %3345 = vmatpush.bf16.msrb.mxu1 %v5640_v22  ;;  %v5548_v22 = vor.u32 %v6367_v39, %v5545_v19  ;;  %v6456_v33 = vld [vmem:[#allocation7 + $0x304] sm:$0xf0]  ;;  %v6359_v20 = vld [vmem:[#allocation7 + $0x4] sm:$0xf]  ;;  %v5513_v8 = vld [vmem:[#allocation7 + $0x8] sm:$0xf0] }
 0x3aa   : > { %v5896_v4 = vor.u32 %v6456_v33, %v5895_v10  ;;  %v6405_v62 = vld [vmem:[#allocation7 + $0x174] sm:$0xf]  ;;  %v5697_v23 = vld [vmem:[#allocation7 + $0x178] sm:$0xf0] }
 0x3ab   : > { %3368 = vmatpush.bf16.msra.mxu3 %v5808_v34  ;;  %3408 = vmatpush.bf16.msrb.mxu2 %v5572_v41  ;;  %v5919_v34 = vld [vmem:[#allocation7 + $0x330] sm:$0xf]  ;;  %v5832_v41 = vor.u32 %v6440_v29, %v5831_v24  ;;  %v5633_v46 = vld [vmem:[#allocation7 + $0xf8] sm:$0xf0]  ;;  %v6387_v24 = vld [vmem:[#allocation7 + $0xe4] sm:$0xf] }
 0x3ac   : > { %3383 = vmatpush.bf16.msrb.mxu0 %v5864_v50  ;;  %v5920_v49 = vor.u32 %v6462_v15, %v5919_v34  ;;  %v5767_v50 = vld [vmem:[#allocation7 + $0x200] sm:$0xf]  ;;  %v5700_v34 = vor.u32 %v6405_v62, %v5697_v23  ;;  %v5625_v29 = vld [vmem:[#allocation7 + $0xe8] sm:$0xf0]  ;;  %v6437_v33 = vld [vmem:[#allocation7 + $0x274] sm:$0xf] }
 0x3ad   : > { %3394 = vmatpush.bf16.msra.mxu1 %v5952_v58  ;;  %v5537_v58 = vld [vmem:[#allocation7 + $0x38] sm:$0xf0]  ;;  %v5768_v52 = vor.u32 %v6424_v18, %v5767_v50  ;;  %v6401_v18 = vld [vmem:[#allocation7 + $0x154] sm:$0xf]  ;;  %v5609_v23 = vld [vmem:[#allocation7 + $0xc8] sm:$0xf0] }
 0x3ae   : > { %v5540_v43 = vor.u32 %v6365_v36, %v5537_v58 }
 0x3af   : > { %3369 = vmatpush.bf16.msra.mxu3 %v5800_v37  ;;  %3409 = vmatpush.bf16.msrb.mxu2 %v5564_v3  ;;  %v6460_v37 = vld [vmem:[#allocation7 + $0x324] sm:$0xf0]  ;;  %v5903_v3 = vld [vmem:[#allocation7 + $0x310] sm:$0xf] }
 0x3b0   : > { %3384 = vmatpush.bf16.msrb.mxu0 %v5856_v54  ;;  %v5912_v61 = vor.u32 %v6460_v37, %v5911_v40  ;;  %v5904_v57 = vor.u32 %v6458_v53, %v5903_v3  ;;  %v5521_v54 = vld [vmem:[#allocation7 + $0x18] sm:$0xf0]  ;;  %v6421_v53 = vld [vmem:[#allocation7 + $0x1f4] sm:$0xf] }
 0x3b1   : > { %3395 = vmatpush.bf16.msra.mxu1 %v5944_v38  ;;  %v5532_v38 = vor.u32 %v6363_v0, %v5529_v55  ;;  %v5524_v21 = vor.u32 %v6361_v60, %v5521_v54  ;;  %v6385_v55 = vld [vmem:[#allocation7 + $0xd4] sm:$0xf]  ;;  %v5617_v3 = vld [vmem:[#allocation7 + $0xd8] sm:$0xf0] }
 0x3b2   : > { %v5761_v60 = vld [vmem:[#allocation7 + $0x1f8] sm:$0xf0] }
 0x3b3   : > { %3370 = vmatpush.bf16.msra.mxu3 %v5792_v31  ;;  %3410 = vmatpush.bf16.msrb.mxu2 %v5556_v6  ;;  %v5516_v31 = vor.u32 %v6359_v20, %v5513_v8  ;;  %v5825_v20 = vld [vmem:[#allocation7 + $0x278] sm:$0xf0]  ;;  %v5764_v62 = vor.u32 %v6421_v53, %v5761_v60 }
 0x3b4   : > { %3385 = vmatpush.bf16.msrb.mxu0 %v5848_v25 }
 0x3b5   : > { %3396 = vmatpush.bf16.msra.mxu1 %v5936_v59 }
 0x3b7   : > { %3371 = vmatpush.bf16.msra.mxu3 %v5784_v2  ;;  %3411 = vmatpush.bf16.msrb.mxu2 %v5548_v22 }
 0x3b8   : > { %3386 = vmatpush.bf16.msrb.mxu0 %v5840_v12  ;;  %v6389_v12 = vld [vmem:[#allocation7 + $0xf4] sm:$0xf] }
 0x3b9   : > { %3397 = vmatpush.bf16.msra.mxu1 %v5928_v1  ;;  %v5636_v58 = vor.u32 %v6389_v12, %v5633_v46  ;;  %v5817_v46 = vld [vmem:[#allocation7 + $0x268] sm:$0xf0] }
 0x3bb   : > { %3372 = vmatpush.bf16.msra.mxu3 %v5776_v5  ;;  %3412 = vmatpush.bf16.msrb.mxu2 %v5540_v43 }
 0x3bc   : > { %3387 = vmatpush.bf16.msrb.mxu0 %v5832_v41 }
 0x3bd   : > { %3398 = vmatpush.bf16.msra.mxu1 %v5920_v49  ;;  %v5689_v49 = vld [vmem:[#allocation7 + $0x168] sm:$0xf0] }
 0x3bf   : > { %3373 = vmatpush.bf16.msra.mxu3 %v5768_v52  ;;  %3413 = vmatpush.bf16.msrb.mxu2 %v5532_v38  ;;  %v5681_v52 = vld [vmem:[#allocation7 + $0x158] sm:$0xf0] }
 0x3c0   : > { %v5684_v38 = vor.u32 %v6401_v18, %v5681_v52  ;;  %v5601_v52 = vld [vmem:[#allocation7 + $0xb8] sm:$0xf0] }
 0x3c1   : > { %3399 = vmatpush.bf16.msra.mxu1 %v5912_v61 }
 0x3c3   : > { %3414 = vmatpush.bf16.msrb.mxu2 %v5524_v21 }
 0x3c5   : > { %3400 = vmatpush.bf16.msra.mxu1 %v5904_v57 }
 0x3c7   : > { %3415 = vmatpush.bf16.msrb.mxu2 %v5516_v31 }
 0x3c9   : > { %3401 = vmatpush.bf16.msra.mxu1 %v5896_v4 }
 0x3eb   : > { %v6769_v59 = vpop.permute.xlu2 %6768 }
 0x3ec   : > { %v6771_v6 = vunpack.i.h.bf16 %v6769_v59  ;;  %v6770_v25 = vunpack.i.l.bf16 %v6769_v59 }
 0x3f3   : > { %v6784_v43 = vpop.permute.xlu2 %6783 }
 0x3f4   : > { %v6786_v37 = vunpack.i.h.bf16 %v6784_v43 }
 0x402   : > { %v6774_v35 = vpop.permute.xlu0 %6773 }
 0x403   : > { %v6776_v32 = vunpack.i.h.bf16 %v6774_v35  ;;  %v6775_v9 = vunpack.i.l.bf16 %v6774_v35  ;;  %v6399_v35 = vld [vmem:[#allocation7 + $0x144] sm:$0xf] }
 0x404   : > { %v9539_v2 = vpop.permute.xlu1 %6763 }
 0x405   : > { %v2612_v39 = vsel %vm1720_vm9, %v6771_v6, %v6776_v32  ;;  %v2611_v1 = vsel %vm1720_vm9, %v6770_v25, %v6775_v9  ;;  %v6766_v19 = vunpack.i.h.bf16 %v9539_v2  ;;  %v6765_v48 = vunpack.i.l.bf16 %v9539_v2 }
 0x406   : > { %v2625_v13 = vmax.f32 %v9448_v44, %v2612_v39  ;;  %v2618_v22 = vmax.f32 %v9444_v7, %v2611_v1  ;;  %v6403_v7 = vld [vmem:[#allocation7 + $0x164] sm:$0xf] }
 0x407   : > { %v2614_v42 = vsel %vm1720_vm9, %v6766_v19, %v6771_v6  ;;  %v2613_v5 = vsel %vm1720_vm9, %v6765_v48, %v6770_v25  ;;  %v5692_v50 = vor.u32 %v6403_v7, %v5689_v49  ;;  %v5673_v6 = vld [vmem:[#allocation7 + $0x148] sm:$0xf0]  ;;  %v6383_v25 = vld [vmem:[#allocation7 + $0xc4] sm:$0xf] }
 0x408   : > { %v9557_v15 = vpack.c.bf16 %v2625_v13, %v2618_v22  ;;  %v2617_v36 = vmax.f32 %v9454_v26, %v2613_v5  ;;  %v2624_v44 = vmax.f32 %v9458_v56, %v2614_v42  ;;  %v5628_v26 = vor.u32 %v6387_v24, %v5625_v29  ;;  %v6419_v39 = vld [vmem:[#allocation7 + $0x1e4] sm:$0xf]  ;;  %v6381_v29 = vld [vmem:[#allocation7 + $0xb4] sm:$0xf] }
 0x409   : > { %v6785_v56 = vunpack.i.l.bf16 %v6784_v43  ;;  %v5612_v5 = vor.u32 %v6383_v25, %v5609_v23  ;;  %v5604_v53 = vor.u32 %v6381_v29, %v5601_v52  ;;  %v5585_v23 = vld [vmem:[#allocation7 + $0x98] sm:$0xf0]  ;;  %v6453_v29 = vld [vmem:[#allocation7 + $0x2f4] sm:$0xf] }
 0x40a   : > { %3332 = vmatmul.bf16.vlgmr.msra.gmra.mxu0 %v9557_v15  ;;  %v9562_v41 = vpack.c.bf16 %v2624_v44, %v2617_v36  ;;  %v6397_v36 = vld [vmem:[#allocation7 + $0x134] sm:$0xf]  ;;  %v5665_v44 = vld [vmem:[#allocation7 + $0x138] sm:$0xf0] }
 0x40b   : > { %3436 = vmatpush.bf16.msra.mxu0 %v5700_v34 }
 0x40c   : > { %v6779_v40 = vpop.permute.xlu1 %6778  ;;  %3318 = vmatmul.bf16.vlgmr.msrb.gmra.mxu3 %v9562_v41 }
 0x40d   : > { %v6781_v0 = vunpack.i.h.bf16 %v6779_v40  ;;  %v6780_v61 = vunpack.i.l.bf16 %v6779_v40  ;;  %3422 = vmatpush.bf16.msrb.mxu3 %v5636_v58  ;;  %v6417_v40 = vld [vmem:[#allocation7 + $0x1d4] sm:$0xf] }
 0x40f   : > { %v2608_v57 = vsel %vm1720_vm9, %v6781_v0, %v6786_v37  ;;  %v2610_v54 = vsel %vm1720_vm9, %v6776_v32, %v6781_v0  ;;  %v2607_v21 = vsel %vm1720_vm9, %v6780_v61, %v6785_v56  ;;  %v2609_v10 = vsel %vm1720_vm9, %v6775_v9, %v6780_v61  ;;  %3437 = vmatpush.bf16.msra.mxu0 %v5692_v50  ;;  %v5753_v9 = vld [vmem:[#allocation7 + $0x1e8] sm:$0xf0]  ;;  %v6433_v61 = vld [vmem:[#allocation7 + $0x254] sm:$0xf] }
 0x410   : > { %v2626_v4 = vmax.f32 %v9428_v63, %v2610_v54  ;;  %v2627_v8 = vmax.f32 %v9485_v51, %v2608_v57  ;;  %v2619_v31 = vmax.f32 %v9424_v27, %v2609_v10  ;;  %v2620_v59 = vmax.f32 %v9489_v16, %v2607_v21  ;;  %v6435_v16 = vld [vmem:[#allocation7 + $0x264] sm:$0xf] }
 0x411   : > { %3423 = vmatpush.bf16.msrb.mxu3 %v5628_v26  ;;  %v5620_v32 = vor.u32 %v6385_v55, %v5617_v3  ;;  %v5828_v63 = vor.u32 %v6437_v33, %v5825_v20  ;;  %v5676_v27 = vor.u32 %v6399_v35, %v5673_v6  ;;  %v5756_v34 = vor.u32 %v6419_v39, %v5753_v9  ;;  %v5745_v26 = vld [vmem:[#allocation7 + $0x1d8] sm:$0xf0]  ;;  %v5657_v3 = vld [vmem:[#allocation7 + $0x128] sm:$0xf0]  ;;  %v6379_v57 = vld [vmem:[#allocation7 + $0xa4] sm:$0xf] }
 0x412   : > { %v6789_v1 = vpop.permute.xlu0 %6788  ;;  %v9577_v13 = vpack.c.bf16 %v2626_v4, %v2619_v31  ;;  %v9579_v22 = vpack.c.bf16 %v2627_v8, %v2620_v59  ;;  %v5820_v18 = vor.u32 %v6435_v16, %v5817_v46  ;;  %v5668_v0 = vor.u32 %v6397_v36, %v5665_v44  ;;  %v5809_v55 = vld [vmem:[#allocation7 + $0x258] sm:$0xf0]  ;;  %v5593_v33 = vld [vmem:[#allocation7 + $0xa8] sm:$0xf0]  ;;  %v6415_v20 = vld [vmem:[#allocation7 + $0x1c4] sm:$0xf] }
 0x413   : > { %v6791_v51 = vunpack.i.h.bf16 %v6789_v1  ;;  %v6790_v12 = vunpack.i.l.bf16 %v6789_v1  ;;  %3438 = vmatpush.bf16.msra.mxu0 %v5684_v38  ;;  %v5748_v60 = vor.u32 %v6417_v40, %v5745_v26  ;;  %v5812_v10 = vor.u32 %v6433_v61, %v5809_v55  ;;  %v5737_v4 = vld [vmem:[#allocation7 + $0x1c8] sm:$0xf0]  ;;  %v6431_v31 = vld [vmem:[#allocation7 + $0x244] sm:$0xf]  ;;  %v6393_v35 = vld [vmem:[#allocation7 + $0x114] sm:$0xf] }
 0x414   : > { %v6794_v42 = vpop.permute.xlu1 %6793  ;;  %3346 = vmatmul.bf16.vlgmr.msrb.gmra.mxu1 %v9577_v13  ;;  %3360 = vmatmul.bf16.vlgmr.msra.gmra.mxu2 %v9579_v22  ;;  %v5801_v59 = vld [vmem:[#allocation7 + $0x248] sm:$0xf0]  ;;  %v5649_v6 = vld [vmem:[#allocation7 + $0x118] sm:$0xf0]  ;;  %v5596_v25 = vor.u32 %v6379_v57, %v5593_v33  ;;  %v6413_v39 = vld [vmem:[#allocation7 + $0x1b4] sm:$0xf] }
 0x415   : > { %v2606_v7 = vsel %vm1720_vm9, %v6786_v37, %v6791_v51  ;;  %v2605_v49 = vsel %vm1720_vm9, %v6785_v56, %v6790_v12  ;;  %v6796_v58 = vunpack.i.h.bf16 %v6794_v42  ;;  %v6795_v24 = vunpack.i.l.bf16 %v6794_v42  ;;  %3424 = vmatpush.bf16.msrb.mxu3 %v5620_v32  ;;  %3450 = vmatpush.bf16.msrb.mxu1 %v5764_v62  ;;  %v5729_v9 = vld [vmem:[#allocation7 + $0x1b8] sm:$0xf0]  ;;  %v6469_v16 = vld [vmem:[#allocation7 + $0x374] sm:$0xf]  ;;  %v6411_v44 = vld [vmem:[#allocation7 + $0x1a4] sm:$0xf] }
 0x416   : > { %v2628_v43 = vmax.f32 %v9497_v14, %v2606_v7  ;;  %v2621_v50 = vmax.f32 %v9493_v11, %v2605_v49  ;;  %3464 = vmatpush.bf16.msra.mxu2 %v5828_v63  ;;  %v6395_v11 = vld [vmem:[#allocation7 + $0x124] sm:$0xf]  ;;  %v5740_v32 = vor.u32 %v6415_v20, %v5737_v4  ;;  %v5652_v1 = vor.u32 %v6393_v35, %v5649_v6  ;;  %v6429_v63 = vld [vmem:[#allocation7 + $0x234] sm:$0xf]  ;;  %v5721_v7 = vld [vmem:[#allocation7 + $0x1a8] sm:$0xf0] }
 0x417   : > { %v2604_v37 = vsel %vm1720_vm9, %v6791_v51, %v6796_v58  ;;  %v2603_v56 = vsel %vm1720_vm9, %v6790_v12, %v6795_v24  ;;  %3439 = vmatpush.bf16.msra.mxu0 %v5676_v27  ;;  %v5660_v8 = vor.u32 %v6395_v11, %v5657_v3  ;;  %v5793_v51 = vld [vmem:[#allocation7 + $0x238] sm:$0xf0]  ;;  %v6391_v12 = vld [vmem:[#allocation7 + $0x104] sm:$0xf]  ;;  %v5641_v27 = vld [vmem:[#allocation7 + $0x108] sm:$0xf0]  ;;  %v5732_v42 = vor.u32 %v6413_v39, %v5729_v9 }
 0x418   : > { %v2629_v38 = vmax.f32 %v9527_v47, %v2604_v37  ;;  %v2622_v14 = vmax.f32 %v9519_v30, %v2603_v56  ;;  %v9595_v54 = vpack.c.bf16 %v2628_v43, %v2621_v50  ;;  %v2615_v30 = vsel %vm1720_vm9, %v6795_v24, %v6765_v48  ;;  %v6377_v48 = vld [vmem:[#allocation7 + $0x94] sm:$0xf]  ;;  %v6427_v49 = vld [vmem:[#allocation7 + $0x224] sm:$0xf]  ;;  %v5785_v24 = vld [vmem:[#allocation7 + $0x228] sm:$0xf0] }
 0x419   : > { %3425 = vmatpush.bf16.msrb.mxu3 %v5612_v5  ;;  %3451 = vmatpush.bf16.msrb.mxu1 %v5756_v34  ;;  %v2616_v47 = vsel %vm1720_vm9, %v6796_v58, %v6766_v19  ;;  %v2623_v2 = vmax.f32 %v9523_v28, %v2615_v30  ;;  %v5804_v19 = vor.u32 %v6431_v31, %v5801_v59  ;;  %v5953_v5 = vld [vmem:[#allocation7 + $0x378] sm:$0xf0]  ;;  %v6375_v28 = vld [vmem:[#allocation7 + $0x84] sm:$0xf]  ;;  %v5577_v34 = vld [vmem:[#allocation7 + $0x88] sm:$0xf0] }
 0x41a   : > { %3465 = vmatpush.bf16.msra.mxu2 %v5820_v18  ;;  %v9597_v21 = vpack.c.bf16 %v2629_v38, %v2622_v14  ;;  %v2630_v62 = vmax.f32 %v9531_v45, %v2616_v47  ;;  %v5588_v46 = vor.u32 %v6377_v48, %v5585_v23  ;;  %v5796_v36 = vor.u32 %v6429_v63, %v5793_v51  ;;  %v5889_v43 = vld [vmem:[#allocation7 + $0x2f8] sm:$0xf0]  ;;  %v6467_v40 = vld [vmem:[#allocation7 + $0x364] sm:$0xf]  ;;  %v5945_v26 = vld [vmem:[#allocation7 + $0x368] sm:$0xf0] }
 0x41b   : > { %3440 = vmatpush.bf16.msra.mxu0 %v5668_v0  ;;  %v5644_v58 = vor.u32 %v6391_v12, %v5641_v27  ;;  %v5956_v50 = vor.u32 %v6469_v16, %v5953_v5  ;;  %v5580_v18 = vor.u32 %v6375_v28, %v5577_v34  ;;  %v5724_v52 = vor.u32 %v6411_v44, %v5721_v7  ;;  %v6409_v0 = vld [vmem:[#allocation7 + $0x194] sm:$0xf]  ;;  %v5713_v61 = vld [vmem:[#allocation7 + $0x198] sm:$0xf0]  ;;  %v6451_v14 = vld [vmem:[#allocation7 + $0x2e4] sm:$0xf] }
 0x41c   : > { %3374 = vmatmul.bf16.vlgmr.msra.gmra.mxu3 %v9595_v54  ;;  %3388 = vmatmul.bf16.vlgmr.msrb.gmra.mxu0 %v9597_v21  ;;  %v9611_v45 = vpack.c.bf16 %v2630_v62, %v2623_v2  ;;  %v5788_v37 = vor.u32 %v6427_v49, %v5785_v24  ;;  %v5892_v56 = vor.u32 %v6453_v29, %v5889_v43  ;;  %v6425_v55 = vld [vmem:[#allocation7 + $0x214] sm:$0xf]  ;;  %v5777_v38 = vld [vmem:[#allocation7 + $0x218] sm:$0xf0]  ;;  %v5881_v11 = vld [vmem:[#allocation7 + $0x2e8] sm:$0xf0] }
 0x41d   : > { %3426 = vmatpush.bf16.msrb.mxu3 %v5604_v53  ;;  %3452 = vmatpush.bf16.msrb.mxu1 %v5748_v60  ;;  %v5948_v3 = vor.u32 %v6467_v40, %v5945_v26  ;;  %v6465_v53 = vld [vmem:[#allocation7 + $0x354] sm:$0xf]  ;;  %v5937_v60 = vld [vmem:[#allocation7 + $0x358] sm:$0xf0]  ;;  %v5780_v57 = vor.u32 %v6425_v55, %v5777_v38  ;;  %v6407_v33 = vld [vmem:[#allocation7 + $0x184] sm:$0xf] }
 0x41e   : > { %3466 = vmatpush.bf16.msra.mxu2 %v5812_v10  ;;  %v5884_v10 = vor.u32 %v6451_v14, %v5881_v11  ;;  %v5705_v20 = vld [vmem:[#allocation7 + $0x188] sm:$0xf0]  ;;  %v6423_v4 = vld [vmem:[#allocation7 + $0x204] sm:$0xf]  ;;  %v6449_v47 = vld [vmem:[#allocation7 + $0x2d4] sm:$0xf]  ;;  %v5940_v31 = vor.u32 %v6465_v53, %v5937_v60 }
 0x41f   : > { %3441 = vmatpush.bf16.msra.mxu0 %v5660_v8  ;;  %v5769_v30 = vld [vmem:[#allocation7 + $0x208] sm:$0xf0]  ;;  %v5873_v8 = vld [vmem:[#allocation7 + $0x2d8] sm:$0xf0]  ;;  %v5708_v59 = vor.u32 %v6407_v33, %v5705_v20  ;;  %v6463_v35 = vld [vmem:[#allocation7 + $0x344] sm:$0xf] }
 0x420   : > { %v5929_v6 = vld [vmem:[#allocation7 + $0x348] sm:$0xf0]  ;;  %v6447_v48 = vld [vmem:[#allocation7 + $0x2c4] sm:$0xf]  ;;  %v5921_v23 = vld [vmem:[#allocation7 + $0x338] sm:$0xf0] }
 0x421   : > { %3427 = vmatpush.bf16.msrb.mxu3 %v5596_v25  ;;  %3453 = vmatpush.bf16.msrb.mxu1 %v5740_v32  ;;  %v5772_v25 = vor.u32 %v6423_v4, %v5769_v30  ;;  %v5876_v32 = vor.u32 %v6449_v47, %v5873_v8  ;;  %v5865_v2 = vld [vmem:[#allocation7 + $0x2c8] sm:$0xf0]  ;;  %v5932_v62 = vor.u32 %v6463_v35, %v5929_v6  ;;  %v6445_v39 = vld [vmem:[#allocation7 + $0x2b4] sm:$0xf]  ;;  %v6443_v12 = vld [vmem:[#allocation7 + $0x2a4] sm:$0xf] }
 0x422   : > { %3467 = vmatpush.bf16.msra.mxu2 %v5804_v19  ;;  %v6461_v19 = vld [vmem:[#allocation7 + $0x334] sm:$0xf]  ;;  %v5913_v63 = vld [vmem:[#allocation7 + $0x328] sm:$0xf0]  ;;  %v5841_v34 = vld [vmem:[#allocation7 + $0x298] sm:$0xf0] }
 0x423   : > { %3442 = vmatpush.bf16.msra.mxu0 %v5652_v1  ;;  %v5924_v9 = vor.u32 %v6461_v19, %v5921_v23  ;;  %v6459_v1 = vld [vmem:[#allocation7 + $0x324] sm:$0xf]  ;;  %v5849_v27 = vld [vmem:[#allocation7 + $0x2a8] sm:$0xf0]  ;;  %v6441_v28 = vld [vmem:[#allocation7 + $0x294] sm:$0xf] }
 0x424   : > { %3402 = vmatmul.bf16.vlgmr.msra.gmra.mxu1 %v9611_v45  ;;  %3416 = vmatmul.bf16.vlgmr.msrb.gmra.mxu2 %v9562_v41  ;;  %v5716_v41 = vor.u32 %v6409_v0, %v5713_v61  ;;  %v5916_v16 = vor.u32 %v6459_v1, %v5913_v63  ;;  %v5852_v5 = vor.u32 %v6443_v12, %v5849_v27  ;;  %v5897_v44 = vld [vmem:[#allocation7 + $0x308] sm:$0xf0]  ;;  %v6439_v7 = vld [vmem:[#allocation7 + $0x284] sm:$0xf] }
 0x425   : > { %3428 = vmatpush.bf16.msrb.mxu3 %v5588_v46  ;;  %3454 = vmatpush.bf16.msrb.mxu1 %v5732_v42  ;;  %v6457_v46 = vld [vmem:[#allocation7 + $0x314] sm:$0xf]  ;;  %v5905_v42 = vld [vmem:[#allocation7 + $0x318] sm:$0xf0]  ;;  %v5833_v49 = vld [vmem:[#allocation7 + $0x288] sm:$0xf0] }
 0x426   : > { %3468 = vmatpush.bf16.msra.mxu2 %v5796_v36  ;;  %v5908_v36 = vor.u32 %v6457_v46, %v5905_v42  ;;  %v5836_v24 = vor.u32 %v6439_v7, %v5833_v49 }
 0x427   : > { %3443 = vmatpush.bf16.msra.mxu0 %v5644_v58 }
 0x429   : > { %3429 = vmatpush.bf16.msrb.mxu3 %v5580_v18  ;;  %3455 = vmatpush.bf16.msrb.mxu1 %v5724_v52 }
 0x42a   : > { %3469 = vmatpush.bf16.msra.mxu2 %v5788_v37 }
 0x42b   : > { %3492 = vmatpush.bf16.msrb.mxu0 %v5956_v50 }
 0x42c   : > { %3430 = vmatmul.bf16.vlgmr.msrb.gmra.mxu3 %v9557_v15  ;;  %3444 = vmatmul.bf16.vlgmr.msra.gmra.mxu0 %v9577_v13  ;;  %v5868_v15 = vor.u32 %v6447_v48, %v5865_v2  ;;  %v5857_v13 = vld [vmem:[#allocation7 + $0x2b8] sm:$0xf0] }
 0x42d   : > { %3478 = vmatpush.bf16.msra.mxu3 %v5892_v56  ;;  %3456 = vmatpush.bf16.msrb.mxu1 %v5716_v41  ;;  %v5860_v51 = vor.u32 %v6445_v39, %v5857_v13 }
 0x42e   : > { %3470 = vmatpush.bf16.msra.mxu2 %v5780_v57 }
 0x42f   : > { %3493 = vmatpush.bf16.msrb.mxu0 %v5948_v3 }
 0x431   : > { %3479 = vmatpush.bf16.msra.mxu3 %v5884_v10  ;;  %3457 = vmatpush.bf16.msrb.mxu1 %v5708_v59 }
 0x432   : > { %3471 = vmatpush.bf16.msra.mxu2 %v5772_v25 }
 0x433   : > { %3494 = vmatpush.bf16.msrb.mxu0 %v5940_v31 }
 0x434   : > { %3458 = vmatmul.bf16.vlgmr.msrb.gmra.mxu1 %v9579_v22  ;;  %v6455_v22 = vld [vmem:[#allocation7 + $0x304] sm:$0xf] }
 0x435   : > { %3480 = vmatpush.bf16.msra.mxu3 %v5876_v32  ;;  %3472 = vmatmul.bf16.vlgmr.msra.gmra.mxu2 %v9595_v54  ;;  %v5844_v54 = vor.u32 %v6441_v28, %v5841_v34  ;;  %v5900_v58 = vor.u32 %v6455_v22, %v5897_v44  ;;  %v3835_v32 = vld [vmem:[#allocation9 + $0x14] ss:$8 sm:$0x3] }
 0x436   : > { %v3837_v23 = vperm.slane %v3835_v32, 0 }
 0x437   : > { %3495 = vmatpush.bf16.msrb.mxu0 %v5932_v62 }
 0x439   : > { %3481 = vmatpush.bf16.msra.mxu3 %v5868_v15 }
 0x43b   : > { %3496 = vmatpush.bf16.msrb.mxu0 %v5924_v9  ;;  %v3838_v9 = vperm.slane %v3835_v32, 1 }
 0x43d   : > { %3482 = vmatpush.bf16.msra.mxu3 %v5860_v51 }
 0x43f   : > { %3497 = vmatpush.bf16.msrb.mxu0 %v5916_v16 }
 0x441   : > { %3483 = vmatpush.bf16.msra.mxu3 %v5852_v5 }
 0x443   : > { %3498 = vmatpush.bf16.msrb.mxu0 %v5908_v36 }
 0x445   : > { %3484 = vmatpush.bf16.msra.mxu3 %v5844_v54 }
 0x447   : > { %3499 = vmatpush.bf16.msrb.mxu0 %v5900_v58 }
 0x449   : > { %3485 = vmatpush.bf16.msra.mxu3 %v5836_v24 }
 0x44a   : > { %3500 = vmatmul.bf16.vlgmr.msrb.gmra.mxu0 %v9611_v45 }
 0x44c   : > { %3486 = vmatmul.bf16.vlgmr.msra.gmra.mxu3 %v9597_v21 }
 0x487   : > { %v3333_v29 = vpop.f32.mrf.mxu0 }
 0x48f   : > { %v3319_v43 = vpop.f32.mrf.mxu3  ;;  %v3335_v40 = vpop.f32.mrf.mxu0 }
 0x490   : > { %v3334_v52 = vadd.f32 %v3333_v29, %v3319_v43 }
 0x491   : > { %v3347_v50 = vpop.f32.mrf.mxu1 }
 0x492   : > { %v3348_v56 = vadd.f32 %v3347_v50, %v3334_v52 }
 0x497   : > { %v3321_v18 = vpop.f32.mrf.mxu3  ;;  %v3361_v37 = vpop.f32.mrf.mxu2 }
 0x498   : > { %v3362_v0 = vadd.f32 %v3361_v37, %v3348_v56  ;;  %v3336_v47 = vadd.f32 %v3335_v40, %v3321_v18 }
 0x499   : > { %v3349_v26 = vpop.f32.mrf.mxu1  ;;  %v3389_v38 = vpop.f32.mrf.mxu0 }
 0x49a   : > { %v3350_v35 = vadd.f32 %v3349_v26, %v3336_v47 }
 0x49f   : > { %v3375_v61 = vpop.f32.mrf.mxu3  ;;  %v3363_v21 = vpop.f32.mrf.mxu2 }
 0x4a0   : > { %v3376_v55 = vadd.f32 %v3375_v61, %v3362_v0  ;;  %v3364_v48 = vadd.f32 %v3363_v21, %v3350_v35 }
 0x4a1   : > { %v3403_v11 = vpop.f32.mrf.mxu1  ;;  %v3391_v45 = vpop.f32.mrf.mxu0 }
 0x4a2   : > { %v3390_v14 = vadd.f32 %v3389_v38, %v3376_v55 }
 0x4a4   : > { %v9621_v3 = vadd.f32 %v3403_v11, %v3390_v14 }
 0x4a6   : > { %3876 = vrot.lane.b32.xlu1 %v9621_v3, %s7127_s15  ;;  %3696 = vrot.lane.b32.xlu0 %v9621_v3, %s7138_s18  ;;  %v3841_v16 = vmul.f32 %v3837_v23, %v9621_v3 }
 0x4a7   : > { %3903 = vrot.lane.b32.xlu2 %v9621_v3, %s11045_s22  ;;  %v3377_v41 = vpop.f32.mrf.mxu3  ;;  %v3417_v53 = vpop.f32.mrf.mxu2 }
 0x4a8   : > { %v3378_v15 = vadd.f32 %v3377_v41, %v3364_v48 }
 0x4a9   : > { %v3445_v60 = vpop.f32.mrf.mxu0  ;;  %v3405_v10 = vpop.f32.mrf.mxu1 }
 0x4aa   : > { %v3392_v12 = vadd.f32 %v3391_v45, %v3378_v15 }
 0x4ac   : > { %v9663_v34 = vadd.f32 %v3405_v10, %v3392_v12 }
 0x4ae   : > { %3849 = vrot.lane.b32.xlu1 %v9621_v3, %s7126_s20  ;;  %3668 = vrot.lane.b32.xlu0 %v9621_v3, %s7140_s27  ;;  %v3843_v54 = vmul.f32 %v3837_v23, %v9663_v34 }
 0x4af   : > { %4124 = vrot.lane.b32.xlu2 %v9621_v3, %s11044_s25  ;;  %v3431_v57 = vpop.f32.mrf.mxu3  ;;  %v3419_v33 = vpop.f32.mrf.mxu2 }
 0x4b0   : > { %v3432_v20 = vadd.f32 %v3431_v57, %v3417_v53 }
 0x4b1   : > { %v3447_v4 = vpop.f32.mrf.mxu0  ;;  %v3459_v31 = vpop.f32.mrf.mxu1 }
 0x4b2   : > { %v3446_v8 = vadd.f32 %v3445_v60, %v3432_v20 }
 0x4b4   : > { %v3460_v6 = vadd.f32 %v3459_v31, %v3446_v8 }
 0x4b6   : > { %4070 = vrot.lane.b32.xlu1 %v9621_v3, %s11047_s14  ;;  %3640 = vrot.lane.b32.xlu0 %v9621_v3, %s11036_s16 }
 0x4b7   : > { %4097 = vrot.lane.b32.xlu2 %v9621_v3, %s11046_s19  ;;  %v3433_v30 = vpop.f32.mrf.mxu3 }
 0x4b8   : > { %v3473_v59 = vpop.f32.mrf.mxu2  ;;  %v3434_v25 = vadd.f32 %v3433_v30, %v3419_v33 }
 0x4b9   : > { %v3474_v2 = vadd.f32 %v3473_v59, %v3460_v6  ;;  %v3461_v63 = vpop.f32.mrf.mxu1 }
 0x4ba   : > { %v3448_v39 = vadd.f32 %v3447_v4, %v3434_v25 }
 0x4bc   : > { %v3462_v27 = vadd.f32 %v3461_v63, %v3448_v39 }
 0x4be   : > { %4043 = vrot.lane.b32.xlu1 %v9621_v3, %s11030_s21  ;;  %3807 = vrot.lane.b32.xlu0 %v9621_v3, %s11038_s23  ;;  %s7144_s21 = smov 12  }
 0x4bf   : > { %3613 = vrot.lane.b32.xlu2 %v9621_v3, %s11040_s30 }
 0x4c0   : > { %v3475_v51 = vpop.f32.mrf.mxu2 }
 0x4c1   : > { %v3476_v42 = vadd.f32 %v3475_v51, %v3462_v27 }
 0x4c6   : > { %4015 = vrot.lane.b32.xlu1 %v9621_v3, %s11028_s12  ;;  %3780 = vrot.lane.b32.xlu0 %v9621_v3, %s11042_s24  ;;  %s11032_s12 = smov 113  }
 0x4c7   : > { %3586 = vrot.lane.b32.xlu2 %v9621_v3, %s7122_s28  ;;  %v3501_v62 = vpop.f32.mrf.mxu0 }
 0x4ce   : > { %3987 = vrot.lane.b32.xlu1 %v9621_v3, %s11032_s12  ;;  %3752 = vrot.lane.b32.xlu0 %v9621_v3, %s7144_s21  ;;  %s7145_s12 = smov 114  }
 0x4cf   : > { %v3487_v19 = vpop.f32.mrf.mxu3  ;;  %3559 = vrot.lane.b32.xlu2 %v9621_v3, %s11034_s17  ;;  %v3503_v22 = vpop.f32.mrf.mxu0  ;;  %s7146_s17 = smov 13  }
 0x4d0   : > { %v3488_v13 = vadd.f32 %v3487_v19, %v3474_v2  ;;  %v9867_v19 = vld [vmem:[#allocation9 + $0x7] ss:$8 sm:$0x3] }
 0x4d1   : > { %v11053_v23 = vperm.slane %v9867_v19, 0  ;;  %v11052_v15 = vperm.slane %v9867_v19, 1 }
 0x4d2   : > { %v9657_v1 = vadd.f32 %v3501_v62, %v3488_v13 }
 0x4d4   : > { %v3842_v46 = vmul.f32 %v3838_v9, %v9657_v1 }
 0x4d6   : > { %v3845_v5 = vpack.c.bf16 %v3842_v46, %v3841_v16  ;;  %3959 = vrot.lane.b32.xlu1 %v9621_v3, %s7145_s12  ;;  %3724 = vrot.lane.b32.xlu0 %v9621_v3, %s7146_s17  ;;  %v9892_v16 = vld [vmem:[#allocation9 + $0x6] ss:$8 sm:$0x3] }
 0x4d7   : > { %v3489_v28 = vpop.f32.mrf.mxu3  ;;  %3532 = vrot.lane.b32.xlu2 %v9621_v3, %s11048_s2 }
 0x4d8   : > { %v3490_v36 = vadd.f32 %v3489_v28, %v3476_v42  ;;  %3847 = vst [vmem:[#allocation3 + $0xc0] sm:$0xff] %v3845_v5  ;;  %v11051_v42 = vperm.slane %v9892_v16, 0  ;;  %v11050_v5 = vperm.slane %v9892_v16, 1 }
 0x4da   : > { %v9669_v44 = vadd.f32 %v3503_v22, %v3490_v36 }
 0x4dc   : > { %v3844_v7 = vmul.f32 %v3838_v9, %v9669_v44 }
 0x4de   : > { %v3846_v49 = vpack.c.bf16 %v3844_v7, %v3843_v54  ;;  %3698 = vrot.lane.b32.xlu1 %v9663_v34, %s7138_s18  ;;  %3905 = vrot.lane.b32.xlu0 %v9663_v34, %s11045_s22 }
 0x4df   : > { %3506 = vrot.lane.b32.xlu2 %v9621_v3, %s11049_s4 }
 0x4e0   : > { %3848 = vst [vmem:[#allocation3 + $0xc8] sm:$0xff] %v3846_v49 }
 0x4e6   : > { %3670 = vrot.lane.b32.xlu1 %v9663_v34, %s7140_s27  ;;  %4126 = vrot.lane.b32.xlu0 %v9663_v34, %s11044_s25 }
 0x4e7   : > { %3878 = vrot.lane.b32.xlu2 %v9663_v34, %s7127_s15 }
 0x4ee   : > { %3642 = vrot.lane.b32.xlu1 %v9663_v34, %s11036_s16  ;;  %4099 = vrot.lane.b32.xlu0 %v9663_v34, %s11046_s19  ;;  %s11210_s16 = smov 102  }
 0x4ef   : > { %3851 = vrot.lane.b32.xlu2 %v9663_v34, %s7126_s20 }
 0x4f6   : > { %3809 = vrot.lane.b32.xlu1 %v9663_v34, %s11038_s23  ;;  %3615 = vrot.lane.b32.xlu0 %v9663_v34, %s11040_s30  ;;  %s11211_s23 = smov 28   ;;  %s11212_s30 = smov 112  }
 0x4f7   : > { %4072 = vrot.lane.b32.xlu2 %v9663_v34, %s11047_s14 }
 0x4fe   : > { %3782 = vrot.lane.b32.xlu1 %v9663_v34, %s11042_s24  ;;  %3588 = vrot.lane.b32.xlu0 %v9663_v34, %s7122_s28  ;;  %s11213_s24 = smov 113  }
 0x4ff   : > { %4045 = vrot.lane.b32.xlu2 %v9663_v34, %s11210_s16 }
 0x501   : > { %v9705_v58 = vpop.permute.xlu2 %3903 }
 0x506   : > { %3754 = vrot.lane.b32.xlu1 %v9663_v34, %s7144_s21  ;;  %3561 = vrot.lane.b32.xlu0 %v9663_v34, %s11211_s23 }
 0x507   : > { %4017 = vrot.lane.b32.xlu2 %v9663_v34, %s11212_s30 }
 0x509   : > { %v9713_v24 = vpop.permute.xlu2 %4124 }
 0x50e   : > { %3726 = vrot.lane.b32.xlu1 %v9663_v34, %s7146_s17  ;;  %3534 = vrot.lane.b32.xlu0 %v9663_v34, %s11048_s2 }
 0x50f   : > { %3989 = vrot.lane.b32.xlu2 %v9663_v34, %s11213_s24 }
 0x511   : > { %v9721_v29 = vpop.permute.xlu2 %4097 }
 0x516   : > { %3907 = vrot.lane.b32.xlu1 %v9657_v1, %s11045_s22  ;;  %3508 = vrot.lane.b32.xlu0 %v9663_v34, %s11049_s4  ;;  %s11215_s22 = smov 16  }
 0x517   : > { %3961 = vrot.lane.b32.xlu2 %v9663_v34, %s7145_s12 }
 0x518   : > { %v9729_v43 = vpop.permute.xlu1 %3876  ;;  %v9731_v50 = vpop.permute.xlu0 %3696 }
 0x519   : > { %v9733_v18 = vpop.permute.xlu2 %3613 }
 0x51e   : > { %4128 = vrot.lane.b32.xlu1 %v9657_v1, %s11044_s25  ;;  %3880 = vrot.lane.b32.xlu0 %v9657_v1, %s7127_s15  ;;  %s11214_s25 = smov 26  }
 0x51f   : > { %3700 = vrot.lane.b32.xlu2 %v9657_v1, %s7138_s18 }
 0x520   : > { %v9741_v52 = vpop.permute.xlu1 %3849  ;;  %v9743_v40 = vpop.permute.xlu0 %3668 }
 0x521   : > { %v9745_v26 = vpop.permute.xlu2 %3586 }
 0x526   : > { %4101 = vrot.lane.b32.xlu1 %v9657_v1, %s11046_s19  ;;  %3853 = vrot.lane.b32.xlu0 %v9657_v1, %s7126_s20  ;;  %s11216_s19 = smov 1  }
 0x527   : > { %3672 = vrot.lane.b32.xlu2 %v9657_v1, %s7140_s27 }
 0x528   : > { %v9753_v37 = vpop.permute.xlu1 %4070  ;;  %v9755_v56 = vpop.permute.xlu0 %3640 }
 0x529   : > { %v9757_v0 = vpop.permute.xlu2 %3559 }
 0x52e   : > { %3617 = vrot.lane.b32.xlu1 %v9657_v1, %s11214_s25  ;;  %4074 = vrot.lane.b32.xlu0 %v9657_v1, %s11047_s14  ;;  %s11217_s14 = smov 2  }
 0x52f   : > { %3644 = vrot.lane.b32.xlu2 %v9657_v1, %s11215_s22 }
 0x530   : > { %v9765_v61 = vpop.permute.xlu1 %4043  ;;  %v9767_v55 = vpop.permute.xlu0 %3807 }
 0x531   : > { %v9769_v38 = vpop.permute.xlu2 %3532 }
 0x536   : > { %3590 = vrot.lane.b32.xlu1 %v9657_v1, %s7122_s28  ;;  %4047 = vrot.lane.b32.xlu0 %v9657_v1, %s11210_s16 }
 0x537   : > { %3811 = vrot.lane.b32.xlu2 %v9657_v1, %s11216_s19 }
 0x538   : > { %v9777_v14 = vpop.permute.xlu1 %4015  ;;  %v9779_v11 = vpop.permute.xlu0 %3780 }
 0x539   : > { %v9781_v21 = vpop.permute.xlu2 %3506 }
 0x53e   : > { %3563 = vrot.lane.b32.xlu1 %v9657_v1, %s11211_s23  ;;  %4019 = vrot.lane.b32.xlu0 %v9657_v1, %s11212_s30 }
 0x53f   : > { %3784 = vrot.lane.b32.xlu2 %v9657_v1, %s11217_s14 }
 0x540   : > { %v9789_v45 = vpop.permute.xlu1 %3987  ;;  %v9791_v41 = vpop.permute.xlu0 %3752 }
 0x541   : > { %v9793_v53 = vpop.permute.xlu2 %3878 }
 0x546   : > { %3536 = vrot.lane.b32.xlu1 %v9657_v1, %s11048_s2  ;;  %3991 = vrot.lane.b32.xlu0 %v9657_v1, %s11213_s24  ;;  %s11218_s2 = smov 116  }
 0x547   : > { %3756 = vrot.lane.b32.xlu2 %v9657_v1, %s7144_s21 }
 0x548   : > { %v9801_v60 = vpop.permute.xlu1 %3959  ;;  %v9803_v57 = vpop.permute.xlu0 %3724 }
 0x549   : > { %v9805_v10 = vpop.permute.xlu2 %3851 }
 0x54e   : > { %3510 = vrot.lane.b32.xlu1 %v9657_v1, %s11049_s4  ;;  %3963 = vrot.lane.b32.xlu0 %v9657_v1, %s7145_s12  ;;  %s11219_s4 = smov 99  }
 0x54f   : > { %3728 = vrot.lane.b32.xlu2 %v9657_v1, %s7146_s17 }
 0x550   : > { %v9813_v33 = vpop.permute.xlu1 %3698  ;;  %v9815_v20 = vpop.permute.xlu0 %3905 }
 0x551   : > { %v9817_v4 = vpop.permute.xlu2 %4072 }
 0x556   : > { %3882 = vrot.lane.b32.xlu1 %v9669_v44, %s7127_s15  ;;  %3702 = vrot.lane.b32.xlu0 %v9669_v44, %s7138_s18  ;;  %s11220_s15 = smov 101  }
 0x557   : > { %3909 = vrot.lane.b32.xlu2 %v9669_v44, %s11218_s2  ;;  %s11221_s2 = smov 100  }
 0x558   : > { %v9825_v30 = vpop.permute.xlu1 %3670  ;;  %v9827_v47 = vpop.permute.xlu0 %4126 }
 0x559   : > { %v9829_v8 = vpop.permute.xlu2 %4045 }
 0x55e   : > { %3855 = vrot.lane.b32.xlu1 %v9669_v44, %s7126_s20  ;;  %3674 = vrot.lane.b32.xlu0 %v9669_v44, %s7140_s27 }
 0x55f   : > { %4130 = vrot.lane.b32.xlu2 %v9669_v44, %s11219_s4 }
 0x560   : > { %v9837_v31 = vpop.permute.xlu1 %3642  ;;  %v9839_v59 = vpop.permute.xlu0 %4099 }
 0x561   : > { %v9841_v35 = vpop.permute.xlu2 %4017 }
 0x566   : > { %4076 = vrot.lane.b32.xlu1 %v9669_v44, %s11220_s15  ;;  %3646 = vrot.lane.b32.xlu0 %v9669_v44, %s11215_s22  ;;  %s7039_s22 = scalar_lea.hbm %s10967_s13, 2 }
 0x567   : > { %4103 = vrot.lane.b32.xlu2 %v9669_v44, %s11221_s2  ;;  %s5353_s2 = scalar_lea.hbm %s10967_s13, %s7239_s29 }
 0x568   : > { %v9849_v6 = vpop.permute.xlu1 %3809  ;;  %v9851_v25 = vpop.permute.xlu0 %3615 }
 0x569   : > { %v9853_v32 = vpop.permute.xlu2 %3989 }
 0x56a   : > { %11222 = vst [vmem:[#allocation31_spill] sm:$0xff] %v9853_v32 }
 0x56e   : > { %4049 = vrot.lane.b32.xlu1 %v9669_v44, %s11210_s16  ;;  %3813 = vrot.lane.b32.xlu0 %v9669_v44, %s11216_s19  ;;  %s7147_s19 = smov 115   ;;  %s529_s16 = sand.u32 1, %s7089_s26  }
 0x56f   : > { %3619 = vrot.lane.b32.xlu2 %v9669_v44, %s11214_s25  ;;  %s11229_s25 = smov 30  }
 0x570   : > { %v9861_v48 = vpop.permute.xlu1 %3782  ;;  %v9863_v2 = vpop.permute.xlu0 %3588 }
 0x571   : > { %11223 = vst [vmem:[#allocation35_spill] sm:$0xff] %v9861_v48  ;;  %v9865_v62 = vpop.permute.xlu2 %3961  ;;  %v10003_v48 = vld [vmem:[#allocation9 + $0x26] ss:$8 sm:$0x3] }
 0x572   : > { %11224 = vst [vmem:[#allocation30_spill] sm:$0xff] %v9865_v62  ;;  %v9957_v62 = vld [vmem:[#allocation9 + $0x13] ss:$8 sm:$0x3] }
 0x576   : > { %4021 = vrot.lane.b32.xlu1 %v9669_v44, %s11212_s30  ;;  %3786 = vrot.lane.b32.xlu0 %v9669_v44, %s11217_s14  ;;  %s11227_s14 = smov 29  }
 0x577   : > { %3592 = vrot.lane.b32.xlu2 %v9669_v44, %s7122_s28  ;;  %s530_s28 = scalar_lea.vmem [#allocation15], %s529_s16 }
 0x578   : > { %v9878_v39 = vpop.permute.xlu1 %3754  ;;  %v9880_v13 = vpop.permute.xlu0 %3561  ;;  %s5355_s30 = sshll.u32 %s530_s28, 4  ;;  %s5356_s30 = int_to_ptr.vmem [resolvable:$true] %s5355_s30 }
 0x579   : > { %11225 = vst [vmem:[#allocation38_spill] sm:$0xff] %v9878_v39  ;;  %v3701_v9 = vpop.permute.xlu2 %3700  ;;  %v9959_v39 = vld [vmem:[#allocation9 + $0x16] ss:$8 sm:$0x3] }
 0x57a   : > { %v3705_v63 = vsel %vm3704_vm2, %v9731_v50, %v3701_v9  ;;  %v3707_v51 = vsel %vm3704_vm2, %v3701_v9, %v9731_v50  ;;  %v9917_v9 = vld [vmem:[#allocation9 + $0x17] ss:$8 sm:$0x3]  ;;  %v11234_v32 = vperm.slane %v9959_v39, 1 }
 0x57b   : > { %v3716_v12 = vmul.f32 %v11053_v23, %v3707_v51  ;;  %v3717_v27 = vmul.f32 %v11052_v15, %v3705_v63  ;;  %v9919_v63 = vld [vmem:[#allocation9 + $0x5] ss:$8 sm:$0x3] }
 0x57d   : > { %v3720_v46 = vpack.c.bf16 %v3717_v27, %v3716_v12  ;;  %v11059_v12 = vperm.slane %v9917_v9, 1  ;;  %v11058_v27 = vperm.slane %v9919_v63, 0 }
 0x57e   : > { %3993 = vrot.lane.b32.xlu1 %v9669_v44, %s11213_s24  ;;  %3758 = vrot.lane.b32.xlu0 %v9669_v44, %s7144_s21  ;;  %s5357_s24 = sshll.u32 %s5353_s2, 4  ;;  %s5358_s24 = int_to_ptr.hbm [resolvable:$true] %s5357_s24 }
 0x57f   : > { %3722 = vst [vmem:[#allocation3 + $0x70] sm:$0xff] %v3720_v46  ;;  %3565 = vrot.lane.b32.xlu2 %v9669_v44, %s11211_s23  ;;  %v11057_v46 = vperm.slane %v9919_v63, 1  ;;  %s5345_s23 = scalar_lea.sflag [#allocation6], %s529_s16  ;;  %s7033_s21 = sshra.s32 %s5358_s24, 4  ;;  %s7034_s21 = int_to_ptr.hbm [resolvable:$true] %s7033_s21 }
 0x580   : > { %v9903_v28 = vpop.permute.xlu1 %3726  ;;  %v9905_v36 = vpop.permute.xlu0 %3534  ;;  %s7035_s4 = scalar_lea.hbm %s7034_s21, 1  ;;  %p7040_p3 = scmp.lt.s32.totalorder %s7034_s21, %s10967_s13 }
 0x581   : > { %11226 = vst [vmem:[#allocation33_spill] sm:$0xff] %v9903_v28  ;;  %v3673_v22 = vpop.permute.xlu2 %3672  ;;  %p7036_p0 = scmp.ne.s32.totalorder %s7034_s21, %s7035_s4  ;;  %p7041_p4 = scmp.lt.s32.totalorder %s7039_s22, %s7035_s4 }
 0x582   : > { %v3677_v54 = vsel %vm3676_vm3, %v9743_v40, %v3673_v22  ;;  %v3679_v7 = vsel %vm3676_vm3, %v3673_v22, %v9743_v40  ;;  %v11060_v40 = vperm.slane %v9917_v9, 0 }
 0x583   : > { %v3688_v49 = vmul.f32 %v11051_v42, %v3679_v7  ;;  %v3689_v50 = vmul.f32 %v11050_v5, %v3677_v54  ;;  %p7037_p1 = pnand %p7036_p0, %p7256_p5  ;;  %p7042_p7 = por %p7041_p4, %p7040_p3 }
 0x585   : > { %v3692_v51 = vpack.c.bf16 %v3689_v50, %v3688_v49  ;;  %p7038_p2 = pneg %p7037_p1 }
 0x586   : > { %3965 = vrot.lane.b32.xlu1 %v9669_v44, %s7145_s12  ;;  %3730 = vrot.lane.b32.xlu0 %v9669_v44, %s7146_s17  ;;  %s11235_s17 = smov 98  }
 0x587   : > { %3694 = vst [vmem:[#allocation3 + $0x60] sm:$0xff] %v3692_v51  ;;  %3538 = vrot.lane.b32.xlu2 %v9669_v44, %s11227_s14  ;;  %p7043_p8 = pnand %p7042_p7, %p7038_p2 }
 0x588   : > { %v3908_v22 = vpop.permute.xlu1 %3907  ;;  %v9933_v54 = vpop.permute.xlu0 %3508 }
 0x589   : > { %11228 = vst [vmem:[#allocation34_spill] sm:$0xff] %v9933_v54  ;;  %v3645_v7 = vpop.permute.xlu2 %3644  ;;  %v3912_v49 = vsel %vm3911_vm4, %v9705_v58, %v3908_v22  ;;  %v3914_v50 = vsel %vm3911_vm4, %v3908_v22, %v9705_v58  ;;  %v9955_v22 = vld [vmem:[#allocation9 + $0x27] ss:$8 sm:$0x3] }
 0x58a   : > { %v3649_v51 = vsel %vm3648_vm5, %v9755_v56, %v3645_v7  ;;  %v3651_v5 = vsel %vm3648_vm5, %v3645_v7, %v9755_v56  ;;  %v3923_v42 = vmul.f32 %v11060_v40, %v3912_v49  ;;  %v3924_v15 = vmul.f32 %v11059_v12, %v3914_v50 }
 0x58b   : > { %v3660_v23 = vmul.f32 %v11058_v27, %v3651_v5  ;;  %v3661_v58 = vmul.f32 %v11057_v46, %v3649_v51  ;;  %v4139_v5 = vperm.slane %v9955_v22, 0  ;;  %v11064_v7 = vperm.slane %v9955_v22, 1 }
 0x58c   : > { %v3927_v28 = vpack.c.bf16 %v3924_v15, %v3923_v42  ;;  %v11066_v15 = vperm.slane %v9957_v62, 0  ;;  %v11067_v42 = vperm.slane %v9959_v39, 0 }
 0x58d   : > { %v3664_v56 = vpack.c.bf16 %v3661_v58, %v3660_v23  ;;  %v11065_v23 = vperm.slane %v9957_v62, 1 }
 0x58e   : > { %3929 = vst [vmem:[#allocation3 + $0xf0] sm:$0xff] %v3927_v28  ;;  %3933 = vrot.lane.b32.xlu1 %v9663_v34, %s7147_s19  ;;  %3931 = vrot.lane.b32.xlu0 %v9621_v3, %s7147_s19 }
 0x58f   : > { %3666 = vst [vmem:[#allocation3 + $0x50] sm:$0xff] %v3664_v56  ;;  %3512 = vrot.lane.b32.xlu2 %v9669_v44, %s11229_s25 }
 0x590   : > { %v4129_v49 = vpop.permute.xlu1 %4128  ;;  %v3881_v50 = vpop.permute.xlu0 %3880 }
 0x591   : > { %v3812_v51 = vpop.permute.xlu2 %3811  ;;  %v4132_v58 = vsel %vm1791_vm10, %v9713_v24, %v4129_v49  ;;  %v4134_v56 = vsel %vm1791_vm10, %v4129_v49, %v9713_v24  ;;  %v3884_v46 = vsel %vm11230_vm6, %v9729_v43, %v3881_v50  ;;  %v3886_v27 = vsel %vm11231_vm7, %v3881_v50, %v9729_v43 }
 0x592   : > { %v3815_v12 = vsel %vm11232_vm8, %v9767_v55, %v3812_v51  ;;  %v3817_v40 = vsel %vm11233_vm12, %v3812_v51, %v9767_v55  ;;  %v4143_v28 = vmul.f32 %v4139_v5, %v4132_v58  ;;  %v4144_v24 = vmul.f32 %v11064_v7, %v4134_v56  ;;  %v10005_v51 = vld [vmem:[#allocation9 + $0x12] ss:$8 sm:$0x3]  ;;  %v10007_v58 = vld [vmem:[#allocation9 + $0x15] ss:$8 sm:$0x3] }
 0x593   : > { %v3826_v49 = vmul.f32 %v11066_v15, %v3817_v40  ;;  %v3827_v43 = vmul.f32 %v11065_v23, %v3815_v12  ;;  %v3895_v50 = vmul.f32 %v11067_v42, %v3884_v46  ;;  %v3896_v54 = vmul.f32 %v11234_v32, %v3886_v27  ;;  %v10051_v42 = vld [vmem:[#allocation9 + $0x4] ss:$8 sm:$0x3] }
 0x594   : > { %v4147_v55 = vpack.c.bf16 %v4144_v24, %v4143_v28  ;;  %v4112_v40 = vperm.slane %v10003_v48, 0  ;;  %v11068_v32 = vperm.slane %v10003_v48, 1  ;;  %v11072_v12 = vperm.slane %v10005_v51, 0 }
 0x595   : > { %v3830_v56 = vpack.c.bf16 %v3827_v43, %v3826_v49  ;;  %v3899_v7 = vpack.c.bf16 %v3896_v54, %v3895_v50  ;;  %v11069_v27 = vperm.slane %v10005_v51, 1  ;;  %v11076_v46 = vperm.slane %v10007_v58, 0 }
 0x596   : > { %4149 = vst [vmem:[#allocation3 + $0x170] sm:$0xff] %v4147_v55  ;;  %4151 = vrot.lane.b32.xlu1 %v9621_v3, %s11235_s17  ;;  %3937 = vrot.lane.b32.xlu0 %v9669_v44, %s7147_s19  ;;  %v11075_v54 = vperm.slane %v10007_v58, 1  ;;  %vm3760_vm6 = vcmp.lt.s32.totalorder %v7442_v17, 12  ;;  %vm11238_vm7 = vcmp.lt.s32.totalorder %v7442_v17, 26  ;;  %vm11240_vm12 = vcmp.lt.s32.totalorder %v7442_v17, 101 }
 0x597   : > { %3832 = vst [vmem:[#allocation3 + $0xb0] sm:$0xff] %v3830_v56  ;;  %3935 = vrot.lane.b32.xlu2 %v9657_v1, %s7147_s19  ;;  %vm11239_vm8 = vmmov %vm11238_vm7 }
 0x598   : > { %3901 = vst [vmem:[#allocation3 + $0xe0] sm:$0xff] %v3899_v7  ;;  %v4102_v3 = vpop.permute.xlu1 %4101  ;;  %v3854_v28 = vpop.permute.xlu0 %3853 }
 0x599   : > { %v3785_v24 = vpop.permute.xlu2 %3784  ;;  %v4105_v49 = vsel %vm1720_vm9, %v9721_v29, %v4102_v3  ;;  %v4107_v43 = vsel %vm1720_vm9, %v4102_v3, %v9721_v29  ;;  %v3857_v50 = vsel %vm1436_vm11, %v9741_v52, %v3854_v28  ;;  %v3859_v55 = vsel %vm1436_vm11, %v3854_v28, %v9741_v52 }
 0x59a   : > { %v3788_v7 = vsel %vm11236_vm13, %v9779_v11, %v3785_v24  ;;  %v3790_v56 = vsel %vm11237_vm1, %v3785_v24, %v9779_v11  ;;  %v4116_v23 = vmul.f32 %v4112_v40, %v4105_v49  ;;  %v4117_v29 = vmul.f32 %v11068_v32, %v4107_v43  ;;  %v10053_v24 = vld [vmem:[#allocation9 + $0x11] ss:$8 sm:$0x3]  ;;  %v10055_v49 = vld [vmem:[#allocation9 + $0x25] ss:$8 sm:$0x3]  ;;  %vm11241_vm13 = vmmov %vm11240_vm12 }
 0x59b   : > { %v3799_v3 = vmul.f32 %v11072_v12, %v3790_v56  ;;  %v3800_v52 = vmul.f32 %v11069_v27, %v3788_v7  ;;  %v3868_v28 = vmul.f32 %v11076_v46, %v3857_v50  ;;  %v3869_v15 = vmul.f32 %v11075_v54, %v3859_v55  ;;  %v10149_v46 = vld [vmem:[#allocation9 + $0x2] ss:$8 sm:$0x3] }
 0x59c   : > { %v4120_v11 = vpack.c.bf16 %v4117_v29, %v4116_v23  ;;  %v3628_v50 = vperm.slane %v10051_v42, 0  ;;  %v3629_v55 = vperm.slane %v10051_v42, 1  ;;  %v11071_v23 = vperm.slane %v10053_v24, 0 }
 0x59d   : > { %v3803_v43 = vpack.c.bf16 %v3800_v52, %v3799_v3  ;;  %v3872_v32 = vpack.c.bf16 %v3869_v15, %v3868_v28  ;;  %v11070_v15 = vperm.slane %v10053_v24, 1  ;;  %v11074_v7 = vperm.slane %v10055_v49, 0 }
 0x59e   : > { %4122 = vst [vmem:[#allocation3 + $0x160] sm:$0xff] %v4120_v11  ;;  %4157 = vrot.lane.b32.xlu1 %v9669_v44, %s11235_s17  ;;  %4155 = vrot.lane.b32.xlu0 %v9657_v1, %s11235_s17  ;;  %v11073_v44 = vperm.slane %v10055_v49, 1  ;;  %vm3732_vm1 = vcmp.lt.s32.totalorder %v7442_v17, 13 }
 0x59f   : > { %3805 = vst [vmem:[#allocation3 + $0xa0] sm:$0xff] %v3803_v43  ;;  %4153 = vrot.lane.b32.xlu2 %v9663_v34, %s11235_s17  ;;  %s11302_s17 = sld [smem:[#allocation45_spill]] }
 0x5a0   : > { %3874 = vst [vmem:[#allocation3 + $0xd0] sm:$0xff] %v3872_v32  ;;  %v3618_v1 = vpop.permute.xlu1 %3617  ;;  %v4075_v56 = vpop.permute.xlu0 %4074 }
 0x5a1   : > { %v3757_v29 = vpop.permute.xlu2 %3756  ;;  %v3621_v3 = vsel %vm11238_vm7, %v9733_v18, %v3618_v1  ;;  %v3623_v34 = vsel %vm11239_vm8, %v3618_v1, %v9733_v18  ;;  %v4078_v52 = vsel %vm11240_vm12, %v9753_v37, %v4075_v56  ;;  %v4080_v28 = vsel %vm11241_vm13, %v4075_v56, %v9753_v37 }
 0x5a2   : > { %v3761_v32 = vsel %vm3760_vm6, %v9791_v41, %v3757_v29  ;;  %v3763_v11 = vsel %vm3760_vm6, %v3757_v29, %v9791_v41  ;;  %v3632_v43 = vmul.f32 %v3628_v50, %v3623_v34  ;;  %v3633_v18 = vmul.f32 %v3629_v55, %v3621_v3  ;;  %v4238_v41 = vld [vmem:[%s10962_s8 + $0x10] sm:$0xff]  ;;  %v4237_v29 = vld [vmem:[%s10962_s8 + $0x8] sm:$0xff] }
 0x5a3   : > { %v3772_v1 = vmul.f32 %v11071_v23, %v3763_v11  ;;  %v3773_v37 = vmul.f32 %v11070_v15, %v3761_v32  ;;  %v4089_v56 = vmul.f32 %v11074_v7, %v4078_v52  ;;  %v4090_v27 = vmul.f32 %v11073_v44, %v4080_v28  ;;  %v10106_v3 = vld [vmem:[#allocation9 + $0x3] ss:$8 sm:$0x3]  ;;  %v10108_v11 = vld [vmem:[#allocation9 + $0x10] ss:$8 sm:$0x3] }
 0x5a4   : > { %v3636_v34 = vpack.c.bf16 %v3633_v18, %v3632_v43  ;;  %v10110_v32 = vld [vmem:[#allocation9 + $0x24] ss:$8 sm:$0x3]  ;;  %v11077_v28 = vperm.slane %v10106_v3, 0  ;;  %v3602_v23 = vperm.slane %v10106_v3, 1  ;;  %v11079_v12 = vperm.slane %v10108_v11, 0 }
 0x5a5   : > { %v3776_v15 = vpack.c.bf16 %v3773_v37, %v3772_v1  ;;  %v4093_v52 = vpack.c.bf16 %v4090_v27, %v4089_v56  ;;  %v11078_v43 = vperm.slane %v10108_v11, 1  ;;  %v11081_v18 = vperm.slane %v10110_v32, 0 }
 0x5a6   : > { %3638 = vst [vmem:[#allocation3 + $0x40] sm:$0xff] %v3636_v34  ;;  %4252 = vperm.xlu1 %6726, %v4238_v41   ;;  %4247 = vperm.xlu0 %6725, %v4237_v29   ;;  %v11080_v44 = vperm.slane %v10110_v32, 1  ;;  %vm11242_vm7 = vcmp.lt.s32.totalorder %v7442_v17, 27  ;;  %vm11244_vm12 = vcmp.lt.s32.totalorder %v7442_v17, 102 }
 0x5a7   : > { %3778 = vst [vmem:[#allocation3 + $0x90] sm:$0xff] %v3776_v15  ;;  %vm11243_vm8 = vmmov %vm11242_vm7 }
 0x5a8   : > { %4095 = vst [vmem:[#allocation3 + $0x150] sm:$0xff] %v4093_v52  ;;  %v3591_v27 = vpop.permute.xlu1 %3590  ;;  %v4048_v1 = vpop.permute.xlu0 %4047  ;;  %vm11245_vm13 = vmmov %vm11244_vm12 }
 0x5a9   : > { %v3729_v37 = vpop.permute.xlu2 %3728  ;;  %v3594_v56 = vsel %vm11242_vm7, %v9745_v26, %v3591_v27  ;;  %v3596_v15 = vsel %vm11243_vm8, %v3591_v27, %v9745_v26  ;;  %v4051_v41 = vsel %vm11244_vm12, %v9765_v61, %v4048_v1  ;;  %v4053_v29 = vsel %vm11245_vm13, %v4048_v1, %v9765_v61 }
 0x5aa   : > { %v3733_v34 = vsel %vm3732_vm1, %v9803_v57, %v3729_v37  ;;  %v3735_v52 = vsel %vm3732_vm1, %v3729_v37, %v9803_v57  ;;  %v3605_v7 = vmul.f32 %v11077_v28, %v3596_v15  ;;  %v3606_v26 = vmul.f32 %v3602_v23, %v3594_v56  ;;  %v10151_v37 = vld [vmem:[#allocation9 + $0x23] ss:$8 sm:$0x3] }
 0x5ab   : > { %v3744_v27 = vmul.f32 %v11079_v12, %v3735_v52  ;;  %v3745_v61 = vmul.f32 %v11078_v43, %v3733_v34  ;;  %v4062_v1 = vmul.f32 %v11081_v18, %v4051_v41  ;;  %v4063_v54 = vmul.f32 %v11080_v44, %v4053_v29  ;;  %v10188_v18 = vld [vmem:[#allocation9 + $0x1] ss:$8 sm:$0x3] }
 0x5ac   : > { %v3609_v57 = vpack.c.bf16 %v3606_v26, %v3605_v7  ;;  %v11082_v56 = vperm.slane %v10149_v46, 0  ;;  %v3575_v52 = vperm.slane %v10149_v46, 1  ;;  %vm4023_vm7 = vcmp.lt.s32.totalorder %v7442_v17, 112 }
 0x5ad   : > { %v3748_v15 = vpack.c.bf16 %v3745_v61, %v3744_v27  ;;  %v4066_v28 = vpack.c.bf16 %v4063_v54, %v4062_v1  ;;  %v4031_v41 = vperm.slane %v10151_v37, 0  ;;  %v11083_v34 = vperm.slane %v10151_v37, 1 }
 0x5ae   : > { %3611 = vst [vmem:[#allocation3 + $0x30] sm:$0xff] %v3609_v57  ;;  %v11247_v12 = vperm.slane %v9917_v9, 1  ;;  %vm11252_vm12 = vcmp.lt.s32.totalorder %v7442_v17, 26 }
 0x5af   : > { %3750 = vst [vmem:[#allocation3 + $0x80] sm:$0xff] %v3748_v15  ;;  %v11246_v15 = vperm.slane %v9917_v9, 0  ;;  %vm11253_vm13 = vmmov %vm11252_vm12 }
 0x5b0   : > { %4068 = vst [vmem:[#allocation3 + $0x140] sm:$0xff] %v4066_v28  ;;  %v3564_v29 = vpop.permute.xlu1 %3563  ;;  %v4020_v43 = vpop.permute.xlu0 %4019 }
 0x5b1   : > { %v3910_v7 = vpop.permute.xlu2 %3909  ;;  %v3567_v54 = vsel %vm1073_vm14, %v9757_v0, %v3564_v29  ;;  %v3569_v26 = vsel %vm1073_vm14, %v3564_v29, %v9757_v0  ;;  %v4024_v27 = vsel %vm4023_vm7, %v9777_v14, %v4020_v43  ;;  %v4026_v61 = vsel %vm4023_vm7, %v4020_v43, %v9777_v14 }
 0x5b2   : > { %v3913_v28 = vsel %vm3911_vm4, %v9815_v20, %v3910_v7  ;;  %v3915_v1 = vsel %vm3911_vm4, %v3910_v7, %v9815_v20  ;;  %v3578_v57 = vmul.f32 %v11082_v56, %v3569_v26  ;;  %v3579_v0 = vmul.f32 %v3575_v52, %v3567_v54  ;;  %v10190_v7 = vld [vmem:[#allocation9 + $0x22] ss:$8 sm:$0x3] }
 0x5b3   : > { %v3925_v29 = vmul.f32 %v11246_v15, %v3913_v28  ;;  %v3926_v14 = vmul.f32 %v11247_v12, %v3915_v1  ;;  %v4035_v43 = vmul.f32 %v4031_v41, %v4024_v27  ;;  %v4036_v44 = vmul.f32 %v11083_v34, %v4026_v61 }
 0x5b4   : > { %v3582_v20 = vpack.c.bf16 %v3579_v0, %v3578_v57  ;;  %v3547_v54 = vperm.slane %v10188_v18, 0  ;;  %v3548_v28 = vperm.slane %v10188_v18, 1  ;;  %vm3995_vm4 = vcmp.lt.s32.totalorder %v7442_v17, 113 }
 0x5b5   : > { %v3928_v26 = vpack.c.bf16 %v3926_v14, %v3925_v29  ;;  %v4039_v56 = vpack.c.bf16 %v4036_v44, %v4035_v43  ;;  %v11085_v9 = vperm.slane %v10190_v7, 0  ;;  %v11084_v12 = vperm.slane %v10190_v7, 1 }
 0x5b6   : > { %3584 = vst [vmem:[#allocation3 + $0x20] sm:$0xff] %v3582_v20  ;;  %v11248_v20 = vperm.slane %v9955_v22, 1 }
 0x5b7   : > { %3930 = vst [vmem:[#allocation3 + $0xf8] sm:$0xff] %v3928_v26 }
 0x5b8   : > { %4041 = vst [vmem:[#allocation3 + $0x130] sm:$0xff] %v4039_v56  ;;  %v3537_v27 = vpop.permute.xlu1 %3536  ;;  %v3992_v61 = vpop.permute.xlu0 %3991 }
 0x5b9   : > { %v4131_v1 = vpop.permute.xlu2 %4130  ;;  %v3540_v44 = vsel %vm1002_vm0, %v9769_v38, %v3537_v27  ;;  %v3542_v57 = vsel %vm1002_vm0, %v3537_v27, %v9769_v38  ;;  %v3996_v0 = vsel %vm3995_vm4, %v9789_v45, %v3992_v61  ;;  %v3998_v15 = vsel %vm3995_vm4, %v3992_v61, %v9789_v45  ;;  %v10227_v61 = vld [vmem:[#allocation9] ss:$8 sm:$0x3] }
 0x5ba   : > { %v4133_v56 = vsel %vm1791_vm10, %v9827_v47, %v4131_v1  ;;  %v4135_v29 = vsel %vm1791_vm10, %v4131_v1, %v9827_v47  ;;  %v3551_v14 = vmul.f32 %v3547_v54, %v3542_v57  ;;  %v3552_v38 = vmul.f32 %v3548_v28, %v3540_v44  ;;  %v10229_v1 = vld [vmem:[#allocation9 + $0x21] ss:$8 sm:$0x3] }
 0x5bb   : > { %v4145_v43 = vmul.f32 %v4139_v5, %v4133_v56  ;;  %v4146_v45 = vmul.f32 %v11248_v20, %v4135_v29  ;;  %v4007_v26 = vmul.f32 %v11085_v9, %v3996_v0  ;;  %v4008_v27 = vmul.f32 %v11084_v12, %v3998_v15  ;;  %v6111_v44 = vld [vmem:[#allocation3 + $0xf0] sm:$0xf] }
 0x5bc   : > { %v3555_v47 = vpack.c.bf16 %v3552_v38, %v3551_v14  ;;  %v3520_v5 = vperm.slane %v10227_v61, 0  ;;  %v3521_v22 = vperm.slane %v10227_v61, 1  ;;  %vm3967_vm10 = vcmp.lt.s32.totalorder %v7442_v17, 114  ;;  %v6015_v61 = vld [vmem:[#allocation3 + $0x30] sm:$0xf] }
 0x5bd   : > { %v4148_v57 = vpack.c.bf16 %v4146_v45, %v4145_v43  ;;  %v4011_v34 = vpack.c.bf16 %v4008_v27, %v4007_v26  ;;  %v3975_v15 = vperm.slane %v10229_v1, 0  ;;  %v3976_v29 = vperm.slane %v10229_v1, 1  ;;  %v6063_v1 = vld [vmem:[#allocation3 + $0x90] sm:$0xf] }
 0x5be   : > { %3557 = vst [vmem:[#allocation3 + $0x10] sm:$0xff] %v3555_v47  ;;  %v6510_v56 = vld [vmem:[#allocation3 + $0xf4] sm:$0xf0] }
 0x5bf   : > { %4150 = vst [vmem:[#allocation3 + $0x178] sm:$0xff] %v4148_v57  ;;  %v6112_v0 = vor.u32 %v6510_v56, %v6111_v44  ;;  %v11249_v56 = vperm.slane %v10003_v48, 1 }
 0x5c0   : > { %4013 = vst [vmem:[#allocation3 + $0x120] sm:$0xff] %v4011_v34  ;;  %v3511_v14 = vpop.permute.xlu1 %3510  ;;  %v3964_v38 = vpop.permute.xlu0 %3963 }
 0x5c1   : > { %v4104_v43 = vpop.permute.xlu2 %4103  ;;  %v3514_v20 = vsel %vm931_vm15, %v9781_v21, %v3511_v14  ;;  %v3516_v45 = vsel %vm931_vm15, %v3511_v14, %v9781_v21  ;;  %4574 = vmatpush.bf16.msrb.mxu2 %v6112_v0  ;;  %v3968_v26 = vsel %vm3967_vm10, %v9801_v60, %v3964_v38  ;;  %v3970_v34 = vsel %vm3967_vm10, %v3964_v38, %v9801_v60 }
 0x5c2   : > { %v4106_v27 = vsel %vm1720_vm9, %v9839_v59, %v4104_v43  ;;  %v4108_v47 = vsel %vm1720_vm9, %v4104_v43, %v9839_v59  ;;  %v3524_v21 = vmul.f32 %v3520_v5, %v3516_v45  ;;  %v3525_v57 = vmul.f32 %v3521_v22, %v3514_v20  ;;  %v6175_v45 = vld [vmem:[#allocation3 + $0x170] sm:$0xf] }
 0x5c3   : > { %v4118_v44 = vmul.f32 %v4112_v40, %v4106_v27  ;;  %v4119_v60 = vmul.f32 %v11249_v56, %v4108_v47  ;;  %v3979_v0 = vmul.f32 %v3975_v15, %v3968_v26  ;;  %v3980_v14 = vmul.f32 %v3976_v29, %v3970_v34 }
 0x5c4   : > { %v3528_v38 = vpack.c.bf16 %v3525_v57, %v3524_v21  ;;  %vm11250_vm9 = vcmp.lt.s32.totalorder %v7442_v17, 126  ;;  %v11254_v57 = vperm.slane %v9959_v39, 0 }
 0x5c5   : > { %v4121_v59 = vpack.c.bf16 %v4119_v60, %v4118_v44  ;;  %v3983_v43 = vpack.c.bf16 %v3980_v14, %v3979_v0  ;;  %vm11251_vm8 = vmmov %vm11250_vm9  ;;  %v11256_v60 = vperm.slane %v9867_v19, 0  ;;  %v11257_v14 = vperm.slane %v9867_v19, 1 }
 0x5c6   : > { %3530 = vst [vmem:[#allocation3] sm:$0xff] %v3528_v38  ;;  %v6526_v12 = vld [vmem:[#allocation3 + $0x174] sm:$0xf0] }
 0x5c7   : > { %4123 = vst [vmem:[#allocation3 + $0x168] sm:$0xff] %v4121_v59  ;;  %v6176_v20 = vor.u32 %v6526_v12, %v6175_v45  ;;  %v6167_v45 = vld [vmem:[#allocation3 + $0x160] sm:$0xf] }
 0x5c8   : > { %3985 = vst [vmem:[#allocation3 + $0x110] sm:$0xff] %v3983_v43  ;;  %v3883_v9 = vpop.permute.xlu1 %3882  ;;  %v3703_v40 = vpop.permute.xlu0 %3702 }
 0x5c9   : > { %v3620_v27 = vpop.permute.xlu2 %3619  ;;  %v3885_v48 = vsel %vm11250_vm9, %v9793_v53, %v3883_v9  ;;  %v3887_v26 = vsel %vm11251_vm8, %v3883_v9, %v9793_v53  ;;  %4593 = vmatpush.bf16.msrb.mxu3 %v6176_v20  ;;  %v3706_v34 = vsel %vm3704_vm2, %v9813_v33, %v3703_v40  ;;  %v3708_v12 = vsel %vm3704_vm2, %v3703_v40, %v9813_v33 }
 0x5ca   : > { %v3622_v47 = vsel %vm11252_vm12, %v9851_v25, %v3620_v27  ;;  %v3624_v21 = vsel %vm11253_vm13, %v3620_v27, %v9851_v25  ;;  %v3897_v53 = vmul.f32 %v11254_v57, %v3885_v48  ;;  %v11255_v9 = vperm.slane %v9959_v39, 1 }
 0x5cb   : > { %v3634_v56 = vmul.f32 %v3628_v50, %v3624_v21  ;;  %v3635_v33 = vmul.f32 %v3629_v55, %v3622_v47  ;;  %v3718_v0 = vmul.f32 %v11256_v60, %v3708_v12  ;;  %v3719_v38 = vmul.f32 %v11257_v14, %v3706_v34  ;;  %v6103_v14 = vld [vmem:[#allocation3 + $0xe0] sm:$0xf] }
 0x5cc   : > { %v3898_v44 = vmul.f32 %v11255_v9, %v3887_v26  ;;  %vm11258_vm2 = vcmp.lt.s32.totalorder %v7442_v17, 27  ;;  %v11260_v12 = vperm.slane %v10007_v58, 0  ;;  %v11261_v47 = vperm.slane %v10007_v58, 1 }
 0x5cd   : > { %v3637_v25 = vpack.c.bf16 %v3635_v33, %v3634_v56  ;;  %v3721_v43 = vpack.c.bf16 %v3719_v38, %v3718_v0  ;;  %vm11259_vm9 = vmmov %vm11258_vm2  ;;  %v11262_v57 = vperm.slane %v10106_v3, 0  ;;  %v11263_v9 = vperm.slane %v9892_v16, 0 }
 0x5ce   : > { %v3900_v59 = vpack.c.bf16 %v3898_v44, %v3897_v53  ;;  %v6524_v20 = vld [vmem:[#allocation3 + $0x164] sm:$0xf0]  ;;  %v11264_v56 = vperm.slane %v9892_v16, 1  ;;  %vm11274_vm12 = vcmp.lt.s32.totalorder %v7442_v17, 1 }
 0x5cf   : > { %3639 = vst [vmem:[#allocation3 + $0x48] sm:$0xff] %v3637_v25  ;;  %v6168_v39 = vor.u32 %v6524_v20, %v6167_v45  ;;  %vm11275_vm13 = vmmov %vm11274_vm12 }
 0x5d0   : > { %3902 = vst [vmem:[#allocation3 + $0xe8] sm:$0xff] %v3900_v59  ;;  %v3856_v40 = vpop.permute.xlu1 %3855  ;;  %v3675_v50 = vpop.permute.xlu0 %3674  ;;  %v6047_v59 = vld [vmem:[#allocation3 + $0x70] sm:$0xf] }
 0x5d1   : > { %3723 = vst [vmem:[#allocation3 + $0x78] sm:$0xff] %v3721_v43  ;;  %v3593_v27 = vpop.permute.xlu2 %3592  ;;  %v3858_v42 = vsel %vm1436_vm11, %v9805_v10, %v3856_v40  ;;  %v3860_v19 = vsel %vm1436_vm11, %v3856_v40, %v9805_v10  ;;  %4594 = vmatpush.bf16.msrb.mxu3 %v6168_v39  ;;  %v3678_v55 = vsel %vm3676_vm3, %v9825_v30, %v3675_v50 }
 0x5d2   : > { %v3680_v48 = vsel %vm3676_vm3, %v3675_v50, %v9825_v30  ;;  %v3595_v26 = vsel %vm11258_vm2, %v9863_v2, %v3593_v27  ;;  %v3597_v34 = vsel %vm11259_vm9, %v3593_v27, %v9863_v2  ;;  %v3870_v10 = vmul.f32 %v11260_v12, %v3858_v42 }
 0x5d3   : > { %v3871_v21 = vmul.f32 %v11261_v47, %v3860_v19  ;;  %v3607_v53 = vmul.f32 %v11262_v57, %v3597_v34  ;;  %v3608_v30 = vmul.f32 %v3602_v23, %v3595_v26  ;;  %v3690_v44 = vmul.f32 %v11263_v9, %v3680_v48 }
 0x5d4   : > { %v3691_v33 = vmul.f32 %v11264_v56, %v3678_v55  ;;  %vm11265_vm3 = vcmp.lt.s32.totalorder %v7442_v17, 101  ;;  %v11267_v42 = vperm.slane %v10055_v49, 0  ;;  %v11269_v48 = vperm.slane %v10149_v46, 0  ;;  %v6039_v56 = vld [vmem:[#allocation3 + $0x60] sm:$0xf] }
 0x5d5   : > { %v3873_v60 = vpack.c.bf16 %v3871_v21, %v3870_v10  ;;  %v3610_v2 = vpack.c.bf16 %v3608_v30, %v3607_v53  ;;  %vm11266_vm8 = vmmov %vm11265_vm3  ;;  %v11270_v34 = vperm.slane %v9919_v63, 0  ;;  %v11271_v10 = vperm.slane %v9919_v63, 1  ;;  %v6095_v53 = vld [vmem:[#allocation3 + $0xd0] sm:$0xf] }
 0x5d6   : > { %v3693_v0 = vpack.c.bf16 %v3691_v33, %v3690_v44  ;;  %v6087_v44 = vld [vmem:[#allocation3 + $0xc0] sm:$0xf]  ;;  %vm4548_vm9 = vcmask 130048  }
 0x5d7   : > { %v6508_v38 = vld [vmem:[#allocation3 + $0xe4] sm:$0xf0]  ;;  %3875 = vst [vmem:[#allocation3 + $0xd8] sm:$0xff] %v3873_v60 }
 0x5d8   : > { %v6104_v58 = vor.u32 %v6508_v38, %v6103_v14  ;;  %3612 = vst [vmem:[#allocation3 + $0x38] sm:$0xff] %v3610_v2  ;;  %v6494_v25 = vld [vmem:[#allocation3 + $0x74] sm:$0xf0]  ;;  %v4077_v43 = vpop.permute.xlu1 %4076  ;;  %v3647_v23 = vpop.permute.xlu0 %3646 }
 0x5d9   : > { %3695 = vst [vmem:[#allocation3 + $0x68] sm:$0xff] %v3693_v0  ;;  %v6048_v3 = vor.u32 %v6494_v25, %v6047_v59  ;;  %v3566_v45 = vpop.permute.xlu2 %3565  ;;  %v4079_v16 = vsel %vm11265_vm3, %v9817_v4, %v4077_v43  ;;  %v4081_v20 = vsel %vm11266_vm8, %v4077_v43, %v9817_v4  ;;  %v3650_v39 = vsel %vm3648_vm5, %v9837_v31, %v3647_v23 }
 0x5da   : > { %4575 = vmatpush.bf16.msrb.mxu2 %v6104_v58  ;;  %v3652_v40 = vsel %vm3648_vm5, %v3647_v23, %v9837_v31  ;;  %v3568_v50 = vsel %vm1073_vm14, %v9880_v13, %v3566_v45  ;;  %v3570_v27 = vsel %vm1073_vm14, %v3566_v45, %v9880_v13  ;;  %v4091_v19 = vmul.f32 %v11267_v42, %v4079_v16  ;;  %v6159_v42 = vld [vmem:[#allocation3 + $0x150] sm:$0xf] }
 0x5db   : > { %v11268_v4 = vperm.slane %v10055_v49, 1  ;;  %4555 = vmatpush.bf16.msra.mxu1 %v6048_v3  ;;  %v3580_v26 = vmul.f32 %v11269_v48, %v3570_v27  ;;  %v3581_v31 = vmul.f32 %v3575_v52, %v3568_v50  ;;  %v3662_v12 = vmul.f32 %v11270_v34, %v3652_v40  ;;  %v6504_v49 = vld [vmem:[#allocation3 + $0xc4] sm:$0xf0] }
 0x5dc   : > { %v3663_v47 = vmul.f32 %v11271_v10, %v3650_v39  ;;  %v6088_v2 = vor.u32 %v6504_v49, %v6087_v44  ;;  %vm11272_vm14 = vcmp.lt.s32.totalorder %v7442_v17, 102  ;;  %v11276_v43 = vperm.slane %v10110_v32, 0  ;;  %v6488_v10 = vld [vmem:[#allocation3 + $0x44] sm:$0xf0] }
 0x5dd   : > { %v4092_v55 = vmul.f32 %v11268_v4, %v4081_v20  ;;  %v3583_v21 = vpack.c.bf16 %v3581_v31, %v3580_v26  ;;  %vm11273_vm5 = vmmov %vm11272_vm14  ;;  %v11278_v16 = vperm.slane %v9957_v62, 0  ;;  %v11279_v39 = vperm.slane %v9957_v62, 1  ;;  %v6031_v4 = vld [vmem:[#allocation3 + $0x50] sm:$0xf]  ;;  %v11280_v31 = vld [vmem:[#allocation35_spill] sm:$0xff] }
 0x5de   : > { %v3665_v57 = vpack.c.bf16 %v3663_v47, %v3662_v12  ;;  %v6506_v30 = vld [vmem:[#allocation3 + $0xd4] sm:$0xf0] }
 0x5df   : > { %v4094_v13 = vpack.c.bf16 %v4092_v55, %v4091_v19  ;;  %v6096_v9 = vor.u32 %v6506_v30, %v6095_v53  ;;  %3585 = vst [vmem:[#allocation3 + $0x28] sm:$0xff] %v3583_v21  ;;  %v11283_v47 = vld [vmem:[#allocation34_spill] sm:$0xff] }
 0x5e0   : > { %v6492_v33 = vld [vmem:[#allocation3 + $0x64] sm:$0xf0]  ;;  %3667 = vst [vmem:[#allocation3 + $0x58] sm:$0xff] %v3665_v57  ;;  %v4050_v46 = vpop.permute.xlu1 %4049  ;;  %v3814_v60 = vpop.permute.xlu0 %3813  ;;  %v11284_v57 = vperm.slane %v10151_v37, 1  ;;  %v6486_v37 = vld [vmem:[#allocation3 + $0x34] sm:$0xf0] }
 0x5e1   : > { %4096 = vst [vmem:[#allocation3 + $0x158] sm:$0xff] %v4094_v13  ;;  %v6040_v52 = vor.u32 %v6492_v33, %v6039_v56  ;;  %4576 = vmatpush.bf16.msrb.mxu2 %v6096_v9  ;;  %v3539_v63 = vpop.permute.xlu2 %3538  ;;  %v4052_v0 = vsel %vm11272_vm14, %v9829_v8, %v4050_v46  ;;  %v4054_v14 = vsel %vm11273_vm5, %v4050_v46, %v9829_v8  ;;  %v11277_v8 = vperm.slane %v10110_v32, 1  ;;  %v6023_v46 = vld [vmem:[#allocation3 + $0x40] sm:$0xf] }
 0x5e2   : > { %v3816_v38 = vsel %vm11274_vm12, %v9849_v6, %v3814_v60  ;;  %v3818_v58 = vsel %vm11275_vm13, %v3814_v60, %v9849_v6  ;;  %v3541_v59 = vsel %vm1002_vm0, %v9905_v36, %v3539_v63  ;;  %v3543_v25 = vsel %vm1002_vm0, %v3539_v63, %v9905_v36  ;;  %v6151_v63 = vld [vmem:[#allocation3 + $0x140] sm:$0xf] }
 0x5e3   : > { %v4064_v3 = vmul.f32 %v11276_v43, %v4052_v0  ;;  %v4065_v23 = vmul.f32 %v11277_v8, %v4054_v14  ;;  %4556 = vmatpush.bf16.msra.mxu1 %v6040_v52  ;;  %v3553_v45 = vmul.f32 %v3547_v54, %v3543_v25  ;;  %v3554_v6 = vmul.f32 %v3548_v28, %v3541_v59  ;;  %v6079_v14 = vld [vmem:[#allocation3 + $0xb0] sm:$0xf]  ;;  %v11287_v25 = vld [vmem:[#allocation31_spill] sm:$0xff] }
 0x5e4   : > { %v3828_v20 = vmul.f32 %v11278_v16, %v3818_v58  ;;  %v3829_v40 = vmul.f32 %v11279_v39, %v3816_v38  ;;  %vm11281_vm0 = vcmp.lt.s32.totalorder %v7442_v17, 2  ;;  %v11285_v9 = vperm.slane %v10005_v51, 0  ;;  %v11288_v8 = vld [vmem:[#allocation38_spill] sm:$0xff] }
 0x5e5   : > { %v4067_v36 = vpack.c.bf16 %v4065_v23, %v4064_v3  ;;  %4577 = vmatpush.bf16.msrb.mxu2 %v6088_v2  ;;  %v3556_v50 = vpack.c.bf16 %v3554_v6, %v3553_v45  ;;  %vm11282_vm2 = vmmov %vm11281_vm0  ;;  %v11286_v56 = vperm.slane %v10005_v51, 1  ;;  %v6024_v60 = vor.u32 %v6488_v10, %v6023_v46  ;;  %v11293_v10 = vld [vmem:[#allocation30_spill] sm:$0xff]  ;;  %v6049_v46 = vld [vmem:[#allocation3 + $0x78] sm:$0xf0] }
 0x5e6   : > { %v3831_v27 = vpack.c.bf16 %v3829_v40, %v3828_v20  ;;  %v6016_v58 = vor.u32 %v6486_v37, %v6015_v61  ;;  %v6484_v6 = vld [vmem:[#allocation3 + $0x24] sm:$0xf0]  ;;  %v11289_v16 = vperm.slane %v10190_v7, 0  ;;  %v11290_v39 = vperm.slane %v10190_v7, 1  ;;  %v6071_v7 = vld [vmem:[#allocation3 + $0xa0] sm:$0xf] }
 0x5e7   : > { %4069 = vst [vmem:[#allocation3 + $0x148] sm:$0xff] %v4067_v36  ;;  %v6490_v54 = vld [vmem:[#allocation3 + $0x54] sm:$0xf0]  ;;  %v11291_v36 = vperm.slane %v10053_v24, 0 }
 0x5e8   : > { %v6522_v32 = vld [vmem:[#allocation3 + $0x154] sm:$0xf0]  ;;  %3558 = vst [vmem:[#allocation3 + $0x18] sm:$0xff] %v3556_v50  ;;  %v4022_v18 = vpop.permute.xlu1 %4021  ;;  %v6032_v28 = vor.u32 %v6490_v54, %v6031_v4  ;;  %v3787_v55 = vpop.permute.xlu0 %3786 }
 0x5e9   : > { %v6160_v19 = vor.u32 %v6522_v32, %v6159_v42  ;;  %3833 = vst [vmem:[#allocation3 + $0xb8] sm:$0xff] %v3831_v27  ;;  %v3513_v48 = vpop.permute.xlu2 %3512  ;;  %v4025_v62 = vsel %vm4023_vm7, %v9841_v35, %v4022_v18  ;;  %v4027_v26 = vsel %vm4023_vm7, %v4022_v18, %v9841_v35  ;;  %v3789_v34 = vsel %vm11281_vm0, %v11280_v31, %v3787_v55  ;;  %v6007_v32 = vld [vmem:[#allocation3 + $0x20] sm:$0xf] }
 0x5ea   : > { %v3791_v12 = vsel %vm11282_vm2, %v3787_v55, %v11280_v31  ;;  %v3515_v13 = vsel %vm931_vm15, %v11283_v47, %v3513_v48  ;;  %v3517_v21 = vsel %vm931_vm15, %v3513_v48, %v11283_v47  ;;  %v4037_v35 = vmul.f32 %v4031_v41, %v4025_v62  ;;  %4557 = vmatpush.bf16.msra.mxu1 %v6032_v28  ;;  %v6143_v28 = vld [vmem:[#allocation3 + $0x130] sm:$0xf] }
 0x5eb   : > { %4595 = vmatpush.bf16.msrb.mxu3 %v6160_v19  ;;  %v4038_v53 = vmul.f32 %v11284_v57, %v4027_v26  ;;  %v3526_v30 = vmul.f32 %v3520_v5, %v3517_v21  ;;  %v3527_v49 = vmul.f32 %v3521_v22, %v3515_v13  ;;  %v3801_v44 = vmul.f32 %v11285_v9, %v3791_v12  ;;  %v5999_v62 = vld [vmem:[#allocation3 + $0x10] sm:$0xf] }
 0x5ec   : > { %v3802_v33 = vmul.f32 %v11286_v56, %v3789_v34  ;;  %v11292_v27 = vperm.slane %v10053_v24, 1  ;;  %v6008_v54 = vor.u32 %v6484_v6, %v6007_v32  ;;  %v11294_v21 = vld [vmem:[#allocation33_spill] sm:$0xff]  ;;  %v11295_v9 = vperm.slane %v10108_v11, 0 }
 0x5ed   : > { %v4040_v52 = vpack.c.bf16 %v4038_v53, %v4037_v35  ;;  %v3529_v41 = vpack.c.bf16 %v3527_v49, %v3526_v30  ;;  %v11296_v56 = vperm.slane %v10108_v11, 1  ;;  %vm3939_vm15 = vcmp.lt.s32.totalorder %v7442_v17, 115 }
 0x5ee   : > { %v3804_v2 = vpack.c.bf16 %v3802_v33, %v3801_v44  ;;  %v6520_v0 = vld [vmem:[#allocation3 + $0x144] sm:$0xf0]  ;;  %4558 = vmatpush.bf16.msra.mxu1 %v6024_v60  ;;  %v6473_v60 = vld [vmem:[#allocation13 + $0xc] sm:$0xf0] }
 0x5ef   : > { %4042 = vst [vmem:[#allocation3 + $0x138] sm:$0xff] %v4040_v52  ;;  %v6152_v5 = vor.u32 %v6520_v0, %v6151_v63  ;;  %v6482_v18 = vld [vmem:[#allocation3 + $0x14] sm:$0xf0]  ;;  %v5959_v52 = vld [vmem:[#allocation13] sm:$0xf] }
 0x5f0   : > { %3531 = vst [vmem:[#allocation3 + $0x8] sm:$0xff] %v3529_v41  ;;  %v6502_v22 = vld [vmem:[#allocation3 + $0xb4] sm:$0xf0]  ;;  %v3994_v38 = vpop.permute.xlu1 %3993  ;;  %v3759_v51 = vpop.permute.xlu0 %3758  ;;  %v6000_v34 = vor.u32 %v6482_v18, %v5999_v62  ;;  %v5991_v41 = vld [vmem:[#allocation3] sm:$0xf] }
 0x5f1   : > { %3806 = vst [vmem:[#allocation3 + $0xa8] sm:$0xff] %v3804_v2  ;;  %4596 = vmatpush.bf16.msrb.mxu3 %v6152_v5  ;;  %v6080_v59 = vor.u32 %v6502_v22, %v6079_v14  ;;  %v3997_v43 = vsel %vm3995_vm4, %v11287_v25, %v3994_v38  ;;  %v3999_v3 = vsel %vm3995_vm4, %v3994_v38, %v11287_v25  ;;  %v10456_v2 = vld [vmem:[#allocation9 + $0x20] ss:$8 sm:$0x3]  ;;  %v6493_v0 = vld [vmem:[#allocation3 + $0x74] sm:$0xf] }
 0x5f2   : > { %v3762_v23 = vsel %vm3760_vm6, %v11288_v8, %v3759_v51  ;;  %v3764_v45 = vsel %vm3760_vm6, %v3759_v51, %v11288_v8  ;;  %v4009_v20 = vmul.f32 %v11289_v16, %v3997_v43  ;;  %v4010_v40 = vmul.f32 %v11290_v39, %v3999_v3  ;;  %4559 = vmatpush.bf16.msra.mxu1 %v6016_v58  ;;  %v6135_v14 = vld [vmem:[#allocation3 + $0x120] sm:$0xf]  ;;  %v6041_v22 = vld [vmem:[#allocation3 + $0x68] sm:$0xf0]  ;;  %v6491_v8 = vld [vmem:[#allocation3 + $0x64] sm:$0xf] }
 0x5f3   : > { %v3774_v50 = vmul.f32 %v11291_v36, %v3764_v45  ;;  %v3775_v42 = vmul.f32 %v11292_v27, %v3762_v23  ;;  %4578 = vmatpush.bf16.msrb.mxu2 %v6080_v59  ;;  %v10458_v5 = vor.u32 %v6473_v60, %v5959_v52  ;;  %v3947_v38 = vperm.slane %v10456_v2, 0  ;;  %v3936_v59 = vpop.permute.xlu2 %3935  ;;  %v6033_v39 = vld [vmem:[#allocation3 + $0x58] sm:$0xf0]  ;;  %v6055_v27 = vld [vmem:[#allocation3 + $0x80] sm:$0xf] }
 0x5f4   : > { %v4012_v19 = vpack.c.bf16 %v4010_v40, %v4009_v20  ;;  %v3948_v58 = vperm.slane %v10456_v2, 1  ;;  %v6044_v6 = vor.u32 %v6491_v8, %v6041_v22  ;;  %v6489_v40 = vld [vmem:[#allocation3 + $0x54] sm:$0xf]  ;;  %v6009_v60 = vld [vmem:[#allocation3 + $0x28] sm:$0xf0]  ;;  %vm11297_vm6 = vcmp.lt.s32.totalorder %v7442_v17, 98 }
 0x5f5   : > { %v3777_v4 = vpack.c.bf16 %v3775_v42, %v3774_v50  ;;  %v6127_v50 = vld [vmem:[#allocation3 + $0x110] sm:$0xf]  ;;  %v6113_v42 = vld [vmem:[#allocation3 + $0xf8] sm:$0xf0]  ;;  %v6036_v32 = vor.u32 %v6489_v40, %v6033_v39  ;;  %v6475_v40 = vld [vmem:[#allocation13 + $0x24] sm:$0xf] }
 0x5f6   : > { %v6518_v55 = vld [vmem:[#allocation3 + $0x134] sm:$0xf0]  ;;  %4014 = vst [vmem:[#allocation3 + $0x128] sm:$0xff] %v4012_v19  ;;  %4560 = vmatpush.bf16.msra.mxu1 %v6008_v54  ;;  %v5961_v54 = vld [vmem:[#allocation13 + $0x10] sm:$0xf0] }
 0x5f7   : > { %v6144_v48 = vor.u32 %v6518_v55, %v6143_v28  ;;  %3779 = vst [vmem:[#allocation3 + $0x98] sm:$0xff] %v3777_v4  ;;  %v6480_v53 = vld [vmem:[#allocation3 + $0x4] sm:$0xf0]  ;;  %v6471_v4 = vld [vmem:[#allocation13 + $0x4] sm:$0xf] }
 0x5f8   : > { %v6500_v26 = vld [vmem:[#allocation3 + $0xa4] sm:$0xf0]  ;;  %v3966_v31 = vpop.permute.xlu1 %3965  ;;  %v3731_v24 = vpop.permute.xlu0 %3730  ;;  %v6025_v55 = vld [vmem:[#allocation3 + $0x48] sm:$0xf0]  ;;  %v6001_v8 = vld [vmem:[#allocation3 + $0x18] sm:$0xf0] }
 0x5f9   : > { %4597 = vmatpush.bf16.msrb.mxu3 %v6144_v48  ;;  %v6072_v12 = vor.u32 %v6500_v26, %v6071_v7  ;;  %v3969_v47 = vsel %vm3967_vm10, %v11293_v10, %v3966_v31  ;;  %v3971_v13 = vsel %vm3967_vm10, %v3966_v31, %v11293_v10  ;;  %v3734_v35 = vsel %vm3732_vm1, %v11294_v21, %v3731_v24  ;;  %v6509_v7 = vld [vmem:[#allocation3 + $0xf4] sm:$0xf]  ;;  %v6487_v31 = vld [vmem:[#allocation3 + $0x44] sm:$0xf]  ;;  %v6558_v17 = vld [vmem:[%s10963_s9 + $0x68] sm:$0xf0] }
 0x5fa   : > { %v3736_v57 = vsel %vm3732_vm1, %v3731_v24, %v11294_v21  ;;  %v3981_v30 = vmul.f32 %v3975_v15, %v3969_v47  ;;  %v3982_v49 = vmul.f32 %v3976_v29, %v3971_v13  ;;  %4561 = vmatpush.bf16.msra.mxu1 %v6000_v34  ;;  %v3747_v33 = vmul.f32 %v11296_v56, %v3734_v35  ;;  %v6105_v13 = vld [vmem:[#allocation3 + $0xe8] sm:$0xf0]  ;;  %v6485_v56 = vld [vmem:[#allocation3 + $0x34] sm:$0xf]  ;;  %vm11298_vm1 = vmmov %vm11297_vm6 }
 0x5fb   : > { %v3746_v44 = vmul.f32 %v11295_v9, %v3736_v57  ;;  %4579 = vmatpush.bf16.msrb.mxu2 %v6072_v12  ;;  %v5992_v15 = vor.u32 %v6480_v53, %v5991_v41  ;;  %v6052_v29 = vor.u32 %v6493_v0, %v6049_v46  ;;  %v6116_v34 = vor.u32 %v6509_v7, %v6113_v42  ;;  %v6017_v57 = vld [vmem:[#allocation3 + $0x38] sm:$0xf0]  ;;  %v5975_v53 = vld [vmem:[#allocation13 + $0x20] sm:$0xf]  ;;  %v6505_v0 = vld [vmem:[#allocation3 + $0xd4] sm:$0xf] }
 0x5fc   : > { %v3984_v37 = vpack.c.bf16 %v3982_v49, %v3981_v30  ;;  %v10468_v24 = vor.u32 %v6471_v4, %v5961_v54  ;;  %v6028_v47 = vor.u32 %v6487_v31, %v6025_v55  ;;  %v6477_v30 = vld [vmem:[#allocation13 + $0x2c] sm:$0xf0]  ;;  %v6507_v49 = vld [vmem:[#allocation3 + $0xe4] sm:$0xf]  ;;  %v6020_v46 = vor.u32 %v6485_v56, %v6017_v57  ;;  %v6097_v41 = vld [vmem:[#allocation3 + $0xd8] sm:$0xf0] }
 0x5fd   : > { %v3749_v63 = vpack.c.bf16 %v3747_v33, %v3746_v44  ;;  %v6516_v61 = vld [vmem:[#allocation3 + $0x124] sm:$0xf0]  ;;  %v6108_v33 = vor.u32 %v6507_v49, %v6105_v13  ;;  %v10475_v52 = vor.u32 %v6477_v30, %v5975_v53  ;;  %vm11299_vm7 = vmmov %vm11298_vm1  ;;  %v5993_v54 = vld [vmem:[#allocation3 + $0x8] sm:$0xf0] }
 0x5fe   : > { %3986 = vst [vmem:[#allocation3 + $0x118] sm:$0xff] %v3984_v37  ;;  %4562 = vmatpush.bf16.msra.mxu1 %v5992_v15  ;;  %v6136_v11 = vor.u32 %v6516_v61, %v6135_v14  ;;  %v6498_v51 = vld [vmem:[#allocation3 + $0x94] sm:$0xf0]  ;;  %v4164_v9 = vld [vmem:[#allocation9 + $0x30] ss:$8 sm:$0x3]  ;;  %v6100_v61 = vor.u32 %v6505_v0, %v6097_v41  ;;  %vm11300_vm4 = vmmov %vm11298_vm1 }
 0x5ff   : > { %3751 = vst [vmem:[#allocation3 + $0x88] sm:$0xff] %v3749_v63  ;;  %v6064_v25 = vor.u32 %v6498_v51, %v6063_v1  ;;  %v4166_v2 = vperm.slane %v4164_v9, 0  ;;  %v4167_v37 = vperm.slane %v4164_v9, 1  ;;  %v4154_v63 = vpop.permute.xlu2 %4153  ;;  %v6483_v15 = vld [vmem:[#allocation3 + $0x24] sm:$0xf] }
 0x600   : > { %v3934_v43 = vpop.permute.xlu1 %3933  ;;  %4598 = vmatpush.bf16.msrb.mxu3 %v6136_v11  ;;  %v3932_v3 = vpop.permute.xlu0 %3931  ;;  %v6012_v14 = vor.u32 %v6483_v15, %v6009_v60  ;;  %v6089_v51 = vld [vmem:[#allocation3 + $0xc8] sm:$0xf0]  ;;  %v6479_v55 = vld [vmem:[#allocation3 + $0x4] sm:$0xf]  ;;  %v6177_v53 = vld [vmem:[#allocation3 + $0x178] sm:$0xf0] }
 0x601   : > { %4563 = vmatmul.bf16.vlgmr.msra.gmra.mxu1 %v10458_v5  ;;  %v3940_v23 = vsel %vm3939_vm15, %v3932_v3, %v3936_v59  ;;  %v3942_v45 = vsel %vm3939_vm15, %v3936_v59, %v3932_v3  ;;  %4580 = vmatpush.bf16.msrb.mxu2 %v6064_v25  ;;  %v6499_v31 = vld [vmem:[#allocation3 + $0xa4] sm:$0xf]  ;;  %v6497_v9 = vld [vmem:[#allocation3 + $0x94] sm:$0xf]  ;;  %v6169_v41 = vld [vmem:[#allocation3 + $0x168] sm:$0xf0] }
 0x602   : > { %4631 = vmatpush.bf16.msrb.mxu1 %v6052_v29  ;;  %v3951_v16 = vmul.f32 %v3947_v38, %v3940_v23  ;;  %v3952_v20 = vmul.f32 %v3948_v58, %v3942_v45  ;;  %v6481_v23 = vld [vmem:[#allocation3 + $0x14] sm:$0xf]  ;;  %v6503_v45 = vld [vmem:[#allocation3 + $0xc4] sm:$0xf]  ;;  %v5983_v15 = vld [vmem:[#allocation13 + $0x28] sm:$0xf] }
 0x603   : > { %v6092_v39 = vor.u32 %v6503_v45, %v6089_v51  ;;  %v6525_v56 = vld [vmem:[#allocation3 + $0x174] sm:$0xf]  ;;  %v6478_v0 = vld [vmem:[#allocation13 + $0x34] sm:$0xf0]  ;;  %v6476_v51 = vld [vmem:[#allocation13 + $0x2c] sm:$0xf] }
 0x604   : > { %v3955_v36 = vpack.c.bf16 %v3952_v20, %v3951_v16  ;;  %v6515_v45 = vld [vmem:[#allocation3 + $0x124] sm:$0xf] }
 0x605   : > { %v6514_v19 = vld [vmem:[#allocation3 + $0x114] sm:$0xf0] }
 0x606   : > { %4632 = vmatpush.bf16.msrb.mxu1 %v6044_v6  ;;  %3957 = vst [vmem:[#allocation3 + $0x100] sm:$0xff] %v3955_v36  ;;  %v6128_v18 = vor.u32 %v6514_v19, %v6127_v50  ;;  %v6496_v28 = vld [vmem:[#allocation3 + $0x84] sm:$0xf0]  ;;  %v6081_v6 = vld [vmem:[#allocation3 + $0xb8] sm:$0xf0] }
 0x607   : > { %v6056_v48 = vor.u32 %v6496_v28, %v6055_v27  ;;  %v5967_v36 = vld [vmem:[#allocation13 + $0x8] sm:$0xf]  ;;  %v6474_v50 = vld [vmem:[#allocation13 + $0x14] sm:$0xf0]  ;;  %v6004_v27 = vor.u32 %v6481_v23, %v6001_v8  ;;  %v5977_v19 = vld [vmem:[#allocation13 + $0x30] sm:$0xf0] }
 0x608   : > { %v4152_v62 = vpop.permute.xlu1 %4151  ;;  %4599 = vmatpush.bf16.msrb.mxu3 %v6128_v18  ;;  %v3938_v26 = vpop.permute.xlu0 %3937  ;;  %v6501_v18 = vld [vmem:[#allocation3 + $0xb4] sm:$0xf]  ;;  %v10486_v28 = vor.u32 %v6474_v50, %v5967_v36  ;;  %v10488_v7 = vor.u32 %v6475_v40, %v5977_v19  ;;  %v6057_v60 = vld [vmem:[#allocation3 + $0x88] sm:$0xf0] }
 0x609   : > { %v3941_v12 = vsel %vm3939_vm15, %v3934_v43, %v3938_v26  ;;  %v3943_v10 = vsel %vm3939_vm15, %v3938_v26, %v3934_v43  ;;  %4581 = vmatpush.bf16.msrb.mxu2 %v6056_v48  ;;  %v6084_v48 = vor.u32 %v6501_v18, %v6081_v6  ;;  %v6073_v26 = vld [vmem:[#allocation3 + $0xa8] sm:$0xf0] }
 0x60a   : > { %4633 = vmatpush.bf16.msrb.mxu1 %v6036_v32  ;;  %v3953_v21 = vmul.f32 %v3947_v38, %v3941_v12  ;;  %v3954_v35 = vmul.f32 %v3948_v58, %v3943_v10  ;;  %v6065_v12 = vld [vmem:[#allocation3 + $0x98] sm:$0xf0]  ;;  %v6472_v10 = vld [vmem:[#allocation13 + $0xc] sm:$0xf] }
 0x60b   : > { %v6137_v23 = vld [vmem:[#allocation3 + $0x128] sm:$0xf0] }
 0x60c   : > { %v3956_v44 = vpack.c.bf16 %v3954_v35, %v3953_v21  ;;  %4582 = vmatmul.bf16.vlgmr.msrb.gmra.mxu2 %v10468_v24  ;;  %v5969_v21 = vld [vmem:[#allocation13 + $0x18] sm:$0xf0]  ;;  %v6140_v6 = vor.u32 %v6515_v45, %v6137_v23 }
 0x60d   : > { %4650 = vmatpush.bf16.msra.mxu2 %v6116_v34  ;;  %v6119_v42 = vld [vmem:[#allocation3 + $0x100] sm:$0xf]  ;;  %v6076_v34 = vor.u32 %v6499_v31, %v6073_v26 }
 0x60e   : > { %4634 = vmatpush.bf16.msrb.mxu1 %v6028_v47  ;;  %3958 = vst [vmem:[#allocation3 + $0x108] sm:$0xff] %v3956_v44  ;;  %v6068_v44 = vor.u32 %v6497_v9, %v6065_v12 }
 0x610   : > { %v4158_v1 = vpop.permute.xlu1 %4157  ;;  %v4156_v29 = vpop.permute.xlu0 %4155 }
 0x611   : > { %4651 = vmatpush.bf16.msra.mxu2 %v6108_v33  ;;  %4568 = vmatmul.bf16.gmra.mxu1 %v10475_v52  ;;  %v4160_v22 = vsel %vm11297_vm6, %v4154_v63, %v4158_v1  ;;  %v4162_v11 = vsel %vm11298_vm1, %v4158_v1, %v4154_v63  ;;  %v4159_v38 = vsel %vm11299_vm7, %v4152_v62, %v4156_v29  ;;  %v4236_v1 = vld [vmem:[%s10962_s8] sm:$0xff] }
 0x612   : > { %4635 = vmatpush.bf16.msrb.mxu1 %v6020_v46  ;;  %v4161_v58 = vsel %vm11300_vm4, %v4156_v29, %v4152_v62  ;;  %v4172_v59 = vmul.f32 %v4166_v2, %v4160_v22  ;;  %v4173_v25 = vmul.f32 %v4167_v37, %v4162_v11  ;;  %v4170_v43 = vmul.f32 %v4166_v2, %v4159_v38  ;;  %v6495_v2 = vld [vmem:[#allocation3 + $0x84] sm:$0xf]  ;;  %v6161_v29 = vld [vmem:[#allocation3 + $0x158] sm:$0xf0]  ;;  %v6153_v11 = vld [vmem:[#allocation3 + $0x148] sm:$0xf0] }
 0x613   : > { %v4171_v3 = vmul.f32 %v4167_v37, %v4161_v58  ;;  %v5996_v62 = vor.u32 %v6479_v55, %v5993_v54  ;;  %v5972_v33 = vor.u32 %v6472_v10, %v5969_v21  ;;  %v6180_v46 = vor.u32 %v6525_v56, %v6177_v53  ;;  %v6523_v37 = vld [vmem:[#allocation3 + $0x164] sm:$0xf]  ;;  %4242 = vperm.xlu2 %6797, %v4236_v1  }
 0x614   : > { %v4175_v16 = vpack.c.bf16 %v4173_v25, %v4172_v59  ;;  %v6060_v63 = vor.u32 %v6495_v2, %v6057_v60  ;;  %v6519_v38 = vld [vmem:[#allocation3 + $0x144] sm:$0xf]  ;;  %v5985_v59 = vld [vmem:[#allocation13 + $0x38] sm:$0xf0] }
 0x615   : > { %4652 = vmatpush.bf16.msra.mxu2 %v6100_v61  ;;  %v4174_v20 = vpack.c.bf16 %v4171_v3, %v4170_v43  ;;  %v6512_v32 = vld [vmem:[#allocation3 + $0x104] sm:$0xf0]  ;;  %v6521_v61 = vld [vmem:[#allocation3 + $0x154] sm:$0xf]  ;;  %v6156_v58 = vor.u32 %v6519_v38, %v6153_v11  ;;  %v6145_v25 = vld [vmem:[#allocation3 + $0x138] sm:$0xf0]  ;;  %v5988_v3 = vor.u32 %v6476_v51, %v5985_v59 }
 0x616   : > { %4636 = vmatpush.bf16.msrb.mxu1 %v6012_v14  ;;  %4177 = vst [vmem:[#allocation3 + $0x188] sm:$0xff] %v4175_v16  ;;  %v6120_v4 = vor.u32 %v6512_v32, %v6119_v42  ;;  %v5984_v14 = vor.u32 %v6478_v0, %v5983_v15  ;;  %v6164_v22 = vor.u32 %v6521_v61, %v6161_v29  ;;  %v6517_v43 = vld [vmem:[#allocation3 + $0x134] sm:$0xf]  ;;  %v6129_v16 = vld [vmem:[#allocation3 + $0x118] sm:$0xf0] }
 0x617   : > { %4176 = vst [vmem:[#allocation3 + $0x180] sm:$0xff] %v4174_v20  ;;  %v6148_v8 = vor.u32 %v6517_v43, %v6145_v25  ;;  %v6513_v20 = vld [vmem:[#allocation3 + $0x114] sm:$0xf]  ;;  %v6121_v40 = vld [vmem:[#allocation3 + $0x108] sm:$0xf0] }
 0x618   : > { %4600 = vmatpush.bf16.msrb.mxu3 %v6120_v4 }
 0x619   : > { %4653 = vmatpush.bf16.msra.mxu2 %v6092_v39  ;;  %v6132_v39 = vor.u32 %v6513_v20, %v6129_v16 }
 0x61a   : > { %4637 = vmatpush.bf16.msrb.mxu1 %v6004_v27 }
 0x61b   : > { %4601 = vmatmul.bf16.vlgmr.msrb.gmra.mxu3 %v10486_v28 }
 0x61c   : > { %4587 = vmatmul.bf16.gmra.mxu2 %v10488_v7 }
 0x61d   : > { %4654 = vmatpush.bf16.msra.mxu2 %v6084_v48  ;;  %v6528_v47 = vld [vmem:[#allocation3 + $0x184] sm:$0xf0]  ;;  %v6185_v13 = vld [vmem:[#allocation3 + $0x188] sm:$0xf0] }
 0x61e   : > { %4638 = vmatpush.bf16.msrb.mxu1 %v5996_v62  ;;  %v6183_v35 = vld [vmem:[#allocation3 + $0x180] sm:$0xf]  ;;  %v6527_v57 = vld [vmem:[#allocation3 + $0x184] sm:$0xf]  ;;  %v4248_v62 = vpop.permute.xlu0 %4247 }
 0x61f   : > { %v6184_v30 = vor.u32 %v6528_v47, %v6183_v35  ;;  %v6188_v49 = vor.u32 %v6527_v57, %v6185_v13 }
 0x621   : > { %4655 = vmatpush.bf16.msra.mxu2 %v6076_v34  ;;  %4639 = vmatmul.bf16.vlgmr.msrb.gmra.mxu1 %v10458_v5  ;;  %v6172_v5 = vor.u32 %v6523_v37, %v6169_v41 }
 0x622   : > { %4619 = vmatpush.bf16.msra.mxu0 %v6184_v30  ;;  %4695 = vmatpush.bf16.msra.mxu3 %v6188_v49 }
 0x625   : > { %4656 = vmatpush.bf16.msra.mxu2 %v6068_v44  ;;  %6189 = vmatmul.msk.bf16.vlgmr.msra.gmra.mxu0 %vm4548_vm9, %v5972_v33  ;;  %v4253_v44 = vpop.permute.xlu1 %4252 }
 0x626   : > { %4669 = vmatpush.bf16.msrb.mxu0 %v6180_v46 }
 0x629   : > { %4657 = vmatpush.bf16.msra.mxu2 %v6060_v63 }
 0x62a   : > { %4670 = vmatpush.bf16.msrb.mxu0 %v6172_v5 }
 0x62b   : > { %4606 = vmatmul.bf16.gmra.mxu3 %v5984_v14 }
 0x62c   : > { %4658 = vmatmul.bf16.vlgmr.msra.gmra.mxu2 %v10468_v24  ;;  %v4239_v24 = vld [vmem:[%s10962_s8 + $0x18] sm:$0xff] }
 0x62d   : > { %4257 = vperm.xlu2 %6797, %v4239_v24  }
 0x62e   : > { %4671 = vmatpush.bf16.msrb.mxu0 %v6164_v22 }
 0x631   : > { %4644 = vmatmul.bf16.gmra.mxu1 %v10475_v52  ;;  %v6511_v52 = vld [vmem:[#allocation3 + $0x104] sm:$0xf] }
 0x632   : > { %4672 = vmatpush.bf16.msrb.mxu0 %v6156_v58  ;;  %v6124_v36 = vor.u32 %v6511_v52, %v6121_v40 }
 0x635   : > { %6190 = vmatmul.msk.bf16.gmra.mxu0 %vm4548_vm9, %v5988_v3 }
 0x636   : > { %4673 = vmatpush.bf16.msrb.mxu0 %v6148_v8 }
 0x63a   : > { %4674 = vmatpush.bf16.msrb.mxu0 %v6140_v6 }
 0x63b   : > { %6191 = vmatmul.msk.bf16.vlgmr.msra.gmra.mxu3 %vm4548_vm9, %v5972_v33 }
 0x63c   : > { %4663 = vmatmul.bf16.gmra.mxu2 %v10488_v7 }
 0x63e   : > { %4675 = vmatpush.bf16.msrb.mxu0 %v6132_v39 }
 0x642   : > { %4676 = vmatpush.bf16.msrb.mxu0 %v6124_v36 }
 0x645   : > { %4677 = vmatmul.bf16.vlgmr.msrb.gmra.mxu0 %v10486_v28 }
 0x64b   : > { %6192 = vmatmul.msk.bf16.gmra.mxu3 %vm4548_vm9, %v5988_v3 }
 0x655   : > { %4682 = vmatmul.bf16.gmra.mxu0 %v5984_v14 }
 0x66d   : > { %v4243_v19 = vpop.permute.xlu2 %4242 }
 0x67e   : > { %v4564_v50 = vpop.f32.mrf.mxu1 }
 0x67f   : > { %v4565_v4 = vadd.f32 %v4564_v50, %v4243_v19 }
 0x686   : > { %v4566_v42 = vpop.f32.mrf.mxu1 }
 0x687   : > { %v4567_v7 = vadd.f32 %v4566_v42, %v4248_v62  ;;  %v4258_v9 = vpop.permute.xlu2 %4257 }
 0x68e   : > { %v4569_v18 = vpop.f32.mrf.mxu1 }
 0x68f   : > { %v4583_v27 = vpop.f32.mrf.mxu2  ;;  %v4570_v56 = vadd.f32 %v4569_v18, %v4253_v44 }
 0x690   : > { %v4584_v55 = vadd.f32 %v4583_v27, %v4565_v4 }
 0x696   : > { %v4571_v13 = vpop.f32.mrf.mxu1 }
 0x697   : > { %v4585_v32 = vpop.f32.mrf.mxu2  ;;  %v4572_v46 = vadd.f32 %v4571_v13, %v4258_v9 }
 0x698   : > { %v4586_v34 = vadd.f32 %v4585_v32, %v4567_v7 }
 0x69e   : > { %v4602_v54 = vpop.f32.mrf.mxu3  ;;  %v4640_v41 = vpop.f32.mrf.mxu1 }
 0x69f   : > { %v4588_v26 = vpop.f32.mrf.mxu2  ;;  %v4603_v31 = vadd.f32 %v4602_v54, %v4584_v55  ;;  %v4641_v22 = vadd.f32 %v4640_v41, %v4243_v19 }
 0x6a0   : > { %v4589_v60 = vadd.f32 %v4588_v26, %v4570_v56 }
 0x6a2   : > { %v4621_v48 = vpop.f32.mrf.mxu0 }
 0x6a3   : > { %v10507_v10 = vadd.f32 %v4621_v48, %v4603_v31 }
 0x6a5   : > { %v4707_v35 = vmax.f32 %v10507_v10, 0.0 }
 0x6a6   : > { %v4604_v12 = vpop.f32.mrf.mxu3  ;;  %v4642_v11 = vpop.f32.mrf.mxu1 }
 0x6a7   : > { %v4605_v28 = vadd.f32 %v4604_v12, %v4586_v34  ;;  %v4590_v53 = vpop.f32.mrf.mxu2  ;;  %v4643_v43 = vadd.f32 %v4642_v11, %v4248_v62 }
 0x6a8   : > { %v4591_v37 = vadd.f32 %v4590_v53, %v4572_v46 }
 0x6aa   : > { %v4623_v47 = vpop.f32.mrf.mxu0 }
 0x6ab   : > { %v10509_v21 = vadd.f32 %v4623_v47, %v4605_v28 }
 0x6ad   : > { %v4709_v57 = vmax.f32 %v10509_v21, 0.0 }
 0x6ae   : > { %v4607_v49 = vpop.f32.mrf.mxu3  ;;  %v4645_v23 = vpop.f32.mrf.mxu1 }
 0x6af   : > { %v6798_v30 = vpack.i.bf16 %v4709_v57, %v4707_v35  ;;  %v4608_v2 = vadd.f32 %v4607_v49, %v4589_v60  ;;  %v4659_v15 = vpop.f32.mrf.mxu2  ;;  %v4646_v32 = vadd.f32 %v4645_v23, %v4253_v44  ;;  %v6535_v23 = vld [vmem:[#allocation10 + $0x30] sm:$0xff] }
 0x6b0   : > { %v4660_v25 = vadd.f32 %v4659_v15, %v4641_v22 }
 0x6b1   : > { %6799 = vrot.lane.b32.xlu0 %v6798_v30, %s7126_s20 }
 0x6b2   : > { %v4626_v33 = vpop.f32.mrf.mxu0 }
 0x6b3   : > { %v10518_v1 = vadd.f32 %v4626_v33, %v4608_v2 }
 0x6b5   : > { %v4711_v14 = vmax.f32 %v10518_v1, 0.0  ;;  %v6543_v1 = vld [vmem:[#allocation10 + $0x70] sm:$0xff] }
 0x6b6   : > { %v4609_v63 = vpop.f32.mrf.mxu3  ;;  %v4647_v50 = vpop.f32.mrf.mxu1 }
 0x6b7   : > { %v4610_v0 = vadd.f32 %v4609_v63, %v4591_v37  ;;  %v4661_v51 = vpop.f32.mrf.mxu2  ;;  %v4648_v4 = vadd.f32 %v4647_v50, %v4258_v9  ;;  %v6529_v50 = vld [vmem:[#allocation10] sm:$0xff] }
 0x6b8   : > { %v4662_v45 = vadd.f32 %v4661_v51, %v4643_v43 }
 0x6ba   : > { %v4628_v5 = vpop.f32.mrf.mxu0 }
 0x6bb   : > { %v10520_v29 = vadd.f32 %v4628_v5, %v4610_v0 }
 0x6bd   : > { %v4713_v61 = vmax.f32 %v10520_v29, 0.0  ;;  %v6536_v29 = vld [vmem:[#allocation10 + $0x38] sm:$0xff] }
 0x6be   : > { %v4697_v58 = vpop.f32.mrf.mxu3  ;;  %4911 = vmatpush.bf16.msra.mxu1 %v6536_v29 }
 0x6bf   : > { %v6808_v38 = vpack.i.bf16 %v4713_v61, %v4711_v14  ;;  %v4664_v20 = vpop.f32.mrf.mxu2 }
 0x6c0   : > { %v4665_v19 = vadd.f32 %v4664_v20, %v4646_v32  ;;  %v6540_v20 = vld [vmem:[#allocation10 + $0x58] sm:$0xff]  ;;  %v6567_v32 = vld [vmem:[%s10963_s9 + $0xb0] sm:$0xf0] }
 0x6c1   : > { %6809 = vrot.lane.b32.xlu2 %v6808_v38, %s7126_s20 }
 0x6c2   : > { %v4678_v59 = vpop.f32.mrf.mxu0  ;;  %4912 = vmatpush.bf16.msra.mxu1 %v6535_v23 }
 0x6c3   : > { %v4679_v3 = vadd.f32 %v4678_v59, %v4660_v25 }
 0x6c5   : > { %v4698_v6 = vadd.f32 %v4697_v58, %v4679_v3 }
 0x6c6   : > { %v4699_v8 = vpop.f32.mrf.mxu3 }
 0x6c7   : > { %v4708_v40 = vmax.f32 %v4698_v6, 0.0  ;;  %v4666_v54 = vpop.f32.mrf.mxu2  ;;  %v6541_v6 = vld [vmem:[#allocation10 + $0x60] sm:$0xff] }
 0x6c8   : > { %v4667_v55 = vadd.f32 %v4666_v54, %v4648_v4  ;;  %v6345_v54 = vld [vmem:[%s10963_s9 + $0xb4] sm:$0xf0] }
 0x6ca   : > { %v4680_v24 = vpop.f32.mrf.mxu0 }
 0x6cb   : > { %v4681_v16 = vadd.f32 %v4680_v24, %v4662_v45  ;;  %v6542_v45 = vld [vmem:[#allocation10 + $0x68] sm:$0xff]  ;;  %v6533_v24 = vld [vmem:[#allocation10 + $0x20] sm:$0xff] }
 0x6cd   : > { %v4700_v39 = vadd.f32 %v4699_v8, %v4681_v16  ;;  %v6532_v16 = vld [vmem:[#allocation10 + $0x18] sm:$0xff] }
 0x6ce   : > { %v4702_v42 = vpop.f32.mrf.mxu3 }
 0x6cf   : > { %v4710_v52 = vmax.f32 %v4700_v39, 0.0  ;;  %v6531_v39 = vld [vmem:[#allocation10 + $0x10] sm:$0xff] }
 0x6d1   : > { %v6803_v36 = vpack.i.bf16 %v4710_v52, %v4708_v40 }
 0x6d2   : > { %v4683_v27 = vpop.f32.mrf.mxu0 }
 0x6d3   : > { %6804 = vrot.lane.b32.xlu1 %v6803_v36, %s7126_s20  ;;  %v4684_v18 = vadd.f32 %v4683_v27, %v4665_v19  ;;  %v6538_v36 = vld [vmem:[#allocation10 + $0x48] sm:$0xff]  ;;  %v6537_v27 = vld [vmem:[#allocation10 + $0x40] sm:$0xff]  ;;  %v6566_v19 = vld [vmem:[%s10963_s9 + $0xac] sm:$0xf] }
 0x6d5   : > { %v4703_v62 = vadd.f32 %v4702_v42, %v4684_v18  ;;  %v6343_v42 = vld [vmem:[%s10963_s9 + $0xa8] sm:$0xf]  ;;  %v6351_v18 = vld [vmem:[%s10963_s9 + $0xb0] sm:$0xf] }
 0x6d6   : > { %v4704_v26 = vpop.f32.mrf.mxu3  ;;  %v6344_v4 = vor.u32 %v6567_v32, %v6343_v42  ;;  %v6307_v42 = vld [vmem:[%s10963_s9 + $0x60] sm:$0xf]  ;;  %v6559_v32 = vld [vmem:[%s10963_s9 + $0x70] sm:$0xf0] }
 0x6d7   : > { %v4712_v34 = vmax.f32 %v4703_v62, 0.0 }
 0x6d8   : > { %5111 = vmatpush.bf16.msra.mxu0 %v6344_v4 }
 0x6da   : > { %v4685_v48 = vpop.f32.mrf.mxu0 }
 0x6db   : > { %v4686_v7 = vadd.f32 %v4685_v48, %v4667_v55  ;;  %v6568_v55 = vld [vmem:[%s10963_s9 + $0xb8] sm:$0xf0]  ;;  %v6348_v48 = vor.u32 %v6566_v19, %v6345_v54  ;;  %v6295_v54 = vld [vmem:[%s10963_s9 + $0x48] sm:$0xf] }
 0x6dc   : > { %v6352_v62 = vor.u32 %v6568_v55, %v6351_v18  ;;  %v6555_v18 = vld [vmem:[%s10963_s9 + $0x50] sm:$0xf0]  ;;  %v6554_v55 = vld [vmem:[%s10963_s9 + $0x4c] sm:$0xf] }
 0x6dd   : > { %v4705_v31 = vadd.f32 %v4704_v26, %v4686_v7  ;;  %v6331_v7 = vld [vmem:[%s10963_s9 + $0x90] sm:$0xf]  ;;  %v6564_v26 = vld [vmem:[%s10963_s9 + $0x98] sm:$0xf0]  ;;  %5130 = vmatpush.bf16.msrb.mxu3 %v6348_v48  ;;  %v6296_v48 = vor.u32 %v6555_v18, %v6295_v54 }
 0x6de   : > { %v5198_v54 = vld [vmem:[%s10965_s11 + $0x30] sm:$0xff] }
 0x6df   : > { %v4714_v12 = vmax.f32 %v4705_v31, 0.0  ;;  %v6563_v31 = vld [vmem:[%s10963_s9 + $0x94] sm:$0xf] }
 0x6e1   : > { %v6813_v28 = vpack.i.bf16 %v4714_v12, %v4712_v34 }
 0x6e3   : > { %6814 = vrot.lane.b32.xlu0 %v6813_v28, %s7126_s20  ;;  %v6339_v28 = vld [vmem:[%s10963_s9 + $0x98] sm:$0xf] }
 0x71b   : > { %v6810_v21 = vpop.permute.xlu2 %6809 }
 0x71c   : > { %v6812_v0 = vunpack.i.h.bf16 %v6810_v21  ;;  %v6811_v5 = vunpack.i.l.bf16 %v6810_v21 }
 0x723   : > { %v6800_v47 = vpop.permute.xlu0 %6799 }
 0x724   : > { %v6802_v53 = vunpack.i.h.bf16 %v6800_v47  ;;  %v6801_v30 = vunpack.i.l.bf16 %v6800_v47  ;;  %v6565_v47 = vld [vmem:[%s10963_s9 + $0xa0] sm:$0xf0] }
 0x745   : > { %v6805_v13 = vpop.permute.xlu1 %6804 }
 0x746   : > { %v6807_v49 = vunpack.i.h.bf16 %v6805_v13  ;;  %v6806_v44 = vunpack.i.l.bf16 %v6805_v13 }
 0x748   : > { %v4732_v9 = vsel %vm1436_vm11, %v6802_v53, %v6807_v49  ;;  %v4736_v56 = vsel %vm1436_vm11, %v6807_v49, %v6802_v53  ;;  %v4731_v33 = vsel %vm1436_vm11, %v6801_v30, %v6806_v44  ;;  %v4735_v46 = vsel %vm1436_vm11, %v6806_v44, %v6801_v30  ;;  %v6319_v30 = vld [vmem:[%s10963_s9 + $0x78] sm:$0xf]  ;;  %v6561_v49 = vld [vmem:[%s10963_s9 + $0x80] sm:$0xf0] }
 0x749   : > { %v10541_v60 = vmax.f32 %v4709_v57, %v4732_v9  ;;  %v10543_v41 = vmax.f32 %v4710_v52, %v4736_v56  ;;  %v10547_v2 = vmax.f32 %v4707_v35, %v4731_v33  ;;  %v10549_v37 = vmax.f32 %v4708_v40, %v4735_v46  ;;  %v6539_v40 = vld [vmem:[#allocation10 + $0x50] sm:$0xff]  ;;  %v6530_v52 = vld [vmem:[#allocation10 + $0x8] sm:$0xff]  ;;  %v6321_v56 = vld [vmem:[%s10963_s9 + $0x84] sm:$0xf0] }
 0x74a   : > { %v6340_v53 = vor.u32 %v6565_v47, %v6339_v28  ;;  %v6560_v9 = vld [vmem:[%s10963_s9 + $0x7c] sm:$0xf]  ;;  %v6327_v33 = vld [vmem:[%s10963_s9 + $0x80] sm:$0xf]  ;;  %v6562_v46 = vld [vmem:[%s10963_s9 + $0x88] sm:$0xf0] }
 0x74b   : > { %v6823_v63 = vpack.i.bf16 %v10543_v41, %v10549_v37  ;;  %v6818_v15 = vpack.i.bf16 %v10541_v60, %v10547_v2  ;;  %v6552_v28 = vld [vmem:[%s10963_s9 + $0x38] sm:$0xf0]  ;;  %v6551_v47 = vld [vmem:[%s10963_s9 + $0x34] sm:$0xf] }
 0x74d   : > { %6824 = vrot.lane.b32.xlu2 %v6823_v63, %s7145_s12  ;;  %6819 = vrot.lane.b32.xlu1 %v6818_v15, %s7145_s12  ;;  %v6320_v63 = vor.u32 %v6561_v49, %v6319_v30  ;;  %v6291_v30 = vld [vmem:[%s10963_s9 + $0x38] sm:$0xf]  ;;  %v6553_v49 = vld [vmem:[%s10963_s9 + $0x40] sm:$0xf0] }
 0x755   : > { %v6815_v57 = vpop.permute.xlu0 %6814 }
 0x756   : > { %v6817_v22 = vunpack.i.h.bf16 %v6815_v57  ;;  %v6816_v10 = vunpack.i.l.bf16 %v6815_v57  ;;  %v6324_v57 = vor.u32 %v6560_v9, %v6321_v56  ;;  %v6292_v9 = vor.u32 %v6553_v49, %v6291_v30  ;;  %v6271_v56 = vld [vmem:[%s10963_s9 + $0x18] sm:$0xf]  ;;  %v5212_v30 = vld [vmem:[%s10965_s11 + $0xa0] sm:$0xff]  ;;  %v5229_v49 = vld [vmem:[%s10965_s11 + $0x128] sm:$0xff] }
 0x758   : > { %v4734_v35 = vsel %vm1436_vm11, %v6812_v0, %v6817_v22  ;;  %v4738_v11 = vsel %vm1436_vm11, %v6817_v22, %v6812_v0  ;;  %v4733_v38 = vsel %vm1436_vm11, %v6811_v5, %v6816_v10  ;;  %v4737_v58 = vsel %vm1436_vm11, %v6816_v10, %v6811_v5 }
 0x759   : > { %v10567_v51 = vmax.f32 %v4713_v61, %v4734_v35  ;;  %v10569_v59 = vmax.f32 %v4714_v12, %v4738_v11  ;;  %v10573_v25 = vmax.f32 %v4711_v14, %v4733_v38  ;;  %v10575_v43 = vmax.f32 %v4712_v34, %v4737_v58  ;;  %v6544_v61 = vld [vmem:[#allocation10 + $0x78] sm:$0xff]  ;;  %v6534_v14 = vld [vmem:[#allocation10 + $0x28] sm:$0xff]  ;;  %v6333_v12 = vld [vmem:[%s10963_s9 + $0x9c] sm:$0xf0] }
 0x75a   : > { %4930 = vmatpush.bf16.msrb.mxu2 %v6544_v61  ;;  %4913 = vmatpush.bf16.msra.mxu1 %v6534_v14  ;;  %v6332_v34 = vor.u32 %v6564_v26, %v6331_v7  ;;  %v6336_v13 = vor.u32 %v6563_v31, %v6333_v12  ;;  %v6328_v10 = vor.u32 %v6562_v46, %v6327_v33  ;;  %v6303_v7 = vld [vmem:[%s10963_s9 + $0x50] sm:$0xf]  ;;  %v6556_v26 = vld [vmem:[%s10963_s9 + $0x58] sm:$0xf0]  ;;  %v6549_v33 = vld [vmem:[%s10963_s9 + $0x20] sm:$0xf0] }
 0x75b   : > { %v6828_v3 = vpack.i.bf16 %v10567_v51, %v10573_v25  ;;  %v6833_v8 = vpack.i.bf16 %v10569_v59, %v10575_v43  ;;  %v6283_v12 = vld [vmem:[%s10963_s9 + $0x30] sm:$0xf]  ;;  %v6548_v46 = vld [vmem:[%s10963_s9 + $0x1c] sm:$0xf]  ;;  %vm5232_vm11 = vcmask 523264  }
 0x75c   : > { %5112 = vmatpush.bf16.msra.mxu0 %v6332_v34  ;;  %5131 = vmatpush.bf16.msrb.mxu3 %v6336_v13  ;;  %v6304_v34 = vor.u32 %v6556_v26, %v6303_v7  ;;  %v6284_v13 = vor.u32 %v6552_v28, %v6283_v12  ;;  %v5196_v7 = vld [vmem:[%s10965_s11 + $0x20] sm:$0xff]  ;;  %v5195_v26 = vld [vmem:[%s10965_s11 + $0x18] sm:$0xff] }
 0x75d   : > { %6829 = vrot.lane.b32.xlu0 %v6828_v3, %s7145_s12  ;;  %6834 = vrot.lane.b32.xlu1 %v6833_v8, %s7145_s12 }
 0x75e   : > { %4931 = vmatpush.bf16.msrb.mxu2 %v6543_v1  ;;  %4914 = vmatpush.bf16.msra.mxu1 %v6533_v24 }
 0x760   : > { %5113 = vmatpush.bf16.msra.mxu0 %v6320_v63  ;;  %5132 = vmatpush.bf16.msrb.mxu3 %v6324_v57  ;;  %v6272_v63 = vor.u32 %v6549_v33, %v6271_v56  ;;  %v6550_v57 = vld [vmem:[%s10963_s9 + $0x28] sm:$0xf0]  ;;  %v5228_v56 = vld [vmem:[%s10965_s11 + $0x120] sm:$0xff]  ;;  %v5210_v33 = vld [vmem:[%s10965_s11 + $0x90] sm:$0xff] }
 0x762   : > { %4932 = vmatpush.bf16.msrb.mxu2 %v6542_v45  ;;  %4915 = vmatpush.bf16.msra.mxu1 %v6532_v16 }
 0x766   : > { %4933 = vmatpush.bf16.msrb.mxu2 %v6541_v6  ;;  %4916 = vmatpush.bf16.msra.mxu1 %v6531_v39 }
 0x76a   : > { %4934 = vmatpush.bf16.msrb.mxu2 %v6540_v20  ;;  %4917 = vmatpush.bf16.msra.mxu1 %v6530_v52 }
 0x76e   : > { %4935 = vmatpush.bf16.msrb.mxu2 %v6539_v40  ;;  %4918 = vmatpush.bf16.msra.mxu1 %v6529_v50 }
 0x772   : > { %4936 = vmatpush.bf16.msrb.mxu2 %v6538_v36  ;;  %5149 = vmatpush.bf16.msrb.mxu1 %v6352_v62  ;;  %v6297_v62 = vld [vmem:[%s10963_s9 + $0x54] sm:$0xf0] }
 0x773   : > { %v6300_v31 = vor.u32 %v6554_v55, %v6297_v62  ;;  %v5214_v55 = vld [vmem:[%s10965_s11 + $0xb0] sm:$0xff]  ;;  %v5213_v62 = vld [vmem:[%s10965_s11 + $0xa8] sm:$0xff] }
 0x776   : > { %4937 = vmatpush.bf16.msrb.mxu2 %v6537_v27  ;;  %5150 = vmatpush.bf16.msrb.mxu1 %v6340_v53  ;;  %v6285_v53 = vld [vmem:[%s10963_s9 + $0x3c] sm:$0xf0] }
 0x77a   : > { %5151 = vmatpush.bf16.msrb.mxu1 %v6328_v10  ;;  %v6546_v10 = vld [vmem:[%s10963_s9 + $0x8] sm:$0xf0] }
 0x7a7   : > { %v6825_v44 = vpop.permute.xlu2 %6824 }
 0x7a8   : > { %v6827_v15 = vunpack.i.h.bf16 %v6825_v44  ;;  %v6826_v0 = vunpack.i.l.bf16 %v6825_v44  ;;  %v6288_v44 = vor.u32 %v6551_v47, %v6285_v53  ;;  %v5193_v53 = vld [vmem:[%s10965_s11 + $0x8] sm:$0xff] }
 0x7bf   : > { %v6820_v21 = vpop.permute.xlu1 %6819 }
 0x7c0   : > { %v6822_v5 = vunpack.i.h.bf16 %v6820_v21  ;;  %v6821_v22 = vunpack.i.l.bf16 %v6820_v21  ;;  %v6279_v21 = vld [vmem:[%s10963_s9 + $0x20] sm:$0xf] }
 0x7c2   : > { %v4764_v35 = vsel %vm3967_vm10, %v6822_v5, %v6827_v15  ;;  %v4768_v11 = vsel %vm3967_vm10, %v6827_v15, %v6822_v5  ;;  %v4763_v38 = vsel %vm3967_vm10, %v6821_v22, %v6826_v0  ;;  %v4767_v58 = vsel %vm3967_vm10, %v6826_v0, %v6821_v22  ;;  %v6273_v15 = vld [vmem:[%s10963_s9 + $0x24] sm:$0xf0]  ;;  %v6259_v22 = vld [vmem:[%s10963_s9] sm:$0xf] }
 0x7c3   : > { %v4773_v3 = vmax.f32 %v10541_v60, %v4764_v35  ;;  %v4774_v8 = vmax.f32 %v10543_v41, %v4768_v11  ;;  %v4771_v29 = vmax.f32 %v10547_v2, %v4763_v38  ;;  %v4772_v61 = vmax.f32 %v10549_v37, %v4767_v58  ;;  %v6545_v35 = vld [vmem:[%s10963_s9 + $0x4] sm:$0xf]  ;;  %v6261_v38 = vld [vmem:[%s10963_s9 + $0xc] sm:$0xf0]  ;;  %v6267_v58 = vld [vmem:[%s10963_s9 + $0x8] sm:$0xf] }
 0x7c4   : > { %v6276_v0 = vor.u32 %v6548_v46, %v6273_v15  ;;  %v6280_v5 = vor.u32 %v6550_v57, %v6279_v21  ;;  %v6260_v11 = vor.u32 %v6546_v10, %v6259_v22  ;;  %v5227_v46 = vld [vmem:[%s10965_s11 + $0x118] sm:$0xff]  ;;  %v5226_v15 = vld [vmem:[%s10965_s11 + $0x110] sm:$0xff]  ;;  %v5208_v21 = vld [vmem:[%s10965_s11 + $0x80] sm:$0xff] }
 0x7c5   : > { %v4779_v23 = vpack.c.bf16 %v4773_v3, %v4771_v29  ;;  %v4780_v1 = vpack.c.bf16 %v4774_v8, %v4772_v61  ;;  %v6547_v3 = vld [vmem:[%s10963_s9 + $0x10] sm:$0xf0]  ;;  %v6264_v8 = vor.u32 %v6545_v35, %v6261_v38  ;;  %v5225_v57 = vld [vmem:[%s10965_s11 + $0x108] sm:$0xff] }
 0x7c6   : > { %v6268_v29 = vor.u32 %v6547_v3, %v6267_v58  ;;  %v5171_v58 = vld [vmem:[%s10964_s10 + $0x18] sm:$0xff] }
 0x7c7   : > { %4919 = vmatmul.bf16.vlgmr.msra.gmra.mxu1 %v4779_v23  ;;  %4938 = vmatmul.bf16.vlgmr.msrb.gmra.mxu2 %v4780_v1  ;;  %v5207_v23 = vld [vmem:[%s10965_s11 + $0x78] sm:$0xff]  ;;  %v5206_v1 = vld [vmem:[%s10965_s11 + $0x70] sm:$0xff] }
 0x7c8   : > { %5245 = vmatpush.msra.mxu2 %v5207_v23 }
 0x7ca   : > { %5246 = vmatpush.msra.mxu2 %v5206_v1 }
 0x7cf   : > { %v6830_v14 = vpop.permute.xlu0 %6829  ;;  %v6835_v45 = vpop.permute.xlu1 %6834 }
 0x7d0   : > { %v6832_v24 = vunpack.i.h.bf16 %v6830_v14  ;;  %v6831_v6 = vunpack.i.l.bf16 %v6830_v14  ;;  %v6837_v16 = vunpack.i.h.bf16 %v6835_v45  ;;  %v6836_v20 = vunpack.i.l.bf16 %v6835_v45  ;;  %v5223_v14 = vld [vmem:[%s10965_s11 + $0xf8] sm:$0xff] }
 0x7d2   : > { %v4765_v60 = vsel %vm3967_vm10, %v6831_v6, %v6836_v20  ;;  %v4766_v41 = vsel %vm3967_vm10, %v6832_v24, %v6837_v16  ;;  %v4769_v2 = vsel %vm3967_vm10, %v6836_v20, %v6831_v6  ;;  %v4770_v37 = vsel %vm3967_vm10, %v6837_v16, %v6832_v24  ;;  %v5205_v24 = vld [vmem:[%s10965_s11 + $0x68] sm:$0xff]  ;;  %v5222_v6 = vld [vmem:[%s10965_s11 + $0xf0] sm:$0xff]  ;;  %v5204_v20 = vld [vmem:[%s10965_s11 + $0x60] sm:$0xff] }
 0x7d3   : > { %v4775_v39 = vmax.f32 %v10573_v25, %v4765_v60  ;;  %v4777_v40 = vmax.f32 %v10567_v51, %v4766_v41  ;;  %v4776_v52 = vmax.f32 %v10575_v43, %v4769_v2  ;;  %v4778_v36 = vmax.f32 %v10569_v59, %v4770_v37  ;;  %v6557_v51 = vld [vmem:[%s10963_s9 + $0x64] sm:$0xf]  ;;  %v6309_v59 = vld [vmem:[%s10963_s9 + $0x6c] sm:$0xf0]  ;;  %v6315_v43 = vld [vmem:[%s10963_s9 + $0x68] sm:$0xf]  ;;  %5247 = vmatpush.msra.mxu2 %v5205_v24 }
 0x7d4   : > { %v6308_v25 = vor.u32 %v6558_v17, %v6307_v42  ;;  %v6312_v19 = vor.u32 %v6557_v51, %v6309_v59  ;;  %v6316_v4 = vor.u32 %v6559_v32, %v6315_v43  ;;  %v5221_v16 = vld [vmem:[%s10965_s11 + $0xe8] sm:$0xff]  ;;  %v5220_v60 = vld [vmem:[%s10965_s11 + $0xe0] sm:$0xff]  ;;  %v5203_v2 = vld [vmem:[%s10965_s11 + $0x58] sm:$0xff] }
 0x7d5   : > { %v4781_v50 = vpack.c.bf16 %v4777_v40, %v4775_v39  ;;  %v4782_v27 = vpack.c.bf16 %v4778_v36, %v4776_v52  ;;  %5248 = vmatpush.msra.mxu2 %v5204_v20  ;;  %v5219_v37 = vld [vmem:[%s10965_s11 + $0xd8] sm:$0xff]  ;;  %v5202_v40 = vld [vmem:[%s10965_s11 + $0x50] sm:$0xff]  ;;  %v5217_v51 = vld [vmem:[%s10965_s11 + $0xc8] sm:$0xff] }
 0x7d6   : > { %5114 = vmatpush.bf16.msra.mxu0 %v6308_v25  ;;  %5133 = vmatpush.bf16.msrb.mxu3 %v6312_v19  ;;  %v10784_v39 = vld [vmem:[%s10965_s11 + $0x138] sm:$0xff]  ;;  %v10793_v52 = vld [vmem:[%s10965_s11 + $0x130] sm:$0xff]  ;;  %v5200_v59 = vld [vmem:[%s10965_s11 + $0x40] sm:$0xff] }
 0x7d7   : > { %4924 = vmatmul.bf16.gmra.mxu1 %v4781_v50  ;;  %4943 = vmatmul.bf16.gmra.mxu2 %v4782_v27  ;;  %v5218_v36 = vld [vmem:[%s10965_s11 + $0xd0] sm:$0xff]  ;;  %v5201_v27 = vld [vmem:[%s10965_s11 + $0x48] sm:$0xff]  ;;  %v5216_v43 = vld [vmem:[%s10965_s11 + $0xc0] sm:$0xff] }
 0x7d8   : > { %5152 = vmatpush.bf16.msrb.mxu1 %v6316_v4  ;;  %5249 = vmatpush.msra.mxu2 %v5203_v2  ;;  %v5199_v32 = vld [vmem:[%s10965_s11 + $0x38] sm:$0xff]  ;;  %v5174_v24 = vld [vmem:[%s10964_s10 + $0x30] sm:$0xff] }
 0x7d9   : > { %v5215_v4 = vld [vmem:[%s10965_s11 + $0xb8] sm:$0xff] }
 0x7da   : > { %5115 = vmatpush.bf16.msra.mxu0 %v6296_v48  ;;  %5134 = vmatpush.bf16.msrb.mxu3 %v6300_v31  ;;  %v5197_v48 = vld [vmem:[%s10965_s11 + $0x28] sm:$0xff]  ;;  %v5194_v31 = vld [vmem:[%s10965_s11 + $0x10] sm:$0xff] }
 0x7db   : > { %5250 = vmatpush.msra.mxu2 %v5202_v40  ;;  %v5177_v40 = vld [vmem:[%s10964_s10 + $0x48] sm:$0xff] }
 0x7dc   : > { %5153 = vmatpush.bf16.msrb.mxu1 %v6304_v34 }
 0x7dd   : > { %5251 = vmatpush.msra.mxu2 %v5201_v27 }
 0x7de   : > { %5116 = vmatpush.bf16.msra.mxu0 %v6284_v13  ;;  %5135 = vmatpush.bf16.msrb.mxu3 %v6288_v44  ;;  %v5192_v44 = vld [vmem:[%s10965_s11] sm:$0xff] }
 0x7df   : > { %5252 = vmatpush.msra.mxu2 %v5200_v59 }
 0x7e0   : > { %5154 = vmatpush.bf16.msrb.mxu1 %v6292_v9  ;;  %v5211_v9 = vld [vmem:[%s10965_s11 + $0x98] sm:$0xff] }
 0x7e1   : > { %5253 = vmatpush.msra.mxu2 %v5199_v32 }
 0x7e2   : > { %5117 = vmatpush.bf16.msra.mxu0 %v6272_v63  ;;  %5136 = vmatpush.bf16.msrb.mxu3 %v6276_v0  ;;  %v5209_v63 = vld [vmem:[%s10965_s11 + $0x88] sm:$0xff]  ;;  %v5224_v0 = vld [vmem:[%s10965_s11 + $0x100] sm:$0xff] }
 0x7e3   : > { %5254 = vmatpush.msra.mxu2 %v5198_v54 }
 0x7e4   : > { %5155 = vmatpush.bf16.msrb.mxu1 %v6280_v5  ;;  %v5168_v5 = vld [vmem:[%s10964_s10] sm:$0xff] }
 0x7e5   : > { %5255 = vmatpush.msra.mxu2 %v5197_v48 }
 0x7e6   : > { %5118 = vmatpush.bf16.msra.mxu0 %v6260_v11  ;;  %5137 = vmatpush.bf16.msrb.mxu3 %v6264_v8  ;;  %v5169_v11 = vld [vmem:[%s10964_s10 + $0x8] sm:$0xff] }
 0x7e7   : > { %5256 = vmatpush.msra.mxu2 %v5196_v7  ;;  %v5173_v8 = vld [vmem:[%s10964_s10 + $0x28] sm:$0xff] }
 0x7e8   : > { %5156 = vmatpush.bf16.msrb.mxu1 %v6268_v29 }
 0x7e9   : > { %5257 = vmatpush.msra.mxu2 %v5195_v26 }
 0x7ea   : > { %5274 = vmatpush.msrb.mxu0 %v5223_v14  ;;  %6573 = vmatpush.msra.mxu3 %v10784_v39  ;;  %v5172_v14 = vld [vmem:[%s10964_s10 + $0x20] sm:$0xff] }
 0x7eb   : > { %5258 = vmatpush.msra.mxu2 %v5194_v31 }
 0x7ec   : > { %5275 = vmatpush.msrb.mxu0 %v5222_v6  ;;  %6574 = vmatpush.msra.mxu3 %v10793_v52 }
 0x7ed   : > { %5259 = vmatpush.msra.mxu2 %v5193_v53 }
 0x7ee   : > { %5276 = vmatpush.msrb.mxu0 %v5221_v16  ;;  %6575 = vmatpush.msra.mxu3 %v5229_v49  ;;  %v5176_v16 = vld [vmem:[%s10964_s10 + $0x40] sm:$0xff] }
 0x7ef   : > { %5260 = vmatpush.msra.mxu2 %v5192_v44 }
 0x7f0   : > { %5277 = vmatpush.msrb.mxu0 %v5220_v60  ;;  %6576 = vmatpush.msra.mxu3 %v5228_v56 }
 0x7f1   : > { %5311 = vmatpush.msrb.mxu2 %v10784_v39 }
 0x7f2   : > { %5278 = vmatpush.msrb.mxu0 %v5219_v37  ;;  %6577 = vmatpush.msra.mxu3 %v5227_v46  ;;  %v5175_v37 = vld [vmem:[%s10964_s10 + $0x38] sm:$0xff] }
 0x7f3   : > { %5312 = vmatpush.msrb.mxu2 %v10793_v52 }
 0x7f4   : > { %5279 = vmatpush.msrb.mxu0 %v5218_v36  ;;  %6578 = vmatpush.msra.mxu3 %v5226_v15  ;;  %v5179_v36 = vld [vmem:[%s10964_s10 + $0x58] sm:$0xff] }
 0x7f5   : > { %5313 = vmatpush.msrb.mxu2 %v5229_v49 }
 0x7f6   : > { %5280 = vmatpush.msrb.mxu0 %v5217_v51  ;;  %6579 = vmatpush.msra.mxu3 %v5225_v57  ;;  %v5178_v51 = vld [vmem:[%s10964_s10 + $0x50] sm:$0xff] }
 0x7f7   : > { %5314 = vmatpush.msrb.mxu2 %v5228_v56 }
 0x7f8   : > { %5281 = vmatpush.msrb.mxu0 %v5216_v43  ;;  %6580 = vmatpush.msra.mxu3 %v5224_v0 }
 0x7f9   : > { %5315 = vmatpush.msrb.mxu2 %v5227_v46 }
 0x7fa   : > { %5282 = vmatpush.msrb.mxu0 %v5215_v4 }
 0x7fb   : > { %5316 = vmatpush.msrb.mxu2 %v5226_v15 }
 0x7fc   : > { %5283 = vmatpush.msrb.mxu0 %v5214_v55 }
 0x7fd   : > { %5317 = vmatpush.msrb.mxu2 %v5225_v57 }
 0x7fe   : > { %5284 = vmatpush.msrb.mxu0 %v5213_v62 }
 0x7ff   : > { %5318 = vmatpush.msrb.mxu2 %v5224_v0 }
 0x800   : > { %5285 = vmatpush.msrb.mxu0 %v5212_v30 }
 0x802   : > { %5286 = vmatpush.msrb.mxu0 %v5211_v9 }
 0x804   : > { %5287 = vmatpush.msrb.mxu0 %v5210_v33 }
 0x806   : > { %5288 = vmatpush.msrb.mxu0 %v5209_v63 }
 0x808   : > { %5289 = vmatpush.msrb.mxu0 %v5208_v21 }
 0x844   : > { %v4920_v61 = vpop.f32.mrf.mxu1 }
 0x84a   : > { %v4939_v45 = vpop.f32.mrf.mxu2 }
 0x84b   : > { %v4940_v42 = vadd.f32 %v4939_v45, %v4920_v61 }
 0x84c   : > { %v4922_v41 = vpop.f32.mrf.mxu1 }
 0x852   : > { %v4941_v50 = vpop.f32.mrf.mxu2 }
 0x853   : > { %v4942_v17 = vadd.f32 %v4941_v50, %v4922_v41 }
 0x854   : > { %v4925_v19 = vpop.f32.mrf.mxu1 }
 0x855   : > { %v4949_v25 = vpack.c.bf16 %v4942_v17, %v4940_v42 }
 0x857   : > { %5119 = vmatmul.bf16.vlgmr.msra.gmra.mxu0 %v4949_v25  ;;  %5138 = vmatmul.bf16.vlgmr.msrb.gmra.mxu3 %v4949_v25 }
 0x858   : > { %5157 = vmatmul.bf16.vlgmr.msrb.gmra.mxu1 %v4949_v25  ;;  %v5170_v25 = vld [vmem:[%s10964_s10 + $0x10] sm:$0xff] }
 0x85a   : > { %v4944_v18 = vpop.f32.mrf.mxu2 }
 0x85b   : > { %v4945_v28 = vadd.f32 %v4944_v18, %v4925_v19 }
 0x85c   : > { %v4927_v34 = vpop.f32.mrf.mxu1 }
 0x862   : > { %v4946_v12 = vpop.f32.mrf.mxu2 }
 0x863   : > { %v4947_v47 = vadd.f32 %v4946_v12, %v4927_v34 }
 0x865   : > { %v4950_v13 = vpack.c.bf16 %v4947_v47, %v4945_v28 }
 0x867   : > { %5124 = vmatmul.bf16.gmra.mxu0 %v4950_v13  ;;  %5143 = vmatmul.bf16.gmra.mxu3 %v4950_v13 }
 0x868   : > { %5162 = vmatmul.bf16.gmra.mxu1 %v4950_v13 }
 0x8d4   : > { %v5120_v22 = vpop.f32.mrf.mxu0 }
 0x8d5   : > { %v5180_v10 = vmul.f32 %v5168_v5, %v5120_v22  ;;  %v5158_v35 = vpop.f32.mrf.mxu1  ;;  %v5341_v5 = vld [vmem:[%s11302_s17] sm:$0x1] }
 0x8d6   : > { %v5182_v32 = vmul.f32 %v5170_v25, %v5158_v35 }
 0x8d7   : > { %5261 = vmatmul.f32.vlgmr.msra.gmra.mxu2 %v5180_v10 }
 0x8da   : > { %v5139_v38 = vpop.f32.mrf.mxu3 }
 0x8db   : > { %v5181_v3 = vmul.f32 %v5169_v11, %v5139_v38 }
 0x8dc   : > { %v5122_v29 = vpop.f32.mrf.mxu0 }
 0x8dd   : > { %v5183_v61 = vmul.f32 %v5171_v58, %v5122_v29  ;;  %v5160_v23 = vpop.f32.mrf.mxu1  ;;  %5290 = vmatmul.f32.vlgmr.msrb.gmra.mxu0 %v5181_v3 }
 0x8de   : > { %v5185_v1 = vmul.f32 %v5173_v8, %v5160_v23 }
 0x8df   : > { %5264 = vmatmul.f32.gmra.mxu2 %v5183_v61 }
 0x8e0   : > { %6354 = vmatmul.msk.f32.vlgmr.msra.gmra.mxu3 %vm5232_vm11, %v5185_v1 }
 0x8e2   : > { %v5141_v45 = vpop.f32.mrf.mxu3 }
 0x8e3   : > { %v5184_v6 = vmul.f32 %v5172_v14, %v5141_v45 }
 0x8e4   : > { %v5125_v20 = vpop.f32.mrf.mxu0 }
 0x8e5   : > { %v5186_v60 = vmul.f32 %v5174_v24, %v5125_v20  ;;  %v5163_v41 = vpop.f32.mrf.mxu1  ;;  %5293 = vmatmul.f32.gmra.mxu0 %v5184_v6 }
 0x8e6   : > { %v5188_v2 = vmul.f32 %v5176_v16, %v5163_v41 }
 0x8e7   : > { %5267 = vmatmul.f32.gmra.mxu2 %v5186_v60 }
 0x8e8   : > { %6355 = vmatmul.msk.f32.gmra.mxu3 %vm5232_vm11, %v5188_v2 }
 0x8ea   : > { %v5144_v39 = vpop.f32.mrf.mxu3 }
 0x8eb   : > { %v5187_v52 = vmul.f32 %v5175_v37, %v5144_v39 }
 0x8ec   : > { %v5127_v50 = vpop.f32.mrf.mxu0 }
 0x8ed   : > { %v5189_v27 = vmul.f32 %v5177_v40, %v5127_v50  ;;  %v5165_v42 = vpop.f32.mrf.mxu1  ;;  %5296 = vmatmul.f32.gmra.mxu0 %v5187_v52 }
 0x8ee   : > { %v5191_v17 = vmul.f32 %v5179_v36, %v5165_v42 }
 0x8ef   : > { %5270 = vmatmul.f32.gmra.mxu2 %v5189_v27 }
 0x8f0   : > { %6356 = vmatmul.msk.f32.gmra.mxu3 %vm5232_vm11, %v5191_v17 }
 0x8f2   : > { %v5146_v59 = vpop.f32.mrf.mxu3 }
 0x8f3   : > { %v5190_v43 = vmul.f32 %v5178_v51, %v5146_v59 }
 0x8f5   : > { %5299 = vmatmul.f32.gmra.mxu0 %v5190_v43 }
 0x8f7   : > { %6353 = vmatmul.msk.f32.vlgmr.msrb.gmra.mxu2 %vm5232_vm11, %v5182_v32 }
 0x95a   : > { %v5262_v19 = vpop.f32.mrf.mxu2  ;;  %v5291_v4 = vpop.f32.mrf.mxu0 }
 0x95b   : > { %v5292_v12 = vadd.f32 %v5291_v4, %v5262_v19 }
 0x962   : > { %v5265_v54 = vpop.f32.mrf.mxu2  ;;  %v5294_v18 = vpop.f32.mrf.mxu0 }
 0x963   : > { %v5323_v55 = vpop.f32.mrf.mxu3  ;;  %v5295_v31 = vadd.f32 %v5294_v18, %v5265_v54 }
 0x965   : > { %v5324_v13 = vadd.f32 %v5323_v55, %v5295_v31 }
 0x96a   : > { %v5268_v48 = vpop.f32.mrf.mxu2  ;;  %v5297_v62 = vpop.f32.mrf.mxu0 }
 0x96b   : > { %v5326_v26 = vpop.f32.mrf.mxu3  ;;  %v5298_v28 = vadd.f32 %v5297_v62, %v5268_v48 }
 0x96d   : > { %v5327_v49 = vadd.f32 %v5326_v26, %v5298_v28 }
 0x972   : > { %v5271_v7 = vpop.f32.mrf.mxu2  ;;  %v5300_v34 = vpop.f32.mrf.mxu0 }
 0x973   : > { %v5301_v53 = vadd.f32 %v5300_v34, %v5271_v7  ;;  %v5329_v9 = vpop.f32.mrf.mxu3 }
 0x975   : > { %v5330_v56 = vadd.f32 %v5329_v9, %v5301_v53 }
 0x97a   : > { %v5320_v47 = vpop.f32.mrf.mxu2 }
 0x97b   : > { %v5321_v30 = vadd.f32 %v5320_v47, %v5292_v12 }
 0x97d   : > { %v5332_v44 = vadd.f32 %v5324_v13, %v5321_v30 }
 0x97f   : > { %v5333_v33 = vadd.f32 %v5332_v44, %v5327_v49 }
 0x981   : > { %v5334_v46 = vadd.f32 %v5333_v33, %v5330_v56 }
 0x983   : > { %v5335_v63 = vrot.slane %v5334_v46, 4 }
 0x985   : > { %v5336_v15 = vadd.f32 %v5335_v63, %v5334_v46 }
 0x987   : > { %v5337_v21 = vrot.slane %v5336_v15, 2 }
 0x989   : > { %v5338_v57 = vadd.f32 %v5337_v21, %v5336_v15 }
 0x98b   : > { %v5339_v0 = vrot.slane %v5338_v57, 1 }
 0x98d   : > { %v5340_v22 = vadd.f32 %v5339_v0, %v5338_v57 }
 0x98f   : > { %v5342_v10 = vadd.f32 %v5341_v5, %v5340_v22 }
 0x991   : > { %5343 = vst [vmem:[%s530_s28] sm:$0x1] %v5342_v10 }
 0x992   : > { %7046 = shalt.err (!%p7043_p8)
}
 0x993   : > { %6606 = dma.vmem_to_hbm [thread:$0]  (%p7256_p5), %s5356_s30, 16, %s5358_s24, %s5345_s23  }
 0x994 PF: > { %s11303_s16 = sld [smem:[#allocation23_spill]] }
 0x995   : > { %s11304_s12 = sld [smem:[#allocation21_spill]] }
 0x99a   : > { %p6643_p9 = scmp.ge.s32.totalorder %s11303_s16, 2 }
 0x99b   : > { %s5369_s2 = sand.u32 1, %s11304_s12  }
 0x99c   : > { %p6628_p10 = pnand %p6643_p9, %p7260_p6  ;;  %s5370_s19 = scalar_lea.sflag [#allocation6], %s5369_s2 }
 0x99e   : > { %p6629_p11 = pneg %p6628_p10 }
 0x9a0   : > { %7080 = dma.done.wait (%p6629_p11), %s5370_s19, 16  }
 0x9a1   : > { %7082 = vsyncadd (%p6629_p11), %s5370_s19, 4294967280  ;;  %s11306_s28 = sld [smem:[#allocation24_spill]]  ;;  %s11309_s25 = smov %s7089_s26 }
 0x9a2   : > { %s11307_s17 = sld [smem:[#allocation22_spill]] }
 0x9a3   : > { %s11308_s27 = sld [smem:[#allocation25_spill]] }
 0x9a7   : > { %p27_p12 = scmp.ge.s32.totalorder %s11306_s28, 4  }
 0x9a8   : > { %s11310_s26 = smov %s11307_s17 }
 0x9a9   :  { %29 = sbr.rel (!%p27_p12) target bundleno = 11 (0xb), region = 204 }
 0x9ae   :  { %5375 = vsyncpa [#allocation5], 1 }
 0x9af   :  { %5377 = vsyncpa [#allocation5 + $0x1], 1 }
 0x9b0   :  { %5378 = vsyncpa [#allocation8], 1 }
 0x9b1   :  { %5379 = vsyncpa [#allocation11], 1 }
 0x9b2   :  { %5380 = vsyncpa [#allocation14], 1 }
 0x9b3   :  { %5381 = vsyncpa [#allocation6], 1 }
 0x9b4   :  { %5383 = vsyncpa [#allocation6 + $0x1], 1 }

</bundles_post_ra>
